<compile_context>
chip_gen: v5e
topology: v5e:2x2
jax: 0.10.0
libtpu: 0.0.40
codegen_flags: <defaults>
</compile_context>

<pallas_src>
import math
import jax
import jax.numpy as jnp
from jax.experimental import pallas as pl
from jax.experimental.pallas import tpu as pltpu

NEG_SLOPE = 0.1
MM_DTYPE = jnp.bfloat16            # MXU operand dtype (f32 accumulation)


def _vmem_limit_bytes():
    # Generation-aware budget: v5e/v6e have 128 MiB physical VMEM, v7x only 64 MiB.
    try:
        cap = int(getattr(pltpu.get_tpu_info(), "vmem_capacity_bytes", 0) or 0)
    except Exception:
        cap = 0
    if cap >= 100 * 1024 * 1024:
        return 96 * 1024 * 1024
    return 48 * 1024 * 1024


_CPARAMS = pltpu.CompilerParams(
    dimension_semantics=("parallel",),
    vmem_limit_bytes=_vmem_limit_bytes(),
)

# ----------------------------------------------------------------------------
# BlockSpec helpers + generic fused-kernel launchers
# ----------------------------------------------------------------------------

def _bspec_batched(c, l):
    # one batch element per grid step; block covers the full (C, L) slice
    return pl.BlockSpec((1, c, l), lambda n: (n, 0, 0))


def _bspec_shared(arr):
    # weights/biases: full-array block, constant index -> resident across grid steps
    idx = (0,) * arr.ndim
    return pl.BlockSpec(arr.shape, lambda n, _i=idx: _i)


def _run_batched(kernel, x_list, w_list, out_c, out_l, n):
    """Kernel arg order: batched activation refs, shared weight refs, output ref."""
    in_specs = ([_bspec_batched(a.shape[1], a.shape[2]) for a in x_list]
                + [_bspec_shared(w) for w in w_list])
    return pl.pallas_call(
        kernel,
        out_shape=jax.ShapeDtypeStruct((n, out_c, out_l), jnp.float32),
        grid=(n,),
        in_specs=in_specs,
        out_specs=_bspec_batched(out_c, out_l),
        compiler_params=_CPARAMS,
    )(*x_list, *w_list)


def _run_single(kernel, arrs, out_c, out_l):
    """Single grid step over 2-D operands (batch already folded into lanes)."""
    in_specs = [pl.BlockSpec(a.shape, lambda n: (0, 0)) for a in arrs]
    return pl.pallas_call(
        kernel,
        out_shape=jax.ShapeDtypeStruct((out_c, out_l), jnp.float32),
        grid=(1,),
        in_specs=in_specs,
        out_specs=pl.BlockSpec((out_c, out_l), lambda n: (0, 0)),
        compiler_params=_CPARAMS,
    )(*arrs)


# ----------------------------------------------------------------------------
# In-kernel building blocks
# ----------------------------------------------------------------------------

def _leaky(x):
    return jnp.where(x >= 0, x, x * NEG_SLOPE)


def _dcc(x, w_ref, b_ref, dilation):
    """Causal dilated conv as K accumulating MXU matmuls over shifted bf16 taps.

    x: [Cin, L] f32 (VMEM-resident), w_ref: [K, Cout, Cin] bf16, b_ref: [Cout, 1] f32.
    No [K*Cin, L] stacked operand is ever materialized; taps that fall entirely in the
    causal zero pad (shift >= L) are skipped at trace time.
    """
    K = w_ref.shape[0]
    cin, L = x.shape
    xb = x.astype(MM_DTYPE)
    acc = None
    for k in range(K):
        s = (K - 1 - k) * dilation
        if s >= L:
            continue
        if s == 0:
            xk = xb
        else:
            # causal right-shift with zero fill, done on the half-width bf16 tile
            xk = jnp.concatenate(
                [jnp.zeros((cin, s), MM_DTYPE), xb[:, :L - s]], axis=1)
        z = jnp.dot(w_ref[k], xk, preferred_element_type=jnp.float32)
        acc = z if acc is None else acc + z
    if acc is None:
        acc = jnp.zeros((w_ref.shape[1], L), jnp.float32)
    return acc + b_ref[...]


def _mm1x1(x, w_ref, b_ref):
    """1x1 conv: [Cout, Cin] x [Cin, L] on the MXU, f32 accumulation."""
    y = jnp.dot(w_ref[...], x.astype(MM_DTYPE), preferred_element_type=jnp.float32)
    return y + b_ref[...]


def _film(x, c, wf_ref, bf_ref):
    """FiLM with to_mu/to_sigma fused into ONE matmul (weights stacked along Cout)."""
    ch = x.shape[0]
    ms = jnp.dot(wf_ref[...], c.astype(MM_DTYPE),
                 preferred_element_type=jnp.float32) + bf_ref[...]
    return x * ms[:ch] + ms[ch:]


# ----------------------------------------------------------------------------
# Wrapper-side weight preparation (tiny, done once per call)
# ----------------------------------------------------------------------------

def _prep_dcc(p):
    w, b = p["w"], p["b"]                                # [Cout, Cin, K], [Cout]
    taps = jnp.transpose(w, (2, 0, 1)).astype(MM_DTYPE)  # [K, Cout, Cin]
    return taps, b.reshape(-1, 1).astype(jnp.float32)


def _prep_1x1(p):
    w, b = p["w"], p["b"]                                # [Cout, Cin, 1]
    return w[:, :, 0].astype(MM_DTYPE), b.reshape(-1, 1).astype(jnp.float32)


def _prep_cin1(p):
    # Cin == 1 path kept f32 (VPU broadcast mul-add, no MXU)
    w, b = p["w"], p["b"]
    return w[:, :, 0].astype(jnp.float32), b.reshape(-1, 1).astype(jnp.float32)


def _prep_film(fp):
    wm, bm = fp["to_mu"]["w"], fp["to_mu"]["b"]
    ws, bs = fp["to_sigma"]["w"], fp["to_sigma"]["b"]
    wf = jnp.concatenate([wm[:, :, 0], ws[:, :, 0]], axis=0).astype(MM_DTYPE)
    bf = jnp.concatenate([bm, bs], axis=0).reshape(-1, 1).astype(jnp.float32)
    return wf, bf


# ----------------------------------------------------------------------------
# F.interpolate(mode='linear', align_corners=False) as a 2-tap FIR (single XLA pass)
# ----------------------------------------------------------------------------

def interp_down(x, f):
    if f == 1:
        return x
    if f % 2 == 0:
        a = f // 2 - 1
        return 0.5 * (x[:, :, a::f] + x[:, :, a + 1::f])
    return x[:, :, (f - 1) // 2::f]


def interp_up(x, f):
    if f == 1:
        return x
    N, C, L = x.shape
    x_left = jnp.concatenate([x[:, :, :1], x[:, :, :-1]], axis=2)   # edge-replicated
    x_right = jnp.concatenate([x[:, :, 1:], x[:, :, -1:]], axis=2)
    parts = []
    for r in range(f):
        t = (r + 0.5) / f - 0.5
        if t < 0:
            parts.append((-t) * x_left + (1.0 + t) * x)
        else:
            parts.append((1.0 - t) * x + t * x_right)
    # [N, C, L, f] -> [N, C, L*f] is a free reshape in XLA (row-major interleave)
    return jnp.stack(parts, axis=3).reshape(N, C, L * f)


# ----------------------------------------------------------------------------
# Fused stage kernels
# ----------------------------------------------------------------------------

def downsample_forward(p, x, factor, input_proj=None):
    """One fused kernel: (optional down_input 1x1) + down_res + leaky/c1/c2/c3 + res.

    The linear decimation runs in the wrapper; for the first stage it is applied to the
    raw (num_harmonics+1)-channel source, which commutes exactly with the 1x1
    down_input projection, so the projected wave-rate tensor never touches HBM."""
    x = interp_down(x, factor)
    N, cin_src, L = x.shape
    wres, bres = _prep_1x1(p["down_res"])
    w1, b1 = _prep_dcc(p["c1"])
    w2, b2 = _prep_dcc(p["c2"])
    w3, b3 = _prep_dcc(p["c3"])
    cn = wres.shape[0]

    if input_proj is not None:
        if cin_src == 1:
            wdi, bdi = _prep_cin1(input_proj)
            proj = lambda s, wr, br: wr[...] * s + br[...]     # VPU broadcast FMA
        else:
            wdi, bdi = _prep_1x1(input_proj)
            proj = lambda s, wr, br: _mm1x1(s, wr, br)

        def kernel(x_ref, wdi_r, bdi_r, wres_r, bres_r, w1_r, b1_r,
                   w2_r, b2_r, w3_r, b3_r, o_ref):
            xv = proj(x_ref[0], wdi_r, bdi_r)               # [C, L] stays in VMEM
            res = _mm1x1(xv, wres_r, bres_r)
            h = _dcc(_leaky(xv), w1_r, b1_r, 1)
            h = _dcc(_leaky(h), w2_r, b2_r, 2)
            h = _dcc(_leaky(h), w3_r, b3_r, 4)
            o_ref[0] = h + res

        return _run_batched(kernel, [x],
                            [wdi, bdi, wres, bres, w1, b1, w2, b2, w3, b3], cn, L, N)

    def kernel(x_ref, wres_r, bres_r, w1_r, b1_r, w2_r, b2_r, w3_r, b3_r, o_ref):
        xv = x_ref[0]
        res = _mm1x1(xv, wres_r, bres_r)
        h = _dcc(_leaky(xv), w1_r, b1_r, 1)
        h = _dcc(_leaky(h), w2_r, b2_r, 2)
        h = _dcc(_leaky(h), w3_r, b3_r, 4)
        o_ref[0] = h + res

    return _run_batched(kernel, [x],
                        [wres, bres, w1, b1, w2, b2, w3, b3], cn, L, N)


def head_forward(params, x, p, e, s0):
    """One fused kernel at frame rate, batch folded into lanes:
       c = e2v(e) + p2v(p); x = content_in(x); x = film_in(x, c); x = film_up0(x, s0)."""
    N, _, Lc = x.shape
    NL = N * Lc
    fold = lambda a: jnp.transpose(a, (1, 0, 2)).reshape(a.shape[1], NL)
    xf, pf, ef, sf = fold(x), fold(p), fold(e), fold(s0)

    wp1, bp1 = _prep_cin1(params["p2v_c1"])     # std=30 weights: keep f32, sin on EUP
    wp2, bp2 = _prep_1x1(params["p2v_c2"])
    we, be = _prep_cin1(params["e2v_c1"])
    wci, bci = _prep_1x1(params["content_in"])
    wfin, bfin = _prep_film(params["film_in"])
    wf0, bf0 = _prep_film(params["ups"][0]["film"])   # first Upsample's FiLM, fused here
    c0 = wci.shape[0]

    def kernel(x_ref, p_ref, e_ref, s_ref, wp1_r, bp1_r, wp2_r, bp2_r,
               we_r, be_r, wci_r, bci_r, wfin_r, bfin_r, wf0_r, bf0_r, o_ref):
        pv = p_ref[...]
        ev = e_ref[...]
        h = jnp.sin(wp1_r[...] * pv + bp1_r[...])                 # [Cc, NL] f32
        c = _mm1x1(h, wp2_r, bp2_r) + (we_r[...] * ev + be_r[...])
        xc = _mm1x1(x_ref[...], wci_r, bci_r)
        xc = _film(xc, c, wfin_r, bfin_r)
        o_ref[...] = _film(xc, s_ref[...], wf0_r, bf0_r)

    out = _run_single(kernel,
                      [xf, pf, ef, sf, wp1, bp1, wp2, bp2,
                       we, be, wci, bci, wfin, bfin, wf0, bf0], c0, NL)
    return out.reshape(c0, N, Lc).transpose(1, 0, 2)


def upsample_forward(p, x, factor, next_film=None, next_skip=None, output_p=None):
    """x is already FiLM'ed at the coarse rate by its producer kernel.  Wrapper does the
    2-tap linear upsample; ONE fused kernel then runs c1..c5 + residuals and either the
    NEXT stage's FiLM (skip conditioning at this output rate) or the final output DCC."""
    x = interp_up(x, factor)
    N, _, L = x.shape
    w1, b1 = _prep_dcc(p["c1"])
    w2, b2 = _prep_dcc(p["c2"])
    w3, b3 = _prep_dcc(p["c3"])
    w4, b4 = _prep_dcc(p["c4"])
    w5, b5 = _prep_dcc(p["c5"])
    cn = w5.shape[1]

    def chain(xv, w1_r, b1_r, w2_r, b2_r, w3_r, b3_r, w4_r, b4_r, w5_r, b5_r):
        res = xv
        h = _dcc(_leaky(xv), w1_r, b1_r, 1)
        h = _dcc(_leaky(h), w2_r, b2_r, 3)
        h = h + res
        res = h
        h = _dcc(_leaky(h), w3_r, b3_r, 9)
        h = _dcc(_leaky(h), w4_r, b4_r, 27)
        h = h + res
        return _dcc(h, w5_r, b5_r, 1)

    if next_film is not None:
        wf, bf = _prep_film(next_film)

        def kernel(x_ref, s_ref, w1_r, b1_r, w2_r, b2_r, w3_r, b3_r, w4_r, b4_r,
                   w5_r, b5_r, wf_r, bf_r, o_ref):
            h = chain(x_ref[0], w1_r, b1_r, w2_r, b2_r, w3_r, b3_r,
                      w4_r, b4_r, w5_r, b5_r)
            o_ref[0] = _film(h, s_ref[0], wf_r, bf_r)

        return _run_batched(kernel, [x, next_skip],
                            [w1, b1, w2, b2, w3, b3, w4, b4, w5, b5, wf, bf], cn, L, N)

    wo, bo = _prep_dcc(output_p)

    def kernel(x_ref, w1_r, b1_r, w2_r, b2_r, w3_r, b3_r, w4_r, b4_r,
               w5_r, b5_r, wo_r, bo_r, o_ref):
        h = chain(x_ref[0], w1_r, b1_r, w2_r, b2_r, w3_r, b3_r,
                  w4_r, b4_r, w5_r, b5_r)
        o_ref[0] = _dcc(h, wo_r, bo_r, 1)                 # output layer fused

    return _run_batched(kernel, [x],
                        [w1, b1, w2, b2, w3, b3, w4, b4, w5, b5, wo, bo], 1, L, N)


# ----------------------------------------------------------------------------
# Decoder forward
# ----------------------------------------------------------------------------

def decoder_forward(params, x, p, e, source_signals, cfg):
    factors = cfg["factors"]
    rev_factors = list(reversed(factors))

    # downsample path over the source signal (down_input fused into the first stage)
    skips = []
    h = source_signals
    for i, (dp, f) in enumerate(zip(params["downs"], rev_factors)):
        h = downsample_forward(dp, h, f,
                               input_proj=params["down_input"] if i == 0 else None)
        skips.append(h)

    # conditioning + content_in + film_in + first Upsample's FiLM (frame rate)
    xa = head_forward(params, x, p, e, skips[-1])

    # upsample path: each kernel also applies the next stage's FiLM (or the output DCC)
    n_up = len(params["ups"])
    for i in range(n_up):
        up = params["ups"][i]
        if i + 1 < n_up:
            xa = upsample_forward(up, xa, factors[i],
                                  next_film=params["ups"][i + 1]["film"],
                                  next_skip=skips[n_up - 2 - i])
        else:
            xa = upsample_forward(up, xa, factors[i],
                                  output_p=params["output_layer"])

    return xa[:, 0, :]                                   # squeeze(1)


# ----------------------------------------------------------------------------
# Deterministic parameter init (PyTorch Conv1d-style uniform init)
# ----------------------------------------------------------------------------

def init_params(key, cfg):
    keys = iter(jax.random.split(key, 256))

    def conv_p(cin, cout, k, std=None):
        kw, kb = next(keys), next(keys)
        bound = 1.0 / math.sqrt(cin * k)
        if std is None:
            w = jax.random.uniform(kw, (cout, cin, k), jnp.float32, -bound, bound)
        else:
            w = jax.random.normal(kw, (cout, cin, k), jnp.float32) * std
        b = jax.random.uniform(kb, (cout,), jnp.float32, -bound, bound)
        return {"w": w, "b": b}

    channels = cfg["channels"]
    cond_channels = cfg["cond_channels"]
    num_harmonics = cfg["num_harmonics"]
    content_channels = cfg["content_channels"]

    cond = list(reversed(cond_channels))
    cond_next = cond[1:] + [cond[-1]]

    params = {}
    params["down_input"] = conv_p(num_harmonics + 1, cond_channels[-1], 1)
    params["downs"] = []
    for c, c_n in zip(cond, cond_next):
        params["downs"].append({
            "down_res": conv_p(c, c_n, 1),
            "c1": conv_p(c, c, 3),
            "c2": conv_p(c, c, 3),
            "c3": conv_p(c, c_n, 3),
        })
    params["content_in"] = conv_p(content_channels, channels[0], 1)
    params["p2v_c1"] = conv_p(1, cond_channels[0], 1, std=30.0)   # torch normal std=30
    params["p2v_c2"] = conv_p(cond_channels[0], cond_channels[0], 1)
    params["e2v_c1"] = conv_p(1, cond_channels[0], 1)
    params["film_in"] = {"to_mu": conv_p(cond_channels[0], channels[0], 1),
                         "to_sigma": conv_p(cond_channels[0], channels[0], 1)}

    up = channels
    up_next = channels[1:] + [channels[-1]]
    rev_cond_next = list(reversed(cond_next))
    params["ups"] = []
    for u, u_n, cn in zip(up, up_next, rev_cond_next):
        params["ups"].append({
            "film": {"to_mu": conv_p(cn, u, 1), "to_sigma": conv_p(cn, u, 1)},
            "c1": conv_p(u, u, 3),
            "c2": conv_p(u, u, 3),
            "c3": conv_p(u, u, 3),
            "c4": conv_p(u, u, 3),
            "c5": conv_p(u, u_n, 3),
        })
    params["output_layer"] = conv_p(channels[-1], 1, 3)
    return params


# ----------------------------------------------------------------------------
# Main
# ----------------------------------------------------------------------------

if __name__ == "__main__":
    # Small but structurally faithful configuration.
    cfg = {
        "channels": [32, 16, 8, 8],
        "factors": [2, 2, 2, 2],
        "cond_channels": [32, 16, 8, 8],
        "num_harmonics": 0,
        "content_channels": 48,
        "frame_size": 16,   # prod(factors)
    }

    N, Lc = 2, 8
    L_wave = Lc * cfg["frame_size"]

    key = jax.random.PRNGKey(0)
    k_params, kx, kp, ke, ks = jax.random.split(key, 5)

    params = init_params(k_params, cfg)

    x = jax.random.normal(kx, (N, cfg["content_channels"], Lc), jnp.float32)
    p = jax.random.uniform(kp, (N, 1, Lc), jnp.float32, 80.0, 400.0)   # pitch (Hz-like)
    e = jax.random.uniform(ke, (N, 1, Lc), jnp.float32, 0.0, 1.0)      # energy
    source_signals = jax.random.normal(ks, (N, cfg["num_harmonics"] + 1, L_wave),
                                       jnp.float32)

    fwd = jax.jit(lambda prm, x, p, e, s: decoder_forward(prm, x, p, e, s, cfg))
    out = fwd(params, x, p, e, source_signals)
    out = jax.block_until_ready(out)

    assert out.shape == (N, L_wave), out.shape
    assert bool(jnp.all(jnp.isfinite(out)))
    print("KERNEL_OK")
</pallas_src>

<mosaic_0001>
module attributes {stable_mosaic.version = 11 : i64} {
  func.func @kernel(%arg0: i32, %arg1: memref<1x1x64xf32, #tpu.memory_space<vmem>>, %arg2: memref<8x1xf32, #tpu.memory_space<vmem>>, %arg3: memref<8x1xf32, #tpu.memory_space<vmem>>, %arg4: memref<8x8xbf16, #tpu.memory_space<vmem>>, %arg5: memref<8x1xf32, #tpu.memory_space<vmem>>, %arg6: memref<3x8x8xbf16, #tpu.memory_space<vmem>>, %arg7: memref<8x1xf32, #tpu.memory_space<vmem>>, %arg8: memref<3x8x8xbf16, #tpu.memory_space<vmem>>, %arg9: memref<8x1xf32, #tpu.memory_space<vmem>>, %arg10: memref<3x8x8xbf16, #tpu.memory_space<vmem>>, %arg11: memref<8x1xf32, #tpu.memory_space<vmem>>, %arg12: memref<1x8x64xf32, #tpu.memory_space<vmem>>) attributes {dimension_semantics = [#tpu.dimension_semantics<parallel>], iteration_bounds = array<i64: 2>, scalar_prefetch = 0 : i64, scratch_operands = 0 : i64, tpu.core_type = #tpu.core_type<tc>, window_params = [{transform_indices = @transform_0, window_bounds = array<i64: 1, 1, 64>}, {pipeline_mode = #tpu.pipeline_mode<synchronous>, transform_indices = @transform_1, window_bounds = array<i64: 8, 1>}, {pipeline_mode = #tpu.pipeline_mode<synchronous>, transform_indices = @transform_2, window_bounds = array<i64: 8, 1>}, {pipeline_mode = #tpu.pipeline_mode<synchronous>, transform_indices = @transform_3, window_bounds = array<i64: 8, 8>}, {pipeline_mode = #tpu.pipeline_mode<synchronous>, transform_indices = @transform_4, window_bounds = array<i64: 8, 1>}, {pipeline_mode = #tpu.pipeline_mode<synchronous>, transform_indices = @transform_5, window_bounds = array<i64: 3, 8, 8>}, {pipeline_mode = #tpu.pipeline_mode<synchronous>, transform_indices = @transform_6, window_bounds = array<i64: 8, 1>}, {pipeline_mode = #tpu.pipeline_mode<synchronous>, transform_indices = @transform_7, window_bounds = array<i64: 3, 8, 8>}, {pipeline_mode = #tpu.pipeline_mode<synchronous>, transform_indices = @transform_8, window_bounds = array<i64: 8, 1>}, {pipeline_mode = #tpu.pipeline_mode<synchronous>, transform_indices = @transform_9, window_bounds = array<i64: 3, 8, 8>}, {pipeline_mode = #tpu.pipeline_mode<synchronous>, transform_indices = @transform_10, window_bounds = array<i64: 8, 1>}, {transform_indices = @transform_11, window_bounds = array<i64: 1, 8, 64>}]} {
    %c0 = arith.constant 0 : index
    %c0_0 = arith.constant 0 : index
    %c0_1 = arith.constant 0 : index
    %0 = vector.load %arg1[%c0, %c0_0, %c0_1] : memref<1x1x64xf32, #tpu.memory_space<vmem>>, vector<1x1x64xf32>
    %1 = vector.shape_cast %0 : vector<1x1x64xf32> to vector<1x64xf32>
    %c0_2 = arith.constant 0 : index
    %c0_3 = arith.constant 0 : index
    %2 = vector.load %arg2[%c0_2, %c0_3] : memref<8x1xf32, #tpu.memory_space<vmem>>, vector<8x1xf32>
    %3 = vector.broadcast %2 : vector<8x1xf32> to vector<8x64xf32>
    %4 = vector.broadcast %1 : vector<1x64xf32> to vector<8x64xf32>
    %5 = arith.mulf %3, %4 : vector<8x64xf32>
    %c0_4 = arith.constant 0 : index
    %c0_5 = arith.constant 0 : index
    %6 = vector.load %arg3[%c0_4, %c0_5] : memref<8x1xf32, #tpu.memory_space<vmem>>, vector<8x1xf32>
    %7 = vector.broadcast %6 : vector<8x1xf32> to vector<8x64xf32>
    %8 = arith.addf %5, %7 : vector<8x64xf32>
    %c0_6 = arith.constant 0 : index
    %c0_7 = arith.constant 0 : index
    %9 = vector.load %arg4[%c0_6, %c0_7] : memref<8x8xbf16, #tpu.memory_space<vmem>>, vector<8x8xbf16>
    %10 = arith.truncf %8 : vector<8x64xf32> to vector<8x64xbf16>
    %cst = arith.constant dense<0.000000e+00> : vector<8x64xf32>
    %11 = tpu.matmul %9, %10, %cst {dimension_numbers = #tpu.dot_dimension_numbers<[1], [0], [0], [1], [0, 0, 1, 1], [], []>} : vector<8x8xbf16>, vector<8x64xbf16>, vector<8x64xf32> -> vector<8x64xf32>
    %c0_8 = arith.constant 0 : index
    %c0_9 = arith.constant 0 : index
    %12 = vector.load %arg5[%c0_8, %c0_9] : memref<8x1xf32, #tpu.memory_space<vmem>>, vector<8x1xf32>
    %13 = vector.broadcast %12 : vector<8x1xf32> to vector<8x64xf32>
    %14 = arith.addf %11, %13 : vector<8x64xf32>
    %cst_10 = arith.constant 0.000000e+00 : f32
    %15 = vector.broadcast %cst_10 : f32 to vector<8x64xf32>
    %16 = arith.cmpf oge, %8, %15 : vector<8x64xf32>
    %cst_11 = arith.constant 1.000000e-01 : f32
    %17 = vector.broadcast %cst_11 : f32 to vector<8x64xf32>
    %18 = arith.mulf %8, %17 : vector<8x64xf32>
    %19 = arith.select %16, %8, %18 : vector<8x64xi1>, vector<8x64xf32>
    %20 = arith.truncf %19 : vector<8x64xf32> to vector<8x64xbf16>
    %cst_12 = arith.constant 0.000000e+00 : bf16
    %21 = vector.broadcast %cst_12 : bf16 to vector<8x2xbf16>
    %22 = vector.extract_strided_slice %20 {offsets = [0, 0], sizes = [8, 62], strides = [1, 1]} : vector<8x64xbf16> to vector<8x62xbf16>
    %23 = tpu.concatenate %21, %22 in 1 : vector<8x2xbf16>, vector<8x62xbf16> -> vector<8x64xbf16>
    %c0_13 = arith.constant 0 : index
    %c0_14 = arith.constant 0 : index
    %c0_15 = arith.constant 0 : index
    %24 = vector.load %arg6[%c0_13, %c0_14, %c0_15] : memref<3x8x8xbf16, #tpu.memory_space<vmem>>, vector<1x8x8xbf16>
    %25 = vector.shape_cast %24 : vector<1x8x8xbf16> to vector<8x8xbf16>
    %cst_16 = arith.constant dense<0.000000e+00> : vector<8x64xf32>
    %26 = tpu.matmul %25, %23, %cst_16 {dimension_numbers = #tpu.dot_dimension_numbers<[1], [0], [0], [1], [0, 0, 1, 1], [], []>} : vector<8x8xbf16>, vector<8x64xbf16>, vector<8x64xf32> -> vector<8x64xf32>
    %cst_17 = arith.constant 0.000000e+00 : bf16
    %27 = vector.broadcast %cst_17 : bf16 to vector<8x1xbf16>
    %28 = vector.extract_strided_slice %20 {offsets = [0, 0], sizes = [8, 63], strides = [1, 1]} : vector<8x64xbf16> to vector<8x63xbf16>
    %29 = tpu.concatenate %27, %28 in 1 : vector<8x1xbf16>, vector<8x63xbf16> -> vector<8x64xbf16>
    %c1 = arith.constant 1 : index
    %c0_18 = arith.constant 0 : index
    %c0_19 = arith.constant 0 : index
    %30 = vector.load %arg6[%c1, %c0_18, %c0_19] : memref<3x8x8xbf16, #tpu.memory_space<vmem>>, vector<1x8x8xbf16>
    %31 = vector.shape_cast %30 : vector<1x8x8xbf16> to vector<8x8xbf16>
    %cst_20 = arith.constant dense<0.000000e+00> : vector<8x64xf32>
    %32 = tpu.matmul %31, %29, %cst_20 {dimension_numbers = #tpu.dot_dimension_numbers<[1], [0], [0], [1], [0, 0, 1, 1], [], []>} : vector<8x8xbf16>, vector<8x64xbf16>, vector<8x64xf32> -> vector<8x64xf32>
    %33 = arith.addf %26, %32 : vector<8x64xf32>
    %c2 = arith.constant 2 : index
    %c0_21 = arith.constant 0 : index
    %c0_22 = arith.constant 0 : index
    %34 = vector.load %arg6[%c2, %c0_21, %c0_22] : memref<3x8x8xbf16, #tpu.memory_space<vmem>>, vector<1x8x8xbf16>
    %35 = vector.shape_cast %34 : vector<1x8x8xbf16> to vector<8x8xbf16>
    %cst_23 = arith.constant dense<0.000000e+00> : vector<8x64xf32>
    %36 = tpu.matmul %35, %20, %cst_23 {dimension_numbers = #tpu.dot_dimension_numbers<[1], [0], [0], [1], [0, 0, 1, 1], [], []>} : vector<8x8xbf16>, vector<8x64xbf16>, vector<8x64xf32> -> vector<8x64xf32>
    %37 = arith.addf %33, %36 : vector<8x64xf32>
    %c0_24 = arith.constant 0 : index
    %c0_25 = arith.constant 0 : index
    %38 = vector.load %arg7[%c0_24, %c0_25] : memref<8x1xf32, #tpu.memory_space<vmem>>, vector<8x1xf32>
    %39 = vector.broadcast %38 : vector<8x1xf32> to vector<8x64xf32>
    %40 = arith.addf %37, %39 : vector<8x64xf32>
    %cst_26 = arith.constant 0.000000e+00 : f32
    %41 = vector.broadcast %cst_26 : f32 to vector<8x64xf32>
    %42 = arith.cmpf oge, %40, %41 : vector<8x64xf32>
    %cst_27 = arith.constant 1.000000e-01 : f32
    %43 = vector.broadcast %cst_27 : f32 to vector<8x64xf32>
    %44 = arith.mulf %40, %43 : vector<8x64xf32>
    %45 = arith.select %42, %40, %44 : vector<8x64xi1>, vector<8x64xf32>
    %46 = arith.truncf %45 : vector<8x64xf32> to vector<8x64xbf16>
    %cst_28 = arith.constant 0.000000e+00 : bf16
    %47 = vector.broadcast %cst_28 : bf16 to vector<8x4xbf16>
    %48 = vector.extract_strided_slice %46 {offsets = [0, 0], sizes = [8, 60], strides = [1, 1]} : vector<8x64xbf16> to vector<8x60xbf16>
    %49 = tpu.concatenate %47, %48 in 1 : vector<8x4xbf16>, vector<8x60xbf16> -> vector<8x64xbf16>
    %c0_29 = arith.constant 0 : index
    %c0_30 = arith.constant 0 : index
    %c0_31 = arith.constant 0 : index
    %50 = vector.load %arg8[%c0_29, %c0_30, %c0_31] : memref<3x8x8xbf16, #tpu.memory_space<vmem>>, vector<1x8x8xbf16>
    %51 = vector.shape_cast %50 : vector<1x8x8xbf16> to vector<8x8xbf16>
    %cst_32 = arith.constant dense<0.000000e+00> : vector<8x64xf32>
    %52 = tpu.matmul %51, %49, %cst_32 {dimension_numbers = #tpu.dot_dimension_numbers<[1], [0], [0], [1], [0, 0, 1, 1], [], []>} : vector<8x8xbf16>, vector<8x64xbf16>, vector<8x64xf32> -> vector<8x64xf32>
    %cst_33 = arith.constant 0.000000e+00 : bf16
    %53 = vector.broadcast %cst_33 : bf16 to vector<8x2xbf16>
    %54 = vector.extract_strided_slice %46 {offsets = [0, 0], sizes = [8, 62], strides = [1, 1]} : vector<8x64xbf16> to vector<8x62xbf16>
    %55 = tpu.concatenate %53, %54 in 1 : vector<8x2xbf16>, vector<8x62xbf16> -> vector<8x64xbf16>
    %c1_34 = arith.constant 1 : index
    %c0_35 = arith.constant 0 : index
    %c0_36 = arith.constant 0 : index
    %56 = vector.load %arg8[%c1_34, %c0_35, %c0_36] : memref<3x8x8xbf16, #tpu.memory_space<vmem>>, vector<1x8x8xbf16>
    %57 = vector.shape_cast %56 : vector<1x8x8xbf16> to vector<8x8xbf16>
    %cst_37 = arith.constant dense<0.000000e+00> : vector<8x64xf32>
    %58 = tpu.matmul %57, %55, %cst_37 {dimension_numbers = #tpu.dot_dimension_numbers<[1], [0], [0], [1], [0, 0, 1, 1], [], []>} : vector<8x8xbf16>, vector<8x64xbf16>, vector<8x64xf32> -> vector<8x64xf32>
    %59 = arith.addf %52, %58 : vector<8x64xf32>
    %c2_38 = arith.constant 2 : index
    %c0_39 = arith.constant 0 : index
    %c0_40 = arith.constant 0 : index
    %60 = vector.load %arg8[%c2_38, %c0_39, %c0_40] : memref<3x8x8xbf16, #tpu.memory_space<vmem>>, vector<1x8x8xbf16>
    %61 = vector.shape_cast %60 : vector<1x8x8xbf16> to vector<8x8xbf16>
    %cst_41 = arith.constant dense<0.000000e+00> : vector<8x64xf32>
    %62 = tpu.matmul %61, %46, %cst_41 {dimension_numbers = #tpu.dot_dimension_numbers<[1], [0], [0], [1], [0, 0, 1, 1], [], []>} : vector<8x8xbf16>, vector<8x64xbf16>, vector<8x64xf32> -> vector<8x64xf32>
    %63 = arith.addf %59, %62 : vector<8x64xf32>
    %c0_42 = arith.constant 0 : index
    %c0_43 = arith.constant 0 : index
    %64 = vector.load %arg9[%c0_42, %c0_43] : memref<8x1xf32, #tpu.memory_space<vmem>>, vector<8x1xf32>
    %65 = vector.broadcast %64 : vector<8x1xf32> to vector<8x64xf32>
    %66 = arith.addf %63, %65 : vector<8x64xf32>
    %cst_44 = arith.constant 0.000000e+00 : f32
    %67 = vector.broadcast %cst_44 : f32 to vector<8x64xf32>
    %68 = arith.cmpf oge, %66, %67 : vector<8x64xf32>
    %cst_45 = arith.constant 1.000000e-01 : f32
    %69 = vector.broadcast %cst_45 : f32 to vector<8x64xf32>
    %70 = arith.mulf %66, %69 : vector<8x64xf32>
    %71 = arith.select %68, %66, %70 : vector<8x64xi1>, vector<8x64xf32>
    %72 = arith.truncf %71 : vector<8x64xf32> to vector<8x64xbf16>
    %cst_46 = arith.constant 0.000000e+00 : bf16
    %73 = vector.broadcast %cst_46 : bf16 to vector<8x8xbf16>
    %74 = vector.extract_strided_slice %72 {offsets = [0, 0], sizes = [8, 56], strides = [1, 1]} : vector<8x64xbf16> to vector<8x56xbf16>
    %75 = tpu.concatenate %73, %74 in 1 : vector<8x8xbf16>, vector<8x56xbf16> -> vector<8x64xbf16>
    %c0_47 = arith.constant 0 : index
    %c0_48 = arith.constant 0 : index
    %c0_49 = arith.constant 0 : index
    %76 = vector.load %arg10[%c0_47, %c0_48, %c0_49] : memref<3x8x8xbf16, #tpu.memory_space<vmem>>, vector<1x8x8xbf16>
    %77 = vector.shape_cast %76 : vector<1x8x8xbf16> to vector<8x8xbf16>
    %cst_50 = arith.constant dense<0.000000e+00> : vector<8x64xf32>
    %78 = tpu.matmul %77, %75, %cst_50 {dimension_numbers = #tpu.dot_dimension_numbers<[1], [0], [0], [1], [0, 0, 1, 1], [], []>} : vector<8x8xbf16>, vector<8x64xbf16>, vector<8x64xf32> -> vector<8x64xf32>
    %cst_51 = arith.constant 0.000000e+00 : bf16
    %79 = vector.broadcast %cst_51 : bf16 to vector<8x4xbf16>
    %80 = vector.extract_strided_slice %72 {offsets = [0, 0], sizes = [8, 60], strides = [1, 1]} : vector<8x64xbf16> to vector<8x60xbf16>
    %81 = tpu.concatenate %79, %80 in 1 : vector<8x4xbf16>, vector<8x60xbf16> -> vector<8x64xbf16>
    %c1_52 = arith.constant 1 : index
    %c0_53 = arith.constant 0 : index
    %c0_54 = arith.constant 0 : index
    %82 = vector.load %arg10[%c1_52, %c0_53, %c0_54] : memref<3x8x8xbf16, #tpu.memory_space<vmem>>, vector<1x8x8xbf16>
    %83 = vector.shape_cast %82 : vector<1x8x8xbf16> to vector<8x8xbf16>
    %cst_55 = arith.constant dense<0.000000e+00> : vector<8x64xf32>
    %84 = tpu.matmul %83, %81, %cst_55 {dimension_numbers = #tpu.dot_dimension_numbers<[1], [0], [0], [1], [0, 0, 1, 1], [], []>} : vector<8x8xbf16>, vector<8x64xbf16>, vector<8x64xf32> -> vector<8x64xf32>
    %85 = arith.addf %78, %84 : vector<8x64xf32>
    %c2_56 = arith.constant 2 : index
    %c0_57 = arith.constant 0 : index
    %c0_58 = arith.constant 0 : index
    %86 = vector.load %arg10[%c2_56, %c0_57, %c0_58] : memref<3x8x8xbf16, #tpu.memory_space<vmem>>, vector<1x8x8xbf16>
    %87 = vector.shape_cast %86 : vector<1x8x8xbf16> to vector<8x8xbf16>
    %cst_59 = arith.constant dense<0.000000e+00> : vector<8x64xf32>
    %88 = tpu.matmul %87, %72, %cst_59 {dimension_numbers = #tpu.dot_dimension_numbers<[1], [0], [0], [1], [0, 0, 1, 1], [], []>} : vector<8x8xbf16>, vector<8x64xbf16>, vector<8x64xf32> -> vector<8x64xf32>
    %89 = arith.addf %85, %88 : vector<8x64xf32>
    %c0_60 = arith.constant 0 : index
    %c0_61 = arith.constant 0 : index
    %90 = vector.load %arg11[%c0_60, %c0_61] : memref<8x1xf32, #tpu.memory_space<vmem>>, vector<8x1xf32>
    %91 = vector.broadcast %90 : vector<8x1xf32> to vector<8x64xf32>
    %92 = arith.addf %89, %91 : vector<8x64xf32>
    %93 = arith.addf %92, %14 : vector<8x64xf32>
    %c0_62 = arith.constant 0 : index
    %c0_63 = arith.constant 0 : index
    %c0_64 = arith.constant 0 : index
    %94 = vector.load %arg12[%c0_62, %c0_63, %c0_64] : memref<1x8x64xf32, #tpu.memory_space<vmem>>, vector<1x8x64xf32>
    %95 = vector.shape_cast %94 : vector<1x8x64xf32> to vector<8x64xf32>
    %96 = vector.shape_cast %93 : vector<8x64xf32> to vector<1x8x64xf32>
    tpu.vector_store %arg12[%c0_62, %c0_63, %c0_64], %96 {strides = array<i32>} : memref<1x8x64xf32, #tpu.memory_space<vmem>>, vector<1x8x64xf32>,
    return
  }
  func.func @transform_0(%arg0: i32) -> (i32, i32, i32) {
    %c0_i32 = arith.constant 0 : i32
    %c0_i32_0 = arith.constant 0 : i32
    %c0_i32_1 = arith.constant 0 : i32
    return %arg0, %c0_i32, %c0_i32_0 : i32, i32, i32
  }
  func.func @transform_1(%arg0: i32) -> (i32, i32) {
    %c0_i32 = arith.constant 0 : i32
    %c0_i32_0 = arith.constant 0 : i32
    %c0_i32_1 = arith.constant 0 : i32
    return %c0_i32, %c0_i32_0 : i32, i32
  }
  func.func @transform_2(%arg0: i32) -> (i32, i32) {
    %c0_i32 = arith.constant 0 : i32
    %c0_i32_0 = arith.constant 0 : i32
    %c0_i32_1 = arith.constant 0 : i32
    return %c0_i32, %c0_i32_0 : i32, i32
  }
  func.func @transform_3(%arg0: i32) -> (i32, i32) {
    %c0_i32 = arith.constant 0 : i32
    %c0_i32_0 = arith.constant 0 : i32
    %c0_i32_1 = arith.constant 0 : i32
    return %c0_i32, %c0_i32_0 : i32, i32
  }
  func.func @transform_4(%arg0: i32) -> (i32, i32) {
    %c0_i32 = arith.constant 0 : i32
    %c0_i32_0 = arith.constant 0 : i32
    %c0_i32_1 = arith.constant 0 : i32
    return %c0_i32, %c0_i32_0 : i32, i32
  }
  func.func @transform_5(%arg0: i32) -> (i32, i32, i32) {
    %c0_i32 = arith.constant 0 : i32
    %c0_i32_0 = arith.constant 0 : i32
    %c0_i32_1 = arith.constant 0 : i32
    %c0_i32_2 = arith.constant 0 : i32
    return %c0_i32, %c0_i32_0, %c0_i32_1 : i32, i32, i32
  }
  func.func @transform_6(%arg0: i32) -> (i32, i32) {
    %c0_i32 = arith.constant 0 : i32
    %c0_i32_0 = arith.constant 0 : i32
    %c0_i32_1 = arith.constant 0 : i32
    return %c0_i32, %c0_i32_0 : i32, i32
  }
  func.func @transform_7(%arg0: i32) -> (i32, i32, i32) {
    %c0_i32 = arith.constant 0 : i32
    %c0_i32_0 = arith.constant 0 : i32
    %c0_i32_1 = arith.constant 0 : i32
    %c0_i32_2 = arith.constant 0 : i32
    return %c0_i32, %c0_i32_0, %c0_i32_1 : i32, i32, i32
  }
  func.func @transform_8(%arg0: i32) -> (i32, i32) {
    %c0_i32 = arith.constant 0 : i32
    %c0_i32_0 = arith.constant 0 : i32
    %c0_i32_1 = arith.constant 0 : i32
    return %c0_i32, %c0_i32_0 : i32, i32
  }
  func.func @transform_9(%arg0: i32) -> (i32, i32, i32) {
    %c0_i32 = arith.constant 0 : i32
    %c0_i32_0 = arith.constant 0 : i32
    %c0_i32_1 = arith.constant 0 : i32
    %c0_i32_2 = arith.constant 0 : i32
    return %c0_i32, %c0_i32_0, %c0_i32_1 : i32, i32, i32
  }
  func.func @transform_10(%arg0: i32) -> (i32, i32) {
    %c0_i32 = arith.constant 0 : i32
    %c0_i32_0 = arith.constant 0 : i32
    %c0_i32_1 = arith.constant 0 : i32
    return %c0_i32, %c0_i32_0 : i32, i32
  }
  func.func @transform_11(%arg0: i32) -> (i32, i32, i32) {
    %c0_i32 = arith.constant 0 : i32
    %c0_i32_0 = arith.constant 0 : i32
    %c0_i32_1 = arith.constant 0 : i32
    return %arg0, %c0_i32, %c0_i32_0 : i32, i32, i32
  }
}

module attributes {stable_mosaic.version = 11 : i64} {
  func.func @kernel(%arg0: i32, %arg1: memref<1x8x32xf32, #tpu.memory_space<vmem>>, %arg2: memref<16x8xbf16, #tpu.memory_space<vmem>>, %arg3: memref<16x1xf32, #tpu.memory_space<vmem>>, %arg4: memref<3x8x8xbf16, #tpu.memory_space<vmem>>, %arg5: memref<8x1xf32, #tpu.memory_space<vmem>>, %arg6: memref<3x8x8xbf16, #tpu.memory_space<vmem>>, %arg7: memref<8x1xf32, #tpu.memory_space<vmem>>, %arg8: memref<3x16x8xbf16, #tpu.memory_space<vmem>>, %arg9: memref<16x1xf32, #tpu.memory_space<vmem>>, %arg10: memref<1x16x32xf32, #tpu.memory_space<vmem>>) attributes {dimension_semantics = [#tpu.dimension_semantics<parallel>], iteration_bounds = array<i64: 2>, scalar_prefetch = 0 : i64, scratch_operands = 0 : i64, tpu.core_type = #tpu.core_type<tc>, window_params = [{transform_indices = @transform_0, window_bounds = array<i64: 1, 8, 32>}, {pipeline_mode = #tpu.pipeline_mode<synchronous>, transform_indices = @transform_1, window_bounds = array<i64: 16, 8>}, {pipeline_mode = #tpu.pipeline_mode<synchronous>, transform_indices = @transform_2, window_bounds = array<i64: 16, 1>}, {pipeline_mode = #tpu.pipeline_mode<synchronous>, transform_indices = @transform_3, window_bounds = array<i64: 3, 8, 8>}, {pipeline_mode = #tpu.pipeline_mode<synchronous>, transform_indices = @transform_4, window_bounds = array<i64: 8, 1>}, {pipeline_mode = #tpu.pipeline_mode<synchronous>, transform_indices = @transform_5, window_bounds = array<i64: 3, 8, 8>}, {pipeline_mode = #tpu.pipeline_mode<synchronous>, transform_indices = @transform_6, window_bounds = array<i64: 8, 1>}, {pipeline_mode = #tpu.pipeline_mode<synchronous>, transform_indices = @transform_7, window_bounds = array<i64: 3, 16, 8>}, {pipeline_mode = #tpu.pipeline_mode<synchronous>, transform_indices = @transform_8, window_bounds = array<i64: 16, 1>}, {transform_indices = @transform_9, window_bounds = array<i64: 1, 16, 32>}]} {
    %c0 = arith.constant 0 : index
    %c0_0 = arith.constant 0 : index
    %c0_1 = arith.constant 0 : index
    %0 = vector.load %arg1[%c0, %c0_0, %c0_1] : memref<1x8x32xf32, #tpu.memory_space<vmem>>, vector<1x8x32xf32>
    %1 = vector.shape_cast %0 : vector<1x8x32xf32> to vector<8x32xf32>
    %c0_2 = arith.constant 0 : index
    %c0_3 = arith.constant 0 : index
    %2 = vector.load %arg2[%c0_2, %c0_3] : memref<16x8xbf16, #tpu.memory_space<vmem>>, vector<16x8xbf16>
    %3 = arith.truncf %1 : vector<8x32xf32> to vector<8x32xbf16>
    %cst = arith.constant dense<0.000000e+00> : vector<16x32xf32>
    %4 = tpu.matmul %2, %3, %cst {dimension_numbers = #tpu.dot_dimension_numbers<[1], [0], [0], [1], [0, 0, 1, 1], [], []>} : vector<16x8xbf16>, vector<8x32xbf16>, vector<16x32xf32> -> vector<16x32xf32>
    %c0_4 = arith.constant 0 : index
    %c0_5 = arith.constant 0 : index
    %5 = vector.load %arg3[%c0_4, %c0_5] : memref<16x1xf32, #tpu.memory_space<vmem>>, vector<16x1xf32>
    %6 = vector.broadcast %5 : vector<16x1xf32> to vector<16x32xf32>
    %7 = arith.addf %4, %6 : vector<16x32xf32>
    %cst_6 = arith.constant 0.000000e+00 : f32
    %8 = vector.broadcast %cst_6 : f32 to vector<8x32xf32>
    %9 = arith.cmpf oge, %1, %8 : vector<8x32xf32>
    %cst_7 = arith.constant 1.000000e-01 : f32
    %10 = vector.broadcast %cst_7 : f32 to vector<8x32xf32>
    %11 = arith.mulf %1, %10 : vector<8x32xf32>
    %12 = arith.select %9, %1, %11 : vector<8x32xi1>, vector<8x32xf32>
    %13 = arith.truncf %12 : vector<8x32xf32> to vector<8x32xbf16>
    %cst_8 = arith.constant 0.000000e+00 : bf16
    %14 = vector.broadcast %cst_8 : bf16 to vector<8x2xbf16>
    %15 = vector.extract_strided_slice %13 {offsets = [0, 0], sizes = [8, 30], strides = [1, 1]} : vector<8x32xbf16> to vector<8x30xbf16>
    %16 = tpu.concatenate %14, %15 in 1 : vector<8x2xbf16>, vector<8x30xbf16> -> vector<8x32xbf16>
    %c0_9 = arith.constant 0 : index
    %c0_10 = arith.constant 0 : index
    %c0_11 = arith.constant 0 : index
    %17 = vector.load %arg4[%c0_9, %c0_10, %c0_11] : memref<3x8x8xbf16, #tpu.memory_space<vmem>>, vector<1x8x8xbf16>
    %18 = vector.shape_cast %17 : vector<1x8x8xbf16> to vector<8x8xbf16>
    %cst_12 = arith.constant dense<0.000000e+00> : vector<8x32xf32>
    %19 = tpu.matmul %18, %16, %cst_12 {dimension_numbers = #tpu.dot_dimension_numbers<[1], [0], [0], [1], [0, 0, 1, 1], [], []>} : vector<8x8xbf16>, vector<8x32xbf16>, vector<8x32xf32> -> vector<8x32xf32>
    %cst_13 = arith.constant 0.000000e+00 : bf16
    %20 = vector.broadcast %cst_13 : bf16 to vector<8x1xbf16>
    %21 = vector.extract_strided_slice %13 {offsets = [0, 0], sizes = [8, 31], strides = [1, 1]} : vector<8x32xbf16> to vector<8x31xbf16>
    %22 = tpu.concatenate %20, %21 in 1 : vector<8x1xbf16>, vector<8x31xbf16> -> vector<8x32xbf16>
    %c1 = arith.constant 1 : index
    %c0_14 = arith.constant 0 : index
    %c0_15 = arith.constant 0 : index
    %23 = vector.load %arg4[%c1, %c0_14, %c0_15] : memref<3x8x8xbf16, #tpu.memory_space<vmem>>, vector<1x8x8xbf16>
    %24 = vector.shape_cast %23 : vector<1x8x8xbf16> to vector<8x8xbf16>
    %cst_16 = arith.constant dense<0.000000e+00> : vector<8x32xf32>
    %25 = tpu.matmul %24, %22, %cst_16 {dimension_numbers = #tpu.dot_dimension_numbers<[1], [0], [0], [1], [0, 0, 1, 1], [], []>} : vector<8x8xbf16>, vector<8x32xbf16>, vector<8x32xf32> -> vector<8x32xf32>
    %26 = arith.addf %19, %25 : vector<8x32xf32>
    %c2 = arith.constant 2 : index
    %c0_17 = arith.constant 0 : index
    %c0_18 = arith.constant 0 : index
    %27 = vector.load %arg4[%c2, %c0_17, %c0_18] : memref<3x8x8xbf16, #tpu.memory_space<vmem>>, vector<1x8x8xbf16>
    %28 = vector.shape_cast %27 : vector<1x8x8xbf16> to vector<8x8xbf16>
    %cst_19 = arith.constant dense<0.000000e+00> : vector<8x32xf32>
    %29 = tpu.matmul %28, %13, %cst_19 {dimension_numbers = #tpu.dot_dimension_numbers<[1], [0], [0], [1], [0, 0, 1, 1], [], []>} : vector<8x8xbf16>, vector<8x32xbf16>, vector<8x32xf32> -> vector<8x32xf32>
    %30 = arith.addf %26, %29 : vector<8x32xf32>
    %c0_20 = arith.constant 0 : index
    %c0_21 = arith.constant 0 : index
    %31 = vector.load %arg5[%c0_20, %c0_21] : memref<8x1xf32, #tpu.memory_space<vmem>>, vector<8x1xf32>
    %32 = vector.broadcast %31 : vector<8x1xf32> to vector<8x32xf32>
    %33 = arith.addf %30, %32 : vector<8x32xf32>
    %cst_22 = arith.constant 0.000000e+00 : f32
    %34 = vector.broadcast %cst_22 : f32 to vector<8x32xf32>
    %35 = arith.cmpf oge, %33, %34 : vector<8x32xf32>
    %cst_23 = arith.constant 1.000000e-01 : f32
    %36 = vector.broadcast %cst_23 : f32 to vector<8x32xf32>
    %37 = arith.mulf %33, %36 : vector<8x32xf32>
    %38 = arith.select %35, %33, %37 : vector<8x32xi1>, vector<8x32xf32>
    %39 = arith.truncf %38 : vector<8x32xf32> to vector<8x32xbf16>
    %cst_24 = arith.constant 0.000000e+00 : bf16
    %40 = vector.broadcast %cst_24 : bf16 to vector<8x4xbf16>
    %41 = vector.extract_strided_slice %39 {offsets = [0, 0], sizes = [8, 28], strides = [1, 1]} : vector<8x32xbf16> to vector<8x28xbf16>
    %42 = tpu.concatenate %40, %41 in 1 : vector<8x4xbf16>, vector<8x28xbf16> -> vector<8x32xbf16>
    %c0_25 = arith.constant 0 : index
    %c0_26 = arith.constant 0 : index
    %c0_27 = arith.constant 0 : index
    %43 = vector.load %arg6[%c0_25, %c0_26, %c0_27] : memref<3x8x8xbf16, #tpu.memory_space<vmem>>, vector<1x8x8xbf16>
    %44 = vector.shape_cast %43 : vector<1x8x8xbf16> to vector<8x8xbf16>
    %cst_28 = arith.constant dense<0.000000e+00> : vector<8x32xf32>
    %45 = tpu.matmul %44, %42, %cst_28 {dimension_numbers = #tpu.dot_dimension_numbers<[1], [0], [0], [1], [0, 0, 1, 1], [], []>} : vector<8x8xbf16>, vector<8x32xbf16>, vector<8x32xf32> -> vector<8x32xf32>
    %cst_29 = arith.constant 0.000000e+00 : bf16
    %46 = vector.broadcast %cst_29 : bf16 to vector<8x2xbf16>
    %47 = vector.extract_strided_slice %39 {offsets = [0, 0], sizes = [8, 30], strides = [1, 1]} : vector<8x32xbf16> to vector<8x30xbf16>
    %48 = tpu.concatenate %46, %47 in 1 : vector<8x2xbf16>, vector<8x30xbf16> -> vector<8x32xbf16>
    %c1_30 = arith.constant 1 : index
    %c0_31 = arith.constant 0 : index
    %c0_32 = arith.constant 0 : index
    %49 = vector.load %arg6[%c1_30, %c0_31, %c0_32] : memref<3x8x8xbf16, #tpu.memory_space<vmem>>, vector<1x8x8xbf16>
    %50 = vector.shape_cast %49 : vector<1x8x8xbf16> to vector<8x8xbf16>
    %cst_33 = arith.constant dense<0.000000e+00> : vector<8x32xf32>
    %51 = tpu.matmul %50, %48, %cst_33 {dimension_numbers = #tpu.dot_dimension_numbers<[1], [0], [0], [1], [0, 0, 1, 1], [], []>} : vector<8x8xbf16>, vector<8x32xbf16>, vector<8x32xf32> -> vector<8x32xf32>
    %52 = arith.addf %45, %51 : vector<8x32xf32>
    %c2_34 = arith.constant 2 : index
    %c0_35 = arith.constant 0 : index
    %c0_36 = arith.constant 0 : index
    %53 = vector.load %arg6[%c2_34, %c0_35, %c0_36] : memref<3x8x8xbf16, #tpu.memory_space<vmem>>, vector<1x8x8xbf16>
    %54 = vector.shape_cast %53 : vector<1x8x8xbf16> to vector<8x8xbf16>
    %cst_37 = arith.constant dense<0.000000e+00> : vector<8x32xf32>
    %55 = tpu.matmul %54, %39, %cst_37 {dimension_numbers = #tpu.dot_dimension_numbers<[1], [0], [0], [1], [0, 0, 1, 1], [], []>} : vector<8x8xbf16>, vector<8x32xbf16>, vector<8x32xf32> -> vector<8x32xf32>
    %56 = arith.addf %52, %55 : vector<8x32xf32>
    %c0_38 = arith.constant 0 : index
    %c0_39 = arith.constant 0 : index
    %57 = vector.load %arg7[%c0_38, %c0_39] : memref<8x1xf32, #tpu.memory_space<vmem>>, vector<8x1xf32>
    %58 = vector.broadcast %57 : vector<8x1xf32> to vector<8x32xf32>
    %59 = arith.addf %56, %58 : vector<8x32xf32>
    %cst_40 = arith.constant 0.000000e+00 : f32
    %60 = vector.broadcast %cst_40 : f32 to vector<8x32xf32>
    %61 = arith.cmpf oge, %59, %60 : vector<8x32xf32>
    %cst_41 = arith.constant 1.000000e-01 : f32
    %62 = vector.broadcast %cst_41 : f32 to vector<8x32xf32>
    %63 = arith.mulf %59, %62 : vector<8x32xf32>
    %64 = arith.select %61, %59, %63 : vector<8x32xi1>, vector<8x32xf32>
    %65 = arith.truncf %64 : vector<8x32xf32> to vector<8x32xbf16>
    %cst_42 = arith.constant 0.000000e+00 : bf16
    %66 = vector.broadcast %cst_42 : bf16 to vector<8x8xbf16>
    %67 = vector.extract_strided_slice %65 {offsets = [0, 0], sizes = [8, 24], strides = [1, 1]} : vector<8x32xbf16> to vector<8x24xbf16>
    %68 = tpu.concatenate %66, %67 in 1 : vector<8x8xbf16>, vector<8x24xbf16> -> vector<8x32xbf16>
    %c0_43 = arith.constant 0 : index
    %c0_44 = arith.constant 0 : index
    %c0_45 = arith.constant 0 : index
    %69 = vector.load %arg8[%c0_43, %c0_44, %c0_45] : memref<3x16x8xbf16, #tpu.memory_space<vmem>>, vector<1x16x8xbf16>
    %70 = vector.shape_cast %69 : vector<1x16x8xbf16> to vector<16x8xbf16>
    %cst_46 = arith.constant dense<0.000000e+00> : vector<16x32xf32>
    %71 = tpu.matmul %70, %68, %cst_46 {dimension_numbers = #tpu.dot_dimension_numbers<[1], [0], [0], [1], [0, 0, 1, 1], [], []>} : vector<16x8xbf16>, vector<8x32xbf16>, vector<16x32xf32> -> vector<16x32xf32>
    %cst_47 = arith.constant 0.000000e+00 : bf16
    %72 = vector.broadcast %cst_47 : bf16 to vector<8x4xbf16>
    %73 = vector.extract_strided_slice %65 {offsets = [0, 0], sizes = [8, 28], strides = [1, 1]} : vector<8x32xbf16> to vector<8x28xbf16>
    %74 = tpu.concatenate %72, %73 in 1 : vector<8x4xbf16>, vector<8x28xbf16> -> vector<8x32xbf16>
    %c1_48 = arith.constant 1 : index
    %c0_49 = arith.constant 0 : index
    %c0_50 = arith.constant 0 : index
    %75 = vector.load %arg8[%c1_48, %c0_49, %c0_50] : memref<3x16x8xbf16, #tpu.memory_space<vmem>>, vector<1x16x8xbf16>
    %76 = vector.shape_cast %75 : vector<1x16x8xbf16> to vector<16x8xbf16>
    %cst_51 = arith.constant dense<0.000000e+00> : vector<16x32xf32>
    %77 = tpu.matmul %76, %74, %cst_51 {dimension_numbers = #tpu.dot_dimension_numbers<[1], [0], [0], [1], [0, 0, 1, 1], [], []>} : vector<16x8xbf16>, vector<8x32xbf16>, vector<16x32xf32> -> vector<16x32xf32>
    %78 = arith.addf %71, %77 : vector<16x32xf32>
    %c2_52 = arith.constant 2 : index
    %c0_53 = arith.constant 0 : index
    %c0_54 = arith.constant 0 : index
    %79 = vector.load %arg8[%c2_52, %c0_53, %c0_54] : memref<3x16x8xbf16, #tpu.memory_space<vmem>>, vector<1x16x8xbf16>
    %80 = vector.shape_cast %79 : vector<1x16x8xbf16> to vector<16x8xbf16>
    %cst_55 = arith.constant dense<0.000000e+00> : vector<16x32xf32>
    %81 = tpu.matmul %80, %65, %cst_55 {dimension_numbers = #tpu.dot_dimension_numbers<[1], [0], [0], [1], [0, 0, 1, 1], [], []>} : vector<16x8xbf16>, vector<8x32xbf16>, vector<16x32xf32> -> vector<16x32xf32>
    %82 = arith.addf %78, %81 : vector<16x32xf32>
    %c0_56 = arith.constant 0 : index
    %c0_57 = arith.constant 0 : index
    %83 = vector.load %arg9[%c0_56, %c0_57] : memref<16x1xf32, #tpu.memory_space<vmem>>, vector<16x1xf32>
    %84 = vector.broadcast %83 : vector<16x1xf32> to vector<16x32xf32>
    %85 = arith.addf %82, %84 : vector<16x32xf32>
    %86 = arith.addf %85, %7 : vector<16x32xf32>
    %c0_58 = arith.constant 0 : index
    %c0_59 = arith.constant 0 : index
    %c0_60 = arith.constant 0 : index
    %87 = vector.load %arg10[%c0_58, %c0_59, %c0_60] : memref<1x16x32xf32, #tpu.memory_space<vmem>>, vector<1x16x32xf32>
    %88 = vector.shape_cast %87 : vector<1x16x32xf32> to vector<16x32xf32>
    %89 = vector.shape_cast %86 : vector<16x32xf32> to vector<1x16x32xf32>
    tpu.vector_store %arg10[%c0_58, %c0_59, %c0_60], %89 {strides = array<i32>} : memref<1x16x32xf32, #tpu.memory_space<vmem>>, vector<1x16x32xf32>,
    return
  }
  func.func @transform_0(%arg0: i32) -> (i32, i32, i32) {
    %c0_i32 = arith.constant 0 : i32
    %c0_i32_0 = arith.constant 0 : i32
    %c0_i32_1 = arith.constant 0 : i32
    return %arg0, %c0_i32, %c0_i32_0 : i32, i32, i32
  }
  func.func @transform_1(%arg0: i32) -> (i32, i32) {
    %c0_i32 = arith.constant 0 : i32
    %c0_i32_0 = arith.constant 0 : i32
    %c0_i32_1 = arith.constant 0 : i32
    return %c0_i32, %c0_i32_0 : i32, i32
  }
  func.func @transform_2(%arg0: i32) -> (i32, i32) {
    %c0_i32 = arith.constant 0 : i32
    %c0_i32_0 = arith.constant 0 : i32
    %c0_i32_1 = arith.constant 0 : i32
    return %c0_i32, %c0_i32_0 : i32, i32
  }
  func.func @transform_3(%arg0: i32) -> (i32, i32, i32) {
    %c0_i32 = arith.constant 0 : i32
    %c0_i32_0 = arith.constant 0 : i32
    %c0_i32_1 = arith.constant 0 : i32
    %c0_i32_2 = arith.constant 0 : i32
    return %c0_i32, %c0_i32_0, %c0_i32_1 : i32, i32, i32
  }
  func.func @transform_4(%arg0: i32) -> (i32, i32) {
    %c0_i32 = arith.constant 0 : i32
    %c0_i32_0 = arith.constant 0 : i32
    %c0_i32_1 = arith.constant 0 : i32
    return %c0_i32, %c0_i32_0 : i32, i32
  }
  func.func @transform_5(%arg0: i32) -> (i32, i32, i32) {
    %c0_i32 = arith.constant 0 : i32
    %c0_i32_0 = arith.constant 0 : i32
    %c0_i32_1 = arith.constant 0 : i32
    %c0_i32_2 = arith.constant 0 : i32
    return %c0_i32, %c0_i32_0, %c0_i32_1 : i32, i32, i32
  }
  func.func @transform_6(%arg0: i32) -> (i32, i32) {
    %c0_i32 = arith.constant 0 : i32
    %c0_i32_0 = arith.constant 0 : i32
    %c0_i32_1 = arith.constant 0 : i32
    return %c0_i32, %c0_i32_0 : i32, i32
  }
  func.func @transform_7(%arg0: i32) -> (i32, i32, i32) {
    %c0_i32 = arith.constant 0 : i32
    %c0_i32_0 = arith.constant 0 : i32
    %c0_i32_1 = arith.constant 0 : i32
    %c0_i32_2 = arith.constant 0 : i32
    return %c0_i32, %c0_i32_0, %c0_i32_1 : i32, i32, i32
  }
  func.func @transform_8(%arg0: i32) -> (i32, i32) {
    %c0_i32 = arith.constant 0 : i32
    %c0_i32_0 = arith.constant 0 : i32
    %c0_i32_1 = arith.constant 0 : i32
    return %c0_i32, %c0_i32_0 : i32, i32
  }
  func.func @transform_9(%arg0: i32) -> (i32, i32, i32) {
    %c0_i32 = arith.constant 0 : i32
    %c0_i32_0 = arith.constant 0 : i32
    %c0_i32_1 = arith.constant 0 : i32
    return %arg0, %c0_i32, %c0_i32_0 : i32, i32, i32
  }
}

module attributes {stable_mosaic.version = 11 : i64} {
  func.func @kernel(%arg0: i32, %arg1: memref<1x16x16xf32, #tpu.memory_space<vmem>>, %arg2: memref<32x16xbf16, #tpu.memory_space<vmem>>, %arg3: memref<32x1xf32, #tpu.memory_space<vmem>>, %arg4: memref<3x16x16xbf16, #tpu.memory_space<vmem>>, %arg5: memref<16x1xf32, #tpu.memory_space<vmem>>, %arg6: memref<3x16x16xbf16, #tpu.memory_space<vmem>>, %arg7: memref<16x1xf32, #tpu.memory_space<vmem>>, %arg8: memref<3x32x16xbf16, #tpu.memory_space<vmem>>, %arg9: memref<32x1xf32, #tpu.memory_space<vmem>>, %arg10: memref<1x32x16xf32, #tpu.memory_space<vmem>>) attributes {dimension_semantics = [#tpu.dimension_semantics<parallel>], iteration_bounds = array<i64: 2>, scalar_prefetch = 0 : i64, scratch_operands = 0 : i64, tpu.core_type = #tpu.core_type<tc>, window_params = [{transform_indices = @transform_0, window_bounds = array<i64: 1, 16, 16>}, {pipeline_mode = #tpu.pipeline_mode<synchronous>, transform_indices = @transform_1, window_bounds = array<i64: 32, 16>}, {pipeline_mode = #tpu.pipeline_mode<synchronous>, transform_indices = @transform_2, window_bounds = array<i64: 32, 1>}, {pipeline_mode = #tpu.pipeline_mode<synchronous>, transform_indices = @transform_3, window_bounds = array<i64: 3, 16, 16>}, {pipeline_mode = #tpu.pipeline_mode<synchronous>, transform_indices = @transform_4, window_bounds = array<i64: 16, 1>}, {pipeline_mode = #tpu.pipeline_mode<synchronous>, transform_indices = @transform_5, window_bounds = array<i64: 3, 16, 16>}, {pipeline_mode = #tpu.pipeline_mode<synchronous>, transform_indices = @transform_6, window_bounds = array<i64: 16, 1>}, {pipeline_mode = #tpu.pipeline_mode<synchronous>, transform_indices = @transform_7, window_bounds = array<i64: 3, 32, 16>}, {pipeline_mode = #tpu.pipeline_mode<synchronous>, transform_indices = @transform_8, window_bounds = array<i64: 32, 1>}, {transform_indices = @transform_9, window_bounds = array<i64: 1, 32, 16>}]} {
    %c0 = arith.constant 0 : index
    %c0_0 = arith.constant 0 : index
    %c0_1 = arith.constant 0 : index
    %0 = vector.load %arg1[%c0, %c0_0, %c0_1] : memref<1x16x16xf32, #tpu.memory_space<vmem>>, vector<1x16x16xf32>
    %1 = vector.shape_cast %0 : vector<1x16x16xf32> to vector<16x16xf32>
    %c0_2 = arith.constant 0 : index
    %c0_3 = arith.constant 0 : index
    %2 = vector.load %arg2[%c0_2, %c0_3] : memref<32x16xbf16, #tpu.memory_space<vmem>>, vector<32x16xbf16>
    %3 = arith.truncf %1 : vector<16x16xf32> to vector<16x16xbf16>
    %cst = arith.constant dense<0.000000e+00> : vector<32x16xf32>
    %4 = tpu.matmul %2, %3, %cst {dimension_numbers = #tpu.dot_dimension_numbers<[1], [0], [0], [1], [0, 0, 1, 1], [], []>} : vector<32x16xbf16>, vector<16x16xbf16>, vector<32x16xf32> -> vector<32x16xf32>
    %c0_4 = arith.constant 0 : index
    %c0_5 = arith.constant 0 : index
    %5 = vector.load %arg3[%c0_4, %c0_5] : memref<32x1xf32, #tpu.memory_space<vmem>>, vector<32x1xf32>
    %6 = vector.broadcast %5 : vector<32x1xf32> to vector<32x16xf32>
    %7 = arith.addf %4, %6 : vector<32x16xf32>
    %cst_6 = arith.constant 0.000000e+00 : f32
    %8 = vector.broadcast %cst_6 : f32 to vector<16x16xf32>
    %9 = arith.cmpf oge, %1, %8 : vector<16x16xf32>
    %cst_7 = arith.constant 1.000000e-01 : f32
    %10 = vector.broadcast %cst_7 : f32 to vector<16x16xf32>
    %11 = arith.mulf %1, %10 : vector<16x16xf32>
    %12 = arith.select %9, %1, %11 : vector<16x16xi1>, vector<16x16xf32>
    %13 = arith.truncf %12 : vector<16x16xf32> to vector<16x16xbf16>
    %cst_8 = arith.constant 0.000000e+00 : bf16
    %14 = vector.broadcast %cst_8 : bf16 to vector<16x2xbf16>
    %15 = vector.extract_strided_slice %13 {offsets = [0, 0], sizes = [16, 14], strides = [1, 1]} : vector<16x16xbf16> to vector<16x14xbf16>
    %16 = tpu.concatenate %14, %15 in 1 : vector<16x2xbf16>, vector<16x14xbf16> -> vector<16x16xbf16>
    %c0_9 = arith.constant 0 : index
    %c0_10 = arith.constant 0 : index
    %c0_11 = arith.constant 0 : index
    %17 = vector.load %arg4[%c0_9, %c0_10, %c0_11] : memref<3x16x16xbf16, #tpu.memory_space<vmem>>, vector<1x16x16xbf16>
    %18 = vector.shape_cast %17 : vector<1x16x16xbf16> to vector<16x16xbf16>
    %cst_12 = arith.constant dense<0.000000e+00> : vector<16x16xf32>
    %19 = tpu.matmul %18, %16, %cst_12 {dimension_numbers = #tpu.dot_dimension_numbers<[1], [0], [0], [1], [0, 0, 1, 1], [], []>} : vector<16x16xbf16>, vector<16x16xbf16>, vector<16x16xf32> -> vector<16x16xf32>
    %cst_13 = arith.constant 0.000000e+00 : bf16
    %20 = vector.broadcast %cst_13 : bf16 to vector<16x1xbf16>
    %21 = vector.extract_strided_slice %13 {offsets = [0, 0], sizes = [16, 15], strides = [1, 1]} : vector<16x16xbf16> to vector<16x15xbf16>
    %22 = tpu.concatenate %20, %21 in 1 : vector<16x1xbf16>, vector<16x15xbf16> -> vector<16x16xbf16>
    %c1 = arith.constant 1 : index
    %c0_14 = arith.constant 0 : index
    %c0_15 = arith.constant 0 : index
    %23 = vector.load %arg4[%c1, %c0_14, %c0_15] : memref<3x16x16xbf16, #tpu.memory_space<vmem>>, vector<1x16x16xbf16>
    %24 = vector.shape_cast %23 : vector<1x16x16xbf16> to vector<16x16xbf16>
    %cst_16 = arith.constant dense<0.000000e+00> : vector<16x16xf32>
    %25 = tpu.matmul %24, %22, %cst_16 {dimension_numbers = #tpu.dot_dimension_numbers<[1], [0], [0], [1], [0, 0, 1, 1], [], []>} : vector<16x16xbf16>, vector<16x16xbf16>, vector<16x16xf32> -> vector<16x16xf32>
    %26 = arith.addf %19, %25 : vector<16x16xf32>
    %c2 = arith.constant 2 : index
    %c0_17 = arith.constant 0 : index
    %c0_18 = arith.constant 0 : index
    %27 = vector.load %arg4[%c2, %c0_17, %c0_18] : memref<3x16x16xbf16, #tpu.memory_space<vmem>>, vector<1x16x16xbf16>
    %28 = vector.shape_cast %27 : vector<1x16x16xbf16> to vector<16x16xbf16>
    %cst_19 = arith.constant dense<0.000000e+00> : vector<16x16xf32>
    %29 = tpu.matmul %28, %13, %cst_19 {dimension_numbers = #tpu.dot_dimension_numbers<[1], [0], [0], [1], [0, 0, 1, 1], [], []>} : vector<16x16xbf16>, vector<16x16xbf16>, vector<16x16xf32> -> vector<16x16xf32>
    %30 = arith.addf %26, %29 : vector<16x16xf32>
    %c0_20 = arith.constant 0 : index
    %c0_21 = arith.constant 0 : index
    %31 = vector.load %arg5[%c0_20, %c0_21] : memref<16x1xf32, #tpu.memory_space<vmem>>, vector<16x1xf32>
    %32 = vector.broadcast %31 : vector<16x1xf32> to vector<16x16xf32>
    %33 = arith.addf %30, %32 : vector<16x16xf32>
    %cst_22 = arith.constant 0.000000e+00 : f32
    %34 = vector.broadcast %cst_22 : f32 to vector<16x16xf32>
    %35 = arith.cmpf oge, %33, %34 : vector<16x16xf32>
    %cst_23 = arith.constant 1.000000e-01 : f32
    %36 = vector.broadcast %cst_23 : f32 to vector<16x16xf32>
    %37 = arith.mulf %33, %36 : vector<16x16xf32>
    %38 = arith.select %35, %33, %37 : vector<16x16xi1>, vector<16x16xf32>
    %39 = arith.truncf %38 : vector<16x16xf32> to vector<16x16xbf16>
    %cst_24 = arith.constant 0.000000e+00 : bf16
    %40 = vector.broadcast %cst_24 : bf16 to vector<16x4xbf16>
    %41 = vector.extract_strided_slice %39 {offsets = [0, 0], sizes = [16, 12], strides = [1, 1]} : vector<16x16xbf16> to vector<16x12xbf16>
    %42 = tpu.concatenate %40, %41 in 1 : vector<16x4xbf16>, vector<16x12xbf16> -> vector<16x16xbf16>
    %c0_25 = arith.constant 0 : index
    %c0_26 = arith.constant 0 : index
    %c0_27 = arith.constant 0 : index
    %43 = vector.load %arg6[%c0_25, %c0_26, %c0_27] : memref<3x16x16xbf16, #tpu.memory_space<vmem>>, vector<1x16x16xbf16>
    %44 = vector.shape_cast %43 : vector<1x16x16xbf16> to vector<16x16xbf16>
    %cst_28 = arith.constant dense<0.000000e+00> : vector<16x16xf32>
    %45 = tpu.matmul %44, %42, %cst_28 {dimension_numbers = #tpu.dot_dimension_numbers<[1], [0], [0], [1], [0, 0, 1, 1], [], []>} : vector<16x16xbf16>, vector<16x16xbf16>, vector<16x16xf32> -> vector<16x16xf32>
    %cst_29 = arith.constant 0.000000e+00 : bf16
    %46 = vector.broadcast %cst_29 : bf16 to vector<16x2xbf16>
    %47 = vector.extract_strided_slice %39 {offsets = [0, 0], sizes = [16, 14], strides = [1, 1]} : vector<16x16xbf16> to vector<16x14xbf16>
    %48 = tpu.concatenate %46, %47 in 1 : vector<16x2xbf16>, vector<16x14xbf16> -> vector<16x16xbf16>
    %c1_30 = arith.constant 1 : index
    %c0_31 = arith.constant 0 : index
    %c0_32 = arith.constant 0 : index
    %49 = vector.load %arg6[%c1_30, %c0_31, %c0_32] : memref<3x16x16xbf16, #tpu.memory_space<vmem>>, vector<1x16x16xbf16>
    %50 = vector.shape_cast %49 : vector<1x16x16xbf16> to vector<16x16xbf16>
    %cst_33 = arith.constant dense<0.000000e+00> : vector<16x16xf32>
    %51 = tpu.matmul %50, %48, %cst_33 {dimension_numbers = #tpu.dot_dimension_numbers<[1], [0], [0], [1], [0, 0, 1, 1], [], []>} : vector<16x16xbf16>, vector<16x16xbf16>, vector<16x16xf32> -> vector<16x16xf32>
    %52 = arith.addf %45, %51 : vector<16x16xf32>
    %c2_34 = arith.constant 2 : index
    %c0_35 = arith.constant 0 : index
    %c0_36 = arith.constant 0 : index
    %53 = vector.load %arg6[%c2_34, %c0_35, %c0_36] : memref<3x16x16xbf16, #tpu.memory_space<vmem>>, vector<1x16x16xbf16>
    %54 = vector.shape_cast %53 : vector<1x16x16xbf16> to vector<16x16xbf16>
    %cst_37 = arith.constant dense<0.000000e+00> : vector<16x16xf32>
    %55 = tpu.matmul %54, %39, %cst_37 {dimension_numbers = #tpu.dot_dimension_numbers<[1], [0], [0], [1], [0, 0, 1, 1], [], []>} : vector<16x16xbf16>, vector<16x16xbf16>, vector<16x16xf32> -> vector<16x16xf32>
    %56 = arith.addf %52, %55 : vector<16x16xf32>
    %c0_38 = arith.constant 0 : index
    %c0_39 = arith.constant 0 : index
    %57 = vector.load %arg7[%c0_38, %c0_39] : memref<16x1xf32, #tpu.memory_space<vmem>>, vector<16x1xf32>
    %58 = vector.broadcast %57 : vector<16x1xf32> to vector<16x16xf32>
    %59 = arith.addf %56, %58 : vector<16x16xf32>
    %cst_40 = arith.constant 0.000000e+00 : f32
    %60 = vector.broadcast %cst_40 : f32 to vector<16x16xf32>
    %61 = arith.cmpf oge, %59, %60 : vector<16x16xf32>
    %cst_41 = arith.constant 1.000000e-01 : f32
    %62 = vector.broadcast %cst_41 : f32 to vector<16x16xf32>
    %63 = arith.mulf %59, %62 : vector<16x16xf32>
    %64 = arith.select %61, %59, %63 : vector<16x16xi1>, vector<16x16xf32>
    %65 = arith.truncf %64 : vector<16x16xf32> to vector<16x16xbf16>
    %cst_42 = arith.constant 0.000000e+00 : bf16
    %66 = vector.broadcast %cst_42 : bf16 to vector<16x8xbf16>
    %67 = vector.extract_strided_slice %65 {offsets = [0, 0], sizes = [16, 8], strides = [1, 1]} : vector<16x16xbf16> to vector<16x8xbf16>
    %68 = tpu.concatenate %66, %67 in 1 : vector<16x8xbf16>, vector<16x8xbf16> -> vector<16x16xbf16>
    %c0_43 = arith.constant 0 : index
    %c0_44 = arith.constant 0 : index
    %c0_45 = arith.constant 0 : index
    %69 = vector.load %arg8[%c0_43, %c0_44, %c0_45] : memref<3x32x16xbf16, #tpu.memory_space<vmem>>, vector<1x32x16xbf16>
    %70 = vector.shape_cast %69 : vector<1x32x16xbf16> to vector<32x16xbf16>
    %cst_46 = arith.constant dense<0.000000e+00> : vector<32x16xf32>
    %71 = tpu.matmul %70, %68, %cst_46 {dimension_numbers = #tpu.dot_dimension_numbers<[1], [0], [0], [1], [0, 0, 1, 1], [], []>} : vector<32x16xbf16>, vector<16x16xbf16>, vector<32x16xf32> -> vector<32x16xf32>
    %cst_47 = arith.constant 0.000000e+00 : bf16
    %72 = vector.broadcast %cst_47 : bf16 to vector<16x4xbf16>
    %73 = vector.extract_strided_slice %65 {offsets = [0, 0], sizes = [16, 12], strides = [1, 1]} : vector<16x16xbf16> to vector<16x12xbf16>
    %74 = tpu.concatenate %72, %73 in 1 : vector<16x4xbf16>, vector<16x12xbf16> -> vector<16x16xbf16>
    %c1_48 = arith.constant 1 : index
    %c0_49 = arith.constant 0 : index
    %c0_50 = arith.constant 0 : index
    %75 = vector.load %arg8[%c1_48, %c0_49, %c0_50] : memref<3x32x16xbf16, #tpu.memory_space<vmem>>, vector<1x32x16xbf16>
    %76 = vector.shape_cast %75 : vector<1x32x16xbf16> to vector<32x16xbf16>
    %cst_51 = arith.constant dense<0.000000e+00> : vector<32x16xf32>
    %77 = tpu.matmul %76, %74, %cst_51 {dimension_numbers = #tpu.dot_dimension_numbers<[1], [0], [0], [1], [0, 0, 1, 1], [], []>} : vector<32x16xbf16>, vector<16x16xbf16>, vector<32x16xf32> -> vector<32x16xf32>
    %78 = arith.addf %71, %77 : vector<32x16xf32>
    %c2_52 = arith.constant 2 : index
    %c0_53 = arith.constant 0 : index
    %c0_54 = arith.constant 0 : index
    %79 = vector.load %arg8[%c2_52, %c0_53, %c0_54] : memref<3x32x16xbf16, #tpu.memory_space<vmem>>, vector<1x32x16xbf16>
    %80 = vector.shape_cast %79 : vector<1x32x16xbf16> to vector<32x16xbf16>
    %cst_55 = arith.constant dense<0.000000e+00> : vector<32x16xf32>
    %81 = tpu.matmul %80, %65, %cst_55 {dimension_numbers = #tpu.dot_dimension_numbers<[1], [0], [0], [1], [0, 0, 1, 1], [], []>} : vector<32x16xbf16>, vector<16x16xbf16>, vector<32x16xf32> -> vector<32x16xf32>
    %82 = arith.addf %78, %81 : vector<32x16xf32>
    %c0_56 = arith.constant 0 : index
    %c0_57 = arith.constant 0 : index
    %83 = vector.load %arg9[%c0_56, %c0_57] : memref<32x1xf32, #tpu.memory_space<vmem>>, vector<32x1xf32>
    %84 = vector.broadcast %83 : vector<32x1xf32> to vector<32x16xf32>
    %85 = arith.addf %82, %84 : vector<32x16xf32>
    %86 = arith.addf %85, %7 : vector<32x16xf32>
    %c0_58 = arith.constant 0 : index
    %c0_59 = arith.constant 0 : index
    %c0_60 = arith.constant 0 : index
    %87 = vector.load %arg10[%c0_58, %c0_59, %c0_60] : memref<1x32x16xf32, #tpu.memory_space<vmem>>, vector<1x32x16xf32>
    %88 = vector.shape_cast %87 : vector<1x32x16xf32> to vector<32x16xf32>
    %89 = vector.shape_cast %86 : vector<32x16xf32> to vector<1x32x16xf32>
    tpu.vector_store %arg10[%c0_58, %c0_59, %c0_60], %89 {strides = array<i32>} : memref<1x32x16xf32, #tpu.memory_space<vmem>>, vector<1x32x16xf32>,
    return
  }
  func.func @transform_0(%arg0: i32) -> (i32, i32, i32) {
    %c0_i32 = arith.constant 0 : i32
    %c0_i32_0 = arith.constant 0 : i32
    %c0_i32_1 = arith.constant 0 : i32
    return %arg0, %c0_i32, %c0_i32_0 : i32, i32, i32
  }
  func.func @transform_1(%arg0: i32) -> (i32, i32) {
    %c0_i32 = arith.constant 0 : i32
    %c0_i32_0 = arith.constant 0 : i32
    %c0_i32_1 = arith.constant 0 : i32
    return %c0_i32, %c0_i32_0 : i32, i32
  }
  func.func @transform_2(%arg0: i32) -> (i32, i32) {
    %c0_i32 = arith.constant 0 : i32
    %c0_i32_0 = arith.constant 0 : i32
    %c0_i32_1 = arith.constant 0 : i32
    return %c0_i32, %c0_i32_0 : i32, i32
  }
  func.func @transform_3(%arg0: i32) -> (i32, i32, i32) {
    %c0_i32 = arith.constant 0 : i32
    %c0_i32_0 = arith.constant 0 : i32
    %c0_i32_1 = arith.constant 0 : i32
    %c0_i32_2 = arith.constant 0 : i32
    return %c0_i32, %c0_i32_0, %c0_i32_1 : i32, i32, i32
  }
  func.func @transform_4(%arg0: i32) -> (i32, i32) {
    %c0_i32 = arith.constant 0 : i32
    %c0_i32_0 = arith.constant 0 : i32
    %c0_i32_1 = arith.constant 0 : i32
    return %c0_i32, %c0_i32_0 : i32, i32
  }
  func.func @transform_5(%arg0: i32) -> (i32, i32, i32) {
    %c0_i32 = arith.constant 0 : i32
    %c0_i32_0 = arith.constant 0 : i32
    %c0_i32_1 = arith.constant 0 : i32
    %c0_i32_2 = arith.constant 0 : i32
    return %c0_i32, %c0_i32_0, %c0_i32_1 : i32, i32, i32
  }
  func.func @transform_6(%arg0: i32) -> (i32, i32) {
    %c0_i32 = arith.constant 0 : i32
    %c0_i32_0 = arith.constant 0 : i32
    %c0_i32_1 = arith.constant 0 : i32
    return %c0_i32, %c0_i32_0 : i32, i32
  }
  func.func @transform_7(%arg0: i32) -> (i32, i32, i32) {
    %c0_i32 = arith.constant 0 : i32
    %c0_i32_0 = arith.constant 0 : i32
    %c0_i32_1 = arith.constant 0 : i32
    %c0_i32_2 = arith.constant 0 : i32
    return %c0_i32, %c0_i32_0, %c0_i32_1 : i32, i32, i32
  }
  func.func @transform_8(%arg0: i32) -> (i32, i32) {
    %c0_i32 = arith.constant 0 : i32
    %c0_i32_0 = arith.constant 0 : i32
    %c0_i32_1 = arith.constant 0 : i32
    return %c0_i32, %c0_i32_0 : i32, i32
  }
  func.func @transform_9(%arg0: i32) -> (i32, i32, i32) {
    %c0_i32 = arith.constant 0 : i32
    %c0_i32_0 = arith.constant 0 : i32
    %c0_i32_1 = arith.constant 0 : i32
    return %arg0, %c0_i32, %c0_i32_0 : i32, i32, i32
  }
}

module attributes {stable_mosaic.version = 11 : i64} {
  func.func @kernel(%arg0: i32, %arg1: memref<1x32x8xf32, #tpu.memory_space<vmem>>, %arg2: memref<32x32xbf16, #tpu.memory_space<vmem>>, %arg3: memref<32x1xf32, #tpu.memory_space<vmem>>, %arg4: memref<3x32x32xbf16, #tpu.memory_space<vmem>>, %arg5: memref<32x1xf32, #tpu.memory_space<vmem>>, %arg6: memref<3x32x32xbf16, #tpu.memory_space<vmem>>, %arg7: memref<32x1xf32, #tpu.memory_space<vmem>>, %arg8: memref<3x32x32xbf16, #tpu.memory_space<vmem>>, %arg9: memref<32x1xf32, #tpu.memory_space<vmem>>, %arg10: memref<1x32x8xf32, #tpu.memory_space<vmem>>) attributes {dimension_semantics = [#tpu.dimension_semantics<parallel>], iteration_bounds = array<i64: 2>, scalar_prefetch = 0 : i64, scratch_operands = 0 : i64, tpu.core_type = #tpu.core_type<tc>, window_params = [{transform_indices = @transform_0, window_bounds = array<i64: 1, 32, 8>}, {pipeline_mode = #tpu.pipeline_mode<synchronous>, transform_indices = @transform_1, window_bounds = array<i64: 32, 32>}, {pipeline_mode = #tpu.pipeline_mode<synchronous>, transform_indices = @transform_2, window_bounds = array<i64: 32, 1>}, {pipeline_mode = #tpu.pipeline_mode<synchronous>, transform_indices = @transform_3, window_bounds = array<i64: 3, 32, 32>}, {pipeline_mode = #tpu.pipeline_mode<synchronous>, transform_indices = @transform_4, window_bounds = array<i64: 32, 1>}, {pipeline_mode = #tpu.pipeline_mode<synchronous>, transform_indices = @transform_5, window_bounds = array<i64: 3, 32, 32>}, {pipeline_mode = #tpu.pipeline_mode<synchronous>, transform_indices = @transform_6, window_bounds = array<i64: 32, 1>}, {pipeline_mode = #tpu.pipeline_mode<synchronous>, transform_indices = @transform_7, window_bounds = array<i64: 3, 32, 32>}, {pipeline_mode = #tpu.pipeline_mode<synchronous>, transform_indices = @transform_8, window_bounds = array<i64: 32, 1>}, {transform_indices = @transform_9, window_bounds = array<i64: 1, 32, 8>}]} {
    %c0 = arith.constant 0 : index
    %c0_0 = arith.constant 0 : index
    %c0_1 = arith.constant 0 : index
    %0 = vector.load %arg1[%c0, %c0_0, %c0_1] : memref<1x32x8xf32, #tpu.memory_space<vmem>>, vector<1x32x8xf32>
    %1 = vector.shape_cast %0 : vector<1x32x8xf32> to vector<32x8xf32>
    %c0_2 = arith.constant 0 : index
    %c0_3 = arith.constant 0 : index
    %2 = vector.load %arg2[%c0_2, %c0_3] : memref<32x32xbf16, #tpu.memory_space<vmem>>, vector<32x32xbf16>
    %3 = arith.truncf %1 : vector<32x8xf32> to vector<32x8xbf16>
    %cst = arith.constant dense<0.000000e+00> : vector<32x8xf32>
    %4 = tpu.matmul %2, %3, %cst {dimension_numbers = #tpu.dot_dimension_numbers<[1], [0], [0], [1], [0, 0, 1, 1], [], []>} : vector<32x32xbf16>, vector<32x8xbf16>, vector<32x8xf32> -> vector<32x8xf32>
    %c0_4 = arith.constant 0 : index
    %c0_5 = arith.constant 0 : index
    %5 = vector.load %arg3[%c0_4, %c0_5] : memref<32x1xf32, #tpu.memory_space<vmem>>, vector<32x1xf32>
    %6 = vector.broadcast %5 : vector<32x1xf32> to vector<32x8xf32>
    %7 = arith.addf %4, %6 : vector<32x8xf32>
    %cst_6 = arith.constant 0.000000e+00 : f32
    %8 = vector.broadcast %cst_6 : f32 to vector<32x8xf32>
    %9 = arith.cmpf oge, %1, %8 : vector<32x8xf32>
    %cst_7 = arith.constant 1.000000e-01 : f32
    %10 = vector.broadcast %cst_7 : f32 to vector<32x8xf32>
    %11 = arith.mulf %1, %10 : vector<32x8xf32>
    %12 = arith.select %9, %1, %11 : vector<32x8xi1>, vector<32x8xf32>
    %13 = arith.truncf %12 : vector<32x8xf32> to vector<32x8xbf16>
    %cst_8 = arith.constant 0.000000e+00 : bf16
    %14 = vector.broadcast %cst_8 : bf16 to vector<32x2xbf16>
    %15 = vector.extract_strided_slice %13 {offsets = [0, 0], sizes = [32, 6], strides = [1, 1]} : vector<32x8xbf16> to vector<32x6xbf16>
    %16 = tpu.concatenate %14, %15 in 1 : vector<32x2xbf16>, vector<32x6xbf16> -> vector<32x8xbf16>
    %c0_9 = arith.constant 0 : index
    %c0_10 = arith.constant 0 : index
    %c0_11 = arith.constant 0 : index
    %17 = vector.load %arg4[%c0_9, %c0_10, %c0_11] : memref<3x32x32xbf16, #tpu.memory_space<vmem>>, vector<1x32x32xbf16>
    %18 = vector.shape_cast %17 : vector<1x32x32xbf16> to vector<32x32xbf16>
    %cst_12 = arith.constant dense<0.000000e+00> : vector<32x8xf32>
    %19 = tpu.matmul %18, %16, %cst_12 {dimension_numbers = #tpu.dot_dimension_numbers<[1], [0], [0], [1], [0, 0, 1, 1], [], []>} : vector<32x32xbf16>, vector<32x8xbf16>, vector<32x8xf32> -> vector<32x8xf32>
    %cst_13 = arith.constant 0.000000e+00 : bf16
    %20 = vector.broadcast %cst_13 : bf16 to vector<32x1xbf16>
    %21 = vector.extract_strided_slice %13 {offsets = [0, 0], sizes = [32, 7], strides = [1, 1]} : vector<32x8xbf16> to vector<32x7xbf16>
    %22 = tpu.concatenate %20, %21 in 1 : vector<32x1xbf16>, vector<32x7xbf16> -> vector<32x8xbf16>
    %c1 = arith.constant 1 : index
    %c0_14 = arith.constant 0 : index
    %c0_15 = arith.constant 0 : index
    %23 = vector.load %arg4[%c1, %c0_14, %c0_15] : memref<3x32x32xbf16, #tpu.memory_space<vmem>>, vector<1x32x32xbf16>
    %24 = vector.shape_cast %23 : vector<1x32x32xbf16> to vector<32x32xbf16>
    %cst_16 = arith.constant dense<0.000000e+00> : vector<32x8xf32>
    %25 = tpu.matmul %24, %22, %cst_16 {dimension_numbers = #tpu.dot_dimension_numbers<[1], [0], [0], [1], [0, 0, 1, 1], [], []>} : vector<32x32xbf16>, vector<32x8xbf16>, vector<32x8xf32> -> vector<32x8xf32>
    %26 = arith.addf %19, %25 : vector<32x8xf32>
    %c2 = arith.constant 2 : index
    %c0_17 = arith.constant 0 : index
    %c0_18 = arith.constant 0 : index
    %27 = vector.load %arg4[%c2, %c0_17, %c0_18] : memref<3x32x32xbf16, #tpu.memory_space<vmem>>, vector<1x32x32xbf16>
    %28 = vector.shape_cast %27 : vector<1x32x32xbf16> to vector<32x32xbf16>
    %cst_19 = arith.constant dense<0.000000e+00> : vector<32x8xf32>
    %29 = tpu.matmul %28, %13, %cst_19 {dimension_numbers = #tpu.dot_dimension_numbers<[1], [0], [0], [1], [0, 0, 1, 1], [], []>} : vector<32x32xbf16>, vector<32x8xbf16>, vector<32x8xf32> -> vector<32x8xf32>
    %30 = arith.addf %26, %29 : vector<32x8xf32>
    %c0_20 = arith.constant 0 : index
    %c0_21 = arith.constant 0 : index
    %31 = vector.load %arg5[%c0_20, %c0_21] : memref<32x1xf32, #tpu.memory_space<vmem>>, vector<32x1xf32>
    %32 = vector.broadcast %31 : vector<32x1xf32> to vector<32x8xf32>
    %33 = arith.addf %30, %32 : vector<32x8xf32>
    %cst_22 = arith.constant 0.000000e+00 : f32
    %34 = vector.broadcast %cst_22 : f32 to vector<32x8xf32>
    %35 = arith.cmpf oge, %33, %34 : vector<32x8xf32>
    %cst_23 = arith.constant 1.000000e-01 : f32
    %36 = vector.broadcast %cst_23 : f32 to vector<32x8xf32>
    %37 = arith.mulf %33, %36 : vector<32x8xf32>
    %38 = arith.select %35, %33, %37 : vector<32x8xi1>, vector<32x8xf32>
    %39 = arith.truncf %38 : vector<32x8xf32> to vector<32x8xbf16>
    %cst_24 = arith.constant 0.000000e+00 : bf16
    %40 = vector.broadcast %cst_24 : bf16 to vector<32x4xbf16>
    %41 = vector.extract_strided_slice %39 {offsets = [0, 0], sizes = [32, 4], strides = [1, 1]} : vector<32x8xbf16> to vector<32x4xbf16>
    %42 = tpu.concatenate %40, %41 in 1 : vector<32x4xbf16>, vector<32x4xbf16> -> vector<32x8xbf16>
    %c0_25 = arith.constant 0 : index
    %c0_26 = arith.constant 0 : index
    %c0_27 = arith.constant 0 : index
    %43 = vector.load %arg6[%c0_25, %c0_26, %c0_27] : memref<3x32x32xbf16, #tpu.memory_space<vmem>>, vector<1x32x32xbf16>
    %44 = vector.shape_cast %43 : vector<1x32x32xbf16> to vector<32x32xbf16>
    %cst_28 = arith.constant dense<0.000000e+00> : vector<32x8xf32>
    %45 = tpu.matmul %44, %42, %cst_28 {dimension_numbers = #tpu.dot_dimension_numbers<[1], [0], [0], [1], [0, 0, 1, 1], [], []>} : vector<32x32xbf16>, vector<32x8xbf16>, vector<32x8xf32> -> vector<32x8xf32>
    %cst_29 = arith.constant 0.000000e+00 : bf16
    %46 = vector.broadcast %cst_29 : bf16 to vector<32x2xbf16>
    %47 = vector.extract_strided_slice %39 {offsets = [0, 0], sizes = [32, 6], strides = [1, 1]} : vector<32x8xbf16> to vector<32x6xbf16>
    %48 = tpu.concatenate %46, %47 in 1 : vector<32x2xbf16>, vector<32x6xbf16> -> vector<32x8xbf16>
    %c1_30 = arith.constant 1 : index
    %c0_31 = arith.constant 0 : index
    %c0_32 = arith.constant 0 : index
    %49 = vector.load %arg6[%c1_30, %c0_31, %c0_32] : memref<3x32x32xbf16, #tpu.memory_space<vmem>>, vector<1x32x32xbf16>
    %50 = vector.shape_cast %49 : vector<1x32x32xbf16> to vector<32x32xbf16>
    %cst_33 = arith.constant dense<0.000000e+00> : vector<32x8xf32>
    %51 = tpu.matmul %50, %48, %cst_33 {dimension_numbers = #tpu.dot_dimension_numbers<[1], [0], [0], [1], [0, 0, 1, 1], [], []>} : vector<32x32xbf16>, vector<32x8xbf16>, vector<32x8xf32> -> vector<32x8xf32>
    %52 = arith.addf %45, %51 : vector<32x8xf32>
    %c2_34 = arith.constant 2 : index
    %c0_35 = arith.constant 0 : index
    %c0_36 = arith.constant 0 : index
    %53 = vector.load %arg6[%c2_34, %c0_35, %c0_36] : memref<3x32x32xbf16, #tpu.memory_space<vmem>>, vector<1x32x32xbf16>
    %54 = vector.shape_cast %53 : vector<1x32x32xbf16> to vector<32x32xbf16>
    %cst_37 = arith.constant dense<0.000000e+00> : vector<32x8xf32>
    %55 = tpu.matmul %54, %39, %cst_37 {dimension_numbers = #tpu.dot_dimension_numbers<[1], [0], [0], [1], [0, 0, 1, 1], [], []>} : vector<32x32xbf16>, vector<32x8xbf16>, vector<32x8xf32> -> vector<32x8xf32>
    %56 = arith.addf %52, %55 : vector<32x8xf32>
    %c0_38 = arith.constant 0 : index
    %c0_39 = arith.constant 0 : index
    %57 = vector.load %arg7[%c0_38, %c0_39] : memref<32x1xf32, #tpu.memory_space<vmem>>, vector<32x1xf32>
    %58 = vector.broadcast %57 : vector<32x1xf32> to vector<32x8xf32>
    %59 = arith.addf %56, %58 : vector<32x8xf32>
    %cst_40 = arith.constant 0.000000e+00 : f32
    %60 = vector.broadcast %cst_40 : f32 to vector<32x8xf32>
    %61 = arith.cmpf oge, %59, %60 : vector<32x8xf32>
    %cst_41 = arith.constant 1.000000e-01 : f32
    %62 = vector.broadcast %cst_41 : f32 to vector<32x8xf32>
    %63 = arith.mulf %59, %62 : vector<32x8xf32>
    %64 = arith.select %61, %59, %63 : vector<32x8xi1>, vector<32x8xf32>
    %65 = arith.truncf %64 : vector<32x8xf32> to vector<32x8xbf16>
    %cst_42 = arith.constant 0.000000e+00 : bf16
    %66 = vector.broadcast %cst_42 : bf16 to vector<32x4xbf16>
    %67 = vector.extract_strided_slice %65 {offsets = [0, 0], sizes = [32, 4], strides = [1, 1]} : vector<32x8xbf16> to vector<32x4xbf16>
    %68 = tpu.concatenate %66, %67 in 1 : vector<32x4xbf16>, vector<32x4xbf16> -> vector<32x8xbf16>
    %c1_43 = arith.constant 1 : index
    %c0_44 = arith.constant 0 : index
    %c0_45 = arith.constant 0 : index
    %69 = vector.load %arg8[%c1_43, %c0_44, %c0_45] : memref<3x32x32xbf16, #tpu.memory_space<vmem>>, vector<1x32x32xbf16>
    %70 = vector.shape_cast %69 : vector<1x32x32xbf16> to vector<32x32xbf16>
    %cst_46 = arith.constant dense<0.000000e+00> : vector<32x8xf32>
    %71 = tpu.matmul %70, %68, %cst_46 {dimension_numbers = #tpu.dot_dimension_numbers<[1], [0], [0], [1], [0, 0, 1, 1], [], []>} : vector<32x32xbf16>, vector<32x8xbf16>, vector<32x8xf32> -> vector<32x8xf32>
    %c2_47 = arith.constant 2 : index
    %c0_48 = arith.constant 0 : index
    %c0_49 = arith.constant 0 : index
    %72 = vector.load %arg8[%c2_47, %c0_48, %c0_49] : memref<3x32x32xbf16, #tpu.memory_space<vmem>>, vector<1x32x32xbf16>
    %73 = vector.shape_cast %72 : vector<1x32x32xbf16> to vector<32x32xbf16>
    %cst_50 = arith.constant dense<0.000000e+00> : vector<32x8xf32>
    %74 = tpu.matmul %73, %65, %cst_50 {dimension_numbers = #tpu.dot_dimension_numbers<[1], [0], [0], [1], [0, 0, 1, 1], [], []>} : vector<32x32xbf16>, vector<32x8xbf16>, vector<32x8xf32> -> vector<32x8xf32>
    %75 = arith.addf %71, %74 : vector<32x8xf32>
    %c0_51 = arith.constant 0 : index
    %c0_52 = arith.constant 0 : index
    %76 = vector.load %arg9[%c0_51, %c0_52] : memref<32x1xf32, #tpu.memory_space<vmem>>, vector<32x1xf32>
    %77 = vector.broadcast %76 : vector<32x1xf32> to vector<32x8xf32>
    %78 = arith.addf %75, %77 : vector<32x8xf32>
    %79 = arith.addf %78, %7 : vector<32x8xf32>
    %c0_53 = arith.constant 0 : index
    %c0_54 = arith.constant 0 : index
    %c0_55 = arith.constant 0 : index
    %80 = vector.load %arg10[%c0_53, %c0_54, %c0_55] : memref<1x32x8xf32, #tpu.memory_space<vmem>>, vector<1x32x8xf32>
    %81 = vector.shape_cast %80 : vector<1x32x8xf32> to vector<32x8xf32>
    %82 = vector.shape_cast %79 : vector<32x8xf32> to vector<1x32x8xf32>
    tpu.vector_store %arg10[%c0_53, %c0_54, %c0_55], %82 {strides = array<i32>} : memref<1x32x8xf32, #tpu.memory_space<vmem>>, vector<1x32x8xf32>,
    return
  }
  func.func @transform_0(%arg0: i32) -> (i32, i32, i32) {
    %c0_i32 = arith.constant 0 : i32
    %c0_i32_0 = arith.constant 0 : i32
    %c0_i32_1 = arith.constant 0 : i32
    return %arg0, %c0_i32, %c0_i32_0 : i32, i32, i32
  }
  func.func @transform_1(%arg0: i32) -> (i32, i32) {
    %c0_i32 = arith.constant 0 : i32
    %c0_i32_0 = arith.constant 0 : i32
    %c0_i32_1 = arith.constant 0 : i32
    return %c0_i32, %c0_i32_0 : i32, i32
  }
  func.func @transform_2(%arg0: i32) -> (i32, i32) {
    %c0_i32 = arith.constant 0 : i32
    %c0_i32_0 = arith.constant 0 : i32
    %c0_i32_1 = arith.constant 0 : i32
    return %c0_i32, %c0_i32_0 : i32, i32
  }
  func.func @transform_3(%arg0: i32) -> (i32, i32, i32) {
    %c0_i32 = arith.constant 0 : i32
    %c0_i32_0 = arith.constant 0 : i32
    %c0_i32_1 = arith.constant 0 : i32
    %c0_i32_2 = arith.constant 0 : i32
    return %c0_i32, %c0_i32_0, %c0_i32_1 : i32, i32, i32
  }
  func.func @transform_4(%arg0: i32) -> (i32, i32) {
    %c0_i32 = arith.constant 0 : i32
    %c0_i32_0 = arith.constant 0 : i32
    %c0_i32_1 = arith.constant 0 : i32
    return %c0_i32, %c0_i32_0 : i32, i32
  }
  func.func @transform_5(%arg0: i32) -> (i32, i32, i32) {
    %c0_i32 = arith.constant 0 : i32
    %c0_i32_0 = arith.constant 0 : i32
    %c0_i32_1 = arith.constant 0 : i32
    %c0_i32_2 = arith.constant 0 : i32
    return %c0_i32, %c0_i32_0, %c0_i32_1 : i32, i32, i32
  }
  func.func @transform_6(%arg0: i32) -> (i32, i32) {
    %c0_i32 = arith.constant 0 : i32
    %c0_i32_0 = arith.constant 0 : i32
    %c0_i32_1 = arith.constant 0 : i32
    return %c0_i32, %c0_i32_0 : i32, i32
  }
  func.func @transform_7(%arg0: i32) -> (i32, i32, i32) {
    %c0_i32 = arith.constant 0 : i32
    %c0_i32_0 = arith.constant 0 : i32
    %c0_i32_1 = arith.constant 0 : i32
    %c0_i32_2 = arith.constant 0 : i32
    return %c0_i32, %c0_i32_0, %c0_i32_1 : i32, i32, i32
  }
  func.func @transform_8(%arg0: i32) -> (i32, i32) {
    %c0_i32 = arith.constant 0 : i32
    %c0_i32_0 = arith.constant 0 : i32
    %c0_i32_1 = arith.constant 0 : i32
    return %c0_i32, %c0_i32_0 : i32, i32
  }
  func.func @transform_9(%arg0: i32) -> (i32, i32, i32) {
    %c0_i32 = arith.constant 0 : i32
    %c0_i32_0 = arith.constant 0 : i32
    %c0_i32_1 = arith.constant 0 : i32
    return %arg0, %c0_i32, %c0_i32_0 : i32, i32, i32
  }
}

module attributes {stable_mosaic.version = 11 : i64} {
  func.func @kernel(%arg0: i32, %arg1: memref<48x16xf32, #tpu.memory_space<vmem>>, %arg2: memref<1x16xf32, #tpu.memory_space<vmem>>, %arg3: memref<1x16xf32, #tpu.memory_space<vmem>>, %arg4: memref<32x16xf32, #tpu.memory_space<vmem>>, %arg5: memref<32x1xf32, #tpu.memory_space<vmem>>, %arg6: memref<32x1xf32, #tpu.memory_space<vmem>>, %arg7: memref<32x32xbf16, #tpu.memory_space<vmem>>, %arg8: memref<32x1xf32, #tpu.memory_space<vmem>>, %arg9: memref<32x1xf32, #tpu.memory_space<vmem>>, %arg10: memref<32x1xf32, #tpu.memory_space<vmem>>, %arg11: memref<32x48xbf16, #tpu.memory_space<vmem>>, %arg12: memref<32x1xf32, #tpu.memory_space<vmem>>, %arg13: memref<64x32xbf16, #tpu.memory_space<vmem>>, %arg14: memref<64x1xf32, #tpu.memory_space<vmem>>, %arg15: memref<64x32xbf16, #tpu.memory_space<vmem>>, %arg16: memref<64x1xf32, #tpu.memory_space<vmem>>, %arg17: memref<32x16xf32, #tpu.memory_space<vmem>>) attributes {dimension_semantics = [#tpu.dimension_semantics<parallel>], iteration_bounds = array<i64: 1>, scalar_prefetch = 0 : i64, scratch_operands = 0 : i64, tpu.core_type = #tpu.core_type<tc>, window_params = [{pipeline_mode = #tpu.pipeline_mode<synchronous>, transform_indices = @transform_0, window_bounds = array<i64: 48, 16>}, {pipeline_mode = #tpu.pipeline_mode<synchronous>, transform_indices = @transform_1, window_bounds = array<i64: 1, 16>}, {pipeline_mode = #tpu.pipeline_mode<synchronous>, transform_indices = @transform_2, window_bounds = array<i64: 1, 16>}, {pipeline_mode = #tpu.pipeline_mode<synchronous>, transform_indices = @transform_3, window_bounds = array<i64: 32, 16>}, {pipeline_mode = #tpu.pipeline_mode<synchronous>, transform_indices = @transform_4, window_bounds = array<i64: 32, 1>}, {pipeline_mode = #tpu.pipeline_mode<synchronous>, transform_indices = @transform_5, window_bounds = array<i64: 32, 1>}, {pipeline_mode = #tpu.pipeline_mode<synchronous>, transform_indices = @transform_6, window_bounds = array<i64: 32, 32>}, {pipeline_mode = #tpu.pipeline_mode<synchronous>, transform_indices = @transform_7, window_bounds = array<i64: 32, 1>}, {pipeline_mode = #tpu.pipeline_mode<synchronous>, transform_indices = @transform_8, window_bounds = array<i64: 32, 1>}, {pipeline_mode = #tpu.pipeline_mode<synchronous>, transform_indices = @transform_9, window_bounds = array<i64: 32, 1>}, {pipeline_mode = #tpu.pipeline_mode<synchronous>, transform_indices = @transform_10, window_bounds = array<i64: 32, 48>}, {pipeline_mode = #tpu.pipeline_mode<synchronous>, transform_indices = @transform_11, window_bounds = array<i64: 32, 1>}, {pipeline_mode = #tpu.pipeline_mode<synchronous>, transform_indices = @transform_12, window_bounds = array<i64: 64, 32>}, {pipeline_mode = #tpu.pipeline_mode<synchronous>, transform_indices = @transform_13, window_bounds = array<i64: 64, 1>}, {pipeline_mode = #tpu.pipeline_mode<synchronous>, transform_indices = @transform_14, window_bounds = array<i64: 64, 32>}, {pipeline_mode = #tpu.pipeline_mode<synchronous>, transform_indices = @transform_15, window_bounds = array<i64: 64, 1>}, {pipeline_mode = #tpu.pipeline_mode<synchronous>, transform_indices = @transform_16, window_bounds = array<i64: 32, 16>}]} {
    %c0 = arith.constant 0 : index
    %c0_0 = arith.constant 0 : index
    %0 = vector.load %arg2[%c0, %c0_0] : memref<1x16xf32, #tpu.memory_space<vmem>>, vector<1x16xf32>
    %c0_1 = arith.constant 0 : index
    %c0_2 = arith.constant 0 : index
    %1 = vector.load %arg3[%c0_1, %c0_2] : memref<1x16xf32, #tpu.memory_space<vmem>>, vector<1x16xf32>
    %c0_3 = arith.constant 0 : index
    %c0_4 = arith.constant 0 : index
    %2 = vector.load %arg5[%c0_3, %c0_4] : memref<32x1xf32, #tpu.memory_space<vmem>>, vector<32x1xf32>
    %3 = vector.broadcast %2 : vector<32x1xf32> to vector<32x16xf32>
    %4 = vector.broadcast %0 : vector<1x16xf32> to vector<32x16xf32>
    %5 = arith.mulf %3, %4 : vector<32x16xf32>
    %c0_5 = arith.constant 0 : index
    %c0_6 = arith.constant 0 : index
    %6 = vector.load %arg6[%c0_5, %c0_6] : memref<32x1xf32, #tpu.memory_space<vmem>>, vector<32x1xf32>
    %7 = vector.broadcast %6 : vector<32x1xf32> to vector<32x16xf32>
    %8 = arith.addf %5, %7 : vector<32x16xf32>
    %9 = math.sin %8 : vector<32x16xf32>
    %c0_7 = arith.constant 0 : index
    %c0_8 = arith.constant 0 : index
    %10 = vector.load %arg7[%c0_7, %c0_8] : memref<32x32xbf16, #tpu.memory_space<vmem>>, vector<32x32xbf16>
    %11 = arith.truncf %9 : vector<32x16xf32> to vector<32x16xbf16>
    %cst = arith.constant dense<0.000000e+00> : vector<32x16xf32>
    %12 = tpu.matmul %10, %11, %cst {dimension_numbers = #tpu.dot_dimension_numbers<[1], [0], [0], [1], [0, 0, 1, 1], [], []>} : vector<32x32xbf16>, vector<32x16xbf16>, vector<32x16xf32> -> vector<32x16xf32>
    %c0_9 = arith.constant 0 : index
    %c0_10 = arith.constant 0 : index
    %13 = vector.load %arg8[%c0_9, %c0_10] : memref<32x1xf32, #tpu.memory_space<vmem>>, vector<32x1xf32>
    %14 = vector.broadcast %13 : vector<32x1xf32> to vector<32x16xf32>
    %15 = arith.addf %12, %14 : vector<32x16xf32>
    %c0_11 = arith.constant 0 : index
    %c0_12 = arith.constant 0 : index
    %16 = vector.load %arg9[%c0_11, %c0_12] : memref<32x1xf32, #tpu.memory_space<vmem>>, vector<32x1xf32>
    %17 = vector.broadcast %16 : vector<32x1xf32> to vector<32x16xf32>
    %18 = vector.broadcast %1 : vector<1x16xf32> to vector<32x16xf32>
    %19 = arith.mulf %17, %18 : vector<32x16xf32>
    %c0_13 = arith.constant 0 : index
    %c0_14 = arith.constant 0 : index
    %20 = vector.load %arg10[%c0_13, %c0_14] : memref<32x1xf32, #tpu.memory_space<vmem>>, vector<32x1xf32>
    %21 = vector.broadcast %20 : vector<32x1xf32> to vector<32x16xf32>
    %22 = arith.addf %19, %21 : vector<32x16xf32>
    %23 = arith.addf %15, %22 : vector<32x16xf32>
    %c0_15 = arith.constant 0 : index
    %c0_16 = arith.constant 0 : index
    %24 = vector.load %arg1[%c0_15, %c0_16] : memref<48x16xf32, #tpu.memory_space<vmem>>, vector<48x16xf32>
    %c0_17 = arith.constant 0 : index
    %c0_18 = arith.constant 0 : index
    %25 = vector.load %arg11[%c0_17, %c0_18] : memref<32x48xbf16, #tpu.memory_space<vmem>>, vector<32x48xbf16>
    %26 = arith.truncf %24 : vector<48x16xf32> to vector<48x16xbf16>
    %cst_19 = arith.constant dense<0.000000e+00> : vector<32x16xf32>
    %27 = tpu.matmul %25, %26, %cst_19 {dimension_numbers = #tpu.dot_dimension_numbers<[1], [0], [0], [1], [0, 0, 1, 1], [], []>} : vector<32x48xbf16>, vector<48x16xbf16>, vector<32x16xf32> -> vector<32x16xf32>
    %c0_20 = arith.constant 0 : index
    %c0_21 = arith.constant 0 : index
    %28 = vector.load %arg12[%c0_20, %c0_21] : memref<32x1xf32, #tpu.memory_space<vmem>>, vector<32x1xf32>
    %29 = vector.broadcast %28 : vector<32x1xf32> to vector<32x16xf32>
    %30 = arith.addf %27, %29 : vector<32x16xf32>
    %c0_22 = arith.constant 0 : index
    %c0_23 = arith.constant 0 : index
    %31 = vector.load %arg13[%c0_22, %c0_23] : memref<64x32xbf16, #tpu.memory_space<vmem>>, vector<64x32xbf16>
    %32 = arith.truncf %23 : vector<32x16xf32> to vector<32x16xbf16>
    %cst_24 = arith.constant dense<0.000000e+00> : vector<64x16xf32>
    %33 = tpu.matmul %31, %32, %cst_24 {dimension_numbers = #tpu.dot_dimension_numbers<[1], [0], [0], [1], [0, 0, 1, 1], [], []>} : vector<64x32xbf16>, vector<32x16xbf16>, vector<64x16xf32> -> vector<64x16xf32>
    %c0_25 = arith.constant 0 : index
    %c0_26 = arith.constant 0 : index
    %34 = vector.load %arg14[%c0_25, %c0_26] : memref<64x1xf32, #tpu.memory_space<vmem>>, vector<64x1xf32>
    %35 = vector.broadcast %34 : vector<64x1xf32> to vector<64x16xf32>
    %36 = arith.addf %33, %35 : vector<64x16xf32>
    %37 = vector.extract_strided_slice %36 {offsets = [0, 0], sizes = [32, 16], strides = [1, 1]} : vector<64x16xf32> to vector<32x16xf32>
    %38 = arith.mulf %30, %37 : vector<32x16xf32>
    %39 = vector.extract_strided_slice %36 {offsets = [32, 0], sizes = [32, 16], strides = [1, 1]} : vector<64x16xf32> to vector<32x16xf32>
    %40 = arith.addf %38, %39 : vector<32x16xf32>
    %c0_27 = arith.constant 0 : index
    %c0_28 = arith.constant 0 : index
    %41 = vector.load %arg4[%c0_27, %c0_28] : memref<32x16xf32, #tpu.memory_space<vmem>>, vector<32x16xf32>
    %c0_29 = arith.constant 0 : index
    %c0_30 = arith.constant 0 : index
    %42 = vector.load %arg15[%c0_29, %c0_30] : memref<64x32xbf16, #tpu.memory_space<vmem>>, vector<64x32xbf16>
    %43 = arith.truncf %41 : vector<32x16xf32> to vector<32x16xbf16>
    %cst_31 = arith.constant dense<0.000000e+00> : vector<64x16xf32>
    %44 = tpu.matmul %42, %43, %cst_31 {dimension_numbers = #tpu.dot_dimension_numbers<[1], [0], [0], [1], [0, 0, 1, 1], [], []>} : vector<64x32xbf16>, vector<32x16xbf16>, vector<64x16xf32> -> vector<64x16xf32>
    %c0_32 = arith.constant 0 : index
    %c0_33 = arith.constant 0 : index
    %45 = vector.load %arg16[%c0_32, %c0_33] : memref<64x1xf32, #tpu.memory_space<vmem>>, vector<64x1xf32>
    %46 = vector.broadcast %45 : vector<64x1xf32> to vector<64x16xf32>
    %47 = arith.addf %44, %46 : vector<64x16xf32>
    %48 = vector.extract_strided_slice %47 {offsets = [0, 0], sizes = [32, 16], strides = [1, 1]} : vector<64x16xf32> to vector<32x16xf32>
    %49 = arith.mulf %40, %48 : vector<32x16xf32>
    %50 = vector.extract_strided_slice %47 {offsets = [32, 0], sizes = [32, 16], strides = [1, 1]} : vector<64x16xf32> to vector<32x16xf32>
    %51 = arith.addf %49, %50 : vector<32x16xf32>
    %c0_34 = arith.constant 0 : index
    %c0_35 = arith.constant 0 : index
    %52 = vector.load %arg17[%c0_34, %c0_35] : memref<32x16xf32, #tpu.memory_space<vmem>>, vector<32x16xf32>
    tpu.vector_store %arg17[%c0_34, %c0_35], %51 {strides = array<i32>} : memref<32x16xf32, #tpu.memory_space<vmem>>, vector<32x16xf32>,
    return
  }
  func.func @transform_0(%arg0: i32) -> (i32, i32) {
    %c0_i32 = arith.constant 0 : i32
    %c0_i32_0 = arith.constant 0 : i32
    %c0_i32_1 = arith.constant 0 : i32
    return %c0_i32, %c0_i32_0 : i32, i32
  }
  func.func @transform_1(%arg0: i32) -> (i32, i32) {
    %c0_i32 = arith.constant 0 : i32
    %c0_i32_0 = arith.constant 0 : i32
    %c0_i32_1 = arith.constant 0 : i32
    return %c0_i32, %c0_i32_0 : i32, i32
  }
  func.func @transform_2(%arg0: i32) -> (i32, i32) {
    %c0_i32 = arith.constant 0 : i32
    %c0_i32_0 = arith.constant 0 : i32
    %c0_i32_1 = arith.constant 0 : i32
    return %c0_i32, %c0_i32_0 : i32, i32
  }
  func.func @transform_3(%arg0: i32) -> (i32, i32) {
    %c0_i32 = arith.constant 0 : i32
    %c0_i32_0 = arith.constant 0 : i32
    %c0_i32_1 = arith.constant 0 : i32
    return %c0_i32, %c0_i32_0 : i32, i32
  }
  func.func @transform_4(%arg0: i32) -> (i32, i32) {
    %c0_i32 = arith.constant 0 : i32
    %c0_i32_0 = arith.constant 0 : i32
    %c0_i32_1 = arith.constant 0 : i32
    return %c0_i32, %c0_i32_0 : i32, i32
  }
  func.func @transform_5(%arg0: i32) -> (i32, i32) {
    %c0_i32 = arith.constant 0 : i32
    %c0_i32_0 = arith.constant 0 : i32
    %c0_i32_1 = arith.constant 0 : i32
    return %c0_i32, %c0_i32_0 : i32, i32
  }
  func.func @transform_6(%arg0: i32) -> (i32, i32) {
    %c0_i32 = arith.constant 0 : i32
    %c0_i32_0 = arith.constant 0 : i32
    %c0_i32_1 = arith.constant 0 : i32
    return %c0_i32, %c0_i32_0 : i32, i32
  }
  func.func @transform_7(%arg0: i32) -> (i32, i32) {
    %c0_i32 = arith.constant 0 : i32
    %c0_i32_0 = arith.constant 0 : i32
    %c0_i32_1 = arith.constant 0 : i32
    return %c0_i32, %c0_i32_0 : i32, i32
  }
  func.func @transform_8(%arg0: i32) -> (i32, i32) {
    %c0_i32 = arith.constant 0 : i32
    %c0_i32_0 = arith.constant 0 : i32
    %c0_i32_1 = arith.constant 0 : i32
    return %c0_i32, %c0_i32_0 : i32, i32
  }
  func.func @transform_9(%arg0: i32) -> (i32, i32) {
    %c0_i32 = arith.constant 0 : i32
    %c0_i32_0 = arith.constant 0 : i32
    %c0_i32_1 = arith.constant 0 : i32
    return %c0_i32, %c0_i32_0 : i32, i32
  }
  func.func @transform_10(%arg0: i32) -> (i32, i32) {
    %c0_i32 = arith.constant 0 : i32
    %c0_i32_0 = arith.constant 0 : i32
    %c0_i32_1 = arith.constant 0 : i32
    return %c0_i32, %c0_i32_0 : i32, i32
  }
  func.func @transform_11(%arg0: i32) -> (i32, i32) {
    %c0_i32 = arith.constant 0 : i32
    %c0_i32_0 = arith.constant 0 : i32
    %c0_i32_1 = arith.constant 0 : i32
    return %c0_i32, %c0_i32_0 : i32, i32
  }
  func.func @transform_12(%arg0: i32) -> (i32, i32) {
    %c0_i32 = arith.constant 0 : i32
    %c0_i32_0 = arith.constant 0 : i32
    %c0_i32_1 = arith.constant 0 : i32
    return %c0_i32, %c0_i32_0 : i32, i32
  }
  func.func @transform_13(%arg0: i32) -> (i32, i32) {
    %c0_i32 = arith.constant 0 : i32
    %c0_i32_0 = arith.constant 0 : i32
    %c0_i32_1 = arith.constant 0 : i32
    return %c0_i32, %c0_i32_0 : i32, i32
  }
  func.func @transform_14(%arg0: i32) -> (i32, i32) {
    %c0_i32 = arith.constant 0 : i32
    %c0_i32_0 = arith.constant 0 : i32
    %c0_i32_1 = arith.constant 0 : i32
    return %c0_i32, %c0_i32_0 : i32, i32
  }
  func.func @transform_15(%arg0: i32) -> (i32, i32) {
    %c0_i32 = arith.constant 0 : i32
    %c0_i32_0 = arith.constant 0 : i32
    %c0_i32_1 = arith.constant 0 : i32
    return %c0_i32, %c0_i32_0 : i32, i32
  }
  func.func @transform_16(%arg0: i32) -> (i32, i32) {
    %c0_i32 = arith.constant 0 : i32
    %c0_i32_0 = arith.constant 0 : i32
    %c0_i32_1 = arith.constant 0 : i32
    return %c0_i32, %c0_i32_0 : i32, i32
  }
}

module attributes {stable_mosaic.version = 11 : i64} {
  func.func @kernel(%arg0: i32, %arg1: memref<1x32x16xf32, #tpu.memory_space<vmem>>, %arg2: memref<1x32x16xf32, #tpu.memory_space<vmem>>, %arg3: memref<3x32x32xbf16, #tpu.memory_space<vmem>>, %arg4: memref<32x1xf32, #tpu.memory_space<vmem>>, %arg5: memref<3x32x32xbf16, #tpu.memory_space<vmem>>, %arg6: memref<32x1xf32, #tpu.memory_space<vmem>>, %arg7: memref<3x32x32xbf16, #tpu.memory_space<vmem>>, %arg8: memref<32x1xf32, #tpu.memory_space<vmem>>, %arg9: memref<3x32x32xbf16, #tpu.memory_space<vmem>>, %arg10: memref<32x1xf32, #tpu.memory_space<vmem>>, %arg11: memref<3x16x32xbf16, #tpu.memory_space<vmem>>, %arg12: memref<16x1xf32, #tpu.memory_space<vmem>>, %arg13: memref<32x32xbf16, #tpu.memory_space<vmem>>, %arg14: memref<32x1xf32, #tpu.memory_space<vmem>>, %arg15: memref<1x16x16xf32, #tpu.memory_space<vmem>>) attributes {dimension_semantics = [#tpu.dimension_semantics<parallel>], iteration_bounds = array<i64: 2>, scalar_prefetch = 0 : i64, scratch_operands = 0 : i64, tpu.core_type = #tpu.core_type<tc>, window_params = [{transform_indices = @transform_0, window_bounds = array<i64: 1, 32, 16>}, {transform_indices = @transform_1, window_bounds = array<i64: 1, 32, 16>}, {pipeline_mode = #tpu.pipeline_mode<synchronous>, transform_indices = @transform_2, window_bounds = array<i64: 3, 32, 32>}, {pipeline_mode = #tpu.pipeline_mode<synchronous>, transform_indices = @transform_3, window_bounds = array<i64: 32, 1>}, {pipeline_mode = #tpu.pipeline_mode<synchronous>, transform_indices = @transform_4, window_bounds = array<i64: 3, 32, 32>}, {pipeline_mode = #tpu.pipeline_mode<synchronous>, transform_indices = @transform_5, window_bounds = array<i64: 32, 1>}, {pipeline_mode = #tpu.pipeline_mode<synchronous>, transform_indices = @transform_6, window_bounds = array<i64: 3, 32, 32>}, {pipeline_mode = #tpu.pipeline_mode<synchronous>, transform_indices = @transform_7, window_bounds = array<i64: 32, 1>}, {pipeline_mode = #tpu.pipeline_mode<synchronous>, transform_indices = @transform_8, window_bounds = array<i64: 3, 32, 32>}, {pipeline_mode = #tpu.pipeline_mode<synchronous>, transform_indices = @transform_9, window_bounds = array<i64: 32, 1>}, {pipeline_mode = #tpu.pipeline_mode<synchronous>, transform_indices = @transform_10, window_bounds = array<i64: 3, 16, 32>}, {pipeline_mode = #tpu.pipeline_mode<synchronous>, transform_indices = @transform_11, window_bounds = array<i64: 16, 1>}, {pipeline_mode = #tpu.pipeline_mode<synchronous>, transform_indices = @transform_12, window_bounds = array<i64: 32, 32>}, {pipeline_mode = #tpu.pipeline_mode<synchronous>, transform_indices = @transform_13, window_bounds = array<i64: 32, 1>}, {transform_indices = @transform_14, window_bounds = array<i64: 1, 16, 16>}]} {
    %c0 = arith.constant 0 : index
    %c0_0 = arith.constant 0 : index
    %c0_1 = arith.constant 0 : index
    %0 = vector.load %arg1[%c0, %c0_0, %c0_1] : memref<1x32x16xf32, #tpu.memory_space<vmem>>, vector<1x32x16xf32>
    %1 = vector.shape_cast %0 : vector<1x32x16xf32> to vector<32x16xf32>
    %cst = arith.constant 0.000000e+00 : f32
    %2 = vector.broadcast %cst : f32 to vector<32x16xf32>
    %3 = arith.cmpf oge, %1, %2 : vector<32x16xf32>
    %cst_2 = arith.constant 1.000000e-01 : f32
    %4 = vector.broadcast %cst_2 : f32 to vector<32x16xf32>
    %5 = arith.mulf %1, %4 : vector<32x16xf32>
    %6 = arith.select %3, %1, %5 : vector<32x16xi1>, vector<32x16xf32>
    %7 = arith.truncf %6 : vector<32x16xf32> to vector<32x16xbf16>
    %cst_3 = arith.constant 0.000000e+00 : bf16
    %8 = vector.broadcast %cst_3 : bf16 to vector<32x2xbf16>
    %9 = vector.extract_strided_slice %7 {offsets = [0, 0], sizes = [32, 14], strides = [1, 1]} : vector<32x16xbf16> to vector<32x14xbf16>
    %10 = tpu.concatenate %8, %9 in 1 : vector<32x2xbf16>, vector<32x14xbf16> -> vector<32x16xbf16>
    %c0_4 = arith.constant 0 : index
    %c0_5 = arith.constant 0 : index
    %c0_6 = arith.constant 0 : index
    %11 = vector.load %arg3[%c0_4, %c0_5, %c0_6] : memref<3x32x32xbf16, #tpu.memory_space<vmem>>, vector<1x32x32xbf16>
    %12 = vector.shape_cast %11 : vector<1x32x32xbf16> to vector<32x32xbf16>
    %cst_7 = arith.constant dense<0.000000e+00> : vector<32x16xf32>
    %13 = tpu.matmul %12, %10, %cst_7 {dimension_numbers = #tpu.dot_dimension_numbers<[1], [0], [0], [1], [0, 0, 1, 1], [], []>} : vector<32x32xbf16>, vector<32x16xbf16>, vector<32x16xf32> -> vector<32x16xf32>
    %cst_8 = arith.constant 0.000000e+00 : bf16
    %14 = vector.broadcast %cst_8 : bf16 to vector<32x1xbf16>
    %15 = vector.extract_strided_slice %7 {offsets = [0, 0], sizes = [32, 15], strides = [1, 1]} : vector<32x16xbf16> to vector<32x15xbf16>
    %16 = tpu.concatenate %14, %15 in 1 : vector<32x1xbf16>, vector<32x15xbf16> -> vector<32x16xbf16>
    %c1 = arith.constant 1 : index
    %c0_9 = arith.constant 0 : index
    %c0_10 = arith.constant 0 : index
    %17 = vector.load %arg3[%c1, %c0_9, %c0_10] : memref<3x32x32xbf16, #tpu.memory_space<vmem>>, vector<1x32x32xbf16>
    %18 = vector.shape_cast %17 : vector<1x32x32xbf16> to vector<32x32xbf16>
    %cst_11 = arith.constant dense<0.000000e+00> : vector<32x16xf32>
    %19 = tpu.matmul %18, %16, %cst_11 {dimension_numbers = #tpu.dot_dimension_numbers<[1], [0], [0], [1], [0, 0, 1, 1], [], []>} : vector<32x32xbf16>, vector<32x16xbf16>, vector<32x16xf32> -> vector<32x16xf32>
    %20 = arith.addf %13, %19 : vector<32x16xf32>
    %c2 = arith.constant 2 : index
    %c0_12 = arith.constant 0 : index
    %c0_13 = arith.constant 0 : index
    %21 = vector.load %arg3[%c2, %c0_12, %c0_13] : memref<3x32x32xbf16, #tpu.memory_space<vmem>>, vector<1x32x32xbf16>
    %22 = vector.shape_cast %21 : vector<1x32x32xbf16> to vector<32x32xbf16>
    %cst_14 = arith.constant dense<0.000000e+00> : vector<32x16xf32>
    %23 = tpu.matmul %22, %7, %cst_14 {dimension_numbers = #tpu.dot_dimension_numbers<[1], [0], [0], [1], [0, 0, 1, 1], [], []>} : vector<32x32xbf16>, vector<32x16xbf16>, vector<32x16xf32> -> vector<32x16xf32>
    %24 = arith.addf %20, %23 : vector<32x16xf32>
    %c0_15 = arith.constant 0 : index
    %c0_16 = arith.constant 0 : index
    %25 = vector.load %arg4[%c0_15, %c0_16] : memref<32x1xf32, #tpu.memory_space<vmem>>, vector<32x1xf32>
    %26 = vector.broadcast %25 : vector<32x1xf32> to vector<32x16xf32>
    %27 = arith.addf %24, %26 : vector<32x16xf32>
    %cst_17 = arith.constant 0.000000e+00 : f32
    %28 = vector.broadcast %cst_17 : f32 to vector<32x16xf32>
    %29 = arith.cmpf oge, %27, %28 : vector<32x16xf32>
    %cst_18 = arith.constant 1.000000e-01 : f32
    %30 = vector.broadcast %cst_18 : f32 to vector<32x16xf32>
    %31 = arith.mulf %27, %30 : vector<32x16xf32>
    %32 = arith.select %29, %27, %31 : vector<32x16xi1>, vector<32x16xf32>
    %33 = arith.truncf %32 : vector<32x16xf32> to vector<32x16xbf16>
    %cst_19 = arith.constant 0.000000e+00 : bf16
    %34 = vector.broadcast %cst_19 : bf16 to vector<32x6xbf16>
    %35 = vector.extract_strided_slice %33 {offsets = [0, 0], sizes = [32, 10], strides = [1, 1]} : vector<32x16xbf16> to vector<32x10xbf16>
    %36 = tpu.concatenate %34, %35 in 1 : vector<32x6xbf16>, vector<32x10xbf16> -> vector<32x16xbf16>
    %c0_20 = arith.constant 0 : index
    %c0_21 = arith.constant 0 : index
    %c0_22 = arith.constant 0 : index
    %37 = vector.load %arg5[%c0_20, %c0_21, %c0_22] : memref<3x32x32xbf16, #tpu.memory_space<vmem>>, vector<1x32x32xbf16>
    %38 = vector.shape_cast %37 : vector<1x32x32xbf16> to vector<32x32xbf16>
    %cst_23 = arith.constant dense<0.000000e+00> : vector<32x16xf32>
    %39 = tpu.matmul %38, %36, %cst_23 {dimension_numbers = #tpu.dot_dimension_numbers<[1], [0], [0], [1], [0, 0, 1, 1], [], []>} : vector<32x32xbf16>, vector<32x16xbf16>, vector<32x16xf32> -> vector<32x16xf32>
    %cst_24 = arith.constant 0.000000e+00 : bf16
    %40 = vector.broadcast %cst_24 : bf16 to vector<32x3xbf16>
    %41 = vector.extract_strided_slice %33 {offsets = [0, 0], sizes = [32, 13], strides = [1, 1]} : vector<32x16xbf16> to vector<32x13xbf16>
    %42 = tpu.concatenate %40, %41 in 1 : vector<32x3xbf16>, vector<32x13xbf16> -> vector<32x16xbf16>
    %c1_25 = arith.constant 1 : index
    %c0_26 = arith.constant 0 : index
    %c0_27 = arith.constant 0 : index
    %43 = vector.load %arg5[%c1_25, %c0_26, %c0_27] : memref<3x32x32xbf16, #tpu.memory_space<vmem>>, vector<1x32x32xbf16>
    %44 = vector.shape_cast %43 : vector<1x32x32xbf16> to vector<32x32xbf16>
    %cst_28 = arith.constant dense<0.000000e+00> : vector<32x16xf32>
    %45 = tpu.matmul %44, %42, %cst_28 {dimension_numbers = #tpu.dot_dimension_numbers<[1], [0], [0], [1], [0, 0, 1, 1], [], []>} : vector<32x32xbf16>, vector<32x16xbf16>, vector<32x16xf32> -> vector<32x16xf32>
    %46 = arith.addf %39, %45 : vector<32x16xf32>
    %c2_29 = arith.constant 2 : index
    %c0_30 = arith.constant 0 : index
    %c0_31 = arith.constant 0 : index
    %47 = vector.load %arg5[%c2_29, %c0_30, %c0_31] : memref<3x32x32xbf16, #tpu.memory_space<vmem>>, vector<1x32x32xbf16>
    %48 = vector.shape_cast %47 : vector<1x32x32xbf16> to vector<32x32xbf16>
    %cst_32 = arith.constant dense<0.000000e+00> : vector<32x16xf32>
    %49 = tpu.matmul %48, %33, %cst_32 {dimension_numbers = #tpu.dot_dimension_numbers<[1], [0], [0], [1], [0, 0, 1, 1], [], []>} : vector<32x32xbf16>, vector<32x16xbf16>, vector<32x16xf32> -> vector<32x16xf32>
    %50 = arith.addf %46, %49 : vector<32x16xf32>
    %c0_33 = arith.constant 0 : index
    %c0_34 = arith.constant 0 : index
    %51 = vector.load %arg6[%c0_33, %c0_34] : memref<32x1xf32, #tpu.memory_space<vmem>>, vector<32x1xf32>
    %52 = vector.broadcast %51 : vector<32x1xf32> to vector<32x16xf32>
    %53 = arith.addf %50, %52 : vector<32x16xf32>
    %54 = arith.addf %53, %1 : vector<32x16xf32>
    %cst_35 = arith.constant 0.000000e+00 : f32
    %55 = vector.broadcast %cst_35 : f32 to vector<32x16xf32>
    %56 = arith.cmpf oge, %54, %55 : vector<32x16xf32>
    %cst_36 = arith.constant 1.000000e-01 : f32
    %57 = vector.broadcast %cst_36 : f32 to vector<32x16xf32>
    %58 = arith.mulf %54, %57 : vector<32x16xf32>
    %59 = arith.select %56, %54, %58 : vector<32x16xi1>, vector<32x16xf32>
    %60 = arith.truncf %59 : vector<32x16xf32> to vector<32x16xbf16>
    %cst_37 = arith.constant 0.000000e+00 : bf16
    %61 = vector.broadcast %cst_37 : bf16 to vector<32x9xbf16>
    %62 = vector.extract_strided_slice %60 {offsets = [0, 0], sizes = [32, 7], strides = [1, 1]} : vector<32x16xbf16> to vector<32x7xbf16>
    %63 = tpu.concatenate %61, %62 in 1 : vector<32x9xbf16>, vector<32x7xbf16> -> vector<32x16xbf16>
    %c1_38 = arith.constant 1 : index
    %c0_39 = arith.constant 0 : index
    %c0_40 = arith.constant 0 : index
    %64 = vector.load %arg7[%c1_38, %c0_39, %c0_40] : memref<3x32x32xbf16, #tpu.memory_space<vmem>>, vector<1x32x32xbf16>
    %65 = vector.shape_cast %64 : vector<1x32x32xbf16> to vector<32x32xbf16>
    %cst_41 = arith.constant dense<0.000000e+00> : vector<32x16xf32>
    %66 = tpu.matmul %65, %63, %cst_41 {dimension_numbers = #tpu.dot_dimension_numbers<[1], [0], [0], [1], [0, 0, 1, 1], [], []>} : vector<32x32xbf16>, vector<32x16xbf16>, vector<32x16xf32> -> vector<32x16xf32>
    %c2_42 = arith.constant 2 : index
    %c0_43 = arith.constant 0 : index
    %c0_44 = arith.constant 0 : index
    %67 = vector.load %arg7[%c2_42, %c0_43, %c0_44] : memref<3x32x32xbf16, #tpu.memory_space<vmem>>, vector<1x32x32xbf16>
    %68 = vector.shape_cast %67 : vector<1x32x32xbf16> to vector<32x32xbf16>
    %cst_45 = arith.constant dense<0.000000e+00> : vector<32x16xf32>
    %69 = tpu.matmul %68, %60, %cst_45 {dimension_numbers = #tpu.dot_dimension_numbers<[1], [0], [0], [1], [0, 0, 1, 1], [], []>} : vector<32x32xbf16>, vector<32x16xbf16>, vector<32x16xf32> -> vector<32x16xf32>
    %70 = arith.addf %66, %69 : vector<32x16xf32>
    %c0_46 = arith.constant 0 : index
    %c0_47 = arith.constant 0 : index
    %71 = vector.load %arg8[%c0_46, %c0_47] : memref<32x1xf32, #tpu.memory_space<vmem>>, vector<32x1xf32>
    %72 = vector.broadcast %71 : vector<32x1xf32> to vector<32x16xf32>
    %73 = arith.addf %70, %72 : vector<32x16xf32>
    %cst_48 = arith.constant 0.000000e+00 : f32
    %74 = vector.broadcast %cst_48 : f32 to vector<32x16xf32>
    %75 = arith.cmpf oge, %73, %74 : vector<32x16xf32>
    %cst_49 = arith.constant 1.000000e-01 : f32
    %76 = vector.broadcast %cst_49 : f32 to vector<32x16xf32>
    %77 = arith.mulf %73, %76 : vector<32x16xf32>
    %78 = arith.select %75, %73, %77 : vector<32x16xi1>, vector<32x16xf32>
    %79 = arith.truncf %78 : vector<32x16xf32> to vector<32x16xbf16>
    %c2_50 = arith.constant 2 : index
    %c0_51 = arith.constant 0 : index
    %c0_52 = arith.constant 0 : index
    %80 = vector.load %arg9[%c2_50, %c0_51, %c0_52] : memref<3x32x32xbf16, #tpu.memory_space<vmem>>, vector<1x32x32xbf16>
    %81 = vector.shape_cast %80 : vector<1x32x32xbf16> to vector<32x32xbf16>
    %cst_53 = arith.constant dense<0.000000e+00> : vector<32x16xf32>
    %82 = tpu.matmul %81, %79, %cst_53 {dimension_numbers = #tpu.dot_dimension_numbers<[1], [0], [0], [1], [0, 0, 1, 1], [], []>} : vector<32x32xbf16>, vector<32x16xbf16>, vector<32x16xf32> -> vector<32x16xf32>
    %c0_54 = arith.constant 0 : index
    %c0_55 = arith.constant 0 : index
    %83 = vector.load %arg10[%c0_54, %c0_55] : memref<32x1xf32, #tpu.memory_space<vmem>>, vector<32x1xf32>
    %84 = vector.broadcast %83 : vector<32x1xf32> to vector<32x16xf32>
    %85 = arith.addf %82, %84 : vector<32x16xf32>
    %86 = arith.addf %85, %54 : vector<32x16xf32>
    %87 = arith.truncf %86 : vector<32x16xf32> to vector<32x16xbf16>
    %cst_56 = arith.constant 0.000000e+00 : bf16
    %88 = vector.broadcast %cst_56 : bf16 to vector<32x2xbf16>
    %89 = vector.extract_strided_slice %87 {offsets = [0, 0], sizes = [32, 14], strides = [1, 1]} : vector<32x16xbf16> to vector<32x14xbf16>
    %90 = tpu.concatenate %88, %89 in 1 : vector<32x2xbf16>, vector<32x14xbf16> -> vector<32x16xbf16>
    %c0_57 = arith.constant 0 : index
    %c0_58 = arith.constant 0 : index
    %c0_59 = arith.constant 0 : index
    %91 = vector.load %arg11[%c0_57, %c0_58, %c0_59] : memref<3x16x32xbf16, #tpu.memory_space<vmem>>, vector<1x16x32xbf16>
    %92 = vector.shape_cast %91 : vector<1x16x32xbf16> to vector<16x32xbf16>
    %cst_60 = arith.constant dense<0.000000e+00> : vector<16x16xf32>
    %93 = tpu.matmul %92, %90, %cst_60 {dimension_numbers = #tpu.dot_dimension_numbers<[1], [0], [0], [1], [0, 0, 1, 1], [], []>} : vector<16x32xbf16>, vector<32x16xbf16>, vector<16x16xf32> -> vector<16x16xf32>
    %cst_61 = arith.constant 0.000000e+00 : bf16
    %94 = vector.broadcast %cst_61 : bf16 to vector<32x1xbf16>
    %95 = vector.extract_strided_slice %87 {offsets = [0, 0], sizes = [32, 15], strides = [1, 1]} : vector<32x16xbf16> to vector<32x15xbf16>
    %96 = tpu.concatenate %94, %95 in 1 : vector<32x1xbf16>, vector<32x15xbf16> -> vector<32x16xbf16>
    %c1_62 = arith.constant 1 : index
    %c0_63 = arith.constant 0 : index
    %c0_64 = arith.constant 0 : index
    %97 = vector.load %arg11[%c1_62, %c0_63, %c0_64] : memref<3x16x32xbf16, #tpu.memory_space<vmem>>, vector<1x16x32xbf16>
    %98 = vector.shape_cast %97 : vector<1x16x32xbf16> to vector<16x32xbf16>
    %cst_65 = arith.constant dense<0.000000e+00> : vector<16x16xf32>
    %99 = tpu.matmul %98, %96, %cst_65 {dimension_numbers = #tpu.dot_dimension_numbers<[1], [0], [0], [1], [0, 0, 1, 1], [], []>} : vector<16x32xbf16>, vector<32x16xbf16>, vector<16x16xf32> -> vector<16x16xf32>
    %100 = arith.addf %93, %99 : vector<16x16xf32>
    %c2_66 = arith.constant 2 : index
    %c0_67 = arith.constant 0 : index
    %c0_68 = arith.constant 0 : index
    %101 = vector.load %arg11[%c2_66, %c0_67, %c0_68] : memref<3x16x32xbf16, #tpu.memory_space<vmem>>, vector<1x16x32xbf16>
    %102 = vector.shape_cast %101 : vector<1x16x32xbf16> to vector<16x32xbf16>
    %cst_69 = arith.constant dense<0.000000e+00> : vector<16x16xf32>
    %103 = tpu.matmul %102, %87, %cst_69 {dimension_numbers = #tpu.dot_dimension_numbers<[1], [0], [0], [1], [0, 0, 1, 1], [], []>} : vector<16x32xbf16>, vector<32x16xbf16>, vector<16x16xf32> -> vector<16x16xf32>
    %104 = arith.addf %100, %103 : vector<16x16xf32>
    %c0_70 = arith.constant 0 : index
    %c0_71 = arith.constant 0 : index
    %105 = vector.load %arg12[%c0_70, %c0_71] : memref<16x1xf32, #tpu.memory_space<vmem>>, vector<16x1xf32>
    %106 = vector.broadcast %105 : vector<16x1xf32> to vector<16x16xf32>
    %107 = arith.addf %104, %106 : vector<16x16xf32>
    %c0_72 = arith.constant 0 : index
    %c0_73 = arith.constant 0 : index
    %c0_74 = arith.constant 0 : index
    %108 = vector.load %arg2[%c0_72, %c0_73, %c0_74] : memref<1x32x16xf32, #tpu.memory_space<vmem>>, vector<1x32x16xf32>
    %109 = vector.shape_cast %108 : vector<1x32x16xf32> to vector<32x16xf32>
    %c0_75 = arith.constant 0 : index
    %c0_76 = arith.constant 0 : index
    %110 = vector.load %arg13[%c0_75, %c0_76] : memref<32x32xbf16, #tpu.memory_space<vmem>>, vector<32x32xbf16>
    %111 = arith.truncf %109 : vector<32x16xf32> to vector<32x16xbf16>
    %cst_77 = arith.constant dense<0.000000e+00> : vector<32x16xf32>
    %112 = tpu.matmul %110, %111, %cst_77 {dimension_numbers = #tpu.dot_dimension_numbers<[1], [0], [0], [1], [0, 0, 1, 1], [], []>} : vector<32x32xbf16>, vector<32x16xbf16>, vector<32x16xf32> -> vector<32x16xf32>
    %c0_78 = arith.constant 0 : index
    %c0_79 = arith.constant 0 : index
    %113 = vector.load %arg14[%c0_78, %c0_79] : memref<32x1xf32, #tpu.memory_space<vmem>>, vector<32x1xf32>
    %114 = vector.broadcast %113 : vector<32x1xf32> to vector<32x16xf32>
    %115 = arith.addf %112, %114 : vector<32x16xf32>
    %116 = vector.extract_strided_slice %115 {offsets = [0, 0], sizes = [16, 16], strides = [1, 1]} : vector<32x16xf32> to vector<16x16xf32>
    %117 = arith.mulf %107, %116 : vector<16x16xf32>
    %118 = vector.extract_strided_slice %115 {offsets = [16, 0], sizes = [16, 16], strides = [1, 1]} : vector<32x16xf32> to vector<16x16xf32>
    %119 = arith.addf %117, %118 : vector<16x16xf32>
    %c0_80 = arith.constant 0 : index
    %c0_81 = arith.constant 0 : index
    %c0_82 = arith.constant 0 : index
    %120 = vector.load %arg15[%c0_80, %c0_81, %c0_82] : memref<1x16x16xf32, #tpu.memory_space<vmem>>, vector<1x16x16xf32>
    %121 = vector.shape_cast %120 : vector<1x16x16xf32> to vector<16x16xf32>
    %122 = vector.shape_cast %119 : vector<16x16xf32> to vector<1x16x16xf32>
    tpu.vector_store %arg15[%c0_80, %c0_81, %c0_82], %122 {strides = array<i32>} : memref<1x16x16xf32, #tpu.memory_space<vmem>>, vector<1x16x16xf32>,
    return
  }
  func.func @transform_0(%arg0: i32) -> (i32, i32, i32) {
    %c0_i32 = arith.constant 0 : i32
    %c0_i32_0 = arith.constant 0 : i32
    %c0_i32_1 = arith.constant 0 : i32
    return %arg0, %c0_i32, %c0_i32_0 : i32, i32, i32
  }
  func.func @transform_1(%arg0: i32) -> (i32, i32, i32) {
    %c0_i32 = arith.constant 0 : i32
    %c0_i32_0 = arith.constant 0 : i32
    %c0_i32_1 = arith.constant 0 : i32
    return %arg0, %c0_i32, %c0_i32_0 : i32, i32, i32
  }
  func.func @transform_2(%arg0: i32) -> (i32, i32, i32) {
    %c0_i32 = arith.constant 0 : i32
    %c0_i32_0 = arith.constant 0 : i32
    %c0_i32_1 = arith.constant 0 : i32
    %c0_i32_2 = arith.constant 0 : i32
    return %c0_i32, %c0_i32_0, %c0_i32_1 : i32, i32, i32
  }
  func.func @transform_3(%arg0: i32) -> (i32, i32) {
    %c0_i32 = arith.constant 0 : i32
    %c0_i32_0 = arith.constant 0 : i32
    %c0_i32_1 = arith.constant 0 : i32
    return %c0_i32, %c0_i32_0 : i32, i32
  }
  func.func @transform_4(%arg0: i32) -> (i32, i32, i32) {
    %c0_i32 = arith.constant 0 : i32
    %c0_i32_0 = arith.constant 0 : i32
    %c0_i32_1 = arith.constant 0 : i32
    %c0_i32_2 = arith.constant 0 : i32
    return %c0_i32, %c0_i32_0, %c0_i32_1 : i32, i32, i32
  }
  func.func @transform_5(%arg0: i32) -> (i32, i32) {
    %c0_i32 = arith.constant 0 : i32
    %c0_i32_0 = arith.constant 0 : i32
    %c0_i32_1 = arith.constant 0 : i32
    return %c0_i32, %c0_i32_0 : i32, i32
  }
  func.func @transform_6(%arg0: i32) -> (i32, i32, i32) {
    %c0_i32 = arith.constant 0 : i32
    %c0_i32_0 = arith.constant 0 : i32
    %c0_i32_1 = arith.constant 0 : i32
    %c0_i32_2 = arith.constant 0 : i32
    return %c0_i32, %c0_i32_0, %c0_i32_1 : i32, i32, i32
  }
  func.func @transform_7(%arg0: i32) -> (i32, i32) {
    %c0_i32 = arith.constant 0 : i32
    %c0_i32_0 = arith.constant 0 : i32
    %c0_i32_1 = arith.constant 0 : i32
    return %c0_i32, %c0_i32_0 : i32, i32
  }
  func.func @transform_8(%arg0: i32) -> (i32, i32, i32) {
    %c0_i32 = arith.constant 0 : i32
    %c0_i32_0 = arith.constant 0 : i32
    %c0_i32_1 = arith.constant 0 : i32
    %c0_i32_2 = arith.constant 0 : i32
    return %c0_i32, %c0_i32_0, %c0_i32_1 : i32, i32, i32
  }
  func.func @transform_9(%arg0: i32) -> (i32, i32) {
    %c0_i32 = arith.constant 0 : i32
    %c0_i32_0 = arith.constant 0 : i32
    %c0_i32_1 = arith.constant 0 : i32
    return %c0_i32, %c0_i32_0 : i32, i32
  }
  func.func @transform_10(%arg0: i32) -> (i32, i32, i32) {
    %c0_i32 = arith.constant 0 : i32
    %c0_i32_0 = arith.constant 0 : i32
    %c0_i32_1 = arith.constant 0 : i32
    %c0_i32_2 = arith.constant 0 : i32
    return %c0_i32, %c0_i32_0, %c0_i32_1 : i32, i32, i32
  }
  func.func @transform_11(%arg0: i32) -> (i32, i32) {
    %c0_i32 = arith.constant 0 : i32
    %c0_i32_0 = arith.constant 0 : i32
    %c0_i32_1 = arith.constant 0 : i32
    return %c0_i32, %c0_i32_0 : i32, i32
  }
  func.func @transform_12(%arg0: i32) -> (i32, i32) {
    %c0_i32 = arith.constant 0 : i32
    %c0_i32_0 = arith.constant 0 : i32
    %c0_i32_1 = arith.constant 0 : i32
    return %c0_i32, %c0_i32_0 : i32, i32
  }
  func.func @transform_13(%arg0: i32) -> (i32, i32) {
    %c0_i32 = arith.constant 0 : i32
    %c0_i32_0 = arith.constant 0 : i32
    %c0_i32_1 = arith.constant 0 : i32
    return %c0_i32, %c0_i32_0 : i32, i32
  }
  func.func @transform_14(%arg0: i32) -> (i32, i32, i32) {
    %c0_i32 = arith.constant 0 : i32
    %c0_i32_0 = arith.constant 0 : i32
    %c0_i32_1 = arith.constant 0 : i32
    return %arg0, %c0_i32, %c0_i32_0 : i32, i32, i32
  }
}

module attributes {stable_mosaic.version = 11 : i64} {
  func.func @kernel(%arg0: i32, %arg1: memref<1x16x32xf32, #tpu.memory_space<vmem>>, %arg2: memref<1x16x32xf32, #tpu.memory_space<vmem>>, %arg3: memref<3x16x16xbf16, #tpu.memory_space<vmem>>, %arg4: memref<16x1xf32, #tpu.memory_space<vmem>>, %arg5: memref<3x16x16xbf16, #tpu.memory_space<vmem>>, %arg6: memref<16x1xf32, #tpu.memory_space<vmem>>, %arg7: memref<3x16x16xbf16, #tpu.memory_space<vmem>>, %arg8: memref<16x1xf32, #tpu.memory_space<vmem>>, %arg9: memref<3x16x16xbf16, #tpu.memory_space<vmem>>, %arg10: memref<16x1xf32, #tpu.memory_space<vmem>>, %arg11: memref<3x8x16xbf16, #tpu.memory_space<vmem>>, %arg12: memref<8x1xf32, #tpu.memory_space<vmem>>, %arg13: memref<16x16xbf16, #tpu.memory_space<vmem>>, %arg14: memref<16x1xf32, #tpu.memory_space<vmem>>, %arg15: memref<1x8x32xf32, #tpu.memory_space<vmem>>) attributes {dimension_semantics = [#tpu.dimension_semantics<parallel>], iteration_bounds = array<i64: 2>, scalar_prefetch = 0 : i64, scratch_operands = 0 : i64, tpu.core_type = #tpu.core_type<tc>, window_params = [{transform_indices = @transform_0, window_bounds = array<i64: 1, 16, 32>}, {transform_indices = @transform_1, window_bounds = array<i64: 1, 16, 32>}, {pipeline_mode = #tpu.pipeline_mode<synchronous>, transform_indices = @transform_2, window_bounds = array<i64: 3, 16, 16>}, {pipeline_mode = #tpu.pipeline_mode<synchronous>, transform_indices = @transform_3, window_bounds = array<i64: 16, 1>}, {pipeline_mode = #tpu.pipeline_mode<synchronous>, transform_indices = @transform_4, window_bounds = array<i64: 3, 16, 16>}, {pipeline_mode = #tpu.pipeline_mode<synchronous>, transform_indices = @transform_5, window_bounds = array<i64: 16, 1>}, {pipeline_mode = #tpu.pipeline_mode<synchronous>, transform_indices = @transform_6, window_bounds = array<i64: 3, 16, 16>}, {pipeline_mode = #tpu.pipeline_mode<synchronous>, transform_indices = @transform_7, window_bounds = array<i64: 16, 1>}, {pipeline_mode = #tpu.pipeline_mode<synchronous>, transform_indices = @transform_8, window_bounds = array<i64: 3, 16, 16>}, {pipeline_mode = #tpu.pipeline_mode<synchronous>, transform_indices = @transform_9, window_bounds = array<i64: 16, 1>}, {pipeline_mode = #tpu.pipeline_mode<synchronous>, transform_indices = @transform_10, window_bounds = array<i64: 3, 8, 16>}, {pipeline_mode = #tpu.pipeline_mode<synchronous>, transform_indices = @transform_11, window_bounds = array<i64: 8, 1>}, {pipeline_mode = #tpu.pipeline_mode<synchronous>, transform_indices = @transform_12, window_bounds = array<i64: 16, 16>}, {pipeline_mode = #tpu.pipeline_mode<synchronous>, transform_indices = @transform_13, window_bounds = array<i64: 16, 1>}, {transform_indices = @transform_14, window_bounds = array<i64: 1, 8, 32>}]} {
    %c0 = arith.constant 0 : index
    %c0_0 = arith.constant 0 : index
    %c0_1 = arith.constant 0 : index
    %0 = vector.load %arg1[%c0, %c0_0, %c0_1] : memref<1x16x32xf32, #tpu.memory_space<vmem>>, vector<1x16x32xf32>
    %1 = vector.shape_cast %0 : vector<1x16x32xf32> to vector<16x32xf32>
    %cst = arith.constant 0.000000e+00 : f32
    %2 = vector.broadcast %cst : f32 to vector<16x32xf32>
    %3 = arith.cmpf oge, %1, %2 : vector<16x32xf32>
    %cst_2 = arith.constant 1.000000e-01 : f32
    %4 = vector.broadcast %cst_2 : f32 to vector<16x32xf32>
    %5 = arith.mulf %1, %4 : vector<16x32xf32>
    %6 = arith.select %3, %1, %5 : vector<16x32xi1>, vector<16x32xf32>
    %7 = arith.truncf %6 : vector<16x32xf32> to vector<16x32xbf16>
    %cst_3 = arith.constant 0.000000e+00 : bf16
    %8 = vector.broadcast %cst_3 : bf16 to vector<16x2xbf16>
    %9 = vector.extract_strided_slice %7 {offsets = [0, 0], sizes = [16, 30], strides = [1, 1]} : vector<16x32xbf16> to vector<16x30xbf16>
    %10 = tpu.concatenate %8, %9 in 1 : vector<16x2xbf16>, vector<16x30xbf16> -> vector<16x32xbf16>
    %c0_4 = arith.constant 0 : index
    %c0_5 = arith.constant 0 : index
    %c0_6 = arith.constant 0 : index
    %11 = vector.load %arg3[%c0_4, %c0_5, %c0_6] : memref<3x16x16xbf16, #tpu.memory_space<vmem>>, vector<1x16x16xbf16>
    %12 = vector.shape_cast %11 : vector<1x16x16xbf16> to vector<16x16xbf16>
    %cst_7 = arith.constant dense<0.000000e+00> : vector<16x32xf32>
    %13 = tpu.matmul %12, %10, %cst_7 {dimension_numbers = #tpu.dot_dimension_numbers<[1], [0], [0], [1], [0, 0, 1, 1], [], []>} : vector<16x16xbf16>, vector<16x32xbf16>, vector<16x32xf32> -> vector<16x32xf32>
    %cst_8 = arith.constant 0.000000e+00 : bf16
    %14 = vector.broadcast %cst_8 : bf16 to vector<16x1xbf16>
    %15 = vector.extract_strided_slice %7 {offsets = [0, 0], sizes = [16, 31], strides = [1, 1]} : vector<16x32xbf16> to vector<16x31xbf16>
    %16 = tpu.concatenate %14, %15 in 1 : vector<16x1xbf16>, vector<16x31xbf16> -> vector<16x32xbf16>
    %c1 = arith.constant 1 : index
    %c0_9 = arith.constant 0 : index
    %c0_10 = arith.constant 0 : index
    %17 = vector.load %arg3[%c1, %c0_9, %c0_10] : memref<3x16x16xbf16, #tpu.memory_space<vmem>>, vector<1x16x16xbf16>
    %18 = vector.shape_cast %17 : vector<1x16x16xbf16> to vector<16x16xbf16>
    %cst_11 = arith.constant dense<0.000000e+00> : vector<16x32xf32>
    %19 = tpu.matmul %18, %16, %cst_11 {dimension_numbers = #tpu.dot_dimension_numbers<[1], [0], [0], [1], [0, 0, 1, 1], [], []>} : vector<16x16xbf16>, vector<16x32xbf16>, vector<16x32xf32> -> vector<16x32xf32>
    %20 = arith.addf %13, %19 : vector<16x32xf32>
    %c2 = arith.constant 2 : index
    %c0_12 = arith.constant 0 : index
    %c0_13 = arith.constant 0 : index
    %21 = vector.load %arg3[%c2, %c0_12, %c0_13] : memref<3x16x16xbf16, #tpu.memory_space<vmem>>, vector<1x16x16xbf16>
    %22 = vector.shape_cast %21 : vector<1x16x16xbf16> to vector<16x16xbf16>
    %cst_14 = arith.constant dense<0.000000e+00> : vector<16x32xf32>
    %23 = tpu.matmul %22, %7, %cst_14 {dimension_numbers = #tpu.dot_dimension_numbers<[1], [0], [0], [1], [0, 0, 1, 1], [], []>} : vector<16x16xbf16>, vector<16x32xbf16>, vector<16x32xf32> -> vector<16x32xf32>
    %24 = arith.addf %20, %23 : vector<16x32xf32>
    %c0_15 = arith.constant 0 : index
    %c0_16 = arith.constant 0 : index
    %25 = vector.load %arg4[%c0_15, %c0_16] : memref<16x1xf32, #tpu.memory_space<vmem>>, vector<16x1xf32>
    %26 = vector.broadcast %25 : vector<16x1xf32> to vector<16x32xf32>
    %27 = arith.addf %24, %26 : vector<16x32xf32>
    %cst_17 = arith.constant 0.000000e+00 : f32
    %28 = vector.broadcast %cst_17 : f32 to vector<16x32xf32>
    %29 = arith.cmpf oge, %27, %28 : vector<16x32xf32>
    %cst_18 = arith.constant 1.000000e-01 : f32
    %30 = vector.broadcast %cst_18 : f32 to vector<16x32xf32>
    %31 = arith.mulf %27, %30 : vector<16x32xf32>
    %32 = arith.select %29, %27, %31 : vector<16x32xi1>, vector<16x32xf32>
    %33 = arith.truncf %32 : vector<16x32xf32> to vector<16x32xbf16>
    %cst_19 = arith.constant 0.000000e+00 : bf16
    %34 = vector.broadcast %cst_19 : bf16 to vector<16x6xbf16>
    %35 = vector.extract_strided_slice %33 {offsets = [0, 0], sizes = [16, 26], strides = [1, 1]} : vector<16x32xbf16> to vector<16x26xbf16>
    %36 = tpu.concatenate %34, %35 in 1 : vector<16x6xbf16>, vector<16x26xbf16> -> vector<16x32xbf16>
    %c0_20 = arith.constant 0 : index
    %c0_21 = arith.constant 0 : index
    %c0_22 = arith.constant 0 : index
    %37 = vector.load %arg5[%c0_20, %c0_21, %c0_22] : memref<3x16x16xbf16, #tpu.memory_space<vmem>>, vector<1x16x16xbf16>
    %38 = vector.shape_cast %37 : vector<1x16x16xbf16> to vector<16x16xbf16>
    %cst_23 = arith.constant dense<0.000000e+00> : vector<16x32xf32>
    %39 = tpu.matmul %38, %36, %cst_23 {dimension_numbers = #tpu.dot_dimension_numbers<[1], [0], [0], [1], [0, 0, 1, 1], [], []>} : vector<16x16xbf16>, vector<16x32xbf16>, vector<16x32xf32> -> vector<16x32xf32>
    %cst_24 = arith.constant 0.000000e+00 : bf16
    %40 = vector.broadcast %cst_24 : bf16 to vector<16x3xbf16>
    %41 = vector.extract_strided_slice %33 {offsets = [0, 0], sizes = [16, 29], strides = [1, 1]} : vector<16x32xbf16> to vector<16x29xbf16>
    %42 = tpu.concatenate %40, %41 in 1 : vector<16x3xbf16>, vector<16x29xbf16> -> vector<16x32xbf16>
    %c1_25 = arith.constant 1 : index
    %c0_26 = arith.constant 0 : index
    %c0_27 = arith.constant 0 : index
    %43 = vector.load %arg5[%c1_25, %c0_26, %c0_27] : memref<3x16x16xbf16, #tpu.memory_space<vmem>>, vector<1x16x16xbf16>
    %44 = vector.shape_cast %43 : vector<1x16x16xbf16> to vector<16x16xbf16>
    %cst_28 = arith.constant dense<0.000000e+00> : vector<16x32xf32>
    %45 = tpu.matmul %44, %42, %cst_28 {dimension_numbers = #tpu.dot_dimension_numbers<[1], [0], [0], [1], [0, 0, 1, 1], [], []>} : vector<16x16xbf16>, vector<16x32xbf16>, vector<16x32xf32> -> vector<16x32xf32>
    %46 = arith.addf %39, %45 : vector<16x32xf32>
    %c2_29 = arith.constant 2 : index
    %c0_30 = arith.constant 0 : index
    %c0_31 = arith.constant 0 : index
    %47 = vector.load %arg5[%c2_29, %c0_30, %c0_31] : memref<3x16x16xbf16, #tpu.memory_space<vmem>>, vector<1x16x16xbf16>
    %48 = vector.shape_cast %47 : vector<1x16x16xbf16> to vector<16x16xbf16>
    %cst_32 = arith.constant dense<0.000000e+00> : vector<16x32xf32>
    %49 = tpu.matmul %48, %33, %cst_32 {dimension_numbers = #tpu.dot_dimension_numbers<[1], [0], [0], [1], [0, 0, 1, 1], [], []>} : vector<16x16xbf16>, vector<16x32xbf16>, vector<16x32xf32> -> vector<16x32xf32>
    %50 = arith.addf %46, %49 : vector<16x32xf32>
    %c0_33 = arith.constant 0 : index
    %c0_34 = arith.constant 0 : index
    %51 = vector.load %arg6[%c0_33, %c0_34] : memref<16x1xf32, #tpu.memory_space<vmem>>, vector<16x1xf32>
    %52 = vector.broadcast %51 : vector<16x1xf32> to vector<16x32xf32>
    %53 = arith.addf %50, %52 : vector<16x32xf32>
    %54 = arith.addf %53, %1 : vector<16x32xf32>
    %cst_35 = arith.constant 0.000000e+00 : f32
    %55 = vector.broadcast %cst_35 : f32 to vector<16x32xf32>
    %56 = arith.cmpf oge, %54, %55 : vector<16x32xf32>
    %cst_36 = arith.constant 1.000000e-01 : f32
    %57 = vector.broadcast %cst_36 : f32 to vector<16x32xf32>
    %58 = arith.mulf %54, %57 : vector<16x32xf32>
    %59 = arith.select %56, %54, %58 : vector<16x32xi1>, vector<16x32xf32>
    %60 = arith.truncf %59 : vector<16x32xf32> to vector<16x32xbf16>
    %cst_37 = arith.constant 0.000000e+00 : bf16
    %61 = vector.broadcast %cst_37 : bf16 to vector<16x18xbf16>
    %62 = vector.extract_strided_slice %60 {offsets = [0, 0], sizes = [16, 14], strides = [1, 1]} : vector<16x32xbf16> to vector<16x14xbf16>
    %63 = tpu.concatenate %61, %62 in 1 : vector<16x18xbf16>, vector<16x14xbf16> -> vector<16x32xbf16>
    %c0_38 = arith.constant 0 : index
    %c0_39 = arith.constant 0 : index
    %c0_40 = arith.constant 0 : index
    %64 = vector.load %arg7[%c0_38, %c0_39, %c0_40] : memref<3x16x16xbf16, #tpu.memory_space<vmem>>, vector<1x16x16xbf16>
    %65 = vector.shape_cast %64 : vector<1x16x16xbf16> to vector<16x16xbf16>
    %cst_41 = arith.constant dense<0.000000e+00> : vector<16x32xf32>
    %66 = tpu.matmul %65, %63, %cst_41 {dimension_numbers = #tpu.dot_dimension_numbers<[1], [0], [0], [1], [0, 0, 1, 1], [], []>} : vector<16x16xbf16>, vector<16x32xbf16>, vector<16x32xf32> -> vector<16x32xf32>
    %cst_42 = arith.constant 0.000000e+00 : bf16
    %67 = vector.broadcast %cst_42 : bf16 to vector<16x9xbf16>
    %68 = vector.extract_strided_slice %60 {offsets = [0, 0], sizes = [16, 23], strides = [1, 1]} : vector<16x32xbf16> to vector<16x23xbf16>
    %69 = tpu.concatenate %67, %68 in 1 : vector<16x9xbf16>, vector<16x23xbf16> -> vector<16x32xbf16>
    %c1_43 = arith.constant 1 : index
    %c0_44 = arith.constant 0 : index
    %c0_45 = arith.constant 0 : index
    %70 = vector.load %arg7[%c1_43, %c0_44, %c0_45] : memref<3x16x16xbf16, #tpu.memory_space<vmem>>, vector<1x16x16xbf16>
    %71 = vector.shape_cast %70 : vector<1x16x16xbf16> to vector<16x16xbf16>
    %cst_46 = arith.constant dense<0.000000e+00> : vector<16x32xf32>
    %72 = tpu.matmul %71, %69, %cst_46 {dimension_numbers = #tpu.dot_dimension_numbers<[1], [0], [0], [1], [0, 0, 1, 1], [], []>} : vector<16x16xbf16>, vector<16x32xbf16>, vector<16x32xf32> -> vector<16x32xf32>
    %73 = arith.addf %66, %72 : vector<16x32xf32>
    %c2_47 = arith.constant 2 : index
    %c0_48 = arith.constant 0 : index
    %c0_49 = arith.constant 0 : index
    %74 = vector.load %arg7[%c2_47, %c0_48, %c0_49] : memref<3x16x16xbf16, #tpu.memory_space<vmem>>, vector<1x16x16xbf16>
    %75 = vector.shape_cast %74 : vector<1x16x16xbf16> to vector<16x16xbf16>
    %cst_50 = arith.constant dense<0.000000e+00> : vector<16x32xf32>
    %76 = tpu.matmul %75, %60, %cst_50 {dimension_numbers = #tpu.dot_dimension_numbers<[1], [0], [0], [1], [0, 0, 1, 1], [], []>} : vector<16x16xbf16>, vector<16x32xbf16>, vector<16x32xf32> -> vector<16x32xf32>
    %77 = arith.addf %73, %76 : vector<16x32xf32>
    %c0_51 = arith.constant 0 : index
    %c0_52 = arith.constant 0 : index
    %78 = vector.load %arg8[%c0_51, %c0_52] : memref<16x1xf32, #tpu.memory_space<vmem>>, vector<16x1xf32>
    %79 = vector.broadcast %78 : vector<16x1xf32> to vector<16x32xf32>
    %80 = arith.addf %77, %79 : vector<16x32xf32>
    %cst_53 = arith.constant 0.000000e+00 : f32
    %81 = vector.broadcast %cst_53 : f32 to vector<16x32xf32>
    %82 = arith.cmpf oge, %80, %81 : vector<16x32xf32>
    %cst_54 = arith.constant 1.000000e-01 : f32
    %83 = vector.broadcast %cst_54 : f32 to vector<16x32xf32>
    %84 = arith.mulf %80, %83 : vector<16x32xf32>
    %85 = arith.select %82, %80, %84 : vector<16x32xi1>, vector<16x32xf32>
    %86 = arith.truncf %85 : vector<16x32xf32> to vector<16x32xbf16>
    %cst_55 = arith.constant 0.000000e+00 : bf16
    %87 = vector.broadcast %cst_55 : bf16 to vector<16x27xbf16>
    %88 = vector.extract_strided_slice %86 {offsets = [0, 0], sizes = [16, 5], strides = [1, 1]} : vector<16x32xbf16> to vector<16x5xbf16>
    %89 = tpu.concatenate %87, %88 in 1 : vector<16x27xbf16>, vector<16x5xbf16> -> vector<16x32xbf16>
    %c1_56 = arith.constant 1 : index
    %c0_57 = arith.constant 0 : index
    %c0_58 = arith.constant 0 : index
    %90 = vector.load %arg9[%c1_56, %c0_57, %c0_58] : memref<3x16x16xbf16, #tpu.memory_space<vmem>>, vector<1x16x16xbf16>
    %91 = vector.shape_cast %90 : vector<1x16x16xbf16> to vector<16x16xbf16>
    %cst_59 = arith.constant dense<0.000000e+00> : vector<16x32xf32>
    %92 = tpu.matmul %91, %89, %cst_59 {dimension_numbers = #tpu.dot_dimension_numbers<[1], [0], [0], [1], [0, 0, 1, 1], [], []>} : vector<16x16xbf16>, vector<16x32xbf16>, vector<16x32xf32> -> vector<16x32xf32>
    %c2_60 = arith.constant 2 : index
    %c0_61 = arith.constant 0 : index
    %c0_62 = arith.constant 0 : index
    %93 = vector.load %arg9[%c2_60, %c0_61, %c0_62] : memref<3x16x16xbf16, #tpu.memory_space<vmem>>, vector<1x16x16xbf16>
    %94 = vector.shape_cast %93 : vector<1x16x16xbf16> to vector<16x16xbf16>
    %cst_63 = arith.constant dense<0.000000e+00> : vector<16x32xf32>
    %95 = tpu.matmul %94, %86, %cst_63 {dimension_numbers = #tpu.dot_dimension_numbers<[1], [0], [0], [1], [0, 0, 1, 1], [], []>} : vector<16x16xbf16>, vector<16x32xbf16>, vector<16x32xf32> -> vector<16x32xf32>
    %96 = arith.addf %92, %95 : vector<16x32xf32>
    %c0_64 = arith.constant 0 : index
    %c0_65 = arith.constant 0 : index
    %97 = vector.load %arg10[%c0_64, %c0_65] : memref<16x1xf32, #tpu.memory_space<vmem>>, vector<16x1xf32>
    %98 = vector.broadcast %97 : vector<16x1xf32> to vector<16x32xf32>
    %99 = arith.addf %96, %98 : vector<16x32xf32>
    %100 = arith.addf %99, %54 : vector<16x32xf32>
    %101 = arith.truncf %100 : vector<16x32xf32> to vector<16x32xbf16>
    %cst_66 = arith.constant 0.000000e+00 : bf16
    %102 = vector.broadcast %cst_66 : bf16 to vector<16x2xbf16>
    %103 = vector.extract_strided_slice %101 {offsets = [0, 0], sizes = [16, 30], strides = [1, 1]} : vector<16x32xbf16> to vector<16x30xbf16>
    %104 = tpu.concatenate %102, %103 in 1 : vector<16x2xbf16>, vector<16x30xbf16> -> vector<16x32xbf16>
    %c0_67 = arith.constant 0 : index
    %c0_68 = arith.constant 0 : index
    %c0_69 = arith.constant 0 : index
    %105 = vector.load %arg11[%c0_67, %c0_68, %c0_69] : memref<3x8x16xbf16, #tpu.memory_space<vmem>>, vector<1x8x16xbf16>
    %106 = vector.shape_cast %105 : vector<1x8x16xbf16> to vector<8x16xbf16>
    %cst_70 = arith.constant dense<0.000000e+00> : vector<8x32xf32>
    %107 = tpu.matmul %106, %104, %cst_70 {dimension_numbers = #tpu.dot_dimension_numbers<[1], [0], [0], [1], [0, 0, 1, 1], [], []>} : vector<8x16xbf16>, vector<16x32xbf16>, vector<8x32xf32> -> vector<8x32xf32>
    %cst_71 = arith.constant 0.000000e+00 : bf16
    %108 = vector.broadcast %cst_71 : bf16 to vector<16x1xbf16>
    %109 = vector.extract_strided_slice %101 {offsets = [0, 0], sizes = [16, 31], strides = [1, 1]} : vector<16x32xbf16> to vector<16x31xbf16>
    %110 = tpu.concatenate %108, %109 in 1 : vector<16x1xbf16>, vector<16x31xbf16> -> vector<16x32xbf16>
    %c1_72 = arith.constant 1 : index
    %c0_73 = arith.constant 0 : index
    %c0_74 = arith.constant 0 : index
    %111 = vector.load %arg11[%c1_72, %c0_73, %c0_74] : memref<3x8x16xbf16, #tpu.memory_space<vmem>>, vector<1x8x16xbf16>
    %112 = vector.shape_cast %111 : vector<1x8x16xbf16> to vector<8x16xbf16>
    %cst_75 = arith.constant dense<0.000000e+00> : vector<8x32xf32>
    %113 = tpu.matmul %112, %110, %cst_75 {dimension_numbers = #tpu.dot_dimension_numbers<[1], [0], [0], [1], [0, 0, 1, 1], [], []>} : vector<8x16xbf16>, vector<16x32xbf16>, vector<8x32xf32> -> vector<8x32xf32>
    %114 = arith.addf %107, %113 : vector<8x32xf32>
    %c2_76 = arith.constant 2 : index
    %c0_77 = arith.constant 0 : index
    %c0_78 = arith.constant 0 : index
    %115 = vector.load %arg11[%c2_76, %c0_77, %c0_78] : memref<3x8x16xbf16, #tpu.memory_space<vmem>>, vector<1x8x16xbf16>
    %116 = vector.shape_cast %115 : vector<1x8x16xbf16> to vector<8x16xbf16>
    %cst_79 = arith.constant dense<0.000000e+00> : vector<8x32xf32>
    %117 = tpu.matmul %116, %101, %cst_79 {dimension_numbers = #tpu.dot_dimension_numbers<[1], [0], [0], [1], [0, 0, 1, 1], [], []>} : vector<8x16xbf16>, vector<16x32xbf16>, vector<8x32xf32> -> vector<8x32xf32>
    %118 = arith.addf %114, %117 : vector<8x32xf32>
    %c0_80 = arith.constant 0 : index
    %c0_81 = arith.constant 0 : index
    %119 = vector.load %arg12[%c0_80, %c0_81] : memref<8x1xf32, #tpu.memory_space<vmem>>, vector<8x1xf32>
    %120 = vector.broadcast %119 : vector<8x1xf32> to vector<8x32xf32>
    %121 = arith.addf %118, %120 : vector<8x32xf32>
    %c0_82 = arith.constant 0 : index
    %c0_83 = arith.constant 0 : index
    %c0_84 = arith.constant 0 : index
    %122 = vector.load %arg2[%c0_82, %c0_83, %c0_84] : memref<1x16x32xf32, #tpu.memory_space<vmem>>, vector<1x16x32xf32>
    %123 = vector.shape_cast %122 : vector<1x16x32xf32> to vector<16x32xf32>
    %c0_85 = arith.constant 0 : index
    %c0_86 = arith.constant 0 : index
    %124 = vector.load %arg13[%c0_85, %c0_86] : memref<16x16xbf16, #tpu.memory_space<vmem>>, vector<16x16xbf16>
    %125 = arith.truncf %123 : vector<16x32xf32> to vector<16x32xbf16>
    %cst_87 = arith.constant dense<0.000000e+00> : vector<16x32xf32>
    %126 = tpu.matmul %124, %125, %cst_87 {dimension_numbers = #tpu.dot_dimension_numbers<[1], [0], [0], [1], [0, 0, 1, 1], [], []>} : vector<16x16xbf16>, vector<16x32xbf16>, vector<16x32xf32> -> vector<16x32xf32>
    %c0_88 = arith.constant 0 : index
    %c0_89 = arith.constant 0 : index
    %127 = vector.load %arg14[%c0_88, %c0_89] : memref<16x1xf32, #tpu.memory_space<vmem>>, vector<16x1xf32>
    %128 = vector.broadcast %127 : vector<16x1xf32> to vector<16x32xf32>
    %129 = arith.addf %126, %128 : vector<16x32xf32>
    %130 = vector.extract_strided_slice %129 {offsets = [0, 0], sizes = [8, 32], strides = [1, 1]} : vector<16x32xf32> to vector<8x32xf32>
    %131 = arith.mulf %121, %130 : vector<8x32xf32>
    %132 = vector.extract_strided_slice %129 {offsets = [8, 0], sizes = [8, 32], strides = [1, 1]} : vector<16x32xf32> to vector<8x32xf32>
    %133 = arith.addf %131, %132 : vector<8x32xf32>
    %c0_90 = arith.constant 0 : index
    %c0_91 = arith.constant 0 : index
    %c0_92 = arith.constant 0 : index
    %134 = vector.load %arg15[%c0_90, %c0_91, %c0_92] : memref<1x8x32xf32, #tpu.memory_space<vmem>>, vector<1x8x32xf32>
    %135 = vector.shape_cast %134 : vector<1x8x32xf32> to vector<8x32xf32>
    %136 = vector.shape_cast %133 : vector<8x32xf32> to vector<1x8x32xf32>
    tpu.vector_store %arg15[%c0_90, %c0_91, %c0_92], %136 {strides = array<i32>} : memref<1x8x32xf32, #tpu.memory_space<vmem>>, vector<1x8x32xf32>,
    return
  }
  func.func @transform_0(%arg0: i32) -> (i32, i32, i32) {
    %c0_i32 = arith.constant 0 : i32
    %c0_i32_0 = arith.constant 0 : i32
    %c0_i32_1 = arith.constant 0 : i32
    return %arg0, %c0_i32, %c0_i32_0 : i32, i32, i32
  }
  func.func @transform_1(%arg0: i32) -> (i32, i32, i32) {
    %c0_i32 = arith.constant 0 : i32
    %c0_i32_0 = arith.constant 0 : i32
    %c0_i32_1 = arith.constant 0 : i32
    return %arg0, %c0_i32, %c0_i32_0 : i32, i32, i32
  }
  func.func @transform_2(%arg0: i32) -> (i32, i32, i32) {
    %c0_i32 = arith.constant 0 : i32
    %c0_i32_0 = arith.constant 0 : i32
    %c0_i32_1 = arith.constant 0 : i32
    %c0_i32_2 = arith.constant 0 : i32
    return %c0_i32, %c0_i32_0, %c0_i32_1 : i32, i32, i32
  }
  func.func @transform_3(%arg0: i32) -> (i32, i32) {
    %c0_i32 = arith.constant 0 : i32
    %c0_i32_0 = arith.constant 0 : i32
    %c0_i32_1 = arith.constant 0 : i32
    return %c0_i32, %c0_i32_0 : i32, i32
  }
  func.func @transform_4(%arg0: i32) -> (i32, i32, i32) {
    %c0_i32 = arith.constant 0 : i32
    %c0_i32_0 = arith.constant 0 : i32
    %c0_i32_1 = arith.constant 0 : i32
    %c0_i32_2 = arith.constant 0 : i32
    return %c0_i32, %c0_i32_0, %c0_i32_1 : i32, i32, i32
  }
  func.func @transform_5(%arg0: i32) -> (i32, i32) {
    %c0_i32 = arith.constant 0 : i32
    %c0_i32_0 = arith.constant 0 : i32
    %c0_i32_1 = arith.constant 0 : i32
    return %c0_i32, %c0_i32_0 : i32, i32
  }
  func.func @transform_6(%arg0: i32) -> (i32, i32, i32) {
    %c0_i32 = arith.constant 0 : i32
    %c0_i32_0 = arith.constant 0 : i32
    %c0_i32_1 = arith.constant 0 : i32
    %c0_i32_2 = arith.constant 0 : i32
    return %c0_i32, %c0_i32_0, %c0_i32_1 : i32, i32, i32
  }
  func.func @transform_7(%arg0: i32) -> (i32, i32) {
    %c0_i32 = arith.constant 0 : i32
    %c0_i32_0 = arith.constant 0 : i32
    %c0_i32_1 = arith.constant 0 : i32
    return %c0_i32, %c0_i32_0 : i32, i32
  }
  func.func @transform_8(%arg0: i32) -> (i32, i32, i32) {
    %c0_i32 = arith.constant 0 : i32
    %c0_i32_0 = arith.constant 0 : i32
    %c0_i32_1 = arith.constant 0 : i32
    %c0_i32_2 = arith.constant 0 : i32
    return %c0_i32, %c0_i32_0, %c0_i32_1 : i32, i32, i32
  }
  func.func @transform_9(%arg0: i32) -> (i32, i32) {
    %c0_i32 = arith.constant 0 : i32
    %c0_i32_0 = arith.constant 0 : i32
    %c0_i32_1 = arith.constant 0 : i32
    return %c0_i32, %c0_i32_0 : i32, i32
  }
  func.func @transform_10(%arg0: i32) -> (i32, i32, i32) {
    %c0_i32 = arith.constant 0 : i32
    %c0_i32_0 = arith.constant 0 : i32
    %c0_i32_1 = arith.constant 0 : i32
    %c0_i32_2 = arith.constant 0 : i32
    return %c0_i32, %c0_i32_0, %c0_i32_1 : i32, i32, i32
  }
  func.func @transform_11(%arg0: i32) -> (i32, i32) {
    %c0_i32 = arith.constant 0 : i32
    %c0_i32_0 = arith.constant 0 : i32
    %c0_i32_1 = arith.constant 0 : i32
    return %c0_i32, %c0_i32_0 : i32, i32
  }
  func.func @transform_12(%arg0: i32) -> (i32, i32) {
    %c0_i32 = arith.constant 0 : i32
    %c0_i32_0 = arith.constant 0 : i32
    %c0_i32_1 = arith.constant 0 : i32
    return %c0_i32, %c0_i32_0 : i32, i32
  }
  func.func @transform_13(%arg0: i32) -> (i32, i32) {
    %c0_i32 = arith.constant 0 : i32
    %c0_i32_0 = arith.constant 0 : i32
    %c0_i32_1 = arith.constant 0 : i32
    return %c0_i32, %c0_i32_0 : i32, i32
  }
  func.func @transform_14(%arg0: i32) -> (i32, i32, i32) {
    %c0_i32 = arith.constant 0 : i32
    %c0_i32_0 = arith.constant 0 : i32
    %c0_i32_1 = arith.constant 0 : i32
    return %arg0, %c0_i32, %c0_i32_0 : i32, i32, i32
  }
}

module attributes {stable_mosaic.version = 11 : i64} {
  func.func @kernel(%arg0: i32, %arg1: memref<1x8x64xf32, #tpu.memory_space<vmem>>, %arg2: memref<1x8x64xf32, #tpu.memory_space<vmem>>, %arg3: memref<3x8x8xbf16, #tpu.memory_space<vmem>>, %arg4: memref<8x1xf32, #tpu.memory_space<vmem>>, %arg5: memref<3x8x8xbf16, #tpu.memory_space<vmem>>, %arg6: memref<8x1xf32, #tpu.memory_space<vmem>>, %arg7: memref<3x8x8xbf16, #tpu.memory_space<vmem>>, %arg8: memref<8x1xf32, #tpu.memory_space<vmem>>, %arg9: memref<3x8x8xbf16, #tpu.memory_space<vmem>>, %arg10: memref<8x1xf32, #tpu.memory_space<vmem>>, %arg11: memref<3x8x8xbf16, #tpu.memory_space<vmem>>, %arg12: memref<8x1xf32, #tpu.memory_space<vmem>>, %arg13: memref<16x8xbf16, #tpu.memory_space<vmem>>, %arg14: memref<16x1xf32, #tpu.memory_space<vmem>>, %arg15: memref<1x8x64xf32, #tpu.memory_space<vmem>>) attributes {dimension_semantics = [#tpu.dimension_semantics<parallel>], iteration_bounds = array<i64: 2>, scalar_prefetch = 0 : i64, scratch_operands = 0 : i64, tpu.core_type = #tpu.core_type<tc>, window_params = [{transform_indices = @transform_0, window_bounds = array<i64: 1, 8, 64>}, {transform_indices = @transform_1, window_bounds = array<i64: 1, 8, 64>}, {pipeline_mode = #tpu.pipeline_mode<synchronous>, transform_indices = @transform_2, window_bounds = array<i64: 3, 8, 8>}, {pipeline_mode = #tpu.pipeline_mode<synchronous>, transform_indices = @transform_3, window_bounds = array<i64: 8, 1>}, {pipeline_mode = #tpu.pipeline_mode<synchronous>, transform_indices = @transform_4, window_bounds = array<i64: 3, 8, 8>}, {pipeline_mode = #tpu.pipeline_mode<synchronous>, transform_indices = @transform_5, window_bounds = array<i64: 8, 1>}, {pipeline_mode = #tpu.pipeline_mode<synchronous>, transform_indices = @transform_6, window_bounds = array<i64: 3, 8, 8>}, {pipeline_mode = #tpu.pipeline_mode<synchronous>, transform_indices = @transform_7, window_bounds = array<i64: 8, 1>}, {pipeline_mode = #tpu.pipeline_mode<synchronous>, transform_indices = @transform_8, window_bounds = array<i64: 3, 8, 8>}, {pipeline_mode = #tpu.pipeline_mode<synchronous>, transform_indices = @transform_9, window_bounds = array<i64: 8, 1>}, {pipeline_mode = #tpu.pipeline_mode<synchronous>, transform_indices = @transform_10, window_bounds = array<i64: 3, 8, 8>}, {pipeline_mode = #tpu.pipeline_mode<synchronous>, transform_indices = @transform_11, window_bounds = array<i64: 8, 1>}, {pipeline_mode = #tpu.pipeline_mode<synchronous>, transform_indices = @transform_12, window_bounds = array<i64: 16, 8>}, {pipeline_mode = #tpu.pipeline_mode<synchronous>, transform_indices = @transform_13, window_bounds = array<i64: 16, 1>}, {transform_indices = @transform_14, window_bounds = array<i64: 1, 8, 64>}]} {
    %c0 = arith.constant 0 : index
    %c0_0 = arith.constant 0 : index
    %c0_1 = arith.constant 0 : index
    %0 = vector.load %arg1[%c0, %c0_0, %c0_1] : memref<1x8x64xf32, #tpu.memory_space<vmem>>, vector<1x8x64xf32>
    %1 = vector.shape_cast %0 : vector<1x8x64xf32> to vector<8x64xf32>
    %cst = arith.constant 0.000000e+00 : f32
    %2 = vector.broadcast %cst : f32 to vector<8x64xf32>
    %3 = arith.cmpf oge, %1, %2 : vector<8x64xf32>
    %cst_2 = arith.constant 1.000000e-01 : f32
    %4 = vector.broadcast %cst_2 : f32 to vector<8x64xf32>
    %5 = arith.mulf %1, %4 : vector<8x64xf32>
    %6 = arith.select %3, %1, %5 : vector<8x64xi1>, vector<8x64xf32>
    %7 = arith.truncf %6 : vector<8x64xf32> to vector<8x64xbf16>
    %cst_3 = arith.constant 0.000000e+00 : bf16
    %8 = vector.broadcast %cst_3 : bf16 to vector<8x2xbf16>
    %9 = vector.extract_strided_slice %7 {offsets = [0, 0], sizes = [8, 62], strides = [1, 1]} : vector<8x64xbf16> to vector<8x62xbf16>
    %10 = tpu.concatenate %8, %9 in 1 : vector<8x2xbf16>, vector<8x62xbf16> -> vector<8x64xbf16>
    %c0_4 = arith.constant 0 : index
    %c0_5 = arith.constant 0 : index
    %c0_6 = arith.constant 0 : index
    %11 = vector.load %arg3[%c0_4, %c0_5, %c0_6] : memref<3x8x8xbf16, #tpu.memory_space<vmem>>, vector<1x8x8xbf16>
    %12 = vector.shape_cast %11 : vector<1x8x8xbf16> to vector<8x8xbf16>
    %cst_7 = arith.constant dense<0.000000e+00> : vector<8x64xf32>
    %13 = tpu.matmul %12, %10, %cst_7 {dimension_numbers = #tpu.dot_dimension_numbers<[1], [0], [0], [1], [0, 0, 1, 1], [], []>} : vector<8x8xbf16>, vector<8x64xbf16>, vector<8x64xf32> -> vector<8x64xf32>
    %cst_8 = arith.constant 0.000000e+00 : bf16
    %14 = vector.broadcast %cst_8 : bf16 to vector<8x1xbf16>
    %15 = vector.extract_strided_slice %7 {offsets = [0, 0], sizes = [8, 63], strides = [1, 1]} : vector<8x64xbf16> to vector<8x63xbf16>
    %16 = tpu.concatenate %14, %15 in 1 : vector<8x1xbf16>, vector<8x63xbf16> -> vector<8x64xbf16>
    %c1 = arith.constant 1 : index
    %c0_9 = arith.constant 0 : index
    %c0_10 = arith.constant 0 : index
    %17 = vector.load %arg3[%c1, %c0_9, %c0_10] : memref<3x8x8xbf16, #tpu.memory_space<vmem>>, vector<1x8x8xbf16>
    %18 = vector.shape_cast %17 : vector<1x8x8xbf16> to vector<8x8xbf16>
    %cst_11 = arith.constant dense<0.000000e+00> : vector<8x64xf32>
    %19 = tpu.matmul %18, %16, %cst_11 {dimension_numbers = #tpu.dot_dimension_numbers<[1], [0], [0], [1], [0, 0, 1, 1], [], []>} : vector<8x8xbf16>, vector<8x64xbf16>, vector<8x64xf32> -> vector<8x64xf32>
    %20 = arith.addf %13, %19 : vector<8x64xf32>
    %c2 = arith.constant 2 : index
    %c0_12 = arith.constant 0 : index
    %c0_13 = arith.constant 0 : index
    %21 = vector.load %arg3[%c2, %c0_12, %c0_13] : memref<3x8x8xbf16, #tpu.memory_space<vmem>>, vector<1x8x8xbf16>
    %22 = vector.shape_cast %21 : vector<1x8x8xbf16> to vector<8x8xbf16>
    %cst_14 = arith.constant dense<0.000000e+00> : vector<8x64xf32>
    %23 = tpu.matmul %22, %7, %cst_14 {dimension_numbers = #tpu.dot_dimension_numbers<[1], [0], [0], [1], [0, 0, 1, 1], [], []>} : vector<8x8xbf16>, vector<8x64xbf16>, vector<8x64xf32> -> vector<8x64xf32>
    %24 = arith.addf %20, %23 : vector<8x64xf32>
    %c0_15 = arith.constant 0 : index
    %c0_16 = arith.constant 0 : index
    %25 = vector.load %arg4[%c0_15, %c0_16] : memref<8x1xf32, #tpu.memory_space<vmem>>, vector<8x1xf32>
    %26 = vector.broadcast %25 : vector<8x1xf32> to vector<8x64xf32>
    %27 = arith.addf %24, %26 : vector<8x64xf32>
    %cst_17 = arith.constant 0.000000e+00 : f32
    %28 = vector.broadcast %cst_17 : f32 to vector<8x64xf32>
    %29 = arith.cmpf oge, %27, %28 : vector<8x64xf32>
    %cst_18 = arith.constant 1.000000e-01 : f32
    %30 = vector.broadcast %cst_18 : f32 to vector<8x64xf32>
    %31 = arith.mulf %27, %30 : vector<8x64xf32>
    %32 = arith.select %29, %27, %31 : vector<8x64xi1>, vector<8x64xf32>
    %33 = arith.truncf %32 : vector<8x64xf32> to vector<8x64xbf16>
    %cst_19 = arith.constant 0.000000e+00 : bf16
    %34 = vector.broadcast %cst_19 : bf16 to vector<8x6xbf16>
    %35 = vector.extract_strided_slice %33 {offsets = [0, 0], sizes = [8, 58], strides = [1, 1]} : vector<8x64xbf16> to vector<8x58xbf16>
    %36 = tpu.concatenate %34, %35 in 1 : vector<8x6xbf16>, vector<8x58xbf16> -> vector<8x64xbf16>
    %c0_20 = arith.constant 0 : index
    %c0_21 = arith.constant 0 : index
    %c0_22 = arith.constant 0 : index
    %37 = vector.load %arg5[%c0_20, %c0_21, %c0_22] : memref<3x8x8xbf16, #tpu.memory_space<vmem>>, vector<1x8x8xbf16>
    %38 = vector.shape_cast %37 : vector<1x8x8xbf16> to vector<8x8xbf16>
    %cst_23 = arith.constant dense<0.000000e+00> : vector<8x64xf32>
    %39 = tpu.matmul %38, %36, %cst_23 {dimension_numbers = #tpu.dot_dimension_numbers<[1], [0], [0], [1], [0, 0, 1, 1], [], []>} : vector<8x8xbf16>, vector<8x64xbf16>, vector<8x64xf32> -> vector<8x64xf32>
    %cst_24 = arith.constant 0.000000e+00 : bf16
    %40 = vector.broadcast %cst_24 : bf16 to vector<8x3xbf16>
    %41 = vector.extract_strided_slice %33 {offsets = [0, 0], sizes = [8, 61], strides = [1, 1]} : vector<8x64xbf16> to vector<8x61xbf16>
    %42 = tpu.concatenate %40, %41 in 1 : vector<8x3xbf16>, vector<8x61xbf16> -> vector<8x64xbf16>
    %c1_25 = arith.constant 1 : index
    %c0_26 = arith.constant 0 : index
    %c0_27 = arith.constant 0 : index
    %43 = vector.load %arg5[%c1_25, %c0_26, %c0_27] : memref<3x8x8xbf16, #tpu.memory_space<vmem>>, vector<1x8x8xbf16>
    %44 = vector.shape_cast %43 : vector<1x8x8xbf16> to vector<8x8xbf16>
    %cst_28 = arith.constant dense<0.000000e+00> : vector<8x64xf32>
    %45 = tpu.matmul %44, %42, %cst_28 {dimension_numbers = #tpu.dot_dimension_numbers<[1], [0], [0], [1], [0, 0, 1, 1], [], []>} : vector<8x8xbf16>, vector<8x64xbf16>, vector<8x64xf32> -> vector<8x64xf32>
    %46 = arith.addf %39, %45 : vector<8x64xf32>
    %c2_29 = arith.constant 2 : index
    %c0_30 = arith.constant 0 : index
    %c0_31 = arith.constant 0 : index
    %47 = vector.load %arg5[%c2_29, %c0_30, %c0_31] : memref<3x8x8xbf16, #tpu.memory_space<vmem>>, vector<1x8x8xbf16>
    %48 = vector.shape_cast %47 : vector<1x8x8xbf16> to vector<8x8xbf16>
    %cst_32 = arith.constant dense<0.000000e+00> : vector<8x64xf32>
    %49 = tpu.matmul %48, %33, %cst_32 {dimension_numbers = #tpu.dot_dimension_numbers<[1], [0], [0], [1], [0, 0, 1, 1], [], []>} : vector<8x8xbf16>, vector<8x64xbf16>, vector<8x64xf32> -> vector<8x64xf32>
    %50 = arith.addf %46, %49 : vector<8x64xf32>
    %c0_33 = arith.constant 0 : index
    %c0_34 = arith.constant 0 : index
    %51 = vector.load %arg6[%c0_33, %c0_34] : memref<8x1xf32, #tpu.memory_space<vmem>>, vector<8x1xf32>
    %52 = vector.broadcast %51 : vector<8x1xf32> to vector<8x64xf32>
    %53 = arith.addf %50, %52 : vector<8x64xf32>
    %54 = arith.addf %53, %1 : vector<8x64xf32>
    %cst_35 = arith.constant 0.000000e+00 : f32
    %55 = vector.broadcast %cst_35 : f32 to vector<8x64xf32>
    %56 = arith.cmpf oge, %54, %55 : vector<8x64xf32>
    %cst_36 = arith.constant 1.000000e-01 : f32
    %57 = vector.broadcast %cst_36 : f32 to vector<8x64xf32>
    %58 = arith.mulf %54, %57 : vector<8x64xf32>
    %59 = arith.select %56, %54, %58 : vector<8x64xi1>, vector<8x64xf32>
    %60 = arith.truncf %59 : vector<8x64xf32> to vector<8x64xbf16>
    %cst_37 = arith.constant 0.000000e+00 : bf16
    %61 = vector.broadcast %cst_37 : bf16 to vector<8x18xbf16>
    %62 = vector.extract_strided_slice %60 {offsets = [0, 0], sizes = [8, 46], strides = [1, 1]} : vector<8x64xbf16> to vector<8x46xbf16>
    %63 = tpu.concatenate %61, %62 in 1 : vector<8x18xbf16>, vector<8x46xbf16> -> vector<8x64xbf16>
    %c0_38 = arith.constant 0 : index
    %c0_39 = arith.constant 0 : index
    %c0_40 = arith.constant 0 : index
    %64 = vector.load %arg7[%c0_38, %c0_39, %c0_40] : memref<3x8x8xbf16, #tpu.memory_space<vmem>>, vector<1x8x8xbf16>
    %65 = vector.shape_cast %64 : vector<1x8x8xbf16> to vector<8x8xbf16>
    %cst_41 = arith.constant dense<0.000000e+00> : vector<8x64xf32>
    %66 = tpu.matmul %65, %63, %cst_41 {dimension_numbers = #tpu.dot_dimension_numbers<[1], [0], [0], [1], [0, 0, 1, 1], [], []>} : vector<8x8xbf16>, vector<8x64xbf16>, vector<8x64xf32> -> vector<8x64xf32>
    %cst_42 = arith.constant 0.000000e+00 : bf16
    %67 = vector.broadcast %cst_42 : bf16 to vector<8x9xbf16>
    %68 = vector.extract_strided_slice %60 {offsets = [0, 0], sizes = [8, 55], strides = [1, 1]} : vector<8x64xbf16> to vector<8x55xbf16>
    %69 = tpu.concatenate %67, %68 in 1 : vector<8x9xbf16>, vector<8x55xbf16> -> vector<8x64xbf16>
    %c1_43 = arith.constant 1 : index
    %c0_44 = arith.constant 0 : index
    %c0_45 = arith.constant 0 : index
    %70 = vector.load %arg7[%c1_43, %c0_44, %c0_45] : memref<3x8x8xbf16, #tpu.memory_space<vmem>>, vector<1x8x8xbf16>
    %71 = vector.shape_cast %70 : vector<1x8x8xbf16> to vector<8x8xbf16>
    %cst_46 = arith.constant dense<0.000000e+00> : vector<8x64xf32>
    %72 = tpu.matmul %71, %69, %cst_46 {dimension_numbers = #tpu.dot_dimension_numbers<[1], [0], [0], [1], [0, 0, 1, 1], [], []>} : vector<8x8xbf16>, vector<8x64xbf16>, vector<8x64xf32> -> vector<8x64xf32>
    %73 = arith.addf %66, %72 : vector<8x64xf32>
    %c2_47 = arith.constant 2 : index
    %c0_48 = arith.constant 0 : index
    %c0_49 = arith.constant 0 : index
    %74 = vector.load %arg7[%c2_47, %c0_48, %c0_49] : memref<3x8x8xbf16, #tpu.memory_space<vmem>>, vector<1x8x8xbf16>
    %75 = vector.shape_cast %74 : vector<1x8x8xbf16> to vector<8x8xbf16>
    %cst_50 = arith.constant dense<0.000000e+00> : vector<8x64xf32>
    %76 = tpu.matmul %75, %60, %cst_50 {dimension_numbers = #tpu.dot_dimension_numbers<[1], [0], [0], [1], [0, 0, 1, 1], [], []>} : vector<8x8xbf16>, vector<8x64xbf16>, vector<8x64xf32> -> vector<8x64xf32>
    %77 = arith.addf %73, %76 : vector<8x64xf32>
    %c0_51 = arith.constant 0 : index
    %c0_52 = arith.constant 0 : index
    %78 = vector.load %arg8[%c0_51, %c0_52] : memref<8x1xf32, #tpu.memory_space<vmem>>, vector<8x1xf32>
    %79 = vector.broadcast %78 : vector<8x1xf32> to vector<8x64xf32>
    %80 = arith.addf %77, %79 : vector<8x64xf32>
    %cst_53 = arith.constant 0.000000e+00 : f32
    %81 = vector.broadcast %cst_53 : f32 to vector<8x64xf32>
    %82 = arith.cmpf oge, %80, %81 : vector<8x64xf32>
    %cst_54 = arith.constant 1.000000e-01 : f32
    %83 = vector.broadcast %cst_54 : f32 to vector<8x64xf32>
    %84 = arith.mulf %80, %83 : vector<8x64xf32>
    %85 = arith.select %82, %80, %84 : vector<8x64xi1>, vector<8x64xf32>
    %86 = arith.truncf %85 : vector<8x64xf32> to vector<8x64xbf16>
    %cst_55 = arith.constant 0.000000e+00 : bf16
    %87 = vector.broadcast %cst_55 : bf16 to vector<8x54xbf16>
    %88 = vector.extract_strided_slice %86 {offsets = [0, 0], sizes = [8, 10], strides = [1, 1]} : vector<8x64xbf16> to vector<8x10xbf16>
    %89 = tpu.concatenate %87, %88 in 1 : vector<8x54xbf16>, vector<8x10xbf16> -> vector<8x64xbf16>
    %c0_56 = arith.constant 0 : index
    %c0_57 = arith.constant 0 : index
    %c0_58 = arith.constant 0 : index
    %90 = vector.load %arg9[%c0_56, %c0_57, %c0_58] : memref<3x8x8xbf16, #tpu.memory_space<vmem>>, vector<1x8x8xbf16>
    %91 = vector.shape_cast %90 : vector<1x8x8xbf16> to vector<8x8xbf16>
    %cst_59 = arith.constant dense<0.000000e+00> : vector<8x64xf32>
    %92 = tpu.matmul %91, %89, %cst_59 {dimension_numbers = #tpu.dot_dimension_numbers<[1], [0], [0], [1], [0, 0, 1, 1], [], []>} : vector<8x8xbf16>, vector<8x64xbf16>, vector<8x64xf32> -> vector<8x64xf32>
    %cst_60 = arith.constant 0.000000e+00 : bf16
    %93 = vector.broadcast %cst_60 : bf16 to vector<8x27xbf16>
    %94 = vector.extract_strided_slice %86 {offsets = [0, 0], sizes = [8, 37], strides = [1, 1]} : vector<8x64xbf16> to vector<8x37xbf16>
    %95 = tpu.concatenate %93, %94 in 1 : vector<8x27xbf16>, vector<8x37xbf16> -> vector<8x64xbf16>
    %c1_61 = arith.constant 1 : index
    %c0_62 = arith.constant 0 : index
    %c0_63 = arith.constant 0 : index
    %96 = vector.load %arg9[%c1_61, %c0_62, %c0_63] : memref<3x8x8xbf16, #tpu.memory_space<vmem>>, vector<1x8x8xbf16>
    %97 = vector.shape_cast %96 : vector<1x8x8xbf16> to vector<8x8xbf16>
    %cst_64 = arith.constant dense<0.000000e+00> : vector<8x64xf32>
    %98 = tpu.matmul %97, %95, %cst_64 {dimension_numbers = #tpu.dot_dimension_numbers<[1], [0], [0], [1], [0, 0, 1, 1], [], []>} : vector<8x8xbf16>, vector<8x64xbf16>, vector<8x64xf32> -> vector<8x64xf32>
    %99 = arith.addf %92, %98 : vector<8x64xf32>
    %c2_65 = arith.constant 2 : index
    %c0_66 = arith.constant 0 : index
    %c0_67 = arith.constant 0 : index
    %100 = vector.load %arg9[%c2_65, %c0_66, %c0_67] : memref<3x8x8xbf16, #tpu.memory_space<vmem>>, vector<1x8x8xbf16>
    %101 = vector.shape_cast %100 : vector<1x8x8xbf16> to vector<8x8xbf16>
    %cst_68 = arith.constant dense<0.000000e+00> : vector<8x64xf32>
    %102 = tpu.matmul %101, %86, %cst_68 {dimension_numbers = #tpu.dot_dimension_numbers<[1], [0], [0], [1], [0, 0, 1, 1], [], []>} : vector<8x8xbf16>, vector<8x64xbf16>, vector<8x64xf32> -> vector<8x64xf32>
    %103 = arith.addf %99, %102 : vector<8x64xf32>
    %c0_69 = arith.constant 0 : index
    %c0_70 = arith.constant 0 : index
    %104 = vector.load %arg10[%c0_69, %c0_70] : memref<8x1xf32, #tpu.memory_space<vmem>>, vector<8x1xf32>
    %105 = vector.broadcast %104 : vector<8x1xf32> to vector<8x64xf32>
    %106 = arith.addf %103, %105 : vector<8x64xf32>
    %107 = arith.addf %106, %54 : vector<8x64xf32>
    %108 = arith.truncf %107 : vector<8x64xf32> to vector<8x64xbf16>
    %cst_71 = arith.constant 0.000000e+00 : bf16
    %109 = vector.broadcast %cst_71 : bf16 to vector<8x2xbf16>
    %110 = vector.extract_strided_slice %108 {offsets = [0, 0], sizes = [8, 62], strides = [1, 1]} : vector<8x64xbf16> to vector<8x62xbf16>
    %111 = tpu.concatenate %109, %110 in 1 : vector<8x2xbf16>, vector<8x62xbf16> -> vector<8x64xbf16>
    %c0_72 = arith.constant 0 : index
    %c0_73 = arith.constant 0 : index
    %c0_74 = arith.constant 0 : index
    %112 = vector.load %arg11[%c0_72, %c0_73, %c0_74] : memref<3x8x8xbf16, #tpu.memory_space<vmem>>, vector<1x8x8xbf16>
    %113 = vector.shape_cast %112 : vector<1x8x8xbf16> to vector<8x8xbf16>
    %cst_75 = arith.constant dense<0.000000e+00> : vector<8x64xf32>
    %114 = tpu.matmul %113, %111, %cst_75 {dimension_numbers = #tpu.dot_dimension_numbers<[1], [0], [0], [1], [0, 0, 1, 1], [], []>} : vector<8x8xbf16>, vector<8x64xbf16>, vector<8x64xf32> -> vector<8x64xf32>
    %cst_76 = arith.constant 0.000000e+00 : bf16
    %115 = vector.broadcast %cst_76 : bf16 to vector<8x1xbf16>
    %116 = vector.extract_strided_slice %108 {offsets = [0, 0], sizes = [8, 63], strides = [1, 1]} : vector<8x64xbf16> to vector<8x63xbf16>
    %117 = tpu.concatenate %115, %116 in 1 : vector<8x1xbf16>, vector<8x63xbf16> -> vector<8x64xbf16>
    %c1_77 = arith.constant 1 : index
    %c0_78 = arith.constant 0 : index
    %c0_79 = arith.constant 0 : index
    %118 = vector.load %arg11[%c1_77, %c0_78, %c0_79] : memref<3x8x8xbf16, #tpu.memory_space<vmem>>, vector<1x8x8xbf16>
    %119 = vector.shape_cast %118 : vector<1x8x8xbf16> to vector<8x8xbf16>
    %cst_80 = arith.constant dense<0.000000e+00> : vector<8x64xf32>
    %120 = tpu.matmul %119, %117, %cst_80 {dimension_numbers = #tpu.dot_dimension_numbers<[1], [0], [0], [1], [0, 0, 1, 1], [], []>} : vector<8x8xbf16>, vector<8x64xbf16>, vector<8x64xf32> -> vector<8x64xf32>
    %121 = arith.addf %114, %120 : vector<8x64xf32>
    %c2_81 = arith.constant 2 : index
    %c0_82 = arith.constant 0 : index
    %c0_83 = arith.constant 0 : index
    %122 = vector.load %arg11[%c2_81, %c0_82, %c0_83] : memref<3x8x8xbf16, #tpu.memory_space<vmem>>, vector<1x8x8xbf16>
    %123 = vector.shape_cast %122 : vector<1x8x8xbf16> to vector<8x8xbf16>
    %cst_84 = arith.constant dense<0.000000e+00> : vector<8x64xf32>
    %124 = tpu.matmul %123, %108, %cst_84 {dimension_numbers = #tpu.dot_dimension_numbers<[1], [0], [0], [1], [0, 0, 1, 1], [], []>} : vector<8x8xbf16>, vector<8x64xbf16>, vector<8x64xf32> -> vector<8x64xf32>
    %125 = arith.addf %121, %124 : vector<8x64xf32>
    %c0_85 = arith.constant 0 : index
    %c0_86 = arith.constant 0 : index
    %126 = vector.load %arg12[%c0_85, %c0_86] : memref<8x1xf32, #tpu.memory_space<vmem>>, vector<8x1xf32>
    %127 = vector.broadcast %126 : vector<8x1xf32> to vector<8x64xf32>
    %128 = arith.addf %125, %127 : vector<8x64xf32>
    %c0_87 = arith.constant 0 : index
    %c0_88 = arith.constant 0 : index
    %c0_89 = arith.constant 0 : index
    %129 = vector.load %arg2[%c0_87, %c0_88, %c0_89] : memref<1x8x64xf32, #tpu.memory_space<vmem>>, vector<1x8x64xf32>
    %130 = vector.shape_cast %129 : vector<1x8x64xf32> to vector<8x64xf32>
    %c0_90 = arith.constant 0 : index
    %c0_91 = arith.constant 0 : index
    %131 = vector.load %arg13[%c0_90, %c0_91] : memref<16x8xbf16, #tpu.memory_space<vmem>>, vector<16x8xbf16>
    %132 = arith.truncf %130 : vector<8x64xf32> to vector<8x64xbf16>
    %cst_92 = arith.constant dense<0.000000e+00> : vector<16x64xf32>
    %133 = tpu.matmul %131, %132, %cst_92 {dimension_numbers = #tpu.dot_dimension_numbers<[1], [0], [0], [1], [0, 0, 1, 1], [], []>} : vector<16x8xbf16>, vector<8x64xbf16>, vector<16x64xf32> -> vector<16x64xf32>
    %c0_93 = arith.constant 0 : index
    %c0_94 = arith.constant 0 : index
    %134 = vector.load %arg14[%c0_93, %c0_94] : memref<16x1xf32, #tpu.memory_space<vmem>>, vector<16x1xf32>
    %135 = vector.broadcast %134 : vector<16x1xf32> to vector<16x64xf32>
    %136 = arith.addf %133, %135 : vector<16x64xf32>
    %137 = vector.extract_strided_slice %136 {offsets = [0, 0], sizes = [8, 64], strides = [1, 1]} : vector<16x64xf32> to vector<8x64xf32>
    %138 = arith.mulf %128, %137 : vector<8x64xf32>
    %139 = vector.extract_strided_slice %136 {offsets = [8, 0], sizes = [8, 64], strides = [1, 1]} : vector<16x64xf32> to vector<8x64xf32>
    %140 = arith.addf %138, %139 : vector<8x64xf32>
    %c0_95 = arith.constant 0 : index
    %c0_96 = arith.constant 0 : index
    %c0_97 = arith.constant 0 : index
    %141 = vector.load %arg15[%c0_95, %c0_96, %c0_97] : memref<1x8x64xf32, #tpu.memory_space<vmem>>, vector<1x8x64xf32>
    %142 = vector.shape_cast %141 : vector<1x8x64xf32> to vector<8x64xf32>
    %143 = vector.shape_cast %140 : vector<8x64xf32> to vector<1x8x64xf32>
    tpu.vector_store %arg15[%c0_95, %c0_96, %c0_97], %143 {strides = array<i32>} : memref<1x8x64xf32, #tpu.memory_space<vmem>>, vector<1x8x64xf32>,
    return
  }
  func.func @transform_0(%arg0: i32) -> (i32, i32, i32) {
    %c0_i32 = arith.constant 0 : i32
    %c0_i32_0 = arith.constant 0 : i32
    %c0_i32_1 = arith.constant 0 : i32
    return %arg0, %c0_i32, %c0_i32_0 : i32, i32, i32
  }
  func.func @transform_1(%arg0: i32) -> (i32, i32, i32) {
    %c0_i32 = arith.constant 0 : i32
    %c0_i32_0 = arith.constant 0 : i32
    %c0_i32_1 = arith.constant 0 : i32
    return %arg0, %c0_i32, %c0_i32_0 : i32, i32, i32
  }
  func.func @transform_2(%arg0: i32) -> (i32, i32, i32) {
    %c0_i32 = arith.constant 0 : i32
    %c0_i32_0 = arith.constant 0 : i32
    %c0_i32_1 = arith.constant 0 : i32
    %c0_i32_2 = arith.constant 0 : i32
    return %c0_i32, %c0_i32_0, %c0_i32_1 : i32, i32, i32
  }
  func.func @transform_3(%arg0: i32) -> (i32, i32) {
    %c0_i32 = arith.constant 0 : i32
    %c0_i32_0 = arith.constant 0 : i32
    %c0_i32_1 = arith.constant 0 : i32
    return %c0_i32, %c0_i32_0 : i32, i32
  }
  func.func @transform_4(%arg0: i32) -> (i32, i32, i32) {
    %c0_i32 = arith.constant 0 : i32
    %c0_i32_0 = arith.constant 0 : i32
    %c0_i32_1 = arith.constant 0 : i32
    %c0_i32_2 = arith.constant 0 : i32
    return %c0_i32, %c0_i32_0, %c0_i32_1 : i32, i32, i32
  }
  func.func @transform_5(%arg0: i32) -> (i32, i32) {
    %c0_i32 = arith.constant 0 : i32
    %c0_i32_0 = arith.constant 0 : i32
    %c0_i32_1 = arith.constant 0 : i32
    return %c0_i32, %c0_i32_0 : i32, i32
  }
  func.func @transform_6(%arg0: i32) -> (i32, i32, i32) {
    %c0_i32 = arith.constant 0 : i32
    %c0_i32_0 = arith.constant 0 : i32
    %c0_i32_1 = arith.constant 0 : i32
    %c0_i32_2 = arith.constant 0 : i32
    return %c0_i32, %c0_i32_0, %c0_i32_1 : i32, i32, i32
  }
  func.func @transform_7(%arg0: i32) -> (i32, i32) {
    %c0_i32 = arith.constant 0 : i32
    %c0_i32_0 = arith.constant 0 : i32
    %c0_i32_1 = arith.constant 0 : i32
    return %c0_i32, %c0_i32_0 : i32, i32
  }
  func.func @transform_8(%arg0: i32) -> (i32, i32, i32) {
    %c0_i32 = arith.constant 0 : i32
    %c0_i32_0 = arith.constant 0 : i32
    %c0_i32_1 = arith.constant 0 : i32
    %c0_i32_2 = arith.constant 0 : i32
    return %c0_i32, %c0_i32_0, %c0_i32_1 : i32, i32, i32
  }
  func.func @transform_9(%arg0: i32) -> (i32, i32) {
    %c0_i32 = arith.constant 0 : i32
    %c0_i32_0 = arith.constant 0 : i32
    %c0_i32_1 = arith.constant 0 : i32
    return %c0_i32, %c0_i32_0 : i32, i32
  }
  func.func @transform_10(%arg0: i32) -> (i32, i32, i32) {
    %c0_i32 = arith.constant 0 : i32
    %c0_i32_0 = arith.constant 0 : i32
    %c0_i32_1 = arith.constant 0 : i32
    %c0_i32_2 = arith.constant 0 : i32
    return %c0_i32, %c0_i32_0, %c0_i32_1 : i32, i32, i32
  }
  func.func @transform_11(%arg0: i32) -> (i32, i32) {
    %c0_i32 = arith.constant 0 : i32
    %c0_i32_0 = arith.constant 0 : i32
    %c0_i32_1 = arith.constant 0 : i32
    return %c0_i32, %c0_i32_0 : i32, i32
  }
  func.func @transform_12(%arg0: i32) -> (i32, i32) {
    %c0_i32 = arith.constant 0 : i32
    %c0_i32_0 = arith.constant 0 : i32
    %c0_i32_1 = arith.constant 0 : i32
    return %c0_i32, %c0_i32_0 : i32, i32
  }
  func.func @transform_13(%arg0: i32) -> (i32, i32) {
    %c0_i32 = arith.constant 0 : i32
    %c0_i32_0 = arith.constant 0 : i32
    %c0_i32_1 = arith.constant 0 : i32
    return %c0_i32, %c0_i32_0 : i32, i32
  }
  func.func @transform_14(%arg0: i32) -> (i32, i32, i32) {
    %c0_i32 = arith.constant 0 : i32
    %c0_i32_0 = arith.constant 0 : i32
    %c0_i32_1 = arith.constant 0 : i32
    return %arg0, %c0_i32, %c0_i32_0 : i32, i32, i32
  }
}

module attributes {stable_mosaic.version = 11 : i64} {
  func.func @kernel(%arg0: i32, %arg1: memref<1x8x128xf32, #tpu.memory_space<vmem>>, %arg2: memref<3x8x8xbf16, #tpu.memory_space<vmem>>, %arg3: memref<8x1xf32, #tpu.memory_space<vmem>>, %arg4: memref<3x8x8xbf16, #tpu.memory_space<vmem>>, %arg5: memref<8x1xf32, #tpu.memory_space<vmem>>, %arg6: memref<3x8x8xbf16, #tpu.memory_space<vmem>>, %arg7: memref<8x1xf32, #tpu.memory_space<vmem>>, %arg8: memref<3x8x8xbf16, #tpu.memory_space<vmem>>, %arg9: memref<8x1xf32, #tpu.memory_space<vmem>>, %arg10: memref<3x8x8xbf16, #tpu.memory_space<vmem>>, %arg11: memref<8x1xf32, #tpu.memory_space<vmem>>, %arg12: memref<3x1x8xbf16, #tpu.memory_space<vmem>>, %arg13: memref<1x1xf32, #tpu.memory_space<vmem>>, %arg14: memref<1x1x128xf32, #tpu.memory_space<vmem>>) attributes {dimension_semantics = [#tpu.dimension_semantics<parallel>], iteration_bounds = array<i64: 2>, scalar_prefetch = 0 : i64, scratch_operands = 0 : i64, tpu.core_type = #tpu.core_type<tc>, window_params = [{transform_indices = @transform_0, window_bounds = array<i64: 1, 8, 128>}, {pipeline_mode = #tpu.pipeline_mode<synchronous>, transform_indices = @transform_1, window_bounds = array<i64: 3, 8, 8>}, {pipeline_mode = #tpu.pipeline_mode<synchronous>, transform_indices = @transform_2, window_bounds = array<i64: 8, 1>}, {pipeline_mode = #tpu.pipeline_mode<synchronous>, transform_indices = @transform_3, window_bounds = array<i64: 3, 8, 8>}, {pipeline_mode = #tpu.pipeline_mode<synchronous>, transform_indices = @transform_4, window_bounds = array<i64: 8, 1>}, {pipeline_mode = #tpu.pipeline_mode<synchronous>, transform_indices = @transform_5, window_bounds = array<i64: 3, 8, 8>}, {pipeline_mode = #tpu.pipeline_mode<synchronous>, transform_indices = @transform_6, window_bounds = array<i64: 8, 1>}, {pipeline_mode = #tpu.pipeline_mode<synchronous>, transform_indices = @transform_7, window_bounds = array<i64: 3, 8, 8>}, {pipeline_mode = #tpu.pipeline_mode<synchronous>, transform_indices = @transform_8, window_bounds = array<i64: 8, 1>}, {pipeline_mode = #tpu.pipeline_mode<synchronous>, transform_indices = @transform_9, window_bounds = array<i64: 3, 8, 8>}, {pipeline_mode = #tpu.pipeline_mode<synchronous>, transform_indices = @transform_10, window_bounds = array<i64: 8, 1>}, {pipeline_mode = #tpu.pipeline_mode<synchronous>, transform_indices = @transform_11, window_bounds = array<i64: 3, 1, 8>}, {pipeline_mode = #tpu.pipeline_mode<synchronous>, transform_indices = @transform_12, window_bounds = array<i64: 1, 1>}, {transform_indices = @transform_13, window_bounds = array<i64: 1, 1, 128>}]} {
    %c0 = arith.constant 0 : index
    %c0_0 = arith.constant 0 : index
    %c0_1 = arith.constant 0 : index
    %0 = vector.load %arg1[%c0, %c0_0, %c0_1] : memref<1x8x128xf32, #tpu.memory_space<vmem>>, vector<1x8x128xf32>
    %1 = vector.shape_cast %0 : vector<1x8x128xf32> to vector<8x128xf32>
    %cst = arith.constant 0.000000e+00 : f32
    %2 = vector.broadcast %cst : f32 to vector<8x128xf32>
    %3 = arith.cmpf oge, %1, %2 : vector<8x128xf32>
    %cst_2 = arith.constant 1.000000e-01 : f32
    %4 = vector.broadcast %cst_2 : f32 to vector<8x128xf32>
    %5 = arith.mulf %1, %4 : vector<8x128xf32>
    %6 = arith.select %3, %1, %5 : vector<8x128xi1>, vector<8x128xf32>
    %7 = arith.truncf %6 : vector<8x128xf32> to vector<8x128xbf16>
    %cst_3 = arith.constant 0.000000e+00 : bf16
    %8 = vector.broadcast %cst_3 : bf16 to vector<8x2xbf16>
    %9 = vector.extract_strided_slice %7 {offsets = [0, 0], sizes = [8, 126], strides = [1, 1]} : vector<8x128xbf16> to vector<8x126xbf16>
    %10 = tpu.concatenate %8, %9 in 1 : vector<8x2xbf16>, vector<8x126xbf16> -> vector<8x128xbf16>
    %c0_4 = arith.constant 0 : index
    %c0_5 = arith.constant 0 : index
    %c0_6 = arith.constant 0 : index
    %11 = vector.load %arg2[%c0_4, %c0_5, %c0_6] : memref<3x8x8xbf16, #tpu.memory_space<vmem>>, vector<1x8x8xbf16>
    %12 = vector.shape_cast %11 : vector<1x8x8xbf16> to vector<8x8xbf16>
    %cst_7 = arith.constant dense<0.000000e+00> : vector<8x128xf32>
    %13 = tpu.matmul %12, %10, %cst_7 {dimension_numbers = #tpu.dot_dimension_numbers<[1], [0], [0], [1], [0, 0, 1, 1], [], []>} : vector<8x8xbf16>, vector<8x128xbf16>, vector<8x128xf32> -> vector<8x128xf32>
    %cst_8 = arith.constant 0.000000e+00 : bf16
    %14 = vector.broadcast %cst_8 : bf16 to vector<8x1xbf16>
    %15 = vector.extract_strided_slice %7 {offsets = [0, 0], sizes = [8, 127], strides = [1, 1]} : vector<8x128xbf16> to vector<8x127xbf16>
    %16 = tpu.concatenate %14, %15 in 1 : vector<8x1xbf16>, vector<8x127xbf16> -> vector<8x128xbf16>
    %c1 = arith.constant 1 : index
    %c0_9 = arith.constant 0 : index
    %c0_10 = arith.constant 0 : index
    %17 = vector.load %arg2[%c1, %c0_9, %c0_10] : memref<3x8x8xbf16, #tpu.memory_space<vmem>>, vector<1x8x8xbf16>
    %18 = vector.shape_cast %17 : vector<1x8x8xbf16> to vector<8x8xbf16>
    %cst_11 = arith.constant dense<0.000000e+00> : vector<8x128xf32>
    %19 = tpu.matmul %18, %16, %cst_11 {dimension_numbers = #tpu.dot_dimension_numbers<[1], [0], [0], [1], [0, 0, 1, 1], [], []>} : vector<8x8xbf16>, vector<8x128xbf16>, vector<8x128xf32> -> vector<8x128xf32>
    %20 = arith.addf %13, %19 : vector<8x128xf32>
    %c2 = arith.constant 2 : index
    %c0_12 = arith.constant 0 : index
    %c0_13 = arith.constant 0 : index
    %21 = vector.load %arg2[%c2, %c0_12, %c0_13] : memref<3x8x8xbf16, #tpu.memory_space<vmem>>, vector<1x8x8xbf16>
    %22 = vector.shape_cast %21 : vector<1x8x8xbf16> to vector<8x8xbf16>
    %cst_14 = arith.constant dense<0.000000e+00> : vector<8x128xf32>
    %23 = tpu.matmul %22, %7, %cst_14 {dimension_numbers = #tpu.dot_dimension_numbers<[1], [0], [0], [1], [0, 0, 1, 1], [], []>} : vector<8x8xbf16>, vector<8x128xbf16>, vector<8x128xf32> -> vector<8x128xf32>
    %24 = arith.addf %20, %23 : vector<8x128xf32>
    %c0_15 = arith.constant 0 : index
    %c0_16 = arith.constant 0 : index
    %25 = vector.load %arg3[%c0_15, %c0_16] : memref<8x1xf32, #tpu.memory_space<vmem>>, vector<8x1xf32>
    %26 = vector.broadcast %25 : vector<8x1xf32> to vector<8x128xf32>
    %27 = arith.addf %24, %26 : vector<8x128xf32>
    %cst_17 = arith.constant 0.000000e+00 : f32
    %28 = vector.broadcast %cst_17 : f32 to vector<8x128xf32>
    %29 = arith.cmpf oge, %27, %28 : vector<8x128xf32>
    %cst_18 = arith.constant 1.000000e-01 : f32
    %30 = vector.broadcast %cst_18 : f32 to vector<8x128xf32>
    %31 = arith.mulf %27, %30 : vector<8x128xf32>
    %32 = arith.select %29, %27, %31 : vector<8x128xi1>, vector<8x128xf32>
    %33 = arith.truncf %32 : vector<8x128xf32> to vector<8x128xbf16>
    %cst_19 = arith.constant 0.000000e+00 : bf16
    %34 = vector.broadcast %cst_19 : bf16 to vector<8x6xbf16>
    %35 = vector.extract_strided_slice %33 {offsets = [0, 0], sizes = [8, 122], strides = [1, 1]} : vector<8x128xbf16> to vector<8x122xbf16>
    %36 = tpu.concatenate %34, %35 in 1 : vector<8x6xbf16>, vector<8x122xbf16> -> vector<8x128xbf16>
    %c0_20 = arith.constant 0 : index
    %c0_21 = arith.constant 0 : index
    %c0_22 = arith.constant 0 : index
    %37 = vector.load %arg4[%c0_20, %c0_21, %c0_22] : memref<3x8x8xbf16, #tpu.memory_space<vmem>>, vector<1x8x8xbf16>
    %38 = vector.shape_cast %37 : vector<1x8x8xbf16> to vector<8x8xbf16>
    %cst_23 = arith.constant dense<0.000000e+00> : vector<8x128xf32>
    %39 = tpu.matmul %38, %36, %cst_23 {dimension_numbers = #tpu.dot_dimension_numbers<[1], [0], [0], [1], [0, 0, 1, 1], [], []>} : vector<8x8xbf16>, vector<8x128xbf16>, vector<8x128xf32> -> vector<8x128xf32>
    %cst_24 = arith.constant 0.000000e+00 : bf16
    %40 = vector.broadcast %cst_24 : bf16 to vector<8x3xbf16>
    %41 = vector.extract_strided_slice %33 {offsets = [0, 0], sizes = [8, 125], strides = [1, 1]} : vector<8x128xbf16> to vector<8x125xbf16>
    %42 = tpu.concatenate %40, %41 in 1 : vector<8x3xbf16>, vector<8x125xbf16> -> vector<8x128xbf16>
    %c1_25 = arith.constant 1 : index
    %c0_26 = arith.constant 0 : index
    %c0_27 = arith.constant 0 : index
    %43 = vector.load %arg4[%c1_25, %c0_26, %c0_27] : memref<3x8x8xbf16, #tpu.memory_space<vmem>>, vector<1x8x8xbf16>
    %44 = vector.shape_cast %43 : vector<1x8x8xbf16> to vector<8x8xbf16>
    %cst_28 = arith.constant dense<0.000000e+00> : vector<8x128xf32>
    %45 = tpu.matmul %44, %42, %cst_28 {dimension_numbers = #tpu.dot_dimension_numbers<[1], [0], [0], [1], [0, 0, 1, 1], [], []>} : vector<8x8xbf16>, vector<8x128xbf16>, vector<8x128xf32> -> vector<8x128xf32>
    %46 = arith.addf %39, %45 : vector<8x128xf32>
    %c2_29 = arith.constant 2 : index
    %c0_30 = arith.constant 0 : index
    %c0_31 = arith.constant 0 : index
    %47 = vector.load %arg4[%c2_29, %c0_30, %c0_31] : memref<3x8x8xbf16, #tpu.memory_space<vmem>>, vector<1x8x8xbf16>
    %48 = vector.shape_cast %47 : vector<1x8x8xbf16> to vector<8x8xbf16>
    %cst_32 = arith.constant dense<0.000000e+00> : vector<8x128xf32>
    %49 = tpu.matmul %48, %33, %cst_32 {dimension_numbers = #tpu.dot_dimension_numbers<[1], [0], [0], [1], [0, 0, 1, 1], [], []>} : vector<8x8xbf16>, vector<8x128xbf16>, vector<8x128xf32> -> vector<8x128xf32>
    %50 = arith.addf %46, %49 : vector<8x128xf32>
    %c0_33 = arith.constant 0 : index
    %c0_34 = arith.constant 0 : index
    %51 = vector.load %arg5[%c0_33, %c0_34] : memref<8x1xf32, #tpu.memory_space<vmem>>, vector<8x1xf32>
    %52 = vector.broadcast %51 : vector<8x1xf32> to vector<8x128xf32>
    %53 = arith.addf %50, %52 : vector<8x128xf32>
    %54 = arith.addf %53, %1 : vector<8x128xf32>
    %cst_35 = arith.constant 0.000000e+00 : f32
    %55 = vector.broadcast %cst_35 : f32 to vector<8x128xf32>
    %56 = arith.cmpf oge, %54, %55 : vector<8x128xf32>
    %cst_36 = arith.constant 1.000000e-01 : f32
    %57 = vector.broadcast %cst_36 : f32 to vector<8x128xf32>
    %58 = arith.mulf %54, %57 : vector<8x128xf32>
    %59 = arith.select %56, %54, %58 : vector<8x128xi1>, vector<8x128xf32>
    %60 = arith.truncf %59 : vector<8x128xf32> to vector<8x128xbf16>
    %cst_37 = arith.constant 0.000000e+00 : bf16
    %61 = vector.broadcast %cst_37 : bf16 to vector<8x18xbf16>
    %62 = vector.extract_strided_slice %60 {offsets = [0, 0], sizes = [8, 110], strides = [1, 1]} : vector<8x128xbf16> to vector<8x110xbf16>
    %63 = tpu.concatenate %61, %62 in 1 : vector<8x18xbf16>, vector<8x110xbf16> -> vector<8x128xbf16>
    %c0_38 = arith.constant 0 : index
    %c0_39 = arith.constant 0 : index
    %c0_40 = arith.constant 0 : index
    %64 = vector.load %arg6[%c0_38, %c0_39, %c0_40] : memref<3x8x8xbf16, #tpu.memory_space<vmem>>, vector<1x8x8xbf16>
    %65 = vector.shape_cast %64 : vector<1x8x8xbf16> to vector<8x8xbf16>
    %cst_41 = arith.constant dense<0.000000e+00> : vector<8x128xf32>
    %66 = tpu.matmul %65, %63, %cst_41 {dimension_numbers = #tpu.dot_dimension_numbers<[1], [0], [0], [1], [0, 0, 1, 1], [], []>} : vector<8x8xbf16>, vector<8x128xbf16>, vector<8x128xf32> -> vector<8x128xf32>
    %cst_42 = arith.constant 0.000000e+00 : bf16
    %67 = vector.broadcast %cst_42 : bf16 to vector<8x9xbf16>
    %68 = vector.extract_strided_slice %60 {offsets = [0, 0], sizes = [8, 119], strides = [1, 1]} : vector<8x128xbf16> to vector<8x119xbf16>
    %69 = tpu.concatenate %67, %68 in 1 : vector<8x9xbf16>, vector<8x119xbf16> -> vector<8x128xbf16>
    %c1_43 = arith.constant 1 : index
    %c0_44 = arith.constant 0 : index
    %c0_45 = arith.constant 0 : index
    %70 = vector.load %arg6[%c1_43, %c0_44, %c0_45] : memref<3x8x8xbf16, #tpu.memory_space<vmem>>, vector<1x8x8xbf16>
    %71 = vector.shape_cast %70 : vector<1x8x8xbf16> to vector<8x8xbf16>
    %cst_46 = arith.constant dense<0.000000e+00> : vector<8x128xf32>
    %72 = tpu.matmul %71, %69, %cst_46 {dimension_numbers = #tpu.dot_dimension_numbers<[1], [0], [0], [1], [0, 0, 1, 1], [], []>} : vector<8x8xbf16>, vector<8x128xbf16>, vector<8x128xf32> -> vector<8x128xf32>
    %73 = arith.addf %66, %72 : vector<8x128xf32>
    %c2_47 = arith.constant 2 : index
    %c0_48 = arith.constant 0 : index
    %c0_49 = arith.constant 0 : index
    %74 = vector.load %arg6[%c2_47, %c0_48, %c0_49] : memref<3x8x8xbf16, #tpu.memory_space<vmem>>, vector<1x8x8xbf16>
    %75 = vector.shape_cast %74 : vector<1x8x8xbf16> to vector<8x8xbf16>
    %cst_50 = arith.constant dense<0.000000e+00> : vector<8x128xf32>
    %76 = tpu.matmul %75, %60, %cst_50 {dimension_numbers = #tpu.dot_dimension_numbers<[1], [0], [0], [1], [0, 0, 1, 1], [], []>} : vector<8x8xbf16>, vector<8x128xbf16>, vector<8x128xf32> -> vector<8x128xf32>
    %77 = arith.addf %73, %76 : vector<8x128xf32>
    %c0_51 = arith.constant 0 : index
    %c0_52 = arith.constant 0 : index
    %78 = vector.load %arg7[%c0_51, %c0_52] : memref<8x1xf32, #tpu.memory_space<vmem>>, vector<8x1xf32>
    %79 = vector.broadcast %78 : vector<8x1xf32> to vector<8x128xf32>
    %80 = arith.addf %77, %79 : vector<8x128xf32>
    %cst_53 = arith.constant 0.000000e+00 : f32
    %81 = vector.broadcast %cst_53 : f32 to vector<8x128xf32>
    %82 = arith.cmpf oge, %80, %81 : vector<8x128xf32>
    %cst_54 = arith.constant 1.000000e-01 : f32
    %83 = vector.broadcast %cst_54 : f32 to vector<8x128xf32>
    %84 = arith.mulf %80, %83 : vector<8x128xf32>
    %85 = arith.select %82, %80, %84 : vector<8x128xi1>, vector<8x128xf32>
    %86 = arith.truncf %85 : vector<8x128xf32> to vector<8x128xbf16>
    %cst_55 = arith.constant 0.000000e+00 : bf16
    %87 = vector.broadcast %cst_55 : bf16 to vector<8x54xbf16>
    %88 = vector.extract_strided_slice %86 {offsets = [0, 0], sizes = [8, 74], strides = [1, 1]} : vector<8x128xbf16> to vector<8x74xbf16>
    %89 = tpu.concatenate %87, %88 in 1 : vector<8x54xbf16>, vector<8x74xbf16> -> vector<8x128xbf16>
    %c0_56 = arith.constant 0 : index
    %c0_57 = arith.constant 0 : index
    %c0_58 = arith.constant 0 : index
    %90 = vector.load %arg8[%c0_56, %c0_57, %c0_58] : memref<3x8x8xbf16, #tpu.memory_space<vmem>>, vector<1x8x8xbf16>
    %91 = vector.shape_cast %90 : vector<1x8x8xbf16> to vector<8x8xbf16>
    %cst_59 = arith.constant dense<0.000000e+00> : vector<8x128xf32>
    %92 = tpu.matmul %91, %89, %cst_59 {dimension_numbers = #tpu.dot_dimension_numbers<[1], [0], [0], [1], [0, 0, 1, 1], [], []>} : vector<8x8xbf16>, vector<8x128xbf16>, vector<8x128xf32> -> vector<8x128xf32>
    %cst_60 = arith.constant 0.000000e+00 : bf16
    %93 = vector.broadcast %cst_60 : bf16 to vector<8x27xbf16>
    %94 = vector.extract_strided_slice %86 {offsets = [0, 0], sizes = [8, 101], strides = [1, 1]} : vector<8x128xbf16> to vector<8x101xbf16>
    %95 = tpu.concatenate %93, %94 in 1 : vector<8x27xbf16>, vector<8x101xbf16> -> vector<8x128xbf16>
    %c1_61 = arith.constant 1 : index
    %c0_62 = arith.constant 0 : index
    %c0_63 = arith.constant 0 : index
    %96 = vector.load %arg8[%c1_61, %c0_62, %c0_63] : memref<3x8x8xbf16, #tpu.memory_space<vmem>>, vector<1x8x8xbf16>
    %97 = vector.shape_cast %96 : vector<1x8x8xbf16> to vector<8x8xbf16>
    %cst_64 = arith.constant dense<0.000000e+00> : vector<8x128xf32>
    %98 = tpu.matmul %97, %95, %cst_64 {dimension_numbers = #tpu.dot_dimension_numbers<[1], [0], [0], [1], [0, 0, 1, 1], [], []>} : vector<8x8xbf16>, vector<8x128xbf16>, vector<8x128xf32> -> vector<8x128xf32>
    %99 = arith.addf %92, %98 : vector<8x128xf32>
    %c2_65 = arith.constant 2 : index
    %c0_66 = arith.constant 0 : index
    %c0_67 = arith.constant 0 : index
    %100 = vector.load %arg8[%c2_65, %c0_66, %c0_67] : memref<3x8x8xbf16, #tpu.memory_space<vmem>>, vector<1x8x8xbf16>
    %101 = vector.shape_cast %100 : vector<1x8x8xbf16> to vector<8x8xbf16>
    %cst_68 = arith.constant dense<0.000000e+00> : vector<8x128xf32>
    %102 = tpu.matmul %101, %86, %cst_68 {dimension_numbers = #tpu.dot_dimension_numbers<[1], [0], [0], [1], [0, 0, 1, 1], [], []>} : vector<8x8xbf16>, vector<8x128xbf16>, vector<8x128xf32> -> vector<8x128xf32>
    %103 = arith.addf %99, %102 : vector<8x128xf32>
    %c0_69 = arith.constant 0 : index
    %c0_70 = arith.constant 0 : index
    %104 = vector.load %arg9[%c0_69, %c0_70] : memref<8x1xf32, #tpu.memory_space<vmem>>, vector<8x1xf32>
    %105 = vector.broadcast %104 : vector<8x1xf32> to vector<8x128xf32>
    %106 = arith.addf %103, %105 : vector<8x128xf32>
    %107 = arith.addf %106, %54 : vector<8x128xf32>
    %108 = arith.truncf %107 : vector<8x128xf32> to vector<8x128xbf16>
    %cst_71 = arith.constant 0.000000e+00 : bf16
    %109 = vector.broadcast %cst_71 : bf16 to vector<8x2xbf16>
    %110 = vector.extract_strided_slice %108 {offsets = [0, 0], sizes = [8, 126], strides = [1, 1]} : vector<8x128xbf16> to vector<8x126xbf16>
    %111 = tpu.concatenate %109, %110 in 1 : vector<8x2xbf16>, vector<8x126xbf16> -> vector<8x128xbf16>
    %c0_72 = arith.constant 0 : index
    %c0_73 = arith.constant 0 : index
    %c0_74 = arith.constant 0 : index
    %112 = vector.load %arg10[%c0_72, %c0_73, %c0_74] : memref<3x8x8xbf16, #tpu.memory_space<vmem>>, vector<1x8x8xbf16>
    %113 = vector.shape_cast %112 : vector<1x8x8xbf16> to vector<8x8xbf16>
    %cst_75 = arith.constant dense<0.000000e+00> : vector<8x128xf32>
    %114 = tpu.matmul %113, %111, %cst_75 {dimension_numbers = #tpu.dot_dimension_numbers<[1], [0], [0], [1], [0, 0, 1, 1], [], []>} : vector<8x8xbf16>, vector<8x128xbf16>, vector<8x128xf32> -> vector<8x128xf32>
    %cst_76 = arith.constant 0.000000e+00 : bf16
    %115 = vector.broadcast %cst_76 : bf16 to vector<8x1xbf16>
    %116 = vector.extract_strided_slice %108 {offsets = [0, 0], sizes = [8, 127], strides = [1, 1]} : vector<8x128xbf16> to vector<8x127xbf16>
    %117 = tpu.concatenate %115, %116 in 1 : vector<8x1xbf16>, vector<8x127xbf16> -> vector<8x128xbf16>
    %c1_77 = arith.constant 1 : index
    %c0_78 = arith.constant 0 : index
    %c0_79 = arith.constant 0 : index
    %118 = vector.load %arg10[%c1_77, %c0_78, %c0_79] : memref<3x8x8xbf16, #tpu.memory_space<vmem>>, vector<1x8x8xbf16>
    %119 = vector.shape_cast %118 : vector<1x8x8xbf16> to vector<8x8xbf16>
    %cst_80 = arith.constant dense<0.000000e+00> : vector<8x128xf32>
    %120 = tpu.matmul %119, %117, %cst_80 {dimension_numbers = #tpu.dot_dimension_numbers<[1], [0], [0], [1], [0, 0, 1, 1], [], []>} : vector<8x8xbf16>, vector<8x128xbf16>, vector<8x128xf32> -> vector<8x128xf32>
    %121 = arith.addf %114, %120 : vector<8x128xf32>
    %c2_81 = arith.constant 2 : index
    %c0_82 = arith.constant 0 : index
    %c0_83 = arith.constant 0 : index
    %122 = vector.load %arg10[%c2_81, %c0_82, %c0_83] : memref<3x8x8xbf16, #tpu.memory_space<vmem>>, vector<1x8x8xbf16>
    %123 = vector.shape_cast %122 : vector<1x8x8xbf16> to vector<8x8xbf16>
    %cst_84 = arith.constant dense<0.000000e+00> : vector<8x128xf32>
    %124 = tpu.matmul %123, %108, %cst_84 {dimension_numbers = #tpu.dot_dimension_numbers<[1], [0], [0], [1], [0, 0, 1, 1], [], []>} : vector<8x8xbf16>, vector<8x128xbf16>, vector<8x128xf32> -> vector<8x128xf32>
    %125 = arith.addf %121, %124 : vector<8x128xf32>
    %c0_85 = arith.constant 0 : index
    %c0_86 = arith.constant 0 : index
    %126 = vector.load %arg11[%c0_85, %c0_86] : memref<8x1xf32, #tpu.memory_space<vmem>>, vector<8x1xf32>
    %127 = vector.broadcast %126 : vector<8x1xf32> to vector<8x128xf32>
    %128 = arith.addf %125, %127 : vector<8x128xf32>
    %129 = arith.truncf %128 : vector<8x128xf32> to vector<8x128xbf16>
    %cst_87 = arith.constant 0.000000e+00 : bf16
    %130 = vector.broadcast %cst_87 : bf16 to vector<8x2xbf16>
    %131 = vector.extract_strided_slice %129 {offsets = [0, 0], sizes = [8, 126], strides = [1, 1]} : vector<8x128xbf16> to vector<8x126xbf16>
    %132 = tpu.concatenate %130, %131 in 1 : vector<8x2xbf16>, vector<8x126xbf16> -> vector<8x128xbf16>
    %c0_88 = arith.constant 0 : index
    %c0_89 = arith.constant 0 : index
    %c0_90 = arith.constant 0 : index
    %133 = vector.load %arg12[%c0_88, %c0_89, %c0_90] : memref<3x1x8xbf16, #tpu.memory_space<vmem>>, vector<1x1x8xbf16>
    %134 = vector.shape_cast %133 : vector<1x1x8xbf16> to vector<1x8xbf16>
    %cst_91 = arith.constant dense<0.000000e+00> : vector<1x128xf32>
    %135 = tpu.matmul %134, %132, %cst_91 {dimension_numbers = #tpu.dot_dimension_numbers<[1], [0], [0], [1], [0, 0, 1, 1], [], []>} : vector<1x8xbf16>, vector<8x128xbf16>, vector<1x128xf32> -> vector<1x128xf32>
    %cst_92 = arith.constant 0.000000e+00 : bf16
    %136 = vector.broadcast %cst_92 : bf16 to vector<8x1xbf16>
    %137 = vector.extract_strided_slice %129 {offsets = [0, 0], sizes = [8, 127], strides = [1, 1]} : vector<8x128xbf16> to vector<8x127xbf16>
    %138 = tpu.concatenate %136, %137 in 1 : vector<8x1xbf16>, vector<8x127xbf16> -> vector<8x128xbf16>
    %c1_93 = arith.constant 1 : index
    %c0_94 = arith.constant 0 : index
    %c0_95 = arith.constant 0 : index
    %139 = vector.load %arg12[%c1_93, %c0_94, %c0_95] : memref<3x1x8xbf16, #tpu.memory_space<vmem>>, vector<1x1x8xbf16>
    %140 = vector.shape_cast %139 : vector<1x1x8xbf16> to vector<1x8xbf16>
    %cst_96 = arith.constant dense<0.000000e+00> : vector<1x128xf32>
    %141 = tpu.matmul %140, %138, %cst_96 {dimension_numbers = #tpu.dot_dimension_numbers<[1], [0], [0], [1], [0, 0, 1, 1], [], []>} : vector<1x8xbf16>, vector<8x128xbf16>, vector<1x128xf32> -> vector<1x128xf32>
    %142 = arith.addf %135, %141 : vector<1x128xf32>
    %c2_97 = arith.constant 2 : index
    %c0_98 = arith.constant 0 : index
    %c0_99 = arith.constant 0 : index
    %143 = vector.load %arg12[%c2_97, %c0_98, %c0_99] : memref<3x1x8xbf16, #tpu.memory_space<vmem>>, vector<1x1x8xbf16>
    %144 = vector.shape_cast %143 : vector<1x1x8xbf16> to vector<1x8xbf16>
    %cst_100 = arith.constant dense<0.000000e+00> : vector<1x128xf32>
    %145 = tpu.matmul %144, %129, %cst_100 {dimension_numbers = #tpu.dot_dimension_numbers<[1], [0], [0], [1], [0, 0, 1, 1], [], []>} : vector<1x8xbf16>, vector<8x128xbf16>, vector<1x128xf32> -> vector<1x128xf32>
    %146 = arith.addf %142, %145 : vector<1x128xf32>
    %c0_101 = arith.constant 0 : index
    %c0_102 = arith.constant 0 : index
    %147 = vector.load %arg13[%c0_101, %c0_102] : memref<1x1xf32, #tpu.memory_space<vmem>>, vector<1x1xf32>
    %148 = vector.broadcast %147 : vector<1x1xf32> to vector<1x128xf32>
    %149 = arith.addf %146, %148 : vector<1x128xf32>
    %c0_103 = arith.constant 0 : index
    %c0_104 = arith.constant 0 : index
    %c0_105 = arith.constant 0 : index
    %150 = vector.load %arg14[%c0_103, %c0_104, %c0_105] : memref<1x1x128xf32, #tpu.memory_space<vmem>>, vector<1x1x128xf32>
    %151 = vector.shape_cast %150 : vector<1x1x128xf32> to vector<1x128xf32>
    %152 = vector.shape_cast %149 : vector<1x128xf32> to vector<1x1x128xf32>
    tpu.vector_store %arg14[%c0_103, %c0_104, %c0_105], %152 {strides = array<i32>} : memref<1x1x128xf32, #tpu.memory_space<vmem>>, vector<1x1x128xf32>,
    return
  }
  func.func @transform_0(%arg0: i32) -> (i32, i32, i32) {
    %c0_i32 = arith.constant 0 : i32
    %c0_i32_0 = arith.constant 0 : i32
    %c0_i32_1 = arith.constant 0 : i32
    return %arg0, %c0_i32, %c0_i32_0 : i32, i32, i32
  }
  func.func @transform_1(%arg0: i32) -> (i32, i32, i32) {
    %c0_i32 = arith.constant 0 : i32
    %c0_i32_0 = arith.constant 0 : i32
    %c0_i32_1 = arith.constant 0 : i32
    %c0_i32_2 = arith.constant 0 : i32
    return %c0_i32, %c0_i32_0, %c0_i32_1 : i32, i32, i32
  }
  func.func @transform_2(%arg0: i32) -> (i32, i32) {
    %c0_i32 = arith.constant 0 : i32
    %c0_i32_0 = arith.constant 0 : i32
    %c0_i32_1 = arith.constant 0 : i32
    return %c0_i32, %c0_i32_0 : i32, i32
  }
  func.func @transform_3(%arg0: i32) -> (i32, i32, i32) {
    %c0_i32 = arith.constant 0 : i32
    %c0_i32_0 = arith.constant 0 : i32
    %c0_i32_1 = arith.constant 0 : i32
    %c0_i32_2 = arith.constant 0 : i32
    return %c0_i32, %c0_i32_0, %c0_i32_1 : i32, i32, i32
  }
  func.func @transform_4(%arg0: i32) -> (i32, i32) {
    %c0_i32 = arith.constant 0 : i32
    %c0_i32_0 = arith.constant 0 : i32
    %c0_i32_1 = arith.constant 0 : i32
    return %c0_i32, %c0_i32_0 : i32, i32
  }
  func.func @transform_5(%arg0: i32) -> (i32, i32, i32) {
    %c0_i32 = arith.constant 0 : i32
    %c0_i32_0 = arith.constant 0 : i32
    %c0_i32_1 = arith.constant 0 : i32
    %c0_i32_2 = arith.constant 0 : i32
    return %c0_i32, %c0_i32_0, %c0_i32_1 : i32, i32, i32
  }
  func.func @transform_6(%arg0: i32) -> (i32, i32) {
    %c0_i32 = arith.constant 0 : i32
    %c0_i32_0 = arith.constant 0 : i32
    %c0_i32_1 = arith.constant 0 : i32
    return %c0_i32, %c0_i32_0 : i32, i32
  }
  func.func @transform_7(%arg0: i32) -> (i32, i32, i32) {
    %c0_i32 = arith.constant 0 : i32
    %c0_i32_0 = arith.constant 0 : i32
    %c0_i32_1 = arith.constant 0 : i32
    %c0_i32_2 = arith.constant 0 : i32
    return %c0_i32, %c0_i32_0, %c0_i32_1 : i32, i32, i32
  }
  func.func @transform_8(%arg0: i32) -> (i32, i32) {
    %c0_i32 = arith.constant 0 : i32
    %c0_i32_0 = arith.constant 0 : i32
    %c0_i32_1 = arith.constant 0 : i32
    return %c0_i32, %c0_i32_0 : i32, i32
  }
  func.func @transform_9(%arg0: i32) -> (i32, i32, i32) {
    %c0_i32 = arith.constant 0 : i32
    %c0_i32_0 = arith.constant 0 : i32
    %c0_i32_1 = arith.constant 0 : i32
    %c0_i32_2 = arith.constant 0 : i32
    return %c0_i32, %c0_i32_0, %c0_i32_1 : i32, i32, i32
  }
  func.func @transform_10(%arg0: i32) -> (i32, i32) {
    %c0_i32 = arith.constant 0 : i32
    %c0_i32_0 = arith.constant 0 : i32
    %c0_i32_1 = arith.constant 0 : i32
    return %c0_i32, %c0_i32_0 : i32, i32
  }
  func.func @transform_11(%arg0: i32) -> (i32, i32, i32) {
    %c0_i32 = arith.constant 0 : i32
    %c0_i32_0 = arith.constant 0 : i32
    %c0_i32_1 = arith.constant 0 : i32
    %c0_i32_2 = arith.constant 0 : i32
    return %c0_i32, %c0_i32_0, %c0_i32_1 : i32, i32, i32
  }
  func.func @transform_12(%arg0: i32) -> (i32, i32) {
    %c0_i32 = arith.constant 0 : i32
    %c0_i32_0 = arith.constant 0 : i32
    %c0_i32_1 = arith.constant 0 : i32
    return %c0_i32, %c0_i32_0 : i32, i32
  }
  func.func @transform_13(%arg0: i32) -> (i32, i32, i32) {
    %c0_i32 = arith.constant 0 : i32
    %c0_i32_0 = arith.constant 0 : i32
    %c0_i32_1 = arith.constant 0 : i32
    return %arg0, %c0_i32, %c0_i32_0 : i32, i32, i32
  }
}

</mosaic_0001>

<bundles_post_ra>
// kernel: _lambda_.9
= control target key start
LH: loop header
LB: loop body
LE: loop exit
PB: predicated region body
PF: predicated region fallthrough
CT: control target
= control target key end

     0   :  { %s847_s17 = smov 0   ;;  %s945_s0 = inlined_call_operand.vmem [shape: f32[2,1,64], index: 0, kind: input, shape index: {}]   ;;  %s946_s1 = inlined_call_operand.vmem [shape: f32[8,1], index: 1, kind: input, shape index: {}]   ;;  %s947_s2 = inlined_call_operand.vmem [shape: f32[8,1], index: 2, kind: input, shape index: {}]   ;;  %s948_s3 = inlined_call_operand.vmem [shape: bf16[8,8], index: 3, kind: input, shape index: {}]   ;;  %s949_s4 = inlined_call_operand.vmem [shape: f32[8,1], index: 4, kind: input, shape index: {}]   ;;  %s950_s5 = inlined_call_operand.vmem [shape: bf16[3,8,8], index: 5, kind: input, shape index: {}]   ;;  %s951_s6 = inlined_call_operand.vmem [shape: f32[8,1], index: 6, kind: input, shape index: {}]   ;;  %s952_s7 = inlined_call_operand.vmem [shape: bf16[3,8,8], index: 7, kind: input, shape index: {}]   ;;  %s953_s8 = inlined_call_operand.vmem [shape: f32[8,1], index: 8, kind: input, shape index: {}]   ;;  %s954_s9 = inlined_call_operand.vmem [shape: bf16[3,8,8], index: 9, kind: input, shape index: {}]   ;;  %s955_s10 = inlined_call_operand.vmem [shape: f32[8,1], index: 10, kind: input, shape index: {}]   ;;  %s956_s11 = inlined_call_operand.vmem [shape: f32[2,8,64], index: 11, kind: output, shape index: {}]  }
   0x1 LB: > { %s733_s18 = sadd.s32 4294967295, %s780_s17   ;;  %p737_p0 = scmp.ge.s32.totalorder %s780_s17, 1  ;;  %s780_s17 = sphi %s847_s17, %s21_s17  }
   0x2   : > { %p335_p1 = scmp.lt.s32.totalorder %s780_s17, 3 }
   0x4   : > { %p336_p2 = pnand %p737_p0, %p335_p1 }
   0x5   : > { %p372_p3 = scmp.lt.s32.totalorder (!%p336_p2), %s733_s18, 1  ;;  %s783_s26 = smov (!%p336_p2), 2  }
   0x6   : > { %339 = sbr.rel (%p336_p2) target bundleno = 932 (0x3a4), region = 64  ;;  %s784_s27 = smov (!%p336_p2), 1  }
   0x7   : > { %s785_s19 = smov (!%p336_p2), 4   ;;  %s786_s13 = smov (!%p336_p2), 8  }
   0xb   : > { %v381_v0 = vld [vmem:[%s946_s1] sm:$0xff]  ;;  %v782_v1 = vmov 0   ;;  %s958_s18 = smov (!%p372_p3, %s733_s18), 1  ;;  %vm410_vm0 = vcmask 1043456   ;;  %vm406_vm2 = vcmask 64512   ;;  %vm436_vm3 = vcmask 15360  }
   0xc   : > { %770 = vset.pattern.permute.xlu0 %v782_v1  ;;  %771 = vset.pattern.permute.xlu2 %v782_v1  ;;  %s374_s23 = scalar_lea.vmem %s945_s0, %s958_s18  ;;  %v391_v2 = vld [vmem:[%s947_s2] sm:$0xff]  ;;  %v743_v16 = vld [vmem:[%s950_s5 + $0x8] sm:$0xf]  ;;  %vm443_vm4 = vcmask 7168   ;;  %vm522_vm6 = vcmask 31744   ;;  %s738_s24 = sshll.u32 %s958_s18, 3 }
   0xd   : > { %384 = vperm.xlu0 %770, %v381_v0   ;;  %772 = vset.pattern.permute.xlu1 %v782_v1  ;;  %v773_v4 = vld [vmem:[%s374_s23] ss:$0 sm:$0xff]  ;;  %v740_v25 = vld [vmem:[%s950_s5 + $0x4] sm:$0xf]  ;;  %v748_v44 = vld [vmem:[%s952_s7 + $0x8] sm:$0xf] }
   0xe   : > { %v506_v17 = vld [vmem:[%s951_s6] sm:$0xff]  ;;  %vm681_vm8 = vcmask 523264  }
   0xf   : > { %509 = vperm.xlu2 %771, %v506_v17   ;;  %v440_v21 = vld [vmem:[%s950_s5] sm:$0xf]  ;;  %v745_v53 = vld [vmem:[%s952_s7 + $0x4] sm:$0xf] }
  0x10   : > { %v398_v42 = vld [vmem:[%s948_s3] sm:$0xf] }
  0x11   : > { %v590_v43 = vld [vmem:[%s953_s8] sm:$0xff] }
  0x12   : > { %v400_v45 = vld [vmem:[%s949_s4] sm:$0xff] }
  0x13   : > { %v525_v49 = vld [vmem:[%s952_s7] sm:$0xf] }
  0x14   : > { %v608_v17 = vld [vmem:[%s954_s9] sm:$0xf] }
  0x15   : > { %394 = vperm.xlu0 %770, %v391_v2  }
  0x69   : > { %v510_v31 = vpop.permute.xlu2 %509 }
  0x7f   : > { %v385_v3 = vpop.permute.xlu0 %384 }
  0x80   : > { %v390_v5 = vmul.f32 %v773_v4, %v385_v3 }
  0x87   : > { %v395_v6 = vpop.permute.xlu0 %394 }
  0x88   : > { %v397_v7 = vadd.f32 %v395_v6, %v390_v5 }
  0x8a   : > { %v399_v8 = vpack.c.bf16 %v397_v7, %v397_v7  ;;  %vm427_vm1 = vcmp.ge.f32.partialorder %v397_v7, 0.0  ;;  %v428_v9 = vmul.f32 0.1, %v397_v7 }
  0x8c   : > { %v412_v10 = vsel %vm410_vm0, %v399_v8, 0  ;;  %v429_v11 = vsel %vm427_vm1, %v397_v7, %v428_v9  ;;  %v673_v8 = vld [vmem:[%s955_s10] sm:$0xff]  ;;  %v753_v9 = vld [vmem:[%s954_s9 + $0x8] sm:$0xf] }
  0x8d   : > { %421 = vmatpush.bf16.msra.mxu0 %v412_v10  ;;  %v430_v12 = vpack.c.bf16 %v429_v11, %v429_v11 }
  0x8f   : > { %v490_v13 = vsel %vm410_vm0, %v430_v12, 0  ;;  %v432_v14 = vunpack.c.l.b16 %v430_v12 }
  0x90   : > { %499 = vmatpush.bf16.msra.mxu3 %v490_v13  ;;  %739 = vmatmul.msk.bf16.vlgmr.msra.gmra.mxu0 %vm406_vm2, %v398_v42  ;;  %v750_v13 = vld [vmem:[%s954_s9 + $0x4] sm:$0xf] }
  0x91   : > { %v433_v15 = vpack.c.b16 %v432_v14, %v432_v14 }
  0x93   : > { %434 = vrot.lane.b32.xlu1 %v433_v15, %s783_s26  ;;  %744 = vmatmul.msk.bf16.vlgmr.msra.gmra.mxu3 %vm406_vm2, %v743_v16 }
  0x9b   : > { %441 = vrot.lane.b32.xlu1 %v433_v15, %s784_s27  ;;  %s378_s27 = scalar_lea.vmem %s956_s11, %s738_s24 }
  0xa3   : > { %593 = vperm.xlu1 %772, %v590_v43  }
  0xab   : > { %403 = vperm.xlu1 %772, %v400_v45  }
 0x105   : > { %v435_v18 = vpop.permute.xlu1 %434 }
 0x106   : > { %v439_v19 = vsel %vm436_vm3, 0, %v435_v18 }
 0x107   : > { %v469_v20 = vsel %vm410_vm0, %v439_v19, 0 }
 0x108   : > { %478 = vmatpush.bf16.msra.mxu2 %v469_v20 }
 0x10b   : > { %742 = vmatmul.msk.bf16.vlgmr.msra.gmra.mxu2 %vm406_vm2, %v440_v21 }
 0x10d   : > { %v442_v22 = vpop.permute.xlu1 %441  ;;  %v423_v54 = vpop.f32.mrf.mxu0 }
 0x10e   : > { %v445_v23 = vsel %vm443_vm4, 0, %v442_v22 }
 0x10f   : > { %v451_v24 = vsel %vm410_vm0, %v445_v23, 0 }
 0x110   : > { %460 = vmatpush.bf16.msra.mxu1 %v451_v24 }
 0x113   : > { %741 = vmatmul.msk.bf16.vlgmr.msra.gmra.mxu1 %vm406_vm2, %v740_v25 }
 0x115   : > { %v425_v56 = vpop.f32.mrf.mxu0  ;;  %v594_v63 = vpop.permute.xlu1 %593 }
 0x116   : > { %v501_v26 = vpop.f32.mrf.mxu3 }
 0x11d   : > { %v404_v24 = vpop.permute.xlu1 %403 }
 0x11e   : > { %v503_v27 = vpop.f32.mrf.mxu3 }
 0x11f   : > { %v424_v27 = vadd.f32 %v423_v54, %v404_v24 }
 0x18e   : > { %v480_v28 = vpop.f32.mrf.mxu2 }
 0x190   : > { %v462_v29 = vpop.f32.mrf.mxu1 }
 0x191   : > { %v481_v30 = vadd.f32 %v480_v28, %v462_v29 }
 0x193   : > { %v505_v32 = vadd.f32 %v501_v26, %v481_v30 }
 0x195   : > { %v512_v33 = vadd.f32 %v510_v31, %v505_v32 }
 0x196   : > { %v482_v34 = vpop.f32.mrf.mxu2 }
 0x197   : > { %v514_v35 = vmul.f32 0.1, %v512_v33  ;;  %vm513_vm5 = vcmp.ge.f32.partialorder %v512_v33, 0.0 }
 0x198   : > { %v464_v36 = vpop.f32.mrf.mxu1 }
 0x199   : > { %v515_v37 = vsel %vm513_vm5, %v512_v33, %v514_v35 }
 0x19a   : > { %v516_v38 = vpack.c.bf16 %v515_v37, %v515_v37 }
 0x19c   : > { %v574_v39 = vsel %vm410_vm0, %v516_v38, 0  ;;  %v518_v40 = vunpack.c.l.b16 %v516_v38 }
 0x19d   : > { %583 = vmatpush.bf16.msrb.mxu2 %v574_v39 }
 0x19e   : > { %v519_v41 = vpack.c.b16 %v518_v40, %v518_v40 }
 0x1a0   : > { %526 = vrot.lane.b32.xlu0 %v519_v41, %s783_s26  ;;  %520 = vrot.lane.b32.xlu2 %v519_v41, %s785_s19 }
 0x1a1   : > { %749 = vmatmul.msk.bf16.vlgmr.msrb.gmra.mxu2 %vm406_vm2, %v748_v44 }
 0x1fa   : > { %v521_v46 = vpop.permute.xlu2 %520 }
 0x1fb   : > { %v524_v47 = vsel %vm522_vm6, 0, %v521_v46 }
 0x1fc   : > { %v553_v48 = vsel %vm410_vm0, %v524_v47, 0 }
 0x1fd   : > { %562 = vmatpush.bf16.msrb.mxu1 %v553_v48 }
 0x200   : > { %747 = vmatmul.msk.bf16.vlgmr.msrb.gmra.mxu1 %vm406_vm2, %v525_v49 }
 0x212   : > { %v527_v50 = vpop.permute.xlu0 %526 }
 0x213   : > { %v529_v51 = vsel %vm436_vm3, 0, %v527_v50 }
 0x214   : > { %v535_v52 = vsel %vm410_vm0, %v529_v51, 0 }
 0x215   : > { %544 = vmatpush.bf16.msrb.mxu0 %v535_v52 }
 0x218   : > { %746 = vmatmul.msk.bf16.vlgmr.msrb.gmra.mxu0 %vm406_vm2, %v745_v53 }
 0x224   : > { %v585_v55 = vpop.f32.mrf.mxu2 }
 0x22c   : > { %v587_v57 = vpop.f32.mrf.mxu2 }
 0x27d   : > { %v564_v58 = vpop.f32.mrf.mxu1 }
 0x285   : > { %v566_v59 = vpop.f32.mrf.mxu1 }
 0x295   : > { %v546_v60 = vpop.f32.mrf.mxu0 }
 0x296   : > { %v565_v61 = vadd.f32 %v564_v58, %v546_v60 }
 0x298   : > { %v589_v62 = vadd.f32 %v585_v55, %v565_v61 }
 0x29a   : > { %v596_v0 = vadd.f32 %v594_v63, %v589_v62 }
 0x29c   : > { %v598_v1 = vmul.f32 0.1, %v596_v0  ;;  %vm597_vm7 = vcmp.ge.f32.partialorder %v596_v0, 0.0 }
 0x29d   : > { %v548_v2 = vpop.f32.mrf.mxu0 }
 0x29e   : > { %v599_v3 = vsel %vm597_vm7, %v596_v0, %v598_v1 }
 0x29f   : > { %v600_v4 = vpack.c.bf16 %v599_v3, %v599_v3 }
 0x2a1   : > { %v657_v5 = vsel %vm410_vm0, %v600_v4, 0  ;;  %v602_v6 = vunpack.c.l.b16 %v600_v4 }
 0x2a2   : > { %666 = vmatpush.bf16.msra.mxu1 %v657_v5 }
 0x2a3   : > { %v603_v7 = vpack.c.b16 %v602_v6, %v602_v6 }
 0x2a5   : > { %604 = vrot.lane.b32.xlu0 %v603_v7, %s786_s13  ;;  %609 = vrot.lane.b32.xlu2 %v603_v7, %s785_s19 }
 0x2a6   : > { %754 = vmatmul.msk.bf16.vlgmr.msra.gmra.mxu1 %vm406_vm2, %v753_v9 }
 0x2ad   : > { %676 = vperm.xlu2 %771, %v673_v8  }
 0x2ff   : > { %v610_v10 = vpop.permute.xlu2 %609 }
 0x300   : > { %v612_v11 = vsel %vm522_vm6, 0, %v610_v10 }
 0x301   : > { %v618_v12 = vsel %vm410_vm0, %v612_v11, 0 }
 0x302   : > { %627 = vmatpush.bf16.msrb.mxu3 %v618_v12 }
 0x305   : > { %751 = vmatmul.msk.bf16.vlgmr.msrb.gmra.mxu3 %vm406_vm2, %v750_v13 }
 0x307   : > { %v677_v26 = vpop.permute.xlu2 %676 }
 0x317   : > { %v605_v14 = vpop.permute.xlu0 %604 }
 0x318   : > { %v607_v15 = vsel %vm406_vm2, 0, %v605_v14 }
 0x319   : > { %v636_v16 = vsel %vm410_vm0, %v607_v15, 0 }
 0x31a   : > { %645 = vmatpush.bf16.msra.mxu0 %v636_v16 }
 0x31d   : > { %752 = vmatmul.msk.bf16.vlgmr.msra.gmra.mxu0 %vm406_vm2, %v608_v17 }
 0x323   : > { %v668_v18 = vpop.f32.mrf.mxu1 }
 0x32b   : > { %v670_v19 = vpop.f32.mrf.mxu1 }
 0x388   : > { %v629_v20 = vpop.f32.mrf.mxu3 }
 0x390   : > { %v631_v21 = vpop.f32.mrf.mxu3 }
 0x39a   : > { %v647_v22 = vpop.f32.mrf.mxu0 }
 0x39b   : > { %v648_v23 = vadd.f32 %v647_v22, %v629_v20 }
 0x39d   : > { %v672_v25 = vadd.f32 %v668_v18, %v648_v23 }
 0x39f   : > { %v679_v28 = vadd.f32 %v677_v26, %v672_v25 }
 0x3a1   : > { %v680_v29 = vadd.f32 %v679_v28, %v424_v27 }
 0x3a2   : > { %v649_v30 = vpop.f32.mrf.mxu0 }
 0x3a3   : > { %682 = vst.msk [vmem:[%s378_s27] sm:$0xff] %vm681_vm8, %v680_v29 }
 0x3a4 PF: > { %s21_s17 = sadd.s32 1, %s780_s17  }
 0x3a5   : > { %p18_p4 = scmp.ge.s32.totalorder %s21_s17, 4  }
 0x3a7   :  { %20 = sbr.rel (!%p18_p4) target bundleno = 1 (0x1), region = 100 }

// kernel: _lambda_.10
= control target key start
LH: loop header
LB: loop body
LE: loop exit
PB: predicated region body
PF: predicated region fallthrough
CT: control target
= control target key end

     0   :  { %s844_s30 = smov 0   ;;  %s942_s0 = inlined_call_operand.vmem [shape: f32[2,8,32], index: 0, kind: input, shape index: {}]   ;;  %s943_s1 = inlined_call_operand.vmem [shape: bf16[16,8], index: 1, kind: input, shape index: {}]   ;;  %s944_s2 = inlined_call_operand.vmem [shape: f32[16,1], index: 2, kind: input, shape index: {}]   ;;  %s945_s3 = inlined_call_operand.vmem [shape: bf16[3,8,8], index: 3, kind: input, shape index: {}]   ;;  %s946_s4 = inlined_call_operand.vmem [shape: f32[8,1], index: 4, kind: input, shape index: {}]   ;;  %s947_s5 = inlined_call_operand.vmem [shape: bf16[3,8,8], index: 5, kind: input, shape index: {}]   ;;  %s948_s6 = inlined_call_operand.vmem [shape: f32[8,1], index: 6, kind: input, shape index: {}]   ;;  %s949_s7 = inlined_call_operand.vmem [shape: bf16[3,16,8], index: 7, kind: input, shape index: {}]   ;;  %s950_s8 = inlined_call_operand.vmem [shape: f32[16,1], index: 8, kind: input, shape index: {}]   ;;  %s951_s9 = inlined_call_operand.vmem [shape: f32[2,16,32], index: 9, kind: output, shape index: {}]  }
   0x1 LB: > { %s716_s10 = sadd.s32 4294967295, %s787_s30   ;;  %p720_p0 = scmp.ge.s32.totalorder %s787_s30, 1  ;;  %s787_s30 = sphi %s844_s30, %s19_s30  }
   0x2   : > { %p286_p1 = scmp.lt.s32.totalorder %s787_s30, 3 }
   0x4   : > { %p287_p2 = pnand %p720_p0, %p286_p1 }
   0x5   : > { %p321_p3 = scmp.lt.s32.totalorder (!%p287_p2), %s716_s10, 1  ;;  %s789_s15 = smov (!%p287_p2), 2  }
   0x6   : > { %290 = sbr.rel (%p287_p2) target bundleno = 823 (0x337), region = 56  ;;  %s790_s16 = smov (!%p287_p2), 1  }
   0x7   : > { %s792_s25 = smov (!%p287_p2), 4   ;;  %s793_s21 = smov (!%p287_p2), 8  }
   0xb   : > { %s953_s10 = smov (!%p321_p3, %s716_s10), 1  ;;  %vm356_vm1 = vcmask 1043456   ;;  %vm352_vm2 = vcmask 64512   ;;  %v732_v7 = vld [vmem:[%s945_s3 + $0x8] sm:$0xf]  ;;  %v453_v8 = vld [vmem:[%s946_s4] sm:$0xff] }
   0xc   : > { %s721_s11 = sshll.u32 %s953_s10, 3  ;;  %v791_v9 = vmov 0   ;;  %vm383_vm3 = vcmask 15360   ;;  %v387_v13 = vld [vmem:[%s945_s3] sm:$0xf]  ;;  %vm390_vm4 = vcmask 7168  }
   0xd   : > { %s324_s14 = scalar_lea.vmem %s942_s0, %s721_s11  ;;  %778 = vset.pattern.permute.xlu1 %v791_v9  ;;  %779 = vset.pattern.permute.xlu2 %v791_v9  ;;  %v729_v17 = vld [vmem:[%s945_s3 + $0x4] sm:$0xf]  ;;  %v737_v37 = vld [vmem:[%s947_s5 + $0x8] sm:$0xf]  ;;  %vm469_vm6 = vcmask 31744   ;;  %s760_s13 = sshll.u32 %s953_s10, 4 }
   0xe   : > { %v331_v0 = vld [vmem:[%s324_s14] sm:$0xff]  ;;  %456 = vperm.xlu1 %778, %v453_v8   ;;  %780 = vset.pattern.permute.xlu0 %v791_v9  ;;  %v643_v44 = vld [vmem:[%s950_s8 + $0x8] sm:$0xff]  ;;  %vm658_vm8 = vcmask 261120  }
   0xf   : > { %vm374_vm0 = vcmp.ge.f32.partialorder %v331_v0, 0.0  ;;  %v375_v1 = vmul.f32 0.1, %v331_v0  ;;  %v334_v34 = vpack.c.bf16 %v331_v0, %v331_v0  ;;  %v761_v36 = vld [vmem:[%s943_s1] sm:$0xff] }
  0x10   : > { %v537_v38 = vld [vmem:[%s948_s6] sm:$0xff] }
  0x11   : > { %v376_v2 = vsel %vm374_vm0, %v331_v0, %v375_v1  ;;  %v358_v35 = vsel %vm356_vm1, %v334_v34, 0  ;;  %v734_v42 = vld [vmem:[%s947_s5 + $0x4] sm:$0xf]  ;;  %v472_v48 = vld [vmem:[%s947_s5] sm:$0xf] }
  0x12   : > { %v377_v3 = vpack.c.bf16 %v376_v2, %v376_v2  ;;  %367 = vmatpush.bf16.msra.mxu0 %v358_v35  ;;  %v335_v43 = vld [vmem:[%s944_s2] sm:$0xff] }
  0x14   : > { %v379_v4 = vunpack.c.l.b16 %v377_v3  ;;  %v437_v5 = vsel %vm356_vm1, %v377_v3, 0  ;;  %v642_v3 = vld [vmem:[%s950_s8] sm:$0xff] }
  0x15   : > { %446 = vmatpush.bf16.msra.mxu3 %v437_v5  ;;  %728 = vmatmul.msk.bf16.vlgmr.msra.gmra.mxu0 %vm352_vm2, %v761_v36  ;;  %v764_v5 = vld [vmem:[%s949_s7 + $0x10] sm:$0xff] }
  0x16   : > { %v380_v6 = vpack.c.b16 %v379_v4, %v379_v4  ;;  %v336_v4 = vld [vmem:[%s944_s2 + $0x8] sm:$0xff] }
  0x18   : > { %381 = vrot.lane.b32.xlu0 %v380_v6, %s789_s15  ;;  %733 = vmatmul.msk.bf16.vlgmr.msra.gmra.mxu3 %vm352_vm2, %v732_v7 }
  0x20   : > { %388 = vrot.lane.b32.xlu0 %v380_v6, %s790_s16  ;;  %s329_s16 = scalar_lea.vmem %s951_s9, %s760_s13 }
  0x80   : > { %v457_v23 = vpop.permute.xlu1 %456 }
  0x8a   : > { %v382_v10 = vpop.permute.xlu0 %381 }
  0x8b   : > { %v386_v11 = vsel %vm383_vm3, 0, %v382_v10 }
  0x8c   : > { %v416_v12 = vsel %vm356_vm1, %v386_v11, 0 }
  0x8d   : > { %425 = vmatpush.bf16.msra.mxu2 %v416_v12  ;;  %v763_v12 = vld [vmem:[%s949_s7 + $0x8] sm:$0xff] }
  0x90   : > { %731 = vmatmul.msk.bf16.vlgmr.msra.gmra.mxu2 %vm352_vm2, %v387_v13  ;;  %v762_v13 = vld [vmem:[%s949_s7] sm:$0xff] }
  0x92   : > { %v389_v14 = vpop.permute.xlu0 %388  ;;  %v369_v50 = vpop.f32.mrf.mxu0 }
  0x93   : > { %v392_v15 = vsel %vm390_vm4, 0, %v389_v14 }
  0x94   : > { %v398_v16 = vsel %vm356_vm1, %v392_v15, 0 }
  0x95   : > { %407 = vmatpush.bf16.msra.mxu1 %v398_v16 }
  0x98   : > { %730 = vmatmul.msk.bf16.vlgmr.msra.gmra.mxu1 %vm352_vm2, %v729_v17 }
  0x9a   : > { %v371_v52 = vpop.f32.mrf.mxu0 }
  0x9b   : > { %v448_v18 = vpop.f32.mrf.mxu3 }
  0xa3   : > { %v450_v19 = vpop.f32.mrf.mxu3 }
 0x113   : > { %v427_v20 = vpop.f32.mrf.mxu2 }
 0x115   : > { %v409_v21 = vpop.f32.mrf.mxu1 }
 0x116   : > { %v428_v22 = vadd.f32 %v427_v20, %v409_v21 }
 0x118   : > { %v452_v24 = vadd.f32 %v448_v18, %v428_v22 }
 0x11a   : > { %v459_v25 = vadd.f32 %v457_v23, %v452_v24 }
 0x11b   : > { %v429_v26 = vpop.f32.mrf.mxu2 }
 0x11c   : > { %v461_v27 = vmul.f32 0.1, %v459_v25  ;;  %vm460_vm5 = vcmp.ge.f32.partialorder %v459_v25, 0.0 }
 0x11d   : > { %v411_v28 = vpop.f32.mrf.mxu1 }
 0x11e   : > { %v462_v29 = vsel %vm460_vm5, %v459_v25, %v461_v27 }
 0x11f   : > { %v463_v30 = vpack.c.bf16 %v462_v29, %v462_v29 }
 0x121   : > { %v521_v31 = vsel %vm356_vm1, %v463_v30, 0  ;;  %v465_v32 = vunpack.c.l.b16 %v463_v30 }
 0x122   : > { %530 = vmatpush.bf16.msrb.mxu2 %v521_v31 }
 0x123   : > { %v466_v33 = vpack.c.b16 %v465_v32, %v465_v32 }
 0x125   : > { %473 = vrot.lane.b32.xlu2 %v466_v33, %s789_s15  ;;  %467 = vrot.lane.b32.xlu1 %v466_v33, %s792_s25 }
 0x126   : > { %738 = vmatmul.msk.bf16.vlgmr.msrb.gmra.mxu2 %vm352_vm2, %v737_v37 }
 0x12d   : > { %540 = vperm.xlu2 %779, %v537_v38  }
 0x135   : > { %339 = vperm.xlu2 %779, %v335_v43  }
 0x13d   : > { %651 = vperm.xlu2 %779, %v643_v44  }
 0x17f   : > { %v474_v39 = vpop.permute.xlu2 %473 }
 0x180   : > { %v476_v40 = vsel %vm383_vm3, 0, %v474_v39 }
 0x181   : > { %v482_v41 = vsel %vm356_vm1, %v476_v40, 0 }
 0x182   : > { %491 = vmatpush.bf16.msrb.mxu0 %v482_v41 }
 0x185   : > { %735 = vmatmul.msk.bf16.vlgmr.msrb.gmra.mxu0 %vm352_vm2, %v734_v42 }
 0x187   : > { %v541_v58 = vpop.permute.xlu2 %540 }
 0x18f   : > { %v340_v18 = vpop.permute.xlu2 %339 }
 0x190   : > { %v370_v21 = vadd.f32 %v369_v50, %v340_v18 }
 0x197   : > { %v468_v45 = vpop.permute.xlu1 %467  ;;  %v652_v30 = vpop.permute.xlu2 %651 }
 0x198   : > { %v471_v46 = vsel %vm469_vm6, 0, %v468_v45 }
 0x199   : > { %v500_v47 = vsel %vm356_vm1, %v471_v46, 0 }
 0x19a   : > { %509 = vmatpush.bf16.msrb.mxu1 %v500_v47 }
 0x19d   : > { %736 = vmatmul.msk.bf16.vlgmr.msrb.gmra.mxu1 %vm352_vm2, %v472_v48 }
 0x1a9   : > { %v532_v49 = vpop.f32.mrf.mxu2 }
 0x1b1   : > { %v534_v51 = vpop.f32.mrf.mxu2 }
 0x202   : > { %v493_v53 = vpop.f32.mrf.mxu0 }
 0x20a   : > { %v495_v54 = vpop.f32.mrf.mxu0 }
 0x21a   : > { %v511_v55 = vpop.f32.mrf.mxu1 }
 0x21b   : > { %v512_v56 = vadd.f32 %v511_v55, %v493_v53 }
 0x21d   : > { %v536_v57 = vadd.f32 %v532_v49, %v512_v56 }
 0x21f   : > { %v543_v59 = vadd.f32 %v541_v58, %v536_v57 }
 0x221   : > { %v545_v60 = vmul.f32 0.1, %v543_v59  ;;  %vm544_vm7 = vcmp.ge.f32.partialorder %v543_v59, 0.0 }
 0x222   : > { %v513_v61 = vpop.f32.mrf.mxu1 }
 0x223   : > { %v546_v62 = vsel %vm544_vm7, %v543_v59, %v545_v60 }
 0x224   : > { %v547_v63 = vpack.c.bf16 %v546_v62, %v546_v62 }
 0x226   : > { %v624_v0 = vsel %vm356_vm1, %v547_v63, 0  ;;  %v549_v1 = vunpack.c.l.b16 %v547_v63 }
 0x227   : > { %633 = vmatpush.bf16.msra.mxu1 %v624_v0 }
 0x228   : > { %v550_v2 = vpack.c.b16 %v549_v1, %v549_v1 }
 0x22a   : > { %551 = vrot.lane.b32.xlu1 %v550_v2, %s793_s21  ;;  %557 = vrot.lane.b32.xlu0 %v550_v2, %s792_s25 }
 0x22b   : > { %757 = vmatmul.msk.bf16.vlgmr.msra.gmra.mxu1 %vm352_vm2, %v764_v5 }
 0x232   : > { %646 = vperm.xlu1 %778, %v642_v3   ;;  %344 = vperm.xlu0 %780, %v336_v4  }
 0x29c   : > { %v552_v6 = vpop.permute.xlu1 %551  ;;  %v558_v7 = vpop.permute.xlu0 %557 }
 0x29d   : > { %v554_v8 = vsel %vm352_vm2, 0, %v552_v6  ;;  %v560_v9 = vsel %vm469_vm6, 0, %v558_v7 }
 0x29e   : > { %v596_v10 = vsel %vm356_vm1, %v554_v8, 0  ;;  %v572_v11 = vsel %vm356_vm1, %v560_v9, 0 }
 0x29f   : > { %581 = vmatpush.bf16.msrb.mxu3 %v572_v11  ;;  %605 = vmatpush.bf16.msra.mxu0 %v596_v10 }
 0x2a2   : > { %745 = vmatmul.msk.bf16.vlgmr.msrb.gmra.mxu3 %vm352_vm2, %v763_v12  ;;  %750 = vmatmul.msk.bf16.vlgmr.msra.gmra.mxu0 %vm352_vm2, %v762_v13 }
 0x2a4   : > { %v647_v20 = vpop.permute.xlu1 %646  ;;  %v345_v27 = vpop.permute.xlu0 %344 }
 0x2a5   : > { %v372_v31 = vadd.f32 %v371_v52, %v345_v27 }
 0x2a8   : > { %v635_v16 = vpop.f32.mrf.mxu1 }
 0x2b0   : > { %v637_v28 = vpop.f32.mrf.mxu1 }
 0x31f   : > { %v607_v14 = vpop.f32.mrf.mxu0 }
 0x325   : > { %v583_v15 = vpop.f32.mrf.mxu3 }
 0x326   : > { %v608_v17 = vadd.f32 %v607_v14, %v583_v15 }
 0x327   : > { %v609_v25 = vpop.f32.mrf.mxu0 }
 0x328   : > { %v640_v19 = vadd.f32 %v635_v16, %v608_v17 }
 0x32a   : > { %v654_v22 = vadd.f32 %v647_v20, %v640_v19 }
 0x32c   : > { %v656_v23 = vadd.f32 %v654_v22, %v370_v21 }
 0x32d   : > { %v585_v24 = vpop.f32.mrf.mxu3 }
 0x32e   : > { %659 = vst.msk [vmem:[%s329_s16] sm:$0xff] %vm658_vm8, %v656_v23  ;;  %v610_v26 = vadd.f32 %v609_v25, %v585_v24 }
 0x330   : > { %v641_v29 = vadd.f32 %v637_v28, %v610_v26 }
 0x332   : > { %v655_v32 = vadd.f32 %v652_v30, %v641_v29 }
 0x334   : > { %v657_v33 = vadd.f32 %v655_v32, %v372_v31 }
 0x336   : > { %660 = vst.msk [vmem:[%s329_s16 + $0x8] sm:$0xff] %vm658_vm8, %v657_v33 }
 0x337 PF: > { %s19_s30 = sadd.s32 1, %s787_s30  }
 0x338   : > { %p16_p4 = scmp.ge.s32.totalorder %s19_s30, 4  }
 0x33a   :  { %18 = sbr.rel (!%p16_p4) target bundleno = 1 (0x1), region = 92 }

// kernel: _lambda_.11
= control target key start
LH: loop header
LB: loop body
LE: loop exit
PB: predicated region body
PF: predicated region fallthrough
CT: control target
= control target key end

     0   :  { %s1077_s30 = smov 0   ;;  %s1226_s0 = inlined_call_operand.vmem [shape: f32[2,16,16], index: 0, kind: input, shape index: {}]   ;;  %s1227_s1 = inlined_call_operand.vmem [shape: bf16[32,16], index: 1, kind: input, shape index: {}]   ;;  %s1228_s2 = inlined_call_operand.vmem [shape: f32[32,1], index: 2, kind: input, shape index: {}]   ;;  %s1229_s3 = inlined_call_operand.vmem [shape: bf16[3,16,16], index: 3, kind: input, shape index: {}]   ;;  %s1230_s4 = inlined_call_operand.vmem [shape: f32[16,1], index: 4, kind: input, shape index: {}]   ;;  %s1231_s5 = inlined_call_operand.vmem [shape: bf16[3,16,16], index: 5, kind: input, shape index: {}]   ;;  %s1232_s6 = inlined_call_operand.vmem [shape: f32[16,1], index: 6, kind: input, shape index: {}]   ;;  %s1233_s7 = inlined_call_operand.vmem [shape: bf16[3,32,16], index: 7, kind: input, shape index: {}]   ;;  %s1234_s8 = inlined_call_operand.vmem [shape: f32[32,1], index: 8, kind: input, shape index: {}]   ;;  %s1235_s9 = inlined_call_operand.vmem [shape: f32[2,32,16], index: 9, kind: output, shape index: {}]  }
   0x1 LB: > { %s872_s10 = sadd.s32 4294967295, %s1020_s30   ;;  %p876_p0 = scmp.ge.s32.totalorder %s1020_s30, 1  ;;  %s1020_s30 = sphi %s1077_s30, %s19_s30  }
   0x2   : > { %p287_p1 = scmp.lt.s32.totalorder %s1020_s30, 3 }
   0x4   : > { %p288_p2 = pnand %p876_p0, %p287_p1 }
   0x5   : > { %p323_p3 = scmp.lt.s32.totalorder (!%p288_p2), %s872_s10, 1  ;;  %s1022_s17 = smov (!%p288_p2), 2  }
   0x6   : > { %291 = sbr.rel (%p288_p2) target bundleno = 827 (0x33b), region = 56  ;;  %s1023_s18 = smov (!%p288_p2), 1  }
   0x7   : > { %s1025_s12 = smov (!%p288_p2), 4   ;;  %s1026_s29 = smov (!%p288_p2), 8  }
   0xb   : > { %s1241_s10 = smov (!%p323_p3, %s872_s10), 1  ;;  %v984_v7 = vld [vmem:[%s1227_s1 + $0x8] sm:$0xff]  ;;  %vm375_vm2 = vcmask 130048   ;;  %v987_v13 = vld [vmem:[%s1229_s3 + $0x10] sm:$0xff]  ;;  %v504_v14 = vld [vmem:[%s1230_s4] sm:$0xff]  ;;  %v1024_v15 = vmov 0  }
   0xc   : > { %s981_s11 = sshll.u32 %s1241_s10, 4  ;;  %1011 = vset.pattern.permute.xlu1 %v1024_v15  ;;  %1012 = vset.pattern.permute.xlu0 %v1024_v15  ;;  %v505_v16 = vld [vmem:[%s1230_s4 + $0x8] sm:$0xff]  ;;  %vm416_vm3 = vcmask 15360   ;;  %v985_v20 = vld [vmem:[%s1229_s3] sm:$0xff]  ;;  %vm425_vm5 = vcmask 7168   ;;  %v990_v48 = vld [vmem:[%s1231_s5 + $0x10] sm:$0xff] }
   0xd   : > { %s327_s14 = scalar_lea.vmem %s1226_s0, %s981_s11  ;;  %508 = vperm.xlu1 %1011, %v504_v14   ;;  %1013 = vset.pattern.permute.xlu2 %v1024_v15  ;;  %v620_v17 = vld [vmem:[%s1232_s6 + $0x8] sm:$0xff]  ;;  %vm1109_vm4 = vmneg %vm416_vm3  ;;  %v619_v49 = vld [vmem:[%s1232_s6] sm:$0xff]  ;;  %vm533_vm9 = vcmask 31744   ;;  %vm648_vm13 = vcmask 64512   ;;  %s982_s15 = sshll.u32 %s1241_s10, 5 }
   0xe   : > { %v334_v0 = vld [vmem:[%s327_s14] sm:$0xff]  ;;  %v335_v1 = vld [vmem:[%s327_s14 + $0x8] sm:$0xff]  ;;  %vm897_vm6 = vmneg %vm425_vm5  ;;  %s1211_s19 = scalar_lea.vmem %s1235_s9, %s982_s15 }
   0xf   : > { %vm401_vm0 = vcmp.ge.f32.partialorder %v334_v0, 0.0  ;;  %vm402_vm1 = vcmp.ge.f32.partialorder %v335_v1, 0.0  ;;  %v403_v2 = vmul.f32 0.1, %v334_v0  ;;  %v404_v3 = vmul.f32 0.1, %v335_v1  ;;  %vm1146_vm10 = vmneg %vm533_vm9 }
  0x10   : > { %v340_v4 = vpack.c.bf16 %v335_v1, %v334_v0  ;;  %v986_v22 = vld [vmem:[%s1229_s3 + $0x8] sm:$0xff]  ;;  %v983_v50 = vld [vmem:[%s1227_s1] sm:$0xff]  ;;  %v784_v54 = vld [vmem:[%s1234_s8 + $0x18] sm:$0xff] }
  0x11   : > { %v405_v5 = vsel %vm401_vm0, %v334_v0, %v403_v2  ;;  %v406_v6 = vsel %vm402_vm1, %v335_v1, %v404_v3  ;;  %v342_v51 = vld [vmem:[%s1228_s2 + $0x8] sm:$0xff]  ;;  %v781_v52 = vld [vmem:[%s1234_s8] sm:$0xff]  ;;  %v343_v18 = vld [vmem:[%s1228_s2 + $0x10] sm:$0xff] }
  0x12   : > { %v407_v8 = vpack.c.bf16 %v405_v5, %v405_v5  ;;  %v408_v9 = vpack.c.bf16 %v406_v6, %v406_v6  ;;  %997 = vmatpush.bf16.msra.mxu3 %v340_v4  ;;  %389 = vmatpush.bf16.msra.mxu0 %v340_v4  ;;  %v988_v56 = vld [vmem:[%s1231_s5] sm:$0xff]  ;;  %v989_v58 = vld [vmem:[%s1231_s5 + $0x8] sm:$0xff]  ;;  %vm961_vm14 = vmneg %vm648_vm13 }
  0x14   : > { %v411_v10 = vunpack.c.l.b16 %v407_v8  ;;  %v412_v11 = vunpack.c.l.b16 %v408_v9 }
  0x15   : > { %890 = vmatmul.msk.bf16.vlgmr.msra.gmra.mxu3 %vm375_vm2, %v984_v7  ;;  %513 = vperm.xlu1 %1011, %v505_v16  }
  0x16   : > { %v413_v12 = vpack.c.b16 %v412_v11, %v411_v10  ;;  %889 = vmatmul.msk.bf16.vlgmr.msra.gmra.mxu0 %vm375_vm2, %v983_v50 }
  0x18   : > { %414 = vrot.lane.b32.xlu0 %v413_v12, %s1022_s17  ;;  %495 = vmatpush.bf16.msrb.mxu3 %v413_v12 }
  0x1d   : > { %628 = vperm.xlu1 %1011, %v620_v17  }
  0x20   : > { %423 = vrot.lane.b32.xlu0 %v413_v12, %s1023_s18 }
  0x25   : > { %913 = vmatmul.msk.bf16.vlgmr.msrb.gmra.mxu3 %vm375_vm2, %v987_v13 }
  0x28   : > { %623 = vperm.xlu0 %1012, %v619_v49  }
  0x30   : > { %352 = vperm.xlu0 %1012, %v342_v51  }
  0x38   : > { %787 = vperm.xlu0 %1012, %v781_v52  }
  0x40   : > { %802 = vperm.xlu0 %1012, %v784_v54  }
  0x7f   : > { %v509_v29 = vpop.permute.xlu1 %508 }
  0x87   : > { %v514_v38 = vpop.permute.xlu1 %513 }
  0x8a   : > { %v415_v19 = vpop.permute.xlu0 %414 }
  0x8b   : > { %905 = vmatpush.bf16.msk.msra.mxu2 %vm1109_vm4, %v415_v19  ;;  %v341_v19 = vld [vmem:[%s1228_s2] sm:$0xff] }
  0x8e   : > { %906 = vmatmul.msk.bf16.vlgmr.msra.gmra.mxu2 %vm375_vm2, %v985_v20  ;;  %v782_v20 = vld [vmem:[%s1234_s8 + $0x8] sm:$0xff] }
  0x8f   : > { %v629_v8 = vpop.permute.xlu1 %628 }
  0x92   : > { %v424_v21 = vpop.permute.xlu0 %423 }
  0x93   : > { %898 = vmatpush.bf16.msk.msra.mxu1 %vm897_vm6, %v424_v21  ;;  %v344_v21 = vld [vmem:[%s1228_s2 + $0x18] sm:$0xff] }
  0x96   : > { %899 = vmatmul.msk.bf16.vlgmr.msra.gmra.mxu1 %vm375_vm2, %v986_v22  ;;  %v995_v22 = vld [vmem:[%s1233_s7 + $0x20] sm:$0xff] }
  0x98   : > { %v1123_v23 = vpop.f32.mrf.mxu3 }
  0x9a   : > { %v624_v0 = vpop.permute.xlu0 %623 }
  0xa0   : > { %v1125_v24 = vpop.f32.mrf.mxu3 }
  0xa8   : > { %v497_v26 = vpop.f32.mrf.mxu3 }
  0xb0   : > { %v499_v36 = vpop.f32.mrf.mxu3 }
 0x111   : > { %v471_v25 = vpop.f32.mrf.mxu2 }
 0x113   : > { %v449_v27 = vpop.f32.mrf.mxu1 }
 0x114   : > { %v472_v28 = vadd.f32 %v471_v25, %v449_v27  ;;  %v996_v25 = vld [vmem:[%s1233_s7 + $0x28] sm:$0xff]  ;;  %v991_v27 = vld [vmem:[%s1233_s7] sm:$0xff] }
 0x116   : > { %v502_v30 = vadd.f32 %v497_v26, %v472_v28  ;;  %v783_v28 = vld [vmem:[%s1234_s8 + $0x10] sm:$0xff] }
 0x118   : > { %v516_v31 = vadd.f32 %v509_v29, %v502_v30  ;;  %v992_v29 = vld [vmem:[%s1233_s7 + $0x8] sm:$0xff] }
 0x119   : > { %v473_v32 = vpop.f32.mrf.mxu2 }
 0x11a   : > { %v520_v34 = vmul.f32 0.1, %v516_v31  ;;  %vm518_vm7 = vcmp.ge.f32.partialorder %v516_v31, 0.0 }
 0x11b   : > { %v451_v33 = vpop.f32.mrf.mxu1 }
 0x11c   : > { %v474_v35 = vadd.f32 %v473_v32, %v451_v33  ;;  %v522_v40 = vsel %vm518_vm7, %v516_v31, %v520_v34  ;;  %v993_v31 = vld [vmem:[%s1233_s7 + $0x10] sm:$0xff]  ;;  %v994_v32 = vld [vmem:[%s1233_s7 + $0x18] sm:$0xff]  ;;  %v391_v33 = vpop.f32.mrf.mxu0 }
 0x11d   : > { %v524_v42 = vpack.c.bf16 %v522_v40, %v522_v40 }
 0x11e   : > { %v503_v37 = vadd.f32 %v499_v36, %v474_v35  ;;  %v353_v35 = vpop.permute.xlu0 %352 }
 0x11f   : > { %v528_v45 = vunpack.c.l.b16 %v524_v42 }
 0x120   : > { %v517_v39 = vadd.f32 %v514_v38, %v503_v37 }
 0x122   : > { %v521_v41 = vmul.f32 0.1, %v517_v39  ;;  %vm519_vm8 = vcmp.ge.f32.partialorder %v517_v39, 0.0 }
 0x124   : > { %v523_v43 = vsel %vm519_vm8, %v517_v39, %v521_v41  ;;  %v393_v34 = vpop.f32.mrf.mxu0 }
 0x125   : > { %v525_v44 = vpack.c.bf16 %v523_v43, %v523_v43  ;;  %v394_v54 = vadd.f32 %v393_v34, %v353_v35 }
 0x126   : > { %v788_v43 = vpop.permute.xlu0 %787 }
 0x127   : > { %v529_v46 = vunpack.c.l.b16 %v525_v44 }
 0x129   : > { %v530_v47 = vpack.c.b16 %v529_v46, %v528_v45 }
 0x12b   : > { %531 = vrot.lane.b32.xlu2 %v530_v47, %s1025_s12  ;;  %610 = vmatpush.bf16.msra.mxu3 %v530_v47 }
 0x12e   : > { %936 = vmatmul.msk.bf16.vlgmr.msra.gmra.mxu3 %vm375_vm2, %v990_v48 }
 0x133   : > { %539 = vrot.lane.b32.xlu2 %v530_v47, %s1022_s17 }
 0x185   : > { %v532_v55 = vpop.permute.xlu2 %531 }
 0x186   : > { %928 = vmatpush.bf16.msk.msrb.mxu2 %vm1146_vm10, %v532_v55 }
 0x189   : > { %929 = vmatmul.msk.bf16.vlgmr.msrb.gmra.mxu2 %vm375_vm2, %v988_v56 }
 0x18d   : > { %v540_v57 = vpop.permute.xlu2 %539 }
 0x18e   : > { %921 = vmatpush.bf16.msk.msrb.mxu1 %vm1109_vm4, %v540_v57 }
 0x191   : > { %922 = vmatmul.msk.bf16.vlgmr.msrb.gmra.mxu1 %vm375_vm2, %v989_v58 }
 0x1b1   : > { %v612_v60 = vpop.f32.mrf.mxu3 }
 0x1b9   : > { %v614_v6 = vpop.f32.mrf.mxu3 }
 0x20c   : > { %v586_v59 = vpop.f32.mrf.mxu2 }
 0x20e   : > { %v564_v61 = vpop.f32.mrf.mxu1 }
 0x20f   : > { %v587_v62 = vadd.f32 %v586_v59, %v564_v61 }
 0x211   : > { %v617_v63 = vadd.f32 %v612_v60, %v587_v62 }
 0x213   : > { %v631_v1 = vadd.f32 %v624_v0, %v617_v63 }
 0x214   : > { %v588_v2 = vpop.f32.mrf.mxu2 }
 0x215   : > { %v635_v4 = vmul.f32 0.1, %v631_v1  ;;  %vm633_vm11 = vcmp.ge.f32.partialorder %v631_v1, 0.0 }
 0x216   : > { %v566_v3 = vpop.f32.mrf.mxu1 }
 0x217   : > { %v589_v5 = vadd.f32 %v588_v2, %v566_v3  ;;  %v637_v10 = vsel %vm633_vm11, %v631_v1, %v635_v4 }
 0x218   : > { %v639_v12 = vpack.c.bf16 %v637_v10, %v637_v10 }
 0x219   : > { %v618_v7 = vadd.f32 %v614_v6, %v589_v5 }
 0x21a   : > { %v643_v15 = vunpack.c.l.b16 %v639_v12 }
 0x21b   : > { %v632_v9 = vadd.f32 %v629_v8, %v618_v7  ;;  %v803_v7 = vpop.permute.xlu0 %802 }
 0x21d   : > { %v636_v11 = vmul.f32 0.1, %v632_v9  ;;  %vm634_vm12 = vcmp.ge.f32.partialorder %v632_v9, 0.0 }
 0x21f   : > { %v638_v13 = vsel %vm634_vm12, %v632_v9, %v636_v11 }
 0x220   : > { %v640_v14 = vpack.c.bf16 %v638_v13, %v638_v13 }
 0x222   : > { %v644_v16 = vunpack.c.l.b16 %v640_v14 }
 0x224   : > { %v645_v17 = vpack.c.b16 %v644_v16, %v643_v15 }
 0x226   : > { %656 = vrot.lane.b32.xlu1 %v645_v17, %s1025_s12  ;;  %646 = vrot.lane.b32.xlu2 %v645_v17, %s1026_s29 }
 0x227   : > { %765 = vmatpush.bf16.msra.mxu2 %v645_v17 }
 0x22a   : > { %977 = vmatmul.msk.bf16.vlgmr.msra.gmra.mxu2 %vm375_vm2, %v995_v22 }
 0x22e   : > { %357 = vperm.xlu1 %1011, %v343_v18   ;;  %347 = vperm.xlu2 %1013, %v341_v19  }
 0x236   : > { %792 = vperm.xlu1 %1011, %v782_v20   ;;  %362 = vperm.xlu2 %1013, %v344_v21  }
 0x23a   : > { %978 = vmatmul.msk.bf16.gmra.mxu2 %vm375_vm2, %v996_v25 }
 0x23e   : > { %797 = vperm.xlu2 %1013, %v783_v28  }
 0x280   : > { %v647_v26 = vpop.permute.xlu2 %646 }
 0x281   : > { %962 = vmatpush.bf16.msk.msra.mxu1 %vm961_vm14, %v647_v26 }
 0x284   : > { %963 = vmatmul.msk.bf16.vlgmr.msra.gmra.mxu1 %vm375_vm2, %v991_v27 }
 0x288   : > { %v348_v40 = vpop.permute.xlu2 %347 }
 0x289   : > { %v392_v45 = vadd.f32 %v391_v33, %v348_v40 }
 0x290   : > { %v363_v52 = vpop.permute.xlu2 %362 }
 0x291   : > { %v399_v8 = vadd.f32 %v1125_v24, %v363_v52 }
 0x294   : > { %964 = vmatmul.msk.bf16.gmra.mxu1 %vm375_vm2, %v992_v29 }
 0x298   : > { %v657_v30 = vpop.permute.xlu1 %656  ;;  %v798_v62 = vpop.permute.xlu2 %797 }
 0x299   : > { %950 = vmatpush.bf16.msk.msrb.mxu0 %vm1146_vm10, %v657_v30 }
 0x29c   : > { %951 = vmatmul.msk.bf16.vlgmr.msrb.gmra.mxu0 %vm375_vm2, %v993_v31 }
 0x2a0   : > { %v358_v41 = vpop.permute.xlu1 %357 }
 0x2a1   : > { %v397_v63 = vadd.f32 %v1123_v23, %v358_v41 }
 0x2a8   : > { %v793_v53 = vpop.permute.xlu1 %792 }
 0x2ac   : > { %952 = vmatmul.msk.bf16.gmra.mxu0 %vm375_vm2, %v994_v32 }
 0x2ad   : > { %v767_v37 = vpop.f32.mrf.mxu2 }
 0x2b5   : > { %v769_v47 = vpop.f32.mrf.mxu2 }
 0x2bd   : > { %v772_v59 = vpop.f32.mrf.mxu2 }
 0x2c5   : > { %v774_v5 = vpop.f32.mrf.mxu2 }
 0x301   : > { %v726_v36 = vpop.f32.mrf.mxu1 }
 0x309   : > { %v728_v44 = vpop.f32.mrf.mxu1 }
 0x311   : > { %v731_v56 = vpop.f32.mrf.mxu1 }
 0x319   : > { %v691_v38 = vpop.f32.mrf.mxu0  ;;  %v733_v3 = vpop.f32.mrf.mxu1 }
 0x31a   : > { %v727_v39 = vadd.f32 %v726_v36, %v691_v38 }
 0x31c   : > { %v777_v42 = vadd.f32 %v767_v37, %v727_v39 }
 0x31e   : > { %v805_v46 = vadd.f32 %v788_v43, %v777_v42 }
 0x320   : > { %v809_v48 = vadd.f32 %v805_v46, %v392_v45 }
 0x321   : > { %v693_v49 = vpop.f32.mrf.mxu0 }
 0x322   : > { %813 = vst.msk [vmem:[%s1211_s19] sm:$0xff] %vm375_vm2, %v809_v48  ;;  %v729_v50 = vadd.f32 %v728_v44, %v693_v49 }
 0x324   : > { %v778_v51 = vadd.f32 %v769_v47, %v729_v50 }
 0x326   : > { %v806_v55 = vadd.f32 %v793_v53, %v778_v51 }
 0x328   : > { %v810_v57 = vadd.f32 %v806_v55, %v394_v54 }
 0x329   : > { %v696_v58 = vpop.f32.mrf.mxu0 }
 0x32a   : > { %814 = vst.msk [vmem:[%s1211_s19 + $0x8] sm:$0xff] %vm375_vm2, %v810_v57  ;;  %v732_v60 = vadd.f32 %v731_v56, %v696_v58 }
 0x32c   : > { %v779_v61 = vadd.f32 %v772_v59, %v732_v60 }
 0x32e   : > { %v807_v0 = vadd.f32 %v798_v62, %v779_v61 }
 0x330   : > { %v811_v1 = vadd.f32 %v807_v0, %v397_v63 }
 0x331   : > { %v698_v2 = vpop.f32.mrf.mxu0 }
 0x332   : > { %815 = vst.msk [vmem:[%s1211_s19 + $0x10] sm:$0xff] %vm375_vm2, %v811_v1  ;;  %v734_v4 = vadd.f32 %v733_v3, %v698_v2 }
 0x334   : > { %v780_v6 = vadd.f32 %v774_v5, %v734_v4 }
 0x336   : > { %v808_v9 = vadd.f32 %v803_v7, %v780_v6 }
 0x338   : > { %v812_v10 = vadd.f32 %v808_v9, %v399_v8 }
 0x33a   : > { %816 = vst.msk [vmem:[%s1211_s19 + $0x18] sm:$0xff] %vm375_vm2, %v812_v10 }
 0x33b PF: > { %s19_s30 = sadd.s32 1, %s1020_s30  }
 0x33c   : > { %p16_p4 = scmp.ge.s32.totalorder %s19_s30, 4  }
 0x33e   :  { %18 = sbr.rel (!%p16_p4) target bundleno = 1 (0x1), region = 92 }

// kernel: _lambda_.12
= control target key start
LH: loop header
LB: loop body
LE: loop exit
PB: predicated region body
PF: predicated region fallthrough
CT: control target
= control target key end

     0   :  { %s1260_s30 = smov 0   ;;  %s1452_s0 = inlined_call_operand.vmem [shape: f32[2,32,8], index: 0, kind: input, shape index: {}]   ;;  %s1453_s1 = inlined_call_operand.vmem [shape: bf16[32,32], index: 1, kind: input, shape index: {}]   ;;  %s1454_s2 = inlined_call_operand.vmem [shape: f32[32,1], index: 2, kind: input, shape index: {}]   ;;  %s1455_s3 = inlined_call_operand.vmem [shape: bf16[3,32,32], index: 3, kind: input, shape index: {}]   ;;  %s1456_s4 = inlined_call_operand.vmem [shape: f32[32,1], index: 4, kind: input, shape index: {}]   ;;  %s1457_s5 = inlined_call_operand.vmem [shape: bf16[3,32,32], index: 5, kind: input, shape index: {}]   ;;  %s1458_s6 = inlined_call_operand.vmem [shape: f32[32,1], index: 6, kind: input, shape index: {}]   ;;  %s1459_s7 = inlined_call_operand.vmem [shape: bf16[3,32,32], index: 7, kind: input, shape index: {}]   ;;  %s1460_s8 = inlined_call_operand.vmem [shape: f32[32,1], index: 8, kind: input, shape index: {}]   ;;  %s1461_s9 = inlined_call_operand.vmem [shape: f32[2,32,8], index: 9, kind: output, shape index: {}]  }
   0x1 LB: > { %s1016_s10 = sadd.s32 4294967295, %s1204_s30   ;;  %p1020_p0 = scmp.ge.s32.totalorder %s1204_s30, 1  ;;  %s1204_s30 = sphi %s1260_s30, %s19_s30  }
   0x2   : > { %p287_p1 = scmp.lt.s32.totalorder %s1204_s30, 3 }
   0x4   : > { %p288_p2 = pnand %p1020_p0, %p287_p1 }
   0x5   : > { %p323_p3 = scmp.lt.s32.totalorder (!%p288_p2), %s1016_s10, 1  ;;  %s1206_s17 = smov (!%p288_p2), 1  }
   0x6   : > { %291 = sbr.rel (%p288_p2) target bundleno = 867 (0x363), region = 56  ;;  %s1207_s18 = smov (!%p288_p2), 2  }
   0x7   : > { %s1209_s26 = smov (!%p288_p2), 4  }
   0xb   : > { %s1467_s10 = smov (!%p323_p3, %s1016_s10), 1  ;;  %v1164_v20 = vld [vmem:[%s1453_s1 + $0x8] sm:$0xff]  ;;  %vm378_vm4 = vcmask 261120   ;;  %v1169_v25 = vld [vmem:[%s1455_s3 + $0x20] sm:$0xff]  ;;  %vm434_vm5 = vcmask 15360   ;;  %vm450_vm6 = vcmask 7168  }
   0xc   : > { %s1161_s11 = sshll.u32 %s1467_s10, 5  ;;  %v1170_v26 = vld [vmem:[%s1455_s3 + $0x28] sm:$0xff]  ;;  %v578_v27 = vld [vmem:[%s1456_s4] sm:$0xff]  ;;  %vm1296_vm7 = vmneg %vm434_vm5  ;;  %v1208_v30 = vmov 0   ;;  %vm636_vm13 = vcmask 31744  }
   0xd   : > { %s327_s14 = scalar_lea.vmem %s1452_s0, %s1161_s11  ;;  %v579_v28 = vld [vmem:[%s1456_s4 + $0x8] sm:$0xff]  ;;  %1196 = vset.pattern.permute.xlu0 %v1208_v30  ;;  %1197 = vset.pattern.permute.xlu1 %v1208_v30  ;;  %v580_v31 = vld [vmem:[%s1456_s4 + $0x10] sm:$0xff]  ;;  %vm1047_vm8 = vmneg %vm450_vm6 }
   0xe   : > { %v336_v0 = vld [vmem:[%s327_s14 + $0x10] sm:$0xff]  ;;  %v337_v1 = vld [vmem:[%s327_s14 + $0x18] sm:$0xff]  ;;  %v334_v2 = vld [vmem:[%s327_s14] sm:$0xff]  ;;  %1195 = vset.pattern.permute.xlu2 %v1208_v30 }
   0xf   : > { %vm406_vm0 = vcmp.ge.f32.partialorder %v336_v0, 0.0  ;;  %vm407_vm1 = vcmp.ge.f32.partialorder %v337_v1, 0.0  ;;  %v410_v3 = vmul.f32 0.1, %v336_v0  ;;  %v411_v4 = vmul.f32 0.1, %v337_v1  ;;  %594 = vperm.xlu2 %1195, %v580_v31   ;;  %vm1363_vm14 = vmneg %vm636_vm13 }
  0x10   : > { %v335_v5 = vld [vmem:[%s327_s14 + $0x8] sm:$0xff]  ;;  %vm404_vm2 = vcmp.ge.f32.partialorder %v334_v2, 0.0  ;;  %v408_v6 = vmul.f32 0.1, %v334_v2  ;;  %v343_v7 = vpack.c.bf16 %v337_v1, %v336_v0  ;;  %v581_v34 = vld [vmem:[%s1456_s4 + $0x18] sm:$0xff]  ;;  %v1167_v37 = vld [vmem:[%s1455_s3 + $0x10] sm:$0xff] }
  0x11   : > { %v414_v8 = vsel %vm406_vm0, %v336_v0, %v410_v3  ;;  %v415_v9 = vsel %vm407_vm1, %v337_v1, %v411_v4  ;;  %vm405_vm3 = vcmp.ge.f32.partialorder %v335_v5, 0.0  ;;  %v409_v10 = vmul.f32 0.1, %v335_v5  ;;  %v1165_v38 = vld [vmem:[%s1455_s3] sm:$0xff]  ;;  %v1168_v39 = vld [vmem:[%s1455_s3 + $0x18] sm:$0xff]  ;;  %v1166_v40 = vld [vmem:[%s1455_s3 + $0x8] sm:$0xff] }
  0x12   : > { %v418_v11 = vpack.c.bf16 %v414_v8, %v414_v8  ;;  %v419_v12 = vpack.c.bf16 %v415_v9, %v415_v9  ;;  %v412_v13 = vsel %vm404_vm2, %v334_v2, %v408_v6  ;;  %1181 = vmatpush.bf16.msra.mxu1 %v343_v7  ;;  %v342_v14 = vpack.c.bf16 %v335_v5, %v334_v2  ;;  %v1163_v0 = vld [vmem:[%s1453_s1] sm:$0xff]  ;;  %v781_v30 = vld [vmem:[%s1458_s6 + $0x18] sm:$0xff] }
  0x13   : > { %v413_v15 = vsel %vm405_vm3, %v335_v5, %v409_v10  ;;  %v416_v16 = vpack.c.bf16 %v412_v13, %v412_v13  ;;  %391 = vmatpush.bf16.msra.mxu0 %v343_v7  ;;  %v344_v31 = vld [vmem:[%s1454_s2] sm:$0xff]  ;;  %vm956_vm3 = vcmask 64512  }
  0x14   : > { %v426_v17 = vunpack.c.l.b16 %v418_v11  ;;  %v427_v18 = vunpack.c.l.b16 %v419_v12  ;;  %v417_v19 = vpack.c.bf16 %v413_v15, %v413_v15 }
  0x15   : > { %v424_v22 = vunpack.c.l.b16 %v416_v16 }
  0x16   : > { %v429_v21 = vpack.c.b16 %v427_v18, %v426_v17  ;;  %1182 = vmatpush.bf16.msra.mxu1 %v342_v14  ;;  %v425_v23 = vunpack.c.l.b16 %v417_v19  ;;  %v778_v18 = vld [vmem:[%s1458_s6] sm:$0xff] }
  0x17   : > { %392 = vmatpush.bf16.msra.mxu0 %v342_v14  ;;  %599 = vperm.xlu2 %1195, %v581_v34   ;;  %v1175_v34 = vld [vmem:[%s1457_s5 + $0x20] sm:$0xff] }
  0x18   : > { %448 = vrot.lane.b32.xlu1 %v429_v21, %s1206_s17  ;;  %432 = vrot.lane.b32.xlu0 %v429_v21, %s1207_s18  ;;  %v428_v24 = vpack.c.b16 %v425_v23, %v424_v22 }
  0x19   : > { %1034 = vmatmul.msk.bf16.vlgmr.msra.gmra.mxu1 %vm378_vm4, %v1164_v20  ;;  %561 = vmatpush.bf16.msra.mxu3 %v429_v21 }
  0x1a   : > { %1033 = vmatmul.msk.bf16.vlgmr.msra.gmra.mxu0 %vm378_vm4, %v1163_v0 }
  0x1d   : > { %562 = vmatpush.bf16.msra.mxu3 %v428_v24 }
  0x20   : > { %446 = vrot.lane.b32.xlu1 %v428_v24, %s1206_s17  ;;  %430 = vrot.lane.b32.xlu0 %v428_v24, %s1207_s18  ;;  %s332_s17 = scalar_lea.vmem %s1461_s9, %s1161_s11 }
  0x21   : > { %1079 = vmatmul.msk.bf16.vlgmr.msra.gmra.mxu3 %vm378_vm4, %v1169_v25 }
  0x28   : > { %584 = vperm.xlu0 %1196, %v578_v27   ;;  %589 = vperm.xlu1 %1197, %v579_v28   ;;  %v780_v27 = vld [vmem:[%s1458_s6 + $0x10] sm:$0xff]  ;;  %v779_v28 = vld [vmem:[%s1458_s6 + $0x8] sm:$0xff] }
  0x31   : > { %1080 = vmatmul.msk.bf16.gmra.mxu3 %vm378_vm4, %v1170_v26 }
  0x69   : > { %v595_v3 = vpop.permute.xlu2 %594 }
  0x71   : > { %v600_v16 = vpop.permute.xlu2 %599 }
  0x8a   : > { %v449_v32 = vpop.permute.xlu1 %448  ;;  %v433_v33 = vpop.permute.xlu0 %432 }
  0x8b   : > { %1062 = vmatpush.bf16.msk.msra.mxu2 %vm1296_vm7, %v433_v33  ;;  %1048 = vmatpush.bf16.msk.msrb.mxu1 %vm1047_vm8, %v449_v32  ;;  %v347_v32 = vld [vmem:[%s1454_s2 + $0x18] sm:$0xff]  ;;  %v926_v33 = vld [vmem:[%s1460_s8 + $0x10] sm:$0xff] }
  0x92   : > { %v447_v35 = vpop.permute.xlu1 %446  ;;  %v431_v36 = vpop.permute.xlu0 %430 }
  0x93   : > { %1050 = vmatpush.bf16.msk.msrb.mxu1 %vm1047_vm8, %v447_v35  ;;  %1064 = vmatpush.bf16.msk.msra.mxu2 %vm1296_vm7, %v431_v36 }
  0x96   : > { %1051 = vmatmul.msk.bf16.vlgmr.msrb.gmra.mxu1 %vm378_vm4, %v1167_v37  ;;  %1065 = vmatmul.msk.bf16.vlgmr.msra.gmra.mxu2 %vm378_vm4, %v1165_v38  ;;  %v1326_v41 = vpop.f32.mrf.mxu1  ;;  %v1176_v37 = vld [vmem:[%s1457_s5 + $0x28] sm:$0xff] }
  0x9a   : > { %v585_v47 = vpop.permute.xlu0 %584  ;;  %v590_v55 = vpop.permute.xlu1 %589 }
  0x9e   : > { %v1328_v42 = vpop.f32.mrf.mxu1 }
  0xa4   : > { %v564_v44 = vpop.f32.mrf.mxu3 }
  0xa6   : > { %1052 = vmatmul.msk.bf16.gmra.mxu1 %vm378_vm4, %v1168_v39  ;;  %1066 = vmatmul.msk.bf16.gmra.mxu2 %vm378_vm4, %v1166_v40  ;;  %v1171_v39 = vld [vmem:[%s1457_s5] sm:$0xff] }
  0xac   : > { %v566_v51 = vpop.f32.mrf.mxu3 }
  0xb4   : > { %v569_v62 = vpop.f32.mrf.mxu3 }
  0xbc   : > { %v571_v14 = vpop.f32.mrf.mxu3 }
 0x113   : > { %v487_v43 = vpop.f32.mrf.mxu1 }
 0x119   : > { %v522_v45 = vpop.f32.mrf.mxu2 }
 0x11a   : > { %v523_v46 = vadd.f32 %v522_v45, %v487_v43  ;;  %v1172_v43 = vld [vmem:[%s1457_s5 + $0x8] sm:$0xff]  ;;  %v1173_v45 = vld [vmem:[%s1457_s5 + $0x10] sm:$0xff] }
 0x11b   : > { %v489_v49 = vpop.f32.mrf.mxu1 }
 0x11c   : > { %v574_v48 = vadd.f32 %v564_v44, %v523_v46  ;;  %v1174_v46 = vld [vmem:[%s1457_s5 + $0x18] sm:$0xff] }
 0x11e   : > { %v602_v50 = vadd.f32 %v585_v47, %v574_v48  ;;  %v1395_v47 = vpop.f32.mrf.mxu0 }
 0x120   : > { %v610_v53 = vmul.f32 0.1, %v602_v50  ;;  %vm606_vm9 = vcmp.ge.f32.partialorder %v602_v50, 0.0 }
 0x121   : > { %v524_v52 = vpop.f32.mrf.mxu2 }
 0x122   : > { %v525_v54 = vadd.f32 %v524_v52, %v489_v49  ;;  %v614_v57 = vsel %vm606_vm9, %v602_v50, %v610_v53 }
 0x123   : > { %v492_v59 = vpop.f32.mrf.mxu1  ;;  %v618_v61 = vpack.c.bf16 %v614_v57, %v614_v57 }
 0x124   : > { %v575_v56 = vadd.f32 %v566_v51, %v525_v54 }
 0x125   : > { %v626_v6 = vunpack.c.l.b16 %v618_v61 }
 0x126   : > { %v603_v58 = vadd.f32 %v590_v55, %v575_v56  ;;  %v1397_v48 = vpop.f32.mrf.mxu0 }
 0x128   : > { %vm607_vm10 = vcmp.ge.f32.partialorder %v603_v58, 0.0  ;;  %v611_v60 = vmul.f32 0.1, %v603_v58 }
 0x129   : > { %v527_v63 = vpop.f32.mrf.mxu2 }
 0x12a   : > { %v615_v1 = vsel %vm607_vm10, %v603_v58, %v611_v60  ;;  %v528_v2 = vadd.f32 %v527_v63, %v492_v59 }
 0x12b   : > { %v619_v4 = vpack.c.bf16 %v615_v1, %v615_v1  ;;  %v494_v10 = vpop.f32.mrf.mxu1 }
 0x12c   : > { %v576_v5 = vadd.f32 %v569_v62, %v528_v2 }
 0x12d   : > { %v627_v7 = vunpack.c.l.b16 %v619_v4 }
 0x12e   : > { %v604_v8 = vadd.f32 %v595_v3, %v576_v5 }
 0x12f   : > { %v630_v9 = vpack.c.b16 %v627_v7, %v626_v6 }
 0x130   : > { %v612_v12 = vmul.f32 0.1, %v604_v8  ;;  %vm608_vm11 = vcmp.ge.f32.partialorder %v604_v8, 0.0 }
 0x131   : > { %v529_v11 = vpop.f32.mrf.mxu2  ;;  %647 = vrot.lane.b32.xlu0 %v630_v9, %s1207_s18 }
 0x132   : > { %v530_v13 = vadd.f32 %v529_v11, %v494_v10  ;;  %v616_v19 = vsel %vm608_vm11, %v604_v8, %v612_v12 }
 0x133   : > { %v620_v21 = vpack.c.bf16 %v616_v19, %v616_v19 }
 0x134   : > { %v577_v15 = vadd.f32 %v571_v14, %v530_v13 }
 0x135   : > { %v628_v24 = vunpack.c.l.b16 %v620_v21 }
 0x136   : > { %v605_v17 = vadd.f32 %v600_v16, %v577_v15 }
 0x138   : > { %v613_v20 = vmul.f32 0.1, %v605_v17  ;;  %vm609_vm12 = vcmp.ge.f32.partialorder %v605_v17, 0.0 }
 0x139   : > { %784 = vperm.xlu0 %1196, %v778_v18  }
 0x13a   : > { %v617_v22 = vsel %vm609_vm12, %v605_v17, %v613_v20 }
 0x13b   : > { %v621_v23 = vpack.c.bf16 %v617_v22, %v617_v22  ;;  %v346_v22 = vld [vmem:[%s1454_s2 + $0x10] sm:$0xff] }
 0x13d   : > { %v629_v25 = vunpack.c.l.b16 %v621_v23 }
 0x13f   : > { %v631_v26 = vpack.c.b16 %v629_v25, %v628_v24 }
 0x141   : > { %649 = vrot.lane.b32.xlu1 %v631_v26, %s1207_s18  ;;  %634 = vrot.lane.b32.xlu2 %v631_v26, %s1209_s26 }
 0x142   : > { %761 = vmatpush.bf16.msrb.mxu2 %v631_v26 }
 0x146   : > { %762 = vmatpush.bf16.msrb.mxu2 %v630_v9 }
 0x149   : > { %794 = vperm.xlu1 %1197, %v780_v27   ;;  %632 = vrot.lane.b32.xlu2 %v630_v9, %s1209_s26 }
 0x14a   : > { %1125 = vmatmul.msk.bf16.vlgmr.msrb.gmra.mxu2 %vm378_vm4, %v1175_v34  ;;  %v924_v34 = vld [vmem:[%s1460_s8] sm:$0xff] }
 0x151   : > { %789 = vperm.xlu1 %1197, %v779_v28   ;;  %799 = vperm.xlu2 %1195, %v781_v30  }
 0x159   : > { %350 = vperm.xlu1 %1197, %v344_v31   ;;  %v925_v31 = vld [vmem:[%s1460_s8 + $0x8] sm:$0xff] }
 0x15a   : > { %1126 = vmatmul.msk.bf16.gmra.mxu2 %vm378_vm4, %v1176_v37  ;;  %v1179_v37 = vld [vmem:[%s1459_s7 + $0x20] sm:$0xff] }
 0x161   : > { %365 = vperm.xlu1 %1197, %v347_v32  }
 0x169   : > { %940 = vperm.xlu1 %1197, %v926_v33   ;;  %v345_v33 = vld [vmem:[%s1454_s2 + $0x8] sm:$0xff] }
 0x19b   : > { %v635_v36 = vpop.permute.xlu2 %634 }
 0x19c   : > { %1108 = vmatpush.bf16.msk.msra.mxu1 %vm1363_vm14, %v635_v36  ;;  %v927_v36 = vld [vmem:[%s1460_s8 + $0x18] sm:$0xff] }
 0x1a3   : > { %v633_v38 = vpop.permute.xlu2 %632  ;;  %v648_v44 = vpop.permute.xlu0 %647 }
 0x1a4   : > { %1110 = vmatpush.bf16.msk.msra.mxu1 %vm1363_vm14, %v633_v38  ;;  %v1180_v38 = vld [vmem:[%s1459_s7 + $0x28] sm:$0xff] }
 0x1a7   : > { %1111 = vmatmul.msk.bf16.vlgmr.msra.gmra.mxu1 %vm378_vm4, %v1171_v39 }
 0x1ab   : > { %v785_v29 = vpop.permute.xlu0 %784  ;;  %v800_v20 = vpop.permute.xlu2 %799 }
 0x1b3   : > { %v650_v40 = vpop.permute.xlu1 %649 }
 0x1b4   : > { %1094 = vmatpush.bf16.msk.msrb.mxu0 %vm1296_vm7, %v650_v40 }
 0x1b7   : > { %1112 = vmatmul.msk.bf16.gmra.mxu1 %vm378_vm4, %v1172_v43  ;;  %v1177_v43 = vld [vmem:[%s1459_s7 + $0x10] sm:$0xff] }
 0x1b8   : > { %1096 = vmatpush.bf16.msk.msrb.mxu0 %vm1296_vm7, %v648_v44  ;;  %v1178_v44 = vld [vmem:[%s1459_s7 + $0x18] sm:$0xff] }
 0x1bb   : > { %1097 = vmatmul.msk.bf16.vlgmr.msrb.gmra.mxu0 %vm378_vm4, %v1173_v45  ;;  %v795_v53 = vpop.permute.xlu1 %794 }
 0x1c3   : > { %v790_v62 = vpop.permute.xlu1 %789 }
 0x1cb   : > { %1098 = vmatmul.msk.bf16.gmra.mxu0 %vm378_vm4, %v1174_v46 }
 0x1cd   : > { %v764_v50 = vpop.f32.mrf.mxu2 }
 0x1d5   : > { %v766_v57 = vpop.f32.mrf.mxu2 }
 0x1dd   : > { %v769_v3 = vpop.f32.mrf.mxu2 }
 0x1e5   : > { %v771_v18 = vpop.f32.mrf.mxu2 }
 0x224   : > { %v722_v49 = vpop.f32.mrf.mxu1 }
 0x22c   : > { %v724_v56 = vpop.f32.mrf.mxu1 }
 0x234   : > { %v727_v1 = vpop.f32.mrf.mxu1 }
 0x238   : > { %v687_v51 = vpop.f32.mrf.mxu0 }
 0x239   : > { %v723_v52 = vadd.f32 %v722_v49, %v687_v51  ;;  %v351_v49 = vpop.permute.xlu1 %350 }
 0x23b   : > { %v774_v54 = vadd.f32 %v764_v50, %v723_v52 }
 0x23c   : > { %v729_v14 = vpop.f32.mrf.mxu1 }
 0x23d   : > { %v802_v55 = vadd.f32 %v785_v29, %v774_v54  ;;  %v395_v54 = vadd.f32 %v1395_v47, %v351_v49 }
 0x23f   : > { %v810_v59 = vmul.f32 0.1, %v802_v55  ;;  %vm806_vm15 = vcmp.ge.f32.partialorder %v802_v55, 0.0 }
 0x240   : > { %v689_v58 = vpop.f32.mrf.mxu0 }
 0x241   : > { %v725_v60 = vadd.f32 %v724_v56, %v689_v58  ;;  %v814_v0 = vsel %vm806_vm15, %v802_v55, %v810_v59  ;;  %v366_v56 = vpop.permute.xlu1 %365 }
 0x242   : > { %v818_v5 = vpack.c.bf16 %v814_v0, %v814_v0 }
 0x243   : > { %v775_v61 = vadd.f32 %v766_v57, %v725_v60 }
 0x244   : > { %v826_v10 = vunpack.c.l.b16 %v818_v5 }
 0x245   : > { %v803_v63 = vadd.f32 %v790_v62, %v775_v61 }
 0x247   : > { %v811_v2 = vmul.f32 0.1, %v803_v63  ;;  %vm807_vm0 = vcmp.ge.f32.partialorder %v803_v63, 0.0 }
 0x248   : > { %v692_v4 = vpop.f32.mrf.mxu0 }
 0x249   : > { %v728_v6 = vadd.f32 %v727_v1, %v692_v4  ;;  %v815_v7 = vsel %vm807_vm0, %v803_v63, %v811_v2  ;;  %v941_v1 = vpop.permute.xlu1 %940 }
 0x24a   : > { %v819_v8 = vpack.c.bf16 %v815_v7, %v815_v7 }
 0x24b   : > { %v776_v9 = vadd.f32 %v769_v3, %v728_v6 }
 0x24c   : > { %v827_v11 = vunpack.c.l.b16 %v819_v8 }
 0x24d   : > { %v804_v12 = vadd.f32 %v795_v53, %v776_v9 }
 0x24e   : > { %v830_v13 = vpack.c.b16 %v827_v11, %v826_v10 }
 0x24f   : > { %v812_v16 = vmul.f32 0.1, %v804_v12  ;;  %vm808_vm1 = vcmp.ge.f32.partialorder %v804_v12, 0.0 }
 0x250   : > { %832 = vrot.lane.b32.xlu0 %v830_v13, %s1209_s26  ;;  %v694_v15 = vpop.f32.mrf.mxu0 }
 0x251   : > { %v730_v17 = vadd.f32 %v729_v14, %v694_v15  ;;  %v816_v23 = vsel %vm808_vm1, %v804_v12, %v812_v16 }
 0x252   : > { %v820_v25 = vpack.c.bf16 %v816_v23, %v816_v23 }
 0x253   : > { %v777_v19 = vadd.f32 %v771_v18, %v730_v17 }
 0x254   : > { %v828_v28 = vunpack.c.l.b16 %v820_v25 }
 0x255   : > { %v805_v21 = vadd.f32 %v800_v20, %v777_v19 }
 0x257   : > { %v813_v24 = vmul.f32 0.1, %v805_v21  ;;  %vm809_vm2 = vcmp.ge.f32.partialorder %v805_v21, 0.0 }
 0x258   : > { %360 = vperm.xlu0 %1196, %v346_v22  }
 0x259   : > { %v817_v26 = vsel %vm809_vm2, %v805_v21, %v813_v24 }
 0x25a   : > { %v821_v27 = vpack.c.bf16 %v817_v26, %v817_v26 }
 0x25c   : > { %v829_v30 = vunpack.c.l.b16 %v821_v27 }
 0x25e   : > { %v831_v32 = vpack.c.b16 %v829_v30, %v828_v28 }
 0x260   : > { %935 = vperm.xlu0 %1196, %v925_v31   ;;  %834 = vrot.lane.b32.xlu2 %v831_v32, %s1209_s26 }
 0x261   : > { %876 = vmatpush.bf16.msrb.mxu3 %v831_v32 }
 0x265   : > { %877 = vmatpush.bf16.msrb.mxu3 %v830_v13 }
 0x268   : > { %355 = vperm.xlu2 %1195, %v345_v33   ;;  %1143 = vmatmul.msk.bf16.vlgmr.msrb.gmra.mxu3 %vm378_vm4, %v1179_v37 }
 0x270   : > { %930 = vperm.xlu2 %1195, %v924_v34  }
 0x278   : > { %945 = vperm.xlu2 %1195, %v927_v36   ;;  %1144 = vmatmul.msk.bf16.gmra.mxu3 %vm378_vm4, %v1180_v38 }
 0x2ba   : > { %v835_v39 = vpop.permute.xlu2 %834 }
 0x2bb   : > { %1154 = vmatpush.bf16.msk.msra.mxu0 %vm1363_vm14, %v835_v39 }
 0x2c2   : > { %v833_v40 = vpop.permute.xlu0 %832  ;;  %v356_v45 = vpop.permute.xlu2 %355 }
 0x2c3   : > { %1156 = vmatpush.bf16.msk.msra.mxu0 %vm1363_vm14, %v833_v40  ;;  %v397_v60 = vadd.f32 %v1397_v48, %v356_v45  ;;  %v402_v48 = vadd.f32 %v1328_v42, %v366_v56 }
 0x2c6   : > { %1157 = vmatmul.msk.bf16.vlgmr.msra.gmra.mxu0 %vm378_vm4, %v1177_v43 }
 0x2ca   : > { %v361_v50 = vpop.permute.xlu0 %360  ;;  %v931_v53 = vpop.permute.xlu2 %930 }
 0x2cb   : > { %v400_v2 = vadd.f32 %v1326_v41, %v361_v50 }
 0x2d2   : > { %v936_v59 = vpop.permute.xlu0 %935  ;;  %v946_v8 = vpop.permute.xlu2 %945 }
 0x2d6   : > { %1158 = vmatmul.msk.bf16.gmra.mxu0 %vm378_vm4, %v1178_v44 }
 0x2eb   : > { %v879_v46 = vpop.f32.mrf.mxu3 }
 0x2f3   : > { %v881_v35 = vpop.f32.mrf.mxu3 }
 0x2fb   : > { %v884_v47 = vpop.f32.mrf.mxu3 }
 0x303   : > { %v886_v5 = vpop.f32.mrf.mxu3 }
 0x343   : > { %v914_v51 = vpop.f32.mrf.mxu0 }
 0x344   : > { %v915_v52 = vadd.f32 %v914_v51, %v879_v46 }
 0x346   : > { %v948_v29 = vadd.f32 %v931_v53, %v915_v52 }
 0x348   : > { %v952_v55 = vadd.f32 %v948_v29, %v395_v54 }
 0x34a   : > { %957 = vst.msk [vmem:[%s332_s17] sm:$0xff] %vm956_vm3, %v952_v55 }
 0x34b   : > { %v916_v57 = vpop.f32.mrf.mxu0 }
 0x34c   : > { %v917_v58 = vadd.f32 %v916_v57, %v881_v35 }
 0x34e   : > { %v949_v61 = vadd.f32 %v936_v59, %v917_v58 }
 0x350   : > { %v953_v62 = vadd.f32 %v949_v61, %v397_v60 }
 0x352   : > { %958 = vst.msk [vmem:[%s332_s17 + $0x8] sm:$0xff] %vm956_vm3, %v953_v62 }
 0x353   : > { %v919_v63 = vpop.f32.mrf.mxu0 }
 0x354   : > { %v920_v0 = vadd.f32 %v919_v63, %v884_v47 }
 0x356   : > { %v950_v3 = vadd.f32 %v941_v1, %v920_v0 }
 0x358   : > { %v954_v4 = vadd.f32 %v950_v3, %v400_v2 }
 0x35a   : > { %959 = vst.msk [vmem:[%s332_s17 + $0x10] sm:$0xff] %vm956_vm3, %v954_v4 }
 0x35b   : > { %v921_v6 = vpop.f32.mrf.mxu0 }
 0x35c   : > { %v922_v7 = vadd.f32 %v921_v6, %v886_v5 }
 0x35e   : > { %v951_v9 = vadd.f32 %v946_v8, %v922_v7 }
 0x360   : > { %v955_v10 = vadd.f32 %v951_v9, %v402_v48 }
 0x362   : > { %960 = vst.msk [vmem:[%s332_s17 + $0x18] sm:$0xff] %vm956_vm3, %v955_v10 }
 0x363 PF: > { %s19_s30 = sadd.s32 1, %s1204_s30  }
 0x364   : > { %p16_p4 = scmp.ge.s32.totalorder %s19_s30, 4  }
 0x366   :  { %18 = sbr.rel (!%p16_p4) target bundleno = 1 (0x1), region = 92 }

// kernel: _lambda_.13
= control target key start
LH: loop header
LB: loop body
LE: loop exit
PB: predicated region body
PF: predicated region fallthrough
CT: control target
= control target key end

     0   :  { %v1300_v0 = vmov 0   ;;  %vm775_vm0 = vcmask 261120   ;;  %vm911_vm1 = vcmask 392192   ;;  %s2176_s5 = inlined_call_operand.vmem [shape: f32[32,1], index: 5, kind: input, shape index: {}]   ;;  %s2177_s4 = inlined_call_operand.vmem [shape: f32[32,1], index: 4, kind: input, shape index: {}]   ;;  %s2178_s0 = inlined_call_operand.vmem [shape: f32[48,16], index: 0, kind: input, shape index: {}]   ;;  %s2179_s3 = inlined_call_operand.vmem [shape: f32[32,16], index: 3, kind: input, shape index: {}]   ;;  %s2180_s14 = inlined_call_operand.vmem [shape: bf16[64,32], index: 14, kind: input, shape index: {}]   ;;  %s2181_s10 = inlined_call_operand.vmem [shape: bf16[32,48], index: 10, kind: input, shape index: {}]   ;;  %s2182_s1 = inlined_call_operand.vmem [shape: f32[1,16], index: 1, kind: input, shape index: {}]   ;;  %s2183_s2 = inlined_call_operand.vmem [shape: f32[1,16], index: 2, kind: input, shape index: {}]   ;;  %s2184_s8 = inlined_call_operand.vmem [shape: f32[32,1], index: 8, kind: input, shape index: {}]   ;;  %s2185_s7 = inlined_call_operand.vmem [shape: f32[32,1], index: 7, kind: input, shape index: {}]   ;;  %s2186_s9 = inlined_call_operand.vmem [shape: f32[32,1], index: 9, kind: input, shape index: {}]   ;;  %s2187_s11 = inlined_call_operand.vmem [shape: f32[32,1], index: 11, kind: input, shape index: {}]   ;;  %s2188_s13 = inlined_call_operand.vmem [shape: f32[64,1], index: 13, kind: input, shape index: {}]   ;;  %s2189_s15 = inlined_call_operand.vmem [shape: f32[64,1], index: 15, kind: input, shape index: {}]   ;;  %s2190_s6 = inlined_call_operand.vmem [shape: bf16[32,32], index: 6, kind: input, shape index: {}]   ;;  %s2191_s12 = inlined_call_operand.vmem [shape: bf16[64,32], index: 12, kind: input, shape index: {}]   ;;  %s2192_s16 = inlined_call_operand.vmem [shape: f32[32,16], index: 16, kind: output, shape index: {}]  }
   0x1   :  { %2209 = sst [smem:[#allocation7_spill]] %s2176_s5  ;;  %1297 = vset.pattern.permute.xlu2 %v1300_v0  ;;  %1296 = vset.pattern.permute.xlu1 %v1300_v0  ;;  %v58_v2 = vld [vmem:[%s2177_s4 + $0x10] sm:$0xff]  ;;  %v56_v3 = vld [vmem:[%s2177_s4] sm:$0xff]  ;;  %v869_v5 = vld [vmem:[%s2178_s0 + $0x28] sm:$0xff] }
   0x2   :  { %s2210_s23 = sld [smem:[#allocation7_spill]]  ;;  %1295 = vset.pattern.permute.xlu0 %v1300_v0  ;;  %v868_v4 = vld [vmem:[%s2178_s0 + $0x20] sm:$0xff]  ;;  %v1066_v6 = vld [vmem:[%s2179_s3 + $0x10] sm:$0xff]  ;;  %62 = vperm.xlu2 %1297, %v56_v3   ;;  %v1067_v8 = vld [vmem:[%s2179_s3 + $0x18] sm:$0xff] }
   0x3   :  { %72 = vperm.xlu0 %1295, %v58_v2   ;;  %v876_v7 = vpack.c.bf16 %v869_v5, %v868_v4  ;;  %v866_v9 = vld [vmem:[%s2178_s0 + $0x10] sm:$0xff]  ;;  %v867_v10 = vld [vmem:[%s2178_s0 + $0x18] sm:$0xff]  ;;  %v1077_v11 = vpack.c.bf16 %v1067_v8, %v1066_v6  ;;  %v1064_v12 = vld [vmem:[%s2179_s3] sm:$0xff] }
   0x4   :  { %v1065_v13 = vld [vmem:[%s2179_s3 + $0x8] sm:$0xff]  ;;  %v875_v14 = vpack.c.bf16 %v867_v10, %v866_v9  ;;  %v864_v16 = vld [vmem:[%s2178_s0] sm:$0xff]  ;;  %v59_v19 = vld [vmem:[%s2177_s4 + $0x18] sm:$0xff] }
   0x5   :  { %923 = vmatpush.bf16.msra.mxu1 %v876_v7  ;;  %1164 = vmatpush.bf16.msra.mxu3 %v1077_v11  ;;  %v1076_v15 = vpack.c.bf16 %v1065_v13, %v1064_v12  ;;  %v865_v17 = vld [vmem:[%s2178_s0 + $0x8] sm:$0xff]  ;;  %v1284_v21 = vld [vmem:[%s2180_s14] sm:$0xff]  ;;  %v803_v26 = vld [vmem:[%s2184_s8 + $0x10] sm:$0xff] }
   0x6   :  { %v57_v20 = vld [vmem:[%s2177_s4 + $0x8] sm:$0xff]  ;;  %v874_v22 = vpack.c.bf16 %v865_v17, %v864_v16  ;;  %v1278_v23 = vld [vmem:[%s2181_s10] sm:$0xff]  ;;  %v743_v27 = vld [vmem:[%s2185_s7 + $0x10] sm:$0xff] }
   0x7   :  { %v804_v28 = vld [vmem:[%s2184_s8 + $0x18] sm:$0xff]  ;;  %v1285_v30 = vld [vmem:[%s2180_s14 + $0x8] sm:$0xff]  ;;  %v834_v33 = vld [vmem:[%s2186_s9 + $0x10] sm:$0xff] }
   0x8   :  { %v89_v1 = vld [vmem:[%s2210_s23 + $0x10] sm:$0xff]  ;;  %v90_v18 = vld [vmem:[%s2210_s23 + $0x18] sm:$0xff]  ;;  %v88_v24 = vld [vmem:[%s2210_s23 + $0x8] sm:$0xff] }
   0x9   :  { %103 = vperm.xlu1 %1296, %v89_v1   ;;  %924 = vmatpush.bf16.msra.mxu1 %v875_v14  ;;  %v87_v25 = vld [vmem:[%s2210_s23] sm:$0xff]  ;;  %v744_v29 = vld [vmem:[%s2185_s7 + $0x18] sm:$0xff]  ;;  %v1279_v31 = vld [vmem:[%s2181_s10 + $0x8] sm:$0xff] }
   0xa   :  { %1165 = vmatpush.bf16.msra.mxu3 %v1076_v15  ;;  %67 = vperm.xlu2 %1297, %v57_v20   ;;  %v835_v32 = vld [vmem:[%s2186_s9 + $0x18] sm:$0xff]  ;;  %v801_v34 = vld [vmem:[%s2184_s8] sm:$0xff]  ;;  %v802_v36 = vld [vmem:[%s2184_s8 + $0x8] sm:$0xff] }
   0xb   :  { %77 = vperm.xlu0 %1295, %v59_v19   ;;  %v741_v35 = vld [vmem:[%s2185_s7] sm:$0xff]  ;;  %v742_v37 = vld [vmem:[%s2185_s7 + $0x8] sm:$0xff]  ;;  %v1286_v38 = vld [vmem:[%s2180_s14 + $0x10] sm:$0xff] }
   0xc   :  { %v833_v39 = vld [vmem:[%s2186_s9 + $0x8] sm:$0xff]  ;;  %v832_v40 = vld [vmem:[%s2186_s9] sm:$0xff]  ;;  %v879_v42 = vld [vmem:[%s2187_s11 + $0x10] sm:$0xff] }
   0xd   :  { %1272 = vmatmul.msk.bf16.vlgmr.msra.gmra.mxu3 %vm775_vm0, %v1284_v21  ;;  %925 = vmatpush.bf16.msra.mxu1 %v874_v22  ;;  %v877_v41 = vld [vmem:[%s2187_s11] sm:$0xff]  ;;  %v878_v43 = vld [vmem:[%s2187_s11 + $0x8] sm:$0xff]  ;;  %v880_v44 = vld [vmem:[%s2187_s11 + $0x18] sm:$0xff] }
   0xe   :  { %v1287_v45 = vld [vmem:[%s2180_s14 + $0x18] sm:$0xff]  ;;  %v948_v46 = vld [vmem:[%s2188_s13 + $0x8] sm:$0xff]  ;;  %v947_v47 = vld [vmem:[%s2188_s13] sm:$0xff] }
   0xf   :  { %v949_v48 = vld [vmem:[%s2188_s13 + $0x10] sm:$0xff]  ;;  %v951_v49 = vld [vmem:[%s2188_s13 + $0x20] sm:$0xff]  ;;  %v950_v50 = vld [vmem:[%s2188_s13 + $0x18] sm:$0xff] }
  0x10   :  { %1234 = vmatmul.msk.bf16.vlgmr.msra.gmra.mxu1 %vm911_vm1, %v1278_v23  ;;  %v952_v51 = vld [vmem:[%s2188_s13 + $0x28] sm:$0xff]  ;;  %v954_v52 = vld [vmem:[%s2188_s13 + $0x38] sm:$0xff]  ;;  %v953_v53 = vld [vmem:[%s2188_s13 + $0x30] sm:$0xff] }
  0x11   :  { %108 = vperm.xlu1 %1296, %v90_v18   ;;  %v1078_v54 = vld [vmem:[%s2189_s15] sm:$0xff]  ;;  %v1080_v55 = vld [vmem:[%s2189_s15 + $0x10] sm:$0xff]  ;;  %v1079_v56 = vld [vmem:[%s2189_s15 + $0x8] sm:$0xff] }
  0x12   :  { %817 = vperm.xlu2 %1297, %v803_v26   ;;  %v1081_v57 = vld [vmem:[%s2189_s15 + $0x18] sm:$0xff]  ;;  %v1083_v58 = vld [vmem:[%s2189_s15 + $0x28] sm:$0xff]  ;;  %v1082_v59 = vld [vmem:[%s2189_s15 + $0x20] sm:$0xff] }
  0x13   :  { %93 = vperm.xlu0 %1295, %v87_v25   ;;  %v1084_v60 = vld [vmem:[%s2189_s15 + $0x30] sm:$0xff]  ;;  %v1085_v61 = vld [vmem:[%s2189_s15 + $0x38] sm:$0xff]  ;;  %v1298_v62 = vld [vmem:[%s2182_s1] ss:$0 sm:$0xff] }
  0x19   :  { %98 = vperm.xlu1 %1296, %v88_v24  }
  0x1a   :  { %762 = vperm.xlu2 %1297, %v744_v29  }
  0x1b   :  { %822 = vperm.xlu0 %1295, %v804_v28  }
  0x1d   :  { %1273 = vmatmul.msk.bf16.gmra.mxu3 %vm775_vm0, %v1285_v30 }
  0x20   :  { %1235 = vmatmul.msk.bf16.gmra.mxu1 %vm911_vm1, %v1279_v31 }
  0x21   :  { %757 = vperm.xlu1 %1296, %v743_v27  }
  0x22   :  { %807 = vperm.xlu2 %1297, %v801_v34  }
  0x23   :  { %848 = vperm.xlu0 %1295, %v834_v33  }
  0x29   :  { %853 = vperm.xlu1 %1296, %v835_v32  }
  0x2a   :  { %752 = vperm.xlu2 %1297, %v742_v37  }
  0x2b   :  { %812 = vperm.xlu0 %1295, %v802_v36  }
  0x2d   :  { %1274 = vmatmul.msk.bf16.gmra.mxu3 %vm775_vm0, %v1286_v38 }
  0x31   :  { %747 = vperm.xlu1 %1296, %v741_v35  }
  0x32   :  { %883 = vperm.xlu2 %1297, %v877_v41  }
  0x33   :  { %838 = vperm.xlu0 %1295, %v832_v40  }
  0x39   :  { %843 = vperm.xlu1 %1296, %v833_v39  }
  0x3a   :  { %898 = vperm.xlu2 %1297, %v880_v44  }
  0x3b   :  { %888 = vperm.xlu0 %1295, %v878_v43  }
  0x3d   :  { %1275 = vmatmul.msk.bf16.gmra.mxu3 %vm775_vm0, %v1287_v45 }
  0x41   :  { %893 = vperm.xlu1 %1296, %v879_v42  }
  0x42   :  { %967 = vperm.xlu2 %1297, %v949_v48   ;;  %v1301_v48 = vmov 1326507024  }
  0x43   :  { %957 = vperm.xlu0 %1295, %v947_v47  }
  0x49   :  { %962 = vperm.xlu1 %1296, %v948_v46  }
  0x4a   :  { %982 = vperm.xlu2 %1297, %v952_v51  }
  0x4b   :  { %972 = vperm.xlu0 %1295, %v950_v50   ;;  %v1302_v50 = vmov 683565275  }
  0x51   :  { %977 = vperm.xlu1 %1296, %v951_v49  }
  0x52   :  { %1088 = vperm.xlu2 %1297, %v1078_v54  }
  0x53   :  { %987 = vperm.xlu0 %1295, %v953_v53  }
  0x59   :  { %992 = vperm.xlu1 %1296, %v954_v52  }
  0x5a   :  { %1103 = vperm.xlu2 %1297, %v1081_v57   ;;  %v1304_v57 = vmov 920167782  }
  0x5b   :  { %1093 = vperm.xlu0 %1295, %v1079_v56  }
  0x5c   :  { %v63_v3 = vpop.permute.xlu2 %62 }
  0x5d   :  { %v83_v13 = vmul.f32 %v1298_v62, %v63_v3  ;;  %v1306_v3 = vmov 2102212464  }
  0x61   :  { %1098 = vperm.xlu1 %1296, %v1080_v55   ;;  %v1303_v55 = vmov 2475754826  }
  0x62   :  { %1118 = vperm.xlu2 %1297, %v1084_v60  }
  0x63   :  { %1108 = vperm.xlu0 %1295, %v1082_v59  }
  0x64   :  { %v68_v10 = vpop.permute.xlu2 %67 }
  0x65   :  { %v84_v12 = vmul.f32 %v1298_v62, %v68_v10 }
  0x69   :  { %1113 = vperm.xlu1 %1296, %v1083_v58  }
  0x6b   :  { %1123 = vperm.xlu0 %1295, %v1085_v61   ;;  %v1305_v61 = vmov 2131351028  }
  0x75   :  { %v73_v1 = vpop.permute.xlu0 %72 }
  0x76   :  { %v85_v2 = vmul.f32 %v1298_v62, %v73_v1 }
  0x7b   :  { %v104_v63 = vpop.permute.xlu1 %103 }
  0x7c   :  { %v1572_v4 = vadd.f32 %v104_v63, %v85_v2 }
  0x7d   :  { %v78_v7 = vpop.permute.xlu0 %77 }
  0x7e   :  { %v428_v5 = vand.u32 2139095040, %v1572_v4  ;;  %v86_v8 = vmul.f32 %v1298_v62, %v78_v7  ;;  %v2196_v32 = vand.u32 2147483647, %v1572_v4 }
  0x80   :  { %v429_v9 = vshrl.u32 %v428_v5, 23  ;;  %v1591_v39 = vand.u32 8388607, %v2196_v32 }
  0x82   :  { %v1210_v14 = vadd.s32 4294967169, %v429_v9  ;;  %v433_v45 = vor.u32 8388608, %v1591_v39 }
  0x83   :  { %v109_v6 = vpop.permute.xlu1 %108 }
  0x84   :  { %v1575_v11 = vadd.f32 %v109_v6, %v86_v8  ;;  %v435_v21 = vadd.s32 1, %v1210_v14 }
  0x85   :  { %v94_v17 = vpop.permute.xlu0 %93 }
  0x86   :  { %2211 = vst [vmem:[#allocation2_spill] sm:$0xff] %v1575_v11  ;;  %v583_v18 = vand.u32 2139095040, %v1575_v11  ;;  %v1580_v19 = vadd.f32 %v94_v17, %v83_v13  ;;  %vm436_vm2 = vcmp.gt.s32.totalorder %v435_v21, 0 }
  0x87   :  { %v437_v29 = vsel %vm436_vm2, %v435_v21, 0 }
  0x88   :  { %2213 = vst [vmem:[#allocation4_spill] sm:$0xff] %v1580_v19  ;;  %v118_v22 = vand.u32 2139095040, %v1580_v19  ;;  %v584_v24 = vshrl.u32 %v583_v18, 23  ;;  %v1586_v35 = vand.u32 31, %v437_v29  ;;  %v2195_v37 = vand.u32 2147483647, %v1580_v19 }
  0x89   :  { %v1602_v44 = vshrl.u32 %v437_v29, 5 }
  0x8a   :  { %v119_v26 = vshrl.u32 %v118_v22, 23  ;;  %v1213_v28 = vadd.s32 4294967169, %v584_v24  ;;  %v1598_v42 = vsub.s32 32, %v1586_v35  ;;  %v122_v43 = vand.u32 8388607, %v2195_v37 }
  0x8b   :  { %v99_v15 = vpop.permute.xlu1 %98  ;;  %v442_v51 = vshll.u32 %v1302_v50, %v1586_v35  ;;  %v445_v56 = vshll.u32 %v1303_v55, %v1586_v35  ;;  %v454_v37 = vshll.u32 %v1304_v57, %v1586_v35  ;;  %vm457_vm13 = vcmp.lt.s32.totalorder %v1602_v44, 1 }
  0x8c   :  { %v1577_v16 = vadd.f32 %v99_v15, %v84_v12  ;;  %v1204_v30 = vadd.s32 4294967169, %v119_v26  ;;  %v590_v36 = vadd.s32 1, %v1213_v28  ;;  %v123_v52 = vor.u32 8388608, %v122_v43 }
  0x8d   :  { %v1611_v54 = vshrl.u32 %v1302_v50, %v1598_v42  ;;  %v443_v60 = vshrl.u32 %v1303_v55, %v1598_v42  ;;  %v446_v62 = vshrl.u32 %v1305_v61, %v1598_v42  ;;  %vm459_vm14 = vcmp.lt.s32.totalorder %v1602_v44, 3 }
  0x8e   :  { %2212 = vst [vmem:[#allocation3_spill] sm:$0xff] %v1577_v16  ;;  %v273_v20 = vand.u32 2139095040, %v1577_v16  ;;  %v2194_v33 = vand.u32 2147483647, %v1577_v16  ;;  %v125_v38 = vadd.s32 1, %v1204_v30  ;;  %vm591_vm4 = vcmp.gt.s32.totalorder %v590_v36, 0 }
  0x8f   :  { %v592_v46 = vsel %vm591_vm4, %v590_v36, 0  ;;  %v1637_v14 = vshll.u32 %v123_v52, 8  ;;  %v1641_v18 = vor.u32 %v443_v60, %v442_v51  ;;  %v452_v52 = vshrl.u32 %v1304_v57, %v1598_v42 }
  0x90   :  { %v274_v23 = vshrl.u32 %v273_v20, 23  ;;  %v277_v40 = vand.u32 8388607, %v2194_v33  ;;  %vm126_vm5 = vcmp.gt.s32.totalorder %v125_v38, 0  ;;  %v1622_v63 = vand.u32 31, %v592_v46 }
  0x91   :  { %v127_v53 = vsel %vm126_vm5, %v125_v38, 0  ;;  %v1639_v15 = vshrl.u32 %v592_v46, 5  ;;  %v1643_v20 = vor.u32 %v446_v62, %v445_v56  ;;  %v1674_v36 = vshrl.u32 %v1637_v14, 16 }
  0x92   :  { %v1207_v25 = vadd.s32 4294967169, %v274_v23  ;;  %v278_v47 = vor.u32 8388608, %v277_v40  ;;  %v129_v9 = vand.u32 31, %v127_v53  ;;  %v1652_v24 = vsub.s32 32, %v1622_v63 }
  0x93   :  { %v1682_v43 = vshrl.u32 %v127_v53, 5  ;;  %v449_v46 = vshrl.u32 %v1306_v3, %v1598_v42  ;;  %vm460_vm15 = vcmp.lt.s32.totalorder %v1602_v44, 4  ;;  %vm458_vm1 = vcmp.lt.s32.totalorder %v1602_v44, 2 }
  0x94   :  { %v280_v27 = vadd.s32 1, %v1207_v25  ;;  %v1631_v8 = vshll.u32 %v278_v47, 8  ;;  %v130_v26 = vsub.s32 32, %v129_v9  ;;  %v135_v60 = vshll.u32 %v1303_v55, %v129_v9 }
  0x95   :  { %v138_v62 = vshll.u32 %v1305_v61, %v129_v9  ;;  %vm147_vm10 = vcmp.lt.s32.totalorder %v1682_v43, 1  ;;  %vm150_vm11 = vcmp.lt.s32.totalorder %v1682_v43, 4  ;;  %vm149_vm12 = vcmp.lt.s32.totalorder %v1682_v43, 3 }
  0x96   :  { %vm281_vm3 = vcmp.gt.s32.totalorder %v280_v27, 0  ;;  %2214 = vst [vmem:[#allocation5_spill] sm:$0xff] %v1631_v8  ;;  %v1661_v29 = vand.u32 65535, %v1631_v8  ;;  %v1664_v30 = vshrl.u32 %v1631_v8, 16  ;;  %v136_v47 = vshrl.u32 %v1305_v61, %v130_v26 }
  0x97   :  { %v282_v31 = vsel %vm281_vm3, %v280_v27, 0  ;;  %v448_v27 = vshll.u32 %v1305_v61, %v1586_v35  ;;  %v142_v51 = vshrl.u32 %v1304_v57, %v130_v26  ;;  %vm148_vm2 = vcmp.lt.s32.totalorder %v1682_v43, 2 }
  0x98   :  { %v284_v34 = vand.u32 31, %v282_v31  ;;  %v1624_v1 = vshrl.u32 %v282_v31, 5  ;;  %v1667_v31 = vand.u32 65535, %v1637_v14 }
  0x9a   :  { %v1595_v41 = vsub.s32 32, %v284_v34  ;;  %v299_v59 = vshll.u32 %v1304_v57, %v284_v34  ;;  %v296_v6 = vshll.u32 %v1306_v3, %v284_v34  ;;  %v290_v12 = vshll.u32 %v1303_v55, %v284_v34 }
  0x9b   :  { %v293_v13 = vshll.u32 %v1305_v61, %v284_v34  ;;  %v287_v21 = vshll.u32 %v1302_v50, %v284_v34  ;;  %vm305_vm6 = vcmp.lt.s32.totalorder %v1624_v1, 4  ;;  %vm302_vm7 = vcmp.lt.s32.totalorder %v1624_v1, 1 }
  0x9c   :  { %v300_v49 = vshrl.u32 %v1301_v48, %v1595_v41  ;;  %v297_v58 = vshrl.u32 %v1304_v57, %v1595_v41  ;;  %v291_v2 = vshrl.u32 %v1305_v61, %v1595_v41  ;;  %v294_v5 = vshrl.u32 %v1306_v3, %v1595_v41 }
  0x9d   :  { %v288_v10 = vshrl.u32 %v1303_v55, %v1595_v41  ;;  %vm304_vm8 = vcmp.lt.s32.totalorder %v1624_v1, 3  ;;  %vm303_vm9 = vcmp.lt.s32.totalorder %v1624_v1, 2 }
  0x9e   :  { %v301_v7 = vor.u32 %v300_v49, %v299_v59  ;;  %v298_v17 = vor.u32 %v297_v58, %v296_v6  ;;  %v1646_v22 = vor.u32 %v291_v2, %v290_v12  ;;  %v1648_v23 = vor.u32 %v294_v5, %v293_v13 }
  0x9f   :  { %v1658_v28 = vor.u32 %v288_v10, %v287_v21  ;;  %v139_v49 = vshrl.u32 %v1306_v3, %v130_v26  ;;  %v145_v58 = vshrl.u32 %v1301_v48, %v130_v26  ;;  %v141_v2 = vshll.u32 %v1306_v3, %v129_v9 }
  0xa0   :  { %v315_v25 = vsel %vm305_vm6, %v301_v7, 1326507024  ;;  %v311_v34 = vsel %vm305_vm6, %v298_v17, 920167782  ;;  %v314_v38 = vsel %vm302_vm7, %v1646_v22, %v1648_v23  ;;  %v132_v5 = vshll.u32 %v1302_v50, %v129_v9 }
  0xa1   :  { %v316_v40 = vsel %vm304_vm8, %v298_v17, %v315_v25  ;;  %v310_v53 = vsel %vm302_vm7, %v1658_v28, %v1646_v22  ;;  %v312_v56 = vsel %vm304_vm8, %v1648_v23, %v311_v34  ;;  %v133_v6 = vshrl.u32 %v1303_v55, %v130_v26 }
  0xa2   :  { %v1702_v59 = vsel %vm303_vm9, %v314_v38, %v316_v40  ;;  %v144_v7 = vshll.u32 %v1304_v57, %v129_v9  ;;  %v451_v10 = vshll.u32 %v1306_v3, %v1586_v35  ;;  %v1714_v12 = vsel %vm303_vm9, %v310_v53, %v312_v56 }
  0xa3   :  { %v1716_v13 = vor.u32 %v136_v47, %v135_v60  ;;  %v1718_v17 = vor.u32 %v139_v49, %v138_v62  ;;  %v143_v21 = vor.u32 %v142_v51, %v141_v2  ;;  %v2197_v34 = vshrl.u32 %v1702_v59, 16 }
  0xa4   :  { %v1723_v38 = vshrl.u32 %v1302_v50, %v130_v26  ;;  %v146_v9 = vor.u32 %v145_v58, %v144_v7  ;;  %v450_v40 = vor.u32 %v449_v46, %v448_v27  ;;  %v453_v33 = vor.u32 %v452_v52, %v451_v10 }
  0xa5   :  { %v455_v47 = vshrl.u32 %v1301_v48, %v1598_v42  ;;  %v1730_v53 = vor.u32 %v133_v6, %v132_v5  ;;  %v156_v26 = vsel %vm150_vm11, %v143_v21, 920167782  ;;  %v159_v35 = vsel %vm147_vm10, %v1716_v13, %v1718_v17 }
  0xa6   :  { %v160_v42 = vsel %vm150_vm11, %v146_v9, 1326507024  ;;  %v462_v46 = vsel %vm460_vm15, %v450_v40, 2102212464  ;;  %v465_v51 = vsel %vm457_vm13, %v1641_v18, %v1643_v20  ;;  %v466_v52 = vsel %vm460_vm15, %v453_v33, 920167782 }
  0xa7   :  { %v456_v27 = vor.u32 %v455_v47, %v454_v37  ;;  %v469_v56 = vsel %vm457_vm13, %v1643_v20, %v450_v40  ;;  %v467_v58 = vsel %vm459_vm14, %v450_v40, %v466_v52  ;;  %v1752_v60 = vshll.u32 %v433_v45, 8 }
  0xa8   :  { %v161_v62 = vsel %vm149_vm12, %v143_v21, %v160_v42  ;;  %v461_v2 = vsel %vm457_vm13, %v1611_v54, %v1641_v18  ;;  %v468_v5 = vsel %vm458_vm1, %v465_v51, %v467_v58  ;;  %v463_v7 = vsel %vm459_vm14, %v1643_v20, %v462_v46 }
  0xa9   :  { %v470_v37 = vsel %vm460_vm15, %v456_v27, 1326507024  ;;  %v475_v9 = vshrl.u32 %v1752_v60, 16  ;;  %v498_v39 = vand.u32 65535, %v468_v5  ;;  %v474_v45 = vand.u32 65535, %v1752_v60 }
  0xaa   :  { %v471_v6 = vsel %vm459_vm14, %v453_v33, %v470_v37  ;;  %v499_v21 = vshrl.u32 %v468_v5, 16  ;;  %v1768_v54 = vmul.u32 %v2197_v34, %v1661_v29  ;;  %v1775_v33 = vsel %vm147_vm10, %v1730_v53, %v1716_v13 }
  0xab   :  { %v472_v10 = vsel %vm458_vm1, %v469_v56, %v471_v6  ;;  %v502_v18 = vmul.u32 %v498_v39, %v475_v9  ;;  %v1780_v20 = vsel %vm149_vm12, %v1718_v17, %v156_v26  ;;  %v1784_v27 = vsel %vm148_vm2, %v159_v35, %v161_v62 }
  0xac   :  { %v476_v40 = vand.u32 65535, %v472_v10  ;;  %v477_v47 = vshrl.u32 %v472_v10, 16  ;;  %v1788_v51 = vsel %vm458_vm1, %v461_v2, %v463_v7  ;;  %v500_v52 = vmul.u32 %v498_v39, %v474_v45 }
  0xad   :  { %v501_v56 = vmul.u32 %v499_v21, %v474_v45  ;;  %v2198_v58 = vand.u32 2147483647, %v1575_v11  ;;  %v503_v10 = vmul.u32 %v499_v21, %v475_v9  ;;  %v506_v49 = vshll.u32 %v502_v18, 16 }
  0xae   :  { %v479_v42 = vmul.u32 %v477_v47, %v474_v45  ;;  %v480_v46 = vmul.u32 %v476_v40, %v475_v9  ;;  %v478_v37 = vmul.u32 %v476_v40, %v474_v45  ;;  %v481_v5 = vmul.u32 %v477_v47, %v475_v9 }
  0xaf   :  { %v504_v34 = vshll.u32 %v501_v56, 16  ;;  %v505_v25 = vshrl.u32 %v501_v56, 16  ;;  %v597_v7 = vshll.u32 %v1302_v50, %v1622_v63  ;;  %v598_v9 = vshrl.u32 %v1303_v55, %v1652_v24 }
  0xb0   :  { %v482_v6 = vshll.u32 %v479_v42, 16  ;;  %v483_v26 = vshrl.u32 %v479_v42, 16  ;;  %v484_v32 = vshll.u32 %v480_v46, 16  ;;  %v485_v35 = vshrl.u32 %v480_v46, 16 }
  0xb1   :  { %vm508_vm4 = vc.u32 %v500_v52, %v504_v34  ;;  %v510_v2 = vadd.s32 %v504_v34, %v500_v52  ;;  %v507_v47 = vshrl.u32 %v502_v18, 16  ;;  %v587_v34 = vand.u32 8388607, %v2198_v58 }
  0xb2   :  { %vm486_vm3 = vc.u32 %v478_v37, %v482_v6  ;;  %v488_v62 = vadd.s32 %v482_v6, %v478_v37  ;;  %v509_v45 = vsel %vm508_vm4, 1, %v1300_v0  ;;  %v1801_v52 = vor.u32 %v598_v9, %v597_v7 }
  0xb3   :  { %v487_v44 = vsel %vm486_vm3, 1, %v1300_v0  ;;  %v511_v21 = vadd.s32 %v509_v45, %v503_v10  ;;  %vm512_vm13 = vc.u32 %v510_v2, %v506_v49  ;;  %v601_v37 = vshrl.u32 %v1305_v61, %v1652_v24 }
  0xb4   :  { %v489_v39 = vadd.s32 %v487_v44, %v481_v5  ;;  %vm490_vm5 = vc.u32 %v488_v62, %v484_v32  ;;  %v513_v46 = vsel %vm512_vm13, 1, %v1300_v0  ;;  %v600_v32 = vshll.u32 %v1303_v55, %v1622_v63 }
  0xb5   :  { %v491_v40 = vsel %vm490_vm5, 1, %v1300_v0  ;;  %v515_v56 = vadd.s32 %v513_v46, %v511_v21  ;;  %v604_v18 = vshrl.u32 %v1306_v3, %v1652_v24  ;;  %v603_v6 = vshll.u32 %v1305_v61, %v1622_v63 }
  0xb6   :  { %v493_v42 = vadd.s32 %v491_v40, %v489_v39  ;;  %v606_v10 = vshll.u32 %v1306_v3, %v1622_v63  ;;  %v607_v62 = vshrl.u32 %v1304_v57, %v1652_v24  ;;  %v1815_v7 = vor.u32 %v601_v37, %v600_v32 }
  0xb7   :  { %v516_v44 = vadd.s32 %v515_v56, %v505_v25  ;;  %v609_v55 = vshll.u32 %v1304_v57, %v1622_v63  ;;  %v610_v39 = vshrl.u32 %v1301_v48, %v1652_v24  ;;  %v1825_v61 = vor.u32 %v604_v18, %v603_v6 }
  0xb8   :  { %v494_v5 = vadd.s32 %v493_v42, %v483_v26  ;;  %v1823_v26 = vadd.s32 %v510_v2, %v506_v49  ;;  %v608_v9 = vor.u32 %v607_v62, %v606_v10  ;;  %v167_v3 = vshrl.u32 %v1784_v27, 16 }
  0xb9   :  { %v517_v40 = vadd.s32 %v516_v44, %v507_v47  ;;  %v518_v25 = vmul.u32 %v1752_v60, %v1788_v51  ;;  %v611_v21 = vor.u32 %v610_v39, %v609_v55  ;;  %v588_v57 = vor.u32 8388608, %v587_v34 }
  0xba   :  { %v1821_v45 = vadd.s32 %v494_v5, %v485_v35  ;;  %vm612_vm15 = vcmp.lt.s32.totalorder %v1639_v15, 1  ;;  %vm615_vm1 = vcmp.lt.s32.totalorder %v1639_v15, 4  ;;  %vm614_vm3 = vcmp.lt.s32.totalorder %v1639_v15, 3 }
  0xbb   :  { %v521_v48 = vadd.s32 1, %v517_v40  ;;  %v620_v63 = vsel %vm612_vm15, %v1801_v52, %v1815_v7  ;;  %v621_v49 = vsel %vm615_vm1, %v608_v9, 920167782  ;;  %vm613_vm4 = vcmp.lt.s32.totalorder %v1639_v15, 2 }
  0xbc   :  { %vm520_vm14 = vc.u32 %v1821_v45, %v1823_v26  ;;  %v622_v60 = vsel %vm614_vm3, %v1825_v61, %v621_v49  ;;  %v624_v51 = vsel %vm612_vm15, %v1815_v7, %v1825_v61  ;;  %v625_v35 = vsel %vm615_vm1, %v611_v21, 1326507024 }
  0xbd   :  { %v1852_v2 = vmul.u32 %v167_v3, %v1667_v31  ;;  %v522_v47 = vsel %vm520_vm14, %v521_v48, %v517_v40  ;;  %v623_v42 = vsel %vm613_vm4, %v620_v63, %v622_v60  ;;  %v626_v46 = vsel %vm614_vm3, %v608_v9, %v625_v35 }
  0xbe   :  { %v1862_v34 = vsel %vm148_vm2, %v1775_v33, %v1780_v20  ;;  %v523_v56 = vadd.s32 %v522_v47, %v518_v25  ;;  %v627_v32 = vsel %vm613_vm4, %v624_v51, %v626_v46  ;;  %v1866_v37 = vshll.u32 %v588_v57, 8 }
  0xbf   :  { %v166_v18 = vand.u32 65535, %v1784_v27  ;;  %v631_v5 = vand.u32 65535, %v627_v32  ;;  %v632_v6 = vshrl.u32 %v627_v32, 16  ;;  %v654_v10 = vshrl.u32 %v623_v42, 16 }
  0xc0   :  { %v2215_v62 = vand.u32 65535, %v1702_v59  ;;  %v524_v33 = vadd.s32 536870912, %v523_v56  ;;  %v629_v20 = vand.u32 65535, %v1866_v37  ;;  %v2216_v39 = vshrl.u32 %v1714_v12, 16 }
  0xc1   :  { %v172_v27 = vshll.u32 %v1852_v2, 16  ;;  %v2207_v40 = vshrl.u32 %v1862_v34, 16  ;;  %v630_v25 = vshrl.u32 %v1866_v37, 16  ;;  %v1888_v57 = vsel %vm150_vm11, %v1718_v17, 2102212464 }
  0xc2   :  { %v1872_v44 = vmul.u32 %v2215_v62, %v1661_v29  ;;  %v1879_v9 = vmul.u32 %v2216_v39, %v1661_v29  ;;  %v1890_v48 = vshrl.u32 %v524_v33, 30  ;;  %v634_v63 = vmul.u32 %v632_v6, %v629_v20 }
  0xc3   :  { %v168_v49 = vmul.u32 %v166_v18, %v1667_v31  ;;  %v635_v60 = vmul.u32 %v631_v5, %v630_v25  ;;  %v653_v51 = vand.u32 65535, %v623_v42  ;;  %v656_v35 = vmul.u32 %v654_v10, %v629_v20 }
  0xc4   :  { %2217 = vst [vmem:[#allocation6_spill] sm:$0xff] %v1890_v48  ;;  %v526_v46 = vshll.u32 %v1890_v48, 30  ;;  %v633_v32 = vmul.u32 %v631_v5, %v629_v20  ;;  %v637_v62 = vshll.u32 %v634_v63, 16  ;;  %v171_v39 = vmul.u32 %v167_v3, %v1674_v36 }
  0xc5   :  { %vm1896_vm5 = vc.u32 %v168_v49, %v172_v27  ;;  %v1903_v17 = vmul.u32 %v2207_v40, %v1667_v31  ;;  %v596_v42 = vshrl.u32 %v1302_v50, %v1652_v24  ;;  %v636_v55 = vmul.u32 %v632_v6, %v630_v25 }
  0xc6   :  { %v527_v33 = vsub.s32 %v523_v56, %v526_v46  ;;  %vm641_vm11 = vc.u32 %v633_v32, %v637_v62  ;;  %v643_v47 = vadd.s32 %v637_v62, %v633_v32  ;;  %v639_v5 = vshll.u32 %v635_v60, 16 }
  0xc7   :  { %v642_v21 = vsel %vm641_vm11, 1, %v1300_v0  ;;  %v655_v3 = vmul.u32 %v653_v51, %v629_v20  ;;  %v659_v16 = vshll.u32 %v656_v35, 16  ;;  %v657_v48 = vmul.u32 %v653_v51, %v630_v25 }
  0xc8   :  { %vm528_vm13 = vcmp.lt.s32.totalorder %v527_v33, 0  ;;  %v529_v19 = vsub.s32 0, %v527_v33  ;;  %v644_v11 = vadd.s32 %v642_v21, %v636_v55  ;;  %v617_v40 = vsel %vm615_vm1, %v1825_v61, 2102212464 }
  0xc9   :  { %v638_v8 = vshrl.u32 %v634_v63, 16  ;;  %vm645_vm14 = vc.u32 %v643_v47, %v639_v5  ;;  %v1912_v24 = vmul.u32 %v166_v18, %v1674_v36  ;;  %v658_v46 = vmul.u32 %v654_v10, %v630_v25 }
  0xca   :  { %v530_v56 = vsel %vm528_vm13, %v529_v19, %v527_v33  ;;  %v646_v6 = vsel %vm645_vm14, 1, %v1300_v0  ;;  %vm663_vm11 = vc.u32 %v655_v3, %v659_v16  ;;  %v665_v55 = vadd.s32 %v659_v16, %v655_v3 }
  0xcb   :  { %v531_v20 = vclz %v530_v56  ;;  %v648_v32 = vadd.s32 %v646_v6, %v644_v11  ;;  %v664_v62 = vsel %vm663_vm11, 1, %v1300_v0  ;;  %v178_v21 = vadd.s32 %v172_v27, %v168_v49 }
  0xcc   :  { %v519_v51 = vadd.s32 %v1823_v26, %v1821_v45  ;;  %v661_v61 = vshll.u32 %v657_v48, 16  ;;  %v177_v18 = vsel %vm1896_vm5, 1, %v1300_v0  ;;  %v616_v19 = vsel %vm612_vm15, %v596_v42, %v1801_v52 }
  0xcd   :  { %v1211_v63 = vadd.s32 4294967294, %v531_v20  ;;  %v649_v10 = vadd.s32 %v648_v32, %v638_v8  ;;  %v666_v25 = vadd.s32 %v664_v62, %v658_v46  ;;  %v618_v11 = vsel %vm614_vm3, %v1815_v7, %v617_v40 }
  0xce   :  { %v640_v16 = vshrl.u32 %v635_v60, 16  ;;  %vm667_vm1 = vc.u32 %v665_v55, %v661_v61  ;;  %v174_v45 = vshll.u32 %v1912_v24, 16  ;;  %v660_v26 = vshrl.u32 %v656_v35, 16 }
  0xcf   :  { %vm1212_vm13 = vcmp.lt.s32.totalorder %v1211_v63, 0  ;;  %v668_v58 = vsel %vm667_vm1, 1, %v1300_v0  ;;  %v179_v27 = vadd.s32 %v177_v18, %v171_v39  ;;  %v662_v47 = vshrl.u32 %v657_v48, 16 }
  0xd0   :  { %v534_v49 = vsel %vm1212_vm13, 0, %v1211_v63  ;;  %v670_v5 = vadd.s32 %v668_v58, %v666_v25  ;;  %vm180_vm5 = vc.u32 %v178_v21, %v174_v45  ;;  %v1929_v42 = vadd.s32 %v649_v10, %v640_v16 }
  0xd1   :  { %v535_v52 = vsub.s32 32, %v534_v49  ;;  %v539_v8 = vsub.s32 4294967266, %v534_v49  ;;  %v1931_v3 = vadd.s32 %v665_v55, %v661_v61  ;;  %v2220_v7 = vshll.u32 %v1768_v54, 16 }
  0xd2   :  { %v536_v60 = vshll.u32 %v527_v33, %v534_v49  ;;  %v671_v35 = vadd.s32 %v670_v5, %v660_v26  ;;  %v181_v39 = vsel %vm180_vm5, 1, %v1300_v0  ;;  %v2223_v48 = vand.u32 65535, %v1862_v34 }
  0xd3   :  { %vm1936_vm15 = vc.u32 %v1872_v44, %v2220_v7  ;;  %v537_v6 = vshrl.u32 %v519_v51, %v535_v52  ;;  %v540_v46 = vadd.s32 127, %v539_v8  ;;  %v183_v20 = vadd.s32 %v181_v39, %v179_v27 }
  0xd4   :  { %v192_v56 = vmul.u32 %v2223_v48, %v1674_v36  ;;  %v194_v32 = vshll.u32 %v1903_v17, 16  ;;  %v2224_v62 = vshrl.u32 %v1862_v34, 16  ;;  %v619_v21 = vsel %vm613_vm4, %v616_v19, %v618_v11 }
  0xd5   :  { %v672_v33 = vadd.s32 %v671_v35, %v662_v47  ;;  %v2225_v61 = vmov %v2223_v48  ;;  %v538_v63 = vor.u32 %v537_v6, %v536_v60  ;;  %v541_v10 = vshll.u32 %v540_v46, 23 }
  0xd6   :  { %v193_v55 = vmul.u32 %v2224_v62, %v1674_v36  ;;  %v190_v18 = vmul.u32 %v2225_v61, %v1667_v31  ;;  %vm675_vm3 = vc.u32 %v1929_v42, %v1931_v3  ;;  %v173_v51 = vshrl.u32 %v1852_v2, 16 }
  0xd7   :  { %vm427_vm14 = vcmp.lt.s32.totalorder %v1572_v4, 0  ;;  %v676_v25 = vadd.s32 1, %v672_v33  ;;  %v196_v16 = vshll.u32 %v192_v56, 16  ;;  %v542_v15 = vor.u32 4788187, %v541_v10 }
  0xd8   :  { %vm198_vm11 = vc.u32 %v190_v18, %v194_v32  ;;  %v200_v36 = vadd.s32 %v194_v32, %v190_v18  ;;  %v673_v19 = vmul.u32 %v1866_v37, %v619_v21  ;;  %v184_v11 = vadd.s32 %v183_v20, %v173_v51 }
  0xd9   :  { %v199_v34 = vsel %vm198_vm11, 1, %v1300_v0  ;;  %v677_v31 = vsel %vm675_vm3, %v676_v25, %v672_v33  ;;  %v175_v45 = vshrl.u32 %v1912_v24, 16  ;;  %v543_v58 = vand.u32 2147483647, %v542_v15 }
  0xda   :  { %v201_v26 = vadd.s32 %v199_v34, %v193_v55  ;;  %vm202_vm4 = vc.u32 %v200_v36, %v196_v16  ;;  %v545_v27 = vcvt.s32.f32 %v538_v63  ;;  %v678_v2 = vadd.s32 %v677_v31, %v673_v19 }
  0xdb   :  { %v203_v49 = vsel %vm202_vm4, 1, %v1300_v0  ;;  %v2226_v47 = vmov %v2220_v7  ;;  %v195_v52 = vshrl.u32 %v1903_v17, 16  ;;  %v2227_v8 = vand.u32 65535, %v1702_v59 }
  0xdc   :  { %v333_v5 = vadd.s32 %v2226_v47, %v1872_v44  ;;  %v205_v37 = vadd.s32 %v203_v49, %v201_v26  ;;  %v151_v24 = vsel %vm147_vm10, %v1723_v38, %v1730_v53  ;;  %v546_v60 = vmul.f32 %v545_v27, %v543_v58 }
  0xdd   :  { %v1968_v7 = vmul.u32 %v2227_v8, %v1664_v30  ;;  %v679_v35 = vadd.s32 536870912, %v678_v2  ;;  %v1974_v39 = vadd.s32 %v184_v11, %v175_v45  ;;  %v153_v44 = vsel %vm149_vm12, %v1716_v13, %v1888_v57 }
  0xde   :  { %v197_v17 = vshrl.u32 %v192_v56, 16  ;;  %v206_v48 = vadd.s32 %v205_v37, %v195_v52  ;;  %v547_v46 = vxor.u32 2147483648, %v546_v60  ;;  %v1983_v32 = vadd.s32 %v200_v36, %v196_v16 }
  0xdf   :  { %v329_v6 = vshll.u32 %v1968_v7, 16  ;;  %v1981_v20 = vshrl.u32 %v679_v35, 30  ;;  %v332_v38 = vsel %vm1936_vm15, 1, %v1300_v0  ;;  %v2228_v53 = vshrl.u32 %v1702_v59, 16 }
  0xe0   :  { %v207_v55 = vadd.s32 %v206_v48, %v197_v17  ;;  %v349_v13 = vshll.u32 %v1879_v9, 16  ;;  %v154_v57 = vsel %vm148_vm2, %v151_v24, %v153_v44  ;;  %v548_v56 = vsel %vm427_vm14, %v547_v46, %v546_v60 }
  0xe1   :  { %v326_v62 = vmul.u32 %v2228_v53, %v1664_v30  ;;  %vm335_vm10 = vc.u32 %v333_v5, %v329_v6  ;;  %v681_v21 = vshll.u32 %v1981_v20, 30  ;;  %vm210_vm12 = vc.u32 %v1974_v39, %v1983_v32 }
  0xe2   :  { %v211_v40 = vadd.s32 1, %v207_v55  ;;  %v2229_v59 = vand.u32 65535, %v1714_v12  ;;  %v2230_v18 = vand.u32 2147483647, %v1572_v4  ;;  %v336_v10 = vsel %vm335_vm10, 1, %v1300_v0 }
  0xe3   :  { %v334_v33 = vadd.s32 %v332_v38, %v326_v62  ;;  %v682_v43 = vsub.s32 %v678_v2, %v681_v21  ;;  %v208_v16 = vmul.u32 %v1637_v14, %v154_v57  ;;  %v2234_v19 = vshrl.u32 %v1714_v12, 16 }
  0xe4   :  { %v345_v61 = vmul.u32 %v2229_v59, %v1661_v29  ;;  %vm2004_vm1 = vcmp.le.f32.partialorder %v2230_v18, 0.7853982  ;;  %v2233_v51 = vmov %v2229_v59  ;;  %v212_v29 = vsel %vm210_vm12, %v211_v40, %v207_v55 }
  0xe5   :  { %v347_v25 = vmul.u32 %v2233_v51, %v1664_v30  ;;  %v2016_v36 = vsel %vm2004_vm1, %v1572_v4, %v548_v56  ;;  %vm683_vm13 = vcmp.lt.s32.totalorder %v682_v43, 0  ;;  %v684_v15 = vsub.s32 0, %v682_v43 }
  0xe6   :  { %vm353_vm2 = vc.u32 %v345_v61, %v349_v13  ;;  %v348_v11 = vmul.u32 %v2234_v19, %v1664_v30  ;;  %v213_v34 = vadd.s32 %v212_v29, %v208_v16  ;;  %v338_v31 = vadd.s32 %v336_v10, %v334_v33 }
  0xe7   :  { %v354_v45 = vsel %vm353_vm2, 1, %v1300_v0  ;;  %v2024_v14 = vmul.f32 %v2016_v36, %v2016_v36  ;;  %v685_v26 = vsel %vm683_vm13, %v684_v15, %v682_v43  ;;  %v351_v58 = vshll.u32 %v347_v25, 16  ;;  %v2236_v15 = vld [vmem:[#allocation6_spill] sm:$0xff] }
  0xe8   :  { %v355_v27 = vadd.s32 %v349_v13, %v345_v61  ;;  %v686_v2 = vclz %v685_v26  ;;  %v214_v49 = vadd.s32 536870912, %v213_v34  ;;  %v356_v47 = vadd.s32 %v354_v45, %v348_v11 }
  0xe9   :  { %v328_v5 = vshrl.u32 %v1768_v54, 16  ;;  %v286_v30 = vshrl.u32 %v1302_v50, %v1595_v41  ;;  %v307_v12 = vsel %vm305_vm6, %v1648_v23, 2102212464  ;;  %v561_v37 = vmul.f32 -0.00019511016, %v2024_v14 }
  0xea   :  { %vm357_vm5 = vc.u32 %v355_v27, %v351_v58  ;;  %v1214_v52 = vadd.s32 4294967294, %v686_v2  ;;  %v2033_v8 = vshrl.u32 %v214_v49, 30  ;;  %v330_v50 = vshrl.u32 %v1968_v7, 16 }
  0xeb   :  { %v339_v24 = vadd.s32 %v338_v31, %v328_v5  ;;  %v358_v60 = vsel %vm357_vm5, 1, %v1300_v0  ;;  %v306_v54 = vsel %vm302_vm7, %v286_v30, %v1658_v28  ;;  %v350_v23 = vshrl.u32 %v1879_v9, 16 }
  0xec   :  { %vm1215_vm15 = vcmp.lt.s32.totalorder %v1214_v52, 0  ;;  %v360_v35 = vadd.s32 %v358_v60, %v356_v47  ;;  %v216_v41 = vshll.u32 %v2033_v8, 30  ;;  %v308_v17 = vsel %vm304_vm8, %v1646_v22, %v307_v12 }
  0xed   :  { %v689_v44 = vsel %vm1215_vm15, 0, %v1214_v52  ;;  %v674_v0 = vadd.s32 %v1931_v3, %v1929_v42  ;;  %v562_v46 = vadd.f32 0.008332121, %v561_v37  ;;  %v2047_v38 = vadd.s32 %v339_v24, %v330_v50 }
  0xee   :  { %v690_v48 = vsub.s32 32, %v689_v44  ;;  %v694_v6 = vsub.s32 4294967266, %v689_v44  ;;  %v217_v28 = vsub.s32 %v213_v34, %v216_v41  ;;  %v361_v53 = vadd.s32 %v360_v35, %v350_v23 }
  0xef   :  { %v691_v62 = vshll.u32 %v682_v43, %v689_v44  ;;  %v352_v7 = vshrl.u32 %v347_v25, 16  ;;  %v554_v9 = vmul.f32 -0.001358992, %v2024_v14  ;;  %v2050_v56 = vadd.s32 %v355_v27, %v351_v58  ;;  %v2235_v43 = vld [vmem:[#allocation5_spill] sm:$0xff]  ;;  %v2237_v58 = vld [vmem:[#allocation2_spill] sm:$0xff] }
  0xf0   :  { %v692_v55 = vshrl.u32 %v674_v0, %v690_v48  ;;  %v695_v13 = vadd.s32 127, %v694_v6  ;;  %vm218_vm6 = vcmp.lt.s32.totalorder %v217_v28, 0  ;;  %v219_v57 = vsub.s32 0, %v217_v28 }
  0xf1   :  { %v309_v22 = vsel %vm303_vm9, %v306_v54, %v308_v17  ;;  %v362_v21 = vadd.s32 %v361_v53, %v352_v7  ;;  %v563_v40 = vmul.f32 %v562_v46, %v2024_v14  ;;  %vm365_vm7 = vc.u32 %v2047_v38, %v2050_v56 }
  0xf2   :  { %v693_v42 = vor.u32 %v692_v55, %v691_v62  ;;  %v696_v3 = vshll.u32 %v695_v13, 23  ;;  %v220_v33 = vsel %vm218_vm6, %v219_v57, %v217_v28  ;;  %v363_v10 = vmul.u32 %v2235_v43, %v309_v22 }
  0xf3   :  { %v221_v61 = vclz %v220_v33  ;;  %v366_v18 = vadd.s32 1, %v362_v21  ;;  %v555_v51 = vadd.f32 0.041655596, %v554_v9  ;;  %v549_v19 = vsub.s32 4, %v2236_v15 }
  0xf4   :  { %v697_v59 = vor.u32 4788187, %v696_v3  ;;  %v700_v16 = vcvt.s32.f32 %v693_v42  ;;  %v564_v11 = vadd.f32 -0.16666654, %v563_v40  ;;  %v704_v34 = vsub.s32 4, %v1981_v20 }
  0xf5   :  { %v1205_v29 = vadd.s32 4294967294, %v221_v61  ;;  %v367_v1 = vsel %vm365_vm7, %v366_v18, %v362_v21  ;;  %v556_v26 = vmul.f32 %v555_v51, %v2024_v14  ;;  %v2238_v27 = vand.u32 2147483647, %v2237_v58 }
  0xf6   :  { %v698_v25 = vand.u32 2147483647, %v697_v59  ;;  %v368_v45 = vadd.s32 %v367_v1, %v363_v10  ;;  %vm582_vm3 = vcmp.lt.s32.totalorder %v2237_v58, 0  ;;  %v209_v5 = vadd.s32 %v1983_v32, %v1974_v39 }
  0xf7   :  { %vm1206_vm8 = vcmp.lt.s32.totalorder %v1205_v29, 0  ;;  %vm2063_vm9 = vcmp.le.f32.partialorder %v2238_v27, 0.7853982  ;;  %v550_v52 = vsel %vm427_vm14, %v549_v19, %v2236_v15  ;;  %v565_v37 = vmul.f32 %v564_v11, %v2024_v14 }
  0xf8   :  { %v701_v31 = vmul.f32 %v700_v16, %v698_v25  ;;  %v224_v49 = vsel %vm1206_vm8, 0, %v1205_v29  ;;  %v705_v24 = vsel %vm582_vm3, %v704_v34, %v1981_v20  ;;  %v369_v60 = vadd.s32 536870912, %v368_v45  ;;  %v2241_v16 = vld [vmem:[#allocation4_spill] sm:$0xff] }
  0xf9   :  { %v225_v30 = vsub.s32 32, %v224_v49  ;;  %v229_v12 = vsub.s32 4294967266, %v224_v49  ;;  %v226_v35 = vshll.u32 %v217_v28, %v224_v49  ;;  %v557_v50 = vadd.f32 -0.4999988, %v556_v26 }
  0xfa   :  { %v702_v47 = vxor.u32 2147483648, %v701_v31  ;;  %v2078_v32 = vshrl.u32 %v369_v60, 30  ;;  %v552_v23 = vsel %vm2004_vm1, 0, %v550_v52  ;;  %v566_v6 = vadd.f32 1.0, %v565_v37 }
  0xfb   :  { %v227_v44 = vshrl.u32 %v209_v5, %v225_v30  ;;  %v230_v41 = vadd.s32 127, %v229_v12  ;;  %v707_v20 = vsel %vm2063_vm9, 0, %v705_v24  ;;  %v558_v55 = vmul.f32 %v557_v50, %v2024_v14 }
  0xfc   :  { %v703_v54 = vsel %vm582_vm3, %v702_v47, %v701_v31  ;;  %v371_v46 = vshll.u32 %v2078_v32, 30  ;;  %v569_v13 = vadd.s32 3, %v552_v23  ;;  %v567_v42 = vmul.f32 %v566_v6, %v2016_v36 }
  0xfd   :  { %v706_v39 = vsel %vm2063_vm9, %v2237_v58, %v703_v54  ;;  %v228_v0 = vor.u32 %v227_v44, %v226_v35  ;;  %v231_v48 = vshll.u32 %v230_v41, 23  ;;  %v724_v3 = vadd.s32 3, %v707_v20 }
  0xfe   :  { %v708_v17 = vmul.f32 %v706_v39, %v706_v39  ;;  %v372_v7 = vsub.s32 %v368_v45, %v371_v46  ;;  %v559_v61 = vadd.f32 1.0, %v558_v55  ;;  %v570_v18 = vand.u32 3, %v569_v13 }
  0xff   :  { %v232_v62 = vor.u32 4788187, %v231_v48  ;;  %v235_v22 = vcvt.s32.f32 %v228_v0  ;;  %vm117_vm11 = vcmp.lt.s32.totalorder %v2241_v16, 0  ;;  %v573_v29 = vxor.u32 2147483648, %v567_v42 }
 0x100   :  { %v709_v28 = vmul.f32 -0.001358992, %v708_v17  ;;  %v716_v53 = vmul.f32 -0.00019511016, %v708_v17  ;;  %vm373_vm14 = vcmp.lt.s32.totalorder %v372_v7, 0  ;;  %v374_v21 = vsub.s32 0, %v372_v7 }
 0x101   :  { %v233_v63 = vand.u32 2147483647, %v232_v62  ;;  %v725_v1 = vand.u32 3, %v724_v3  ;;  %v2242_v15 = vand.u32 2147483647, %v2241_v16  ;;  %vm568_vm10 = vweird.f32 %v1572_v4  ;;  %v2245_v3 = vld [vmem:[#allocation3_spill] sm:$0xff] }
 0x102   :  { %v710_v9 = vadd.f32 0.041655596, %v709_v28  ;;  %v717_v57 = vadd.f32 0.008332121, %v716_v53  ;;  %v375_v43 = vsel %vm373_vm14, %v374_v21, %v372_v7  ;;  %vm572_vm12 = vcmp.eq.s32.totalorder %v570_v18, 0 }
 0x103   :  { %v236_v59 = vmul.f32 %v235_v22, %v233_v63  ;;  %v376_v25 = vclz %v375_v43  ;;  %vm2090_vm4 = vcmp.le.f32.partialorder %v2242_v15, 0.7853982  ;;  %v576_v45 = vxor.u32 2147483648, %v559_v61 }
 0x104   :  { %v711_v40 = vmul.f32 %v710_v9, %v708_v17  ;;  %v718_v33 = vmul.f32 %v717_v57, %v708_v17  ;;  %vm571_vm2 = vcmp.lt.s32.totalorder %v570_v18, 2  ;;  %v574_v47 = vsel %vm572_vm12, %v559_v61, %v573_v29 }
 0x105   :  { %v237_v14 = vxor.u32 2147483648, %v236_v59  ;;  %v1208_v31 = vadd.s32 4294967294, %v376_v25  ;;  %vm575_vm13 = vcmp.eq.s32.totalorder %v570_v18, 2  ;;  %vm727_vm5 = vcmp.eq.s32.totalorder %v725_v1, 0 }
 0x106   :  { %v712_v10 = vadd.f32 -0.4999988, %v711_v40  ;;  %v719_v51 = vadd.f32 -0.16666654, %v718_v33  ;;  %v577_v37 = vsel %vm575_vm13, %v576_v45, %v567_v42  ;;  %v364_v24 = vadd.s32 %v2050_v56, %v2047_v38 }
 0x107   :  { %v238_v34 = vsel %vm117_vm11, %v237_v14, %v236_v59  ;;  %vm1209_vm1 = vcmp.lt.s32.totalorder %v1208_v31, 0  ;;  %v578_v35 = vsel %vm571_vm2, %v574_v47, %v577_v37  ;;  %vm730_vm15 = vcmp.eq.s32.totalorder %v725_v1, 2 }
 0x108   :  { %v713_v19 = vmul.f32 %v712_v10, %v708_v17  ;;  %v720_v11 = vmul.f32 %v719_v51, %v708_v17  ;;  %v2100_v26 = vsel %vm2090_vm4, %v2241_v16, %v238_v34  ;;  %v379_v5 = vsel %vm1209_vm1, 0, %v1208_v31 }
 0x109   :  { %v243_v49 = vmul.f32 %v2100_v26, %v2100_v26  ;;  %v380_v60 = vsub.s32 32, %v379_v5  ;;  %v384_v54 = vsub.s32 4294967266, %v379_v5  ;;  %v381_v23 = vshll.u32 %v372_v7, %v379_v5 }
 0x10a   :  { %v714_v27 = vadd.f32 1.0, %v713_v19  ;;  %v721_v2 = vadd.f32 1.0, %v720_v11  ;;  %vm723_vm6 = vweird.f32 %v2237_v58  ;;  %vm726_vm7 = vcmp.lt.s32.totalorder %v725_v1, 2 }
 0x10b   :  { %v251_v52 = vmul.f32 -0.00019511016, %v243_v49  ;;  %v244_v50 = vmul.f32 -0.001358992, %v243_v49  ;;  %v382_v17 = vshrl.u32 %v364_v24, %v380_v60  ;;  %v385_v0 = vadd.s32 127, %v384_v54 }
 0x10c   :  { %v722_v30 = vmul.f32 %v721_v2, %v706_v39  ;;  %v731_v12 = vxor.u32 2147483648, %v714_v27  ;;  %v579_v56 = vsel %vm568_vm10, nan, %v578_v35  ;;  %v239_v58 = vsub.s32 4, %v2033_v8 }
 0x10d   :  { %v252_v41 = vadd.f32 0.008332121, %v251_v52  ;;  %v383_v46 = vor.u32 %v382_v17, %v381_v23  ;;  %v386_v38 = vshll.u32 %v385_v0, 23  ;;  %v245_v62 = vadd.f32 0.041655596, %v244_v50 }
 0x10e   :  { %v728_v44 = vxor.u32 2147483648, %v722_v30  ;;  %v732_v48 = vsel %vm730_vm15, %v731_v12, %v722_v30  ;;  %vm272_vm8 = vcmp.lt.s32.totalorder %v2245_v3, 0  ;;  %v240_v4 = vsel %vm117_vm11, %v239_v58, %v2033_v8 }
 0x10f   :  { %v253_v20 = vmul.f32 %v252_v41, %v243_v49  ;;  %v387_v55 = vor.u32 4788187, %v386_v38  ;;  %v390_v9 = vcvt.s32.f32 %v383_v46  ;;  %v246_v57 = vmul.f32 %v245_v62, %v243_v49  ;;  %v758_v46 = vpop.permute.xlu1 %757  ;;  %v823_v38 = vpop.permute.xlu0 %822 }
 0x110   :  { %v729_v39 = vsel %vm727_vm5, %v714_v27, %v728_v44  ;;  %v2246_v40 = vand.u32 2147483647, %v2245_v3  ;;  %v394_v61 = vsub.s32 4, %v2078_v32  ;;  %v242_v43 = vsel %vm2090_vm4, 0, %v240_v4 }
 0x111   :  { %v733_v6 = vsel %vm726_vm7, %v729_v39, %v732_v48  ;;  %v254_v13 = vadd.f32 -0.16666654, %v253_v20  ;;  %v388_v7 = vand.u32 2147483647, %v387_v55  ;;  %v247_v21 = vadd.f32 -0.4999988, %v246_v57  ;;  %v818_v20 = vpop.permute.xlu2 %817 }
 0x112   :  { %v734_v28 = vsel %vm723_vm6, nan, %v733_v6  ;;  %vm2117_vm9 = vcmp.le.f32.partialorder %v2246_v40, 0.7853982  ;;  %v259_v29 = vadd.s32 3, %v242_v43  ;;  %v395_v1 = vsel %vm272_vm8, %v394_v61, %v2078_v32  ;;  %v1276_v6 = vld [vmem:[%s2190_s6] sm:$0xff] }
 0x113   :  { %v740_v53 = vpack.c.bf16 %v734_v28, %v579_v56  ;;  %v391_v63 = vmul.f32 %v390_v9, %v388_v7  ;;  %v255_v22 = vmul.f32 %v254_v13, %v243_v49  ;;  %v248_v8 = vmul.f32 %v247_v21, %v243_v49  ;;  %v1299_v57 = vld [vmem:[%s2183_s2] ss:$0 sm:$0xff] }
 0x114   :  { %v397_v31 = vsel %vm2117_vm9, 0, %v395_v1  ;;  %v260_v36 = vand.u32 3, %v259_v29  ;;  %vm258_vm4 = vweird.f32 %v2241_v16  ;;  %vm413_vm2 = vweird.f32 %v2245_v3  ;;  %v1277_v16 = vld [vmem:[%s2190_s6 + $0x8] sm:$0xff] }
 0x115   :  { %788 = vmatpush.bf16.msra.mxu0 %v740_v53  ;;  %v392_v42 = vxor.u32 2147483648, %v391_v63  ;;  %v256_v10 = vadd.f32 1.0, %v255_v22  ;;  %v249_v34 = vadd.f32 1.0, %v248_v8  ;;  %v414_v49 = vadd.s32 3, %v397_v31  ;;  %v1281_v31 = vld [vmem:[%s2191_s12 + $0x8] sm:$0xff] }
 0x116   :  { %vm262_vm3 = vcmp.eq.s32.totalorder %v260_v36, 0  ;;  %vm265_vm14 = vcmp.eq.s32.totalorder %v260_v36, 2  ;;  %vm261_vm11 = vcmp.lt.s32.totalorder %v260_v36, 2  ;;  %v830_v22 = vmul.f32 %v1299_v57, %v818_v20 }
 0x117   :  { %v393_v59 = vsel %vm272_vm8, %v392_v42, %v391_v63  ;;  %v257_v15 = vmul.f32 %v256_v10, %v2100_v26  ;;  %v266_v30 = vxor.u32 2147483648, %v249_v34  ;;  %v415_v24 = vand.u32 3, %v414_v49  ;;  %v854_v53 = vpop.permute.xlu1 %853  ;;  %v849_v62 = vpop.permute.xlu0 %848 }
 0x118   :  { %v396_v18 = vsel %vm2117_vm9, %v2245_v3, %v393_v59  ;;  %v831_v63 = vmul.f32 %v1299_v57, %v823_v38  ;;  %v858_v33 = vadd.f32 %v849_v62, %v830_v22 }
 0x119   :  { %v398_v51 = vmul.f32 %v396_v18, %v396_v18  ;;  %v263_v2 = vxor.u32 2147483648, %v257_v15  ;;  %v267_v60 = vsel %vm265_vm14, %v266_v30, %v257_v15  ;;  %vm417_vm10 = vcmp.eq.s32.totalorder %v415_v24, 0  ;;  %v763_v28 = vpop.permute.xlu2 %762 }
 0x11a   :  { %vm420_vm12 = vcmp.eq.s32.totalorder %v415_v24, 2  ;;  %vm416_vm1 = vcmp.lt.s32.totalorder %v415_v24, 2  ;;  %v859_v4 = vadd.f32 %v854_v53, %v831_v63 }
 0x11b   :  { %v399_v14 = vmul.f32 -0.001358992, %v398_v51  ;;  %v406_v25 = vmul.f32 -0.00019511016, %v398_v51  ;;  %v264_v32 = vsel %vm262_vm3, %v249_v34, %v263_v2  ;;  %v1280_v34 = vld [vmem:[%s2191_s12] sm:$0xff]  ;;  %v1167_v2 = vpop.f32.mrf.mxu3 }
 0x11c   :  { %v268_v44 = vsel %vm261_vm11, %v264_v32, %v267_v60 }
 0x11d   :  { %v400_v19 = vadd.f32 0.041655596, %v399_v14  ;;  %v407_v11 = vadd.f32 0.008332121, %v406_v25  ;;  %v269_v50 = vsel %vm258_vm4, nan, %v268_v44 }
 0x11f   :  { %v401_v45 = vmul.f32 %v400_v19, %v398_v51  ;;  %v408_v27 = vmul.f32 %v407_v11, %v398_v51  ;;  %v748_v7 = vpop.permute.xlu1 %747  ;;  %v813_v9 = vpop.permute.xlu0 %812 }
 0x120   :  { %v829_v59 = vmul.f32 %v1299_v57, %v813_v9 }
 0x121   :  { %v402_v47 = vadd.f32 -0.4999988, %v401_v45  ;;  %v409_v5 = vadd.f32 -0.16666654, %v408_v27  ;;  %v808_v13 = vpop.permute.xlu2 %807  ;;  %v1282_v45 = vld [vmem:[%s2191_s12 + $0x10] sm:$0xff]  ;;  %v1283_v27 = vld [vmem:[%s2191_s12 + $0x18] sm:$0xff] }
 0x122   :  { %v828_v43 = vmul.f32 %v1299_v57, %v808_v13 }
 0x123   :  { %v403_v12 = vmul.f32 %v402_v47, %v398_v51  ;;  %v410_v52 = vmul.f32 %v409_v5, %v398_v51  ;;  %v1169_v30 = vpop.f32.mrf.mxu3 }
 0x125   :  { %v404_v37 = vadd.f32 1.0, %v403_v12  ;;  %v411_v26 = vadd.f32 1.0, %v410_v52 }
 0x127   :  { %v412_v54 = vmul.f32 %v411_v26, %v396_v18  ;;  %v421_v35 = vxor.u32 2147483648, %v404_v37  ;;  %v844_v21 = vpop.permute.xlu1 %843  ;;  %v839_v10 = vpop.permute.xlu0 %838 }
 0x128   :  { %v857_v51 = vadd.f32 %v844_v21, %v829_v59  ;;  %v856_v29 = vadd.f32 %v839_v10, %v828_v43 }
 0x129   :  { %v418_v41 = vxor.u32 2147483648, %v412_v54  ;;  %v422_v17 = vsel %vm420_vm12, %v421_v35, %v412_v54  ;;  %v753_v42 = vpop.permute.xlu2 %752 }
 0x12b   :  { %v419_v23 = vsel %vm417_vm10, %v404_v37, %v418_v41  ;;  %v1172_v24 = vpop.f32.mrf.mxu3 }
 0x12c   :  { %v423_v0 = vsel %vm416_vm1, %v419_v23, %v422_v17 }
 0x12d   :  { %v424_v39 = vsel %vm413_vm2, nan, %v423_v0 }
 0x12e   :  { %v739_v48 = vpack.c.bf16 %v424_v39, %v269_v50  ;;  %v927_v50 = vpop.f32.mrf.mxu1 }
 0x12f   :  { %v889_v36 = vpop.permute.xlu0 %888  ;;  %v894_v5 = vpop.permute.xlu1 %893 }
 0x130   :  { %789 = vmatpush.bf16.msra.mxu0 %v739_v48 }
 0x131   :  { %v884_v47 = vpop.permute.xlu2 %883 }
 0x133   :  { %1224 = vmatmul.msk.bf16.vlgmr.msra.gmra.mxu0 %vm775_vm0, %v1276_v6  ;;  %v1174_v41 = vpop.f32.mrf.mxu3 }
 0x136   :  { %v929_v20 = vpop.f32.mrf.mxu1 }
 0x137   :  { %v958_v49 = vpop.permute.xlu0 %957  ;;  %v963_v32 = vpop.permute.xlu1 %962  ;;  %v930_v57 = vadd.f32 %v929_v20, %v889_v36 }
 0x139   :  { %v899_v52 = vpop.permute.xlu2 %898 }
 0x13b   :  { %v1177_v6 = vpop.f32.mrf.mxu3 }
 0x13f   :  { %v973_v37 = vpop.permute.xlu0 %972  ;;  %v978_v54 = vpop.permute.xlu1 %977 }
 0x141   :  { %v968_v60 = vpop.permute.xlu2 %967 }
 0x143   :  { %1225 = vmatmul.msk.bf16.gmra.mxu0 %vm775_vm0, %v1277_v16  ;;  %v928_v16 = vadd.f32 %v927_v50, %v884_v47  ;;  %v1179_v22 = vpop.f32.mrf.mxu3 }
 0x147   :  { %v988_v35 = vpop.permute.xlu0 %987  ;;  %v993_v17 = vpop.permute.xlu1 %992 }
 0x149   :  { %v983_v23 = vpop.permute.xlu2 %982 }
 0x14f   :  { %v1094_v0 = vpop.permute.xlu0 %1093  ;;  %v1099_v38 = vpop.permute.xlu1 %1098 }
 0x150   :  { %v1170_v59 = vadd.f32 %v1169_v30, %v1094_v0 }
 0x157   :  { %v1109_v62 = vpop.permute.xlu0 %1108 }
 0x15f   :  { %v1124_v30 = vpop.permute.xlu0 %1123 }
 0x1b0   :  { %v791_v56 = vpop.f32.mrf.mxu0 }
 0x1b1   :  { %v792_v8 = vadd.f32 %v791_v56, %v748_v7  ;;  %v1178_v7 = vadd.f32 %v1177_v6, %v1109_v62 }
 0x1b3   :  { %v860_v19 = vadd.f32 %v856_v29, %v792_v8 }
 0x1b8   :  { %v793_v55 = vpop.f32.mrf.mxu0 }
 0x1b9   :  { %v794_v61 = vadd.f32 %v793_v55, %v753_v42 }
 0x1bb   :  { %v861_v1 = vadd.f32 %v857_v51, %v794_v61 }
 0x1bd   :  { %v945_v11 = vpack.c.bf16 %v861_v1, %v860_v19  ;;  %v1182_v1 = vpop.f32.mrf.mxu3 }
 0x1c0   :  { %v796_v58 = vpop.f32.mrf.mxu0 }
 0x1c1   :  { %v797_v3 = vadd.f32 %v796_v58, %v758_v46  ;;  %v1089_v46 = vpop.permute.xlu2 %1088 }
 0x1c2   :  { %v1168_v55 = vadd.f32 %v1167_v2, %v1089_v46 }
 0x1c3   :  { %v862_v14 = vadd.f32 %v858_v33, %v797_v3  ;;  %v932_v3 = vpop.f32.mrf.mxu1  ;;  %v1114_v33 = vpop.permute.xlu1 %1113 }
 0x1c4   :  { %v933_v51 = vadd.f32 %v932_v3, %v894_v5 }
 0x1c8   :  { %v798_v40 = vpop.f32.mrf.mxu0 }
 0x1c9   :  { %v799_v18 = vadd.f32 %v798_v40, %v763_v28  ;;  %v1104_v40 = vpop.permute.xlu2 %1103 }
 0x1cb   :  { %v863_v25 = vadd.f32 %v859_v4, %v799_v18  ;;  %v1180_v18 = vadd.f32 %v1179_v22, %v1114_v33 }
 0x1cd   :  { %v946_v15 = vpack.c.bf16 %v863_v25, %v862_v14 }
 0x1cf   :  { %1033 = vmatpush.bf16.msra.mxu2 %v946_v15  ;;  %v1173_v15 = vadd.f32 %v1172_v24, %v1099_v38 }
 0x1d3   :  { %1034 = vmatpush.bf16.msra.mxu2 %v945_v11  ;;  %v934_v11 = vpop.f32.mrf.mxu1 }
 0x1d4   :  { %v935_v36 = vadd.f32 %v934_v11, %v899_v52 }
 0x1d6   :  { %1252 = vmatmul.msk.bf16.vlgmr.msra.gmra.mxu2 %vm775_vm0, %v1280_v34  ;;  %v1119_v34 = vpop.permute.xlu2 %1118 }
 0x1e6   :  { %1253 = vmatmul.msk.bf16.gmra.mxu2 %vm775_vm0, %v1281_v31  ;;  %v1183_v31 = vadd.f32 %v1182_v1, %v1119_v34 }
 0x1f6   :  { %1254 = vmatmul.msk.bf16.gmra.mxu2 %vm775_vm0, %v1282_v45 }
 0x206   :  { %1255 = vmatmul.msk.bf16.gmra.mxu2 %vm775_vm0, %v1283_v27  ;;  %vm1195_vm0 = vcmask 130048  }
 0x259   :  { %v1036_v12 = vpop.f32.mrf.mxu2 }
 0x25a   :  { %v1037_v48 = vadd.f32 %v1036_v12, %v958_v49  ;;  %v1184_v12 = vpop.f32.mrf.mxu3 }
 0x25b   :  { %v1185_v24 = vadd.f32 %v1184_v12, %v1124_v30 }
 0x25c   :  { %v1056_v28 = vmul.f32 %v1037_v48, %v928_v16 }
 0x261   :  { %v1038_v26 = vpop.f32.mrf.mxu2 }
 0x262   :  { %v1039_v9 = vadd.f32 %v1038_v26, %v963_v32  ;;  %v1175_v32 = vadd.f32 %v1174_v41, %v1104_v40 }
 0x264   :  { %v1057_v4 = vmul.f32 %v1039_v9, %v930_v57 }
 0x269   :  { %v1041_v44 = vpop.f32.mrf.mxu2 }
 0x26a   :  { %v1042_v43 = vadd.f32 %v1041_v44, %v968_v60 }
 0x26c   :  { %v1058_v25 = vmul.f32 %v1042_v43, %v933_v51 }
 0x271   :  { %v1043_v39 = vpop.f32.mrf.mxu2 }
 0x272   :  { %v1044_v45 = vadd.f32 %v1043_v39, %v973_v37 }
 0x274   :  { %v1059_v5 = vmul.f32 %v1044_v45, %v935_v36 }
 0x279   :  { %v1046_v56 = vpop.f32.mrf.mxu2 }
 0x27a   :  { %v1047_v53 = vadd.f32 %v1046_v56, %v978_v54 }
 0x27c   :  { %v1060_v13 = vadd.f32 %v1056_v28, %v1047_v53 }
 0x27e   :  { %v1187_v58 = vmul.f32 %v1168_v55, %v1060_v13 }
 0x280   :  { %v1191_v63 = vadd.f32 %v1187_v58, %v1178_v7 }
 0x281   :  { %v1048_v42 = vpop.f32.mrf.mxu2 }
 0x282   :  { %1196 = vst.msk [vmem:[%s2192_s16] sm:$0xff] %vm1195_vm0, %v1191_v63  ;;  %v1049_v21 = vadd.f32 %v1048_v42, %v983_v23 }
 0x284   :  { %v1061_v61 = vadd.f32 %v1057_v4, %v1049_v21 }
 0x286   :  { %v1188_v10 = vmul.f32 %v1170_v59, %v1061_v61 }
 0x288   :  { %v1192_v8 = vadd.f32 %v1188_v10, %v1180_v18 }
 0x289   :  { %v1051_v14 = vpop.f32.mrf.mxu2 }
 0x28a   :  { %1197 = vst.msk [vmem:[%s2192_s16 + $0x8] sm:$0xff] %vm1195_vm0, %v1192_v8  ;;  %v1052_v29 = vadd.f32 %v1051_v14, %v988_v35 }
 0x28c   :  { %v1062_v19 = vadd.f32 %v1058_v25, %v1052_v29 }
 0x28e   :  { %v1189_v27 = vmul.f32 %v1173_v15, %v1062_v19 }
 0x290   :  { %v1193_v2 = vadd.f32 %v1189_v27, %v1183_v31 }
 0x291   :  { %v1053_v47 = vpop.f32.mrf.mxu2 }
 0x292   :  { %1198 = vst.msk [vmem:[%s2192_s16 + $0x10] sm:$0xff] %vm1195_vm0, %v1193_v2  ;;  %v1054_v49 = vadd.f32 %v1053_v47, %v993_v17 }
 0x294   :  { %v1063_v26 = vadd.f32 %v1059_v5, %v1054_v49 }
 0x296   :  { %v1190_v60 = vmul.f32 %v1175_v32, %v1063_v26 }
 0x298   :  { %v1194_v54 = vadd.f32 %v1190_v60, %v1185_v24 }
 0x29a   :  { %1199 = vst.msk [vmem:[%s2192_s16 + $0x18] sm:$0xff] %vm1195_vm0, %v1194_v54 }

// kernel: _lambda_.14
= control target key start
LH: loop header
LB: loop body
LE: loop exit
PB: predicated region body
PF: predicated region fallthrough
CT: control target
= control target key end

     0   :  { %s1721_s29 = smov 0   ;;  %s1993_s0 = inlined_call_operand.vmem [shape: f32[2,32,16], index: 0, kind: input, shape index: {}]   ;;  %s1994_s1 = inlined_call_operand.vmem [shape: f32[2,32,16], index: 1, kind: input, shape index: {}]   ;;  %s1995_s2 = inlined_call_operand.vmem [shape: bf16[3,32,32], index: 2, kind: input, shape index: {}]   ;;  %s1996_s3 = inlined_call_operand.vmem [shape: f32[32,1], index: 3, kind: input, shape index: {}]   ;;  %s1997_s4 = inlined_call_operand.vmem [shape: bf16[3,32,32], index: 4, kind: input, shape index: {}]   ;;  %s1998_s5 = inlined_call_operand.vmem [shape: f32[32,1], index: 5, kind: input, shape index: {}]   ;;  %s1999_s6 = inlined_call_operand.vmem [shape: bf16[3,32,32], index: 6, kind: input, shape index: {}]   ;;  %s2000_s7 = inlined_call_operand.vmem [shape: f32[32,1], index: 7, kind: input, shape index: {}]   ;;  %s2001_s8 = inlined_call_operand.vmem [shape: bf16[3,32,32], index: 8, kind: input, shape index: {}]   ;;  %s2002_s9 = inlined_call_operand.vmem [shape: f32[32,1], index: 9, kind: input, shape index: {}]   ;;  %s2003_s10 = inlined_call_operand.vmem [shape: bf16[3,16,32], index: 10, kind: input, shape index: {}]   ;;  %s2004_s11 = inlined_call_operand.vmem [shape: f32[16,1], index: 11, kind: input, shape index: {}]   ;;  %s2005_s12 = inlined_call_operand.vmem [shape: bf16[32,32], index: 12, kind: input, shape index: {}]   ;;  %s2006_s13 = inlined_call_operand.vmem [shape: f32[32,1], index: 13, kind: input, shape index: {}]   ;;  %s2007_s14 = inlined_call_operand.vmem [shape: f32[2,16,16], index: 14, kind: output, shape index: {}]  }
   0x1 LB: > { %s1399_s30 = sadd.s32 4294967295, %s1638_s29   ;;  %p1403_p0 = scmp.ge.s32.totalorder %s1638_s29, 1  ;;  %s1638_s29 = sphi %s1721_s29, %s24_s29  }
   0x2   : > { %p422_p1 = scmp.lt.s32.totalorder %s1638_s29, 3 }
   0x4   : > { %p423_p2 = pnand %p1403_p0, %p422_p1 }
   0x5   : > { %p473_p3 = scmp.lt.s32.totalorder (!%p423_p2), %s1399_s30, 1  ;;  %s1640_s19 = smov (!%p423_p2), 1  }
   0x6   : > { %426 = sbr.rel (%p423_p2) target bundleno = 1338 (0x53a), region = 76  ;;  %s1641_s20 = smov (!%p423_p2), 2  }
   0x7   : > { %s1643_s17 = smov (!%p423_p2), 6   ;;  %s1645_s26 = smov (!%p423_p2), 9  }
   0xb   : > { %s2013_s30 = smov (!%p473_p3, %s1399_s30), 1  ;;  %vm523_vm4 = vcmask 15360   ;;  %vm539_vm5 = vcmask 7168   ;;  %v1592_v28 = vld [vmem:[%s1995_s2 + $0x10] sm:$0xff]  ;;  %v1590_v29 = vld [vmem:[%s1995_s2] sm:$0xff]  ;;  %vm561_vm8 = vcmask 261120  }
   0xc   : > { %s1587_s15 = sshll.u32 %s2013_s30, 5  ;;  %vm1761_vm6 = vmneg %vm523_vm4  ;;  %v1591_v30 = vld [vmem:[%s1995_s2 + $0x8] sm:$0xff]  ;;  %v668_v31 = vld [vmem:[%s1996_s3] sm:$0xff]  ;;  %v1642_v33 = vmov 0   ;;  %vm741_vm13 = vcmask 23552   ;;  %vm726_vm15 = vcmask 48128  }
   0xd   : > { %s477_s18 = scalar_lea.vmem %s1993_s0, %s1587_s15  ;;  %vm1765_vm7 = vmneg %vm539_vm5  ;;  %v669_v32 = vld [vmem:[%s1996_s3 + $0x8] sm:$0xff]  ;;  %1630 = vset.pattern.permute.xlu0 %v1642_v33  ;;  %1631 = vset.pattern.permute.xlu1 %v1642_v33  ;;  %v670_v34 = vld [vmem:[%s1996_s3 + $0x10] sm:$0xff]  ;;  %vm931_vm5 = vcmask 72704   ;;  %s482_s16 = scalar_lea.vmem %s1994_s1, %s1587_s15 }
   0xe   : > { %v1737_v0 = vld [vmem:[%s477_s18 + $0x10] sm:$0xff]  ;;  %v1739_v1 = vld [vmem:[%s477_s18 + $0x18] sm:$0xff]  ;;  %v1741_v2 = vld [vmem:[%s477_s18] sm:$0xff]  ;;  %1629 = vset.pattern.permute.xlu2 %v1642_v33 }
   0xf   : > { %vm495_vm0 = vcmp.ge.f32.partialorder %v1737_v0, 0.0  ;;  %vm496_vm1 = vcmp.ge.f32.partialorder %v1739_v1, 0.0  ;;  %v499_v3 = vmul.f32 0.1, %v1737_v0  ;;  %v500_v4 = vmul.f32 0.1, %v1739_v1  ;;  %684 = vperm.xlu2 %1629, %v670_v34   ;;  %vm1468_vm14 = vmneg %vm741_vm13 }
  0x10   : > { %v1747_v5 = vld [vmem:[%s477_s18 + $0x8] sm:$0xff]  ;;  %vm493_vm2 = vcmp.ge.f32.partialorder %v1741_v2, 0.0  ;;  %v497_v6 = vmul.f32 0.1, %v1741_v2  ;;  %v671_v35 = vld [vmem:[%s1996_s3 + $0x18] sm:$0xff]  ;;  %v1594_v37 = vld [vmem:[%s1995_s2 + $0x20] sm:$0xff] }
  0x11   : > { %v503_v7 = vsel %vm495_vm0, %v1737_v0, %v499_v3  ;;  %v504_v8 = vsel %vm496_vm1, %v1739_v1, %v500_v4  ;;  %vm494_vm3 = vcmp.ge.f32.partialorder %v1747_v5, 0.0  ;;  %v498_v9 = vmul.f32 0.1, %v1747_v5  ;;  %v1593_v36 = vld [vmem:[%s1995_s2 + $0x18] sm:$0xff]  ;;  %v1595_v38 = vld [vmem:[%s1995_s2 + $0x28] sm:$0xff]  ;;  %s1644_s18 = smov 3   ;;  %vm1482_vm0 = vmneg %vm726_vm15 }
  0x12   : > { %v507_v10 = vpack.c.bf16 %v503_v7, %v503_v7  ;;  %v508_v11 = vpack.c.bf16 %v504_v8, %v504_v8  ;;  %v501_v12 = vsel %vm493_vm2, %v1741_v2, %v497_v6  ;;  %v1067_v33 = vld [vmem:[%s2002_s9] sm:$0xff] }
  0x13   : > { %v502_v13 = vsel %vm494_vm3, %v1747_v5, %v498_v9  ;;  %v505_v16 = vpack.c.bf16 %v501_v12, %v501_v12  ;;  %v1600_v34 = vld [vmem:[%s1997_s4 + $0x20] sm:$0xff] }
  0x14   : > { %v515_v14 = vunpack.c.l.b16 %v507_v10  ;;  %v516_v15 = vunpack.c.l.b16 %v508_v11  ;;  %v506_v17 = vpack.c.bf16 %v502_v13, %v502_v13  ;;  %v1611_v23 = vld [vmem:[%s2005_s12] sm:$0xff] }
  0x15   : > { %v513_v19 = vunpack.c.l.b16 %v505_v16 }
  0x16   : > { %v518_v18 = vpack.c.b16 %v516_v15, %v515_v14  ;;  %v514_v20 = vunpack.c.l.b16 %v506_v17  ;;  %v869_v17 = vld [vmem:[%s1998_s5] sm:$0xff] }
  0x17   : > { %689 = vperm.xlu2 %1629, %v671_v35   ;;  %v1601_v35 = vld [vmem:[%s1997_s4 + $0x28] sm:$0xff] }
  0x18   : > { %537 = vrot.lane.b32.xlu1 %v518_v18, %s1640_s19  ;;  %521 = vrot.lane.b32.xlu0 %v518_v18, %s1641_s20  ;;  %v517_v21 = vpack.c.b16 %v514_v20, %v513_v19 }
  0x20   : > { %535 = vrot.lane.b32.xlu1 %v517_v21, %s1640_s19  ;;  %519 = vrot.lane.b32.xlu0 %v517_v21, %s1641_s20 }
  0x28   : > { %674 = vperm.xlu0 %1630, %v668_v31   ;;  %679 = vperm.xlu1 %1631, %v669_v32   ;;  %v872_v31 = vld [vmem:[%s1998_s5 + $0x18] sm:$0xff]  ;;  %v1021_v32 = vld [vmem:[%s2000_s7 + $0x8] sm:$0xff] }
  0x69   : > { %v685_v63 = vpop.permute.xlu2 %684 }
  0x71   : > { %v690_v15 = vpop.permute.xlu2 %689 }
  0x8a   : > { %v538_v24 = vpop.permute.xlu1 %537  ;;  %v522_v25 = vpop.permute.xlu0 %521 }
  0x8b   : > { %1437 = vmatpush.bf16.msk.msra.mxu1 %vm1761_vm6, %v522_v25  ;;  %1613 = vmatpush.bf16.msk.msra.mxu2 %vm1761_vm6, %v522_v25 }
  0x8c   : > { %1423 = vmatpush.bf16.msk.msra.mxu0 %vm1765_vm7, %v538_v24 }
  0x92   : > { %v536_v26 = vpop.permute.xlu1 %535  ;;  %v520_v27 = vpop.permute.xlu0 %519 }
  0x93   : > { %1425 = vmatpush.bf16.msk.msra.mxu0 %vm1765_vm7, %v536_v26  ;;  %1439 = vmatpush.bf16.msk.msra.mxu1 %vm1761_vm6, %v520_v27 }
  0x94   : > { %1614 = vmatpush.bf16.msk.msra.mxu2 %vm1761_vm6, %v520_v27 }
  0x96   : > { %1426 = vmatmul.msk.bf16.vlgmr.msra.gmra.mxu0 %vm561_vm8, %v1592_v28  ;;  %1440 = vmatmul.msk.bf16.vlgmr.msra.gmra.mxu1 %vm561_vm8, %v1590_v29  ;;  %v870_v29 = vld [vmem:[%s1998_s5 + $0x8] sm:$0xff] }
  0x97   : > { %1441 = vmatmul.msk.bf16.vlgmr.msra.gmra.mxu2 %vm561_vm8, %v1591_v30  ;;  %v1022_v30 = vld [vmem:[%s2000_s7 + $0x10] sm:$0xff] }
  0x98   : > { %651 = vmatpush.bf16.msrb.mxu2 %v518_v18  ;;  %v871_v18 = vld [vmem:[%s1998_s5 + $0x10] sm:$0xff] }
  0x9a   : > { %v675_v44 = vpop.permute.xlu0 %674  ;;  %v680_v53 = vpop.permute.xlu1 %679 }
  0x9c   : > { %652 = vmatpush.bf16.msrb.mxu2 %v517_v21 }
  0xa6   : > { %1427 = vmatmul.msk.bf16.gmra.mxu0 %vm561_vm8, %v1593_v36 }
  0xa7   : > { %1454 = vmatmul.msk.bf16.vlgmr.msrb.gmra.mxu2 %vm561_vm8, %v1594_v37 }
  0xb7   : > { %1455 = vmatmul.msk.bf16.gmra.mxu2 %vm561_vm8, %v1595_v38 }
 0x113   : > { %v577_v40 = vpop.f32.mrf.mxu0  ;;  %v612_v42 = vpop.f32.mrf.mxu1 }
 0x114   : > { %v613_v43 = vadd.f32 %v612_v42, %v577_v40  ;;  %v1599_v42 = vld [vmem:[%s1997_s4 + $0x18] sm:$0xff] }
 0x11a   : > { %v617_v39 = vpop.f32.mrf.mxu2 }
 0x11b   : > { %v579_v45 = vpop.f32.mrf.mxu0  ;;  %v614_v49 = vpop.f32.mrf.mxu1 }
 0x11c   : > { %v615_v50 = vadd.f32 %v614_v49, %v579_v45 }
 0x122   : > { %v619_v41 = vpop.f32.mrf.mxu2 }
 0x123   : > { %v582_v55 = vpop.f32.mrf.mxu0 }
 0x124   : > { %v618_v60 = vadd.f32 %v617_v39, %v582_v55  ;;  %v1598_v39 = vld [vmem:[%s1997_s4 + $0x10] sm:$0xff] }
 0x12a   : > { %v654_v46 = vpop.f32.mrf.mxu2 }
 0x12b   : > { %v664_v47 = vadd.f32 %v654_v46, %v613_v43  ;;  %v584_v9 = vpop.f32.mrf.mxu0  ;;  %v1597_v43 = vld [vmem:[%s1997_s4 + $0x8] sm:$0xff] }
 0x12c   : > { %v620_v11 = vadd.f32 %v619_v41, %v584_v9  ;;  %v1596_v41 = vld [vmem:[%s1997_s4] sm:$0xff] }
 0x12d   : > { %v692_v48 = vadd.f32 %v675_v44, %v664_v47 }
 0x12f   : > { %v700_v51 = vmul.f32 0.1, %v692_v48  ;;  %vm696_vm9 = vcmp.ge.f32.partialorder %v692_v48, 0.0 }
 0x131   : > { %v704_v56 = vsel %vm696_vm9, %v692_v48, %v700_v51  ;;  %vm1528_vm9 = vmneg %vm931_vm5 }
 0x132   : > { %v656_v52 = vpop.f32.mrf.mxu2  ;;  %v708_v59 = vpack.c.bf16 %v704_v56, %v704_v56 }
 0x133   : > { %v665_v54 = vadd.f32 %v656_v52, %v615_v50 }
 0x134   : > { %v716_v6 = vunpack.c.l.b16 %v708_v59 }
 0x135   : > { %v693_v57 = vadd.f32 %v680_v53, %v665_v54 }
 0x137   : > { %vm697_vm10 = vcmp.ge.f32.partialorder %v693_v57, 0.0  ;;  %v701_v58 = vmul.f32 0.1, %v693_v57 }
 0x139   : > { %v705_v61 = vsel %vm697_vm10, %v693_v57, %v701_v58 }
 0x13a   : > { %v709_v62 = vpack.c.bf16 %v705_v61, %v705_v61  ;;  %v659_v3 = vpop.f32.mrf.mxu2 }
 0x13b   : > { %v666_v4 = vadd.f32 %v659_v3, %v618_v60 }
 0x13c   : > { %v717_v7 = vunpack.c.l.b16 %v709_v62 }
 0x13d   : > { %v694_v8 = vadd.f32 %v685_v63, %v666_v4 }
 0x13e   : > { %v720_v10 = vpack.c.b16 %v717_v7, %v716_v6 }
 0x13f   : > { %v702_v12 = vmul.f32 0.1, %v694_v8  ;;  %vm698_vm11 = vcmp.ge.f32.partialorder %v694_v8, 0.0 }
 0x140   : > { %722 = vrot.lane.b32.xlu0 %v720_v10, %s1643_s17  ;;  %737 = vrot.lane.b32.xlu1 %v720_v10, %s1644_s18 }
 0x141   : > { %v706_v19 = vsel %vm698_vm11, %v694_v8, %v702_v12 }
 0x142   : > { %v661_v13 = vpop.f32.mrf.mxu2  ;;  %v710_v21 = vpack.c.bf16 %v706_v19, %v706_v19 }
 0x143   : > { %v667_v14 = vadd.f32 %v661_v13, %v620_v11 }
 0x144   : > { %v718_v26 = vunpack.c.l.b16 %v710_v21 }
 0x145   : > { %v695_v16 = vadd.f32 %v690_v15, %v667_v14 }
 0x147   : > { %vm699_vm12 = vcmp.ge.f32.partialorder %v695_v16, 0.0  ;;  %v703_v20 = vmul.f32 0.1, %v695_v16 }
 0x148   : > { %875 = vperm.xlu0 %1630, %v869_v17   ;;  %885 = vperm.xlu1 %1631, %v871_v18  }
 0x149   : > { %v707_v24 = vsel %vm699_vm12, %v695_v16, %v703_v20 }
 0x14a   : > { %v711_v25 = vpack.c.bf16 %v707_v24, %v707_v24 }
 0x14c   : > { %v719_v27 = vunpack.c.l.b16 %v711_v25 }
 0x14e   : > { %v721_v28 = vpack.c.b16 %v719_v27, %v718_v26 }
 0x150   : > { %739 = vrot.lane.b32.xlu2 %v721_v28, %s1644_s18  ;;  %852 = vmatpush.bf16.msrb.mxu1 %v721_v28 }
 0x151   : > { %880 = vperm.xlu1 %1631, %v870_v29  }
 0x154   : > { %853 = vmatpush.bf16.msrb.mxu1 %v720_v10 }
 0x157   : > { %1500 = vmatmul.msk.bf16.vlgmr.msrb.gmra.mxu1 %vm561_vm8, %v1600_v34  ;;  %v1023_v34 = vld [vmem:[%s2000_s7 + $0x18] sm:$0xff] }
 0x158   : > { %724 = vrot.lane.b32.xlu2 %v721_v28, %s1643_s17  ;;  %s1589_s17 = sshll.u32 %s2013_s30, 4 }
 0x159   : > { %1036 = vperm.xlu1 %1631, %v1022_v30  }
 0x160   : > { %890 = vperm.xlu2 %1629, %v872_v31  }
 0x161   : > { %1031 = vperm.xlu1 %1631, %v1021_v32  }
 0x167   : > { %1501 = vmatmul.msk.bf16.gmra.mxu1 %vm561_vm8, %v1601_v35  ;;  %v1069_v35 = vld [vmem:[%s2002_s9 + $0x10] sm:$0xff] }
 0x169   : > { %1073 = vperm.xlu1 %1631, %v1067_v33  }
 0x1aa   : > { %v740_v36 = vpop.permute.xlu2 %739 }
 0x1ab   : > { %1469 = vmatpush.bf16.msk.msra.mxu3 %vm1468_vm14, %v740_v36  ;;  %v1068_v36 = vld [vmem:[%s2002_s9 + $0x8] sm:$0xff] }
 0x1b2   : > { %v725_v37 = vpop.permute.xlu2 %724  ;;  %v738_v38 = vpop.permute.xlu1 %737 }
 0x1b3   : > { %1483 = vmatpush.bf16.msk.msrb.mxu0 %vm1482_vm0, %v725_v37  ;;  %1471 = vmatpush.bf16.msk.msra.mxu3 %vm1468_vm14, %v738_v38  ;;  %v723_v40 = vpop.permute.xlu0 %722  ;;  %v1604_v37 = vld [vmem:[%s1999_s6 + $0x20] sm:$0xff]  ;;  %v1605_v38 = vld [vmem:[%s1999_s6 + $0x28] sm:$0xff] }
 0x1b6   : > { %1472 = vmatmul.msk.bf16.vlgmr.msra.gmra.mxu3 %vm561_vm8, %v1598_v39 }
 0x1b7   : > { %1485 = vmatpush.bf16.msk.msrb.mxu0 %vm1482_vm0, %v723_v40 }
 0x1ba   : > { %1486 = vmatmul.msk.bf16.vlgmr.msrb.gmra.mxu0 %vm561_vm8, %v1596_v41  ;;  %v886_v48 = vpop.permute.xlu1 %885  ;;  %v891_v21 = vpop.permute.xlu2 %890  ;;  %v1602_v41 = vld [vmem:[%s1999_s6 + $0x10] sm:$0xff] }
 0x1bb   : > { %v876_v50 = vpop.permute.xlu0 %875 }
 0x1c3   : > { %v881_v59 = vpop.permute.xlu1 %880 }
 0x1c6   : > { %1473 = vmatmul.msk.bf16.gmra.mxu3 %vm561_vm8, %v1599_v42  ;;  %v1603_v42 = vld [vmem:[%s1999_s6 + $0x18] sm:$0xff] }
 0x1ca   : > { %1487 = vmatmul.msk.bf16.gmra.mxu0 %vm561_vm8, %v1597_v43 }
 0x1d4   : > { %v855_v45 = vpop.f32.mrf.mxu1 }
 0x1dc   : > { %v857_v54 = vpop.f32.mrf.mxu1 }
 0x1e4   : > { %v860_v3 = vpop.f32.mrf.mxu1 }
 0x1ec   : > { %v862_v18 = vpop.f32.mrf.mxu1 }
 0x237   : > { %v813_v44 = vpop.f32.mrf.mxu0 }
 0x239   : > { %v778_v46 = vpop.f32.mrf.mxu3 }
 0x23a   : > { %v814_v47 = vadd.f32 %v813_v44, %v778_v46 }
 0x23c   : > { %v865_v49 = vadd.f32 %v855_v45, %v814_v47  ;;  %v1037_v47 = vpop.permute.xlu1 %1036 }
 0x23e   : > { %v893_v51 = vadd.f32 %v876_v50, %v865_v49 }
 0x23f   : > { %v815_v52 = vpop.f32.mrf.mxu0 }
 0x240   : > { %v1865_v53 = vadd.f32 %v893_v51, %v1741_v2 }
 0x241   : > { %v780_v55 = vpop.f32.mrf.mxu3 }
 0x242   : > { %v816_v56 = vadd.f32 %v815_v52, %v780_v55  ;;  %v905_v58 = vmul.f32 0.1, %v1865_v53  ;;  %vm901_vm1 = vcmp.ge.f32.partialorder %v1865_v53, 0.0 }
 0x244   : > { %v866_v57 = vadd.f32 %v857_v54, %v816_v56  ;;  %v909_v63 = vsel %vm901_vm1, %v1865_v53, %v905_v58  ;;  %v1032_v52 = vpop.permute.xlu1 %1031 }
 0x245   : > { %v913_v7 = vpack.c.bf16 %v909_v63, %v909_v63 }
 0x246   : > { %v894_v60 = vadd.f32 %v881_v59, %v866_v57 }
 0x247   : > { %v818_v61 = vpop.f32.mrf.mxu0  ;;  %v921_v12 = vunpack.c.l.b16 %v913_v7 }
 0x248   : > { %v1870_v62 = vadd.f32 %v894_v60, %v1747_v5 }
 0x249   : > { %v783_v4 = vpop.f32.mrf.mxu3 }
 0x24a   : > { %v819_v2 = vadd.f32 %v818_v61, %v783_v4  ;;  %vm902_vm2 = vcmp.ge.f32.partialorder %v1870_v62, 0.0  ;;  %v906_v6 = vmul.f32 0.1, %v1870_v62 }
 0x24c   : > { %v867_v8 = vadd.f32 %v860_v3, %v819_v2  ;;  %v910_v9 = vsel %vm902_vm2, %v1870_v62, %v906_v6 }
 0x24d   : > { %v914_v10 = vpack.c.bf16 %v910_v9, %v910_v9 }
 0x24e   : > { %v895_v11 = vadd.f32 %v886_v48, %v867_v8 }
 0x24f   : > { %v922_v13 = vunpack.c.l.b16 %v914_v10  ;;  %v820_v14 = vpop.f32.mrf.mxu0 }
 0x250   : > { %v1877_v5 = vadd.f32 %v895_v11, %v1737_v0  ;;  %v1020_v0 = vld [vmem:[%s2000_s7] sm:$0xff] }
 0x251   : > { %v785_v15 = vpop.f32.mrf.mxu3  ;;  %v925_v16 = vpack.c.b16 %v922_v13, %v921_v12 }
 0x252   : > { %v821_v17 = vadd.f32 %v820_v14, %v785_v15  ;;  %v907_v20 = vmul.f32 0.1, %v1877_v5  ;;  %vm903_vm3 = vcmp.ge.f32.partialorder %v1877_v5, 0.0  ;;  %v1606_v14 = vld [vmem:[%s2001_s8 + $0x20] sm:$0xff]  ;;  %v1607_v15 = vld [vmem:[%s2001_s8 + $0x28] sm:$0xff] }
 0x253   : > { %927 = vrot.lane.b32.xlu0 %v925_v16, %s1645_s26 }
 0x254   : > { %v868_v19 = vadd.f32 %v862_v18, %v821_v17  ;;  %v911_v26 = vsel %vm903_vm3, %v1877_v5, %v907_v20  ;;  %v1074_v18 = vpop.permute.xlu1 %1073 }
 0x255   : > { %v915_v28 = vpack.c.bf16 %v911_v26, %v911_v26 }
 0x256   : > { %v896_v24 = vadd.f32 %v891_v21, %v868_v19 }
 0x257   : > { %v923_v31 = vunpack.c.l.b16 %v915_v28 }
 0x258   : > { %v1882_v25 = vadd.f32 %v896_v24, %v1739_v1  ;;  %v1070_v1 = vld [vmem:[%s2002_s9 + $0x18] sm:$0xff] }
 0x25a   : > { %vm904_vm4 = vcmp.ge.f32.partialorder %v1882_v25, 0.0  ;;  %v908_v27 = vmul.f32 0.1, %v1882_v25 }
 0x25b   : > { %1026 = vperm.xlu0 %1630, %v1020_v0  }
 0x25c   : > { %v912_v29 = vsel %vm904_vm4, %v1882_v25, %v908_v27 }
 0x25d   : > { %v916_v30 = vpack.c.bf16 %v912_v29, %v912_v29 }
 0x25f   : > { %v924_v32 = vunpack.c.l.b16 %v916_v30 }
 0x261   : > { %v926_v33 = vpack.c.b16 %v924_v32, %v923_v31 }
 0x263   : > { %1088 = vperm.xlu0 %1630, %v1070_v1   ;;  %929 = vrot.lane.b32.xlu2 %v926_v33, %s1645_s26  ;;  %s487_s26 = scalar_lea.vmem %s2007_s14, %s1589_s17 }
 0x264   : > { %972 = vmatpush.bf16.msra.mxu2 %v926_v33 }
 0x268   : > { %973 = vmatpush.bf16.msra.mxu2 %v925_v16 }
 0x26b   : > { %1041 = vperm.xlu2 %1629, %v1023_v34   ;;  %1518 = vmatmul.msk.bf16.vlgmr.msra.gmra.mxu2 %vm561_vm8, %v1604_v37 }
 0x273   : > { %1083 = vperm.xlu2 %1629, %v1069_v35  }
 0x27b   : > { %1078 = vperm.xlu2 %1629, %v1068_v36   ;;  %1519 = vmatmul.msk.bf16.gmra.mxu2 %vm561_vm8, %v1605_v38 }
 0x2bd   : > { %v930_v39 = vpop.permute.xlu2 %929 }
 0x2be   : > { %1529 = vmatpush.bf16.msk.msrb.mxu3 %vm1528_vm9, %v930_v39 }
 0x2c5   : > { %v928_v40 = vpop.permute.xlu0 %927  ;;  %v1042_v60 = vpop.permute.xlu2 %1041 }
 0x2c6   : > { %1531 = vmatpush.bf16.msk.msrb.mxu3 %vm1528_vm9, %v928_v40 }
 0x2c9   : > { %1532 = vmatmul.msk.bf16.vlgmr.msrb.gmra.mxu3 %vm561_vm8, %v1602_v41 }
 0x2cd   : > { %v1027_v61 = vpop.permute.xlu0 %1026  ;;  %v1084_v16 = vpop.permute.xlu2 %1083 }
 0x2d5   : > { %v1079_v21 = vpop.permute.xlu2 %1078  ;;  %v1089_v34 = vpop.permute.xlu0 %1088 }
 0x2d9   : > { %1533 = vmatmul.msk.bf16.gmra.mxu3 %vm561_vm8, %v1603_v42  ;;  %v1267_v42 = vld [vmem:[%s2006_s13 + $0x8] sm:$0xff] }
 0x2ee   : > { %v975_v43 = vpop.f32.mrf.mxu2 }
 0x2f6   : > { %v977_v45 = vpop.f32.mrf.mxu2 }
 0x2fe   : > { %v980_v48 = vpop.f32.mrf.mxu2 }
 0x306   : > { %v982_v56 = vpop.f32.mrf.mxu2 }
 0x34c   : > { %v1010_v44 = vpop.f32.mrf.mxu3 }
 0x34d   : > { %v1011_v54 = vadd.f32 %v1010_v44, %v975_v43  ;;  %v1266_v43 = vld [vmem:[%s2006_s13] sm:$0xff]  ;;  %v1269_v44 = vld [vmem:[%s2006_s13 + $0x18] sm:$0xff] }
 0x34f   : > { %v1044_v63 = vadd.f32 %v1027_v61, %v1011_v54 }
 0x351   : > { %v1052_v7 = vmul.f32 0.1, %v1044_v63  ;;  %vm1048_vm13 = vcmp.ge.f32.partialorder %v1044_v63, 0.0 }
 0x353   : > { %v1056_v12 = vsel %vm1048_vm13, %v1044_v63, %v1052_v7 }
 0x354   : > { %v1012_v46 = vpop.f32.mrf.mxu3 }
 0x355   : > { %v1013_v51 = vadd.f32 %v1012_v46, %v977_v45  ;;  %v1610_v46 = vld [vmem:[%s2003_s10 + $0x10] sm:$0xff] }
 0x357   : > { %v1045_v58 = vadd.f32 %v1032_v52, %v1013_v51  ;;  %v1256_v51 = vld [vmem:[%s482_s16] sm:$0xff]  ;;  %v1257_v52 = vld [vmem:[%s482_s16 + $0x8] sm:$0xff] }
 0x359   : > { %v1053_v2 = vmul.f32 0.1, %v1045_v58  ;;  %vm1049_vm12 = vcmp.ge.f32.partialorder %v1045_v58, 0.0 }
 0x35b   : > { %v1057_v11 = vsel %vm1049_vm12, %v1045_v58, %v1053_v2  ;;  %v1608_v58 = vld [vmem:[%s2003_s10] sm:$0xff] }
 0x35c   : > { %v1015_v49 = vpop.f32.mrf.mxu3  ;;  %v1060_v13 = vpack.c.bf16 %v1057_v11, %v1056_v12 }
 0x35d   : > { %v1016_v50 = vadd.f32 %v1015_v49, %v980_v48  ;;  %v1259_v48 = vld [vmem:[%s482_s16 + $0x18] sm:$0xff] }
 0x35f   : > { %v1046_v55 = vadd.f32 %v1037_v47, %v1016_v50  ;;  %v1258_v47 = vld [vmem:[%s482_s16 + $0x10] sm:$0xff] }
 0x360   : > { %v1265_v50 = vpack.c.bf16 %v1259_v48, %v1258_v47 }
 0x361   : > { %v1054_v3 = vmul.f32 0.1, %v1046_v55  ;;  %vm1050_vm10 = vcmp.ge.f32.partialorder %v1046_v55, 0.0 }
 0x363   : > { %v1058_v8 = vsel %vm1050_vm10, %v1046_v55, %v1054_v3  ;;  %v1609_v55 = vld [vmem:[%s2003_s10 + $0x8] sm:$0xff] }
 0x364   : > { %v1017_v57 = vpop.f32.mrf.mxu3 }
 0x365   : > { %v1018_v59 = vadd.f32 %v1017_v57, %v982_v56  ;;  %v1264_v56 = vpack.c.bf16 %v1257_v52, %v1256_v51 }
 0x367   : > { %v1047_v4 = vadd.f32 %v1042_v60, %v1018_v59  ;;  %v1612_v59 = vld [vmem:[%s2005_s12 + $0x8] sm:$0xff] }
 0x369   : > { %vm1051_vm11 = vcmp.ge.f32.partialorder %v1047_v4, 0.0  ;;  %v1055_v6 = vmul.f32 0.1, %v1047_v4 }
 0x36b   : > { %v1059_v9 = vsel %vm1051_vm11, %v1047_v4, %v1055_v6 }
 0x36c   : > { %v1061_v10 = vpack.c.bf16 %v1059_v9, %v1058_v8 }
 0x36e   : > { %1113 = vmatpush.bf16.msra.mxu0 %v1061_v10 }
 0x372   : > { %1114 = vmatpush.bf16.msra.mxu0 %v1060_v13 }
 0x375   : > { %1546 = vmatmul.msk.bf16.vlgmr.msra.gmra.mxu0 %vm561_vm8, %v1606_v14 }
 0x385   : > { %1547 = vmatmul.msk.bf16.gmra.mxu0 %vm561_vm8, %v1607_v15 }
 0x3f2   : > { %v1116_v17 = vpop.f32.mrf.mxu0 }
 0x3f3   : > { %v1117_v19 = vadd.f32 %v1116_v17, %v1074_v18 }
 0x3f5   : > { %v1126_v20 = vadd.f32 %v1117_v19, %v1865_v53  ;;  %v1242_v53 = vld [vmem:[%s2004_s11] sm:$0xff] }
 0x3f7   : > { %v1130_v26 = vpack.c.bf16 %v1126_v20, %v1126_v20 }
 0x3f9   : > { %v1138_v29 = vunpack.c.l.b16 %v1130_v26 }
 0x3fa   : > { %v1118_v24 = vpop.f32.mrf.mxu0 }
 0x3fb   : > { %v1119_v0 = vadd.f32 %v1118_v24, %v1079_v21 }
 0x3fd   : > { %v1127_v27 = vadd.f32 %v1119_v0, %v1870_v62 }
 0x3ff   : > { %v1131_v28 = vpack.c.bf16 %v1127_v27, %v1127_v27 }
 0x401   : > { %v1139_v30 = vunpack.c.l.b16 %v1131_v28 }
 0x402   : > { %v1121_v31 = vpop.f32.mrf.mxu0 }
 0x403   : > { %v1142_v32 = vpack.c.b16 %v1139_v30, %v1138_v29  ;;  %v1122_v1 = vadd.f32 %v1121_v31, %v1084_v16 }
 0x405   : > { %1156 = vrot.lane.b32.xlu1 %v1142_v32, %s1640_s19  ;;  %v1128_v33 = vadd.f32 %v1122_v1, %v1877_v5  ;;  %v1243_v5 = vld [vmem:[%s2004_s11 + $0x8] sm:$0xff] }
 0x407   : > { %v1132_v37 = vpack.c.bf16 %v1128_v33, %v1128_v33 }
 0x409   : > { %v1140_v39 = vunpack.c.l.b16 %v1132_v37 }
 0x40a   : > { %v1123_v35 = vpop.f32.mrf.mxu0 }
 0x40b   : > { %v1124_v36 = vadd.f32 %v1123_v35, %v1089_v34 }
 0x40d   : > { %v1129_v62 = vadd.f32 %v1124_v36, %v1882_v25  ;;  %1246 = vperm.xlu1 %1631, %v1242_v53   ;;  %v1268_v25 = vld [vmem:[%s2006_s13 + $0x10] sm:$0xff] }
 0x40f   : > { %v1133_v38 = vpack.c.bf16 %v1129_v62, %v1129_v62 }
 0x411   : > { %v1141_v40 = vunpack.c.l.b16 %v1133_v38 }
 0x413   : > { %v1143_v41 = vpack.c.b16 %v1141_v40, %v1140_v39 }
 0x415   : > { %1146 = vrot.lane.b32.xlu2 %v1143_v41, %s1641_s20  ;;  %1158 = vrot.lane.b32.xlu0 %v1143_v41, %s1640_s19 }
 0x416   : > { %1232 = vmatpush.bf16.msra.mxu3 %v1143_v41  ;;  %1277 = vperm.xlu1 %1631, %v1267_v42  }
 0x41a   : > { %1233 = vmatpush.bf16.msra.mxu3 %v1142_v32 }
 0x41d   : > { %1251 = vperm.xlu2 %1629, %v1243_v5   ;;  %1144 = vrot.lane.b32.xlu0 %v1142_v32, %s1641_s20 }
 0x41e   : > { %1574 = vmatmul.msk.bf16.vlgmr.msra.gmra.mxu3 %vm561_vm8, %v1610_v46 }
 0x425   : > { %1282 = vperm.xlu2 %1629, %v1268_v25   ;;  %1272 = vperm.xlu0 %1630, %v1266_v43  }
 0x42d   : > { %1287 = vperm.xlu0 %1630, %v1269_v44  }
 0x46f   : > { %v1147_v45 = vpop.permute.xlu2 %1146 }
 0x470   : > { %1564 = vmatpush.bf16.msk.msrb.mxu2 %vm1761_vm6, %v1147_v45 }
 0x477   : > { %v1157_v54 = vpop.permute.xlu1 %1156  ;;  %v1252_v3 = vpop.permute.xlu2 %1251 }
 0x47f   : > { %v1247_v7 = vpop.permute.xlu1 %1246  ;;  %v1283_v12 = vpop.permute.xlu2 %1282 }
 0x487   : > { %v1159_v49 = vpop.permute.xlu0 %1158 }
 0x488   : > { %1555 = vmatpush.bf16.msk.msra.mxu1 %vm1765_vm7, %v1159_v49  ;;  %v1278_v21 = vpop.permute.xlu1 %1277 }
 0x48c   : > { %1557 = vmatpush.bf16.msk.msra.mxu1 %vm1765_vm7, %v1157_v54 }
 0x48f   : > { %v1145_v57 = vpop.permute.xlu0 %1144  ;;  %1558 = vmatmul.msk.bf16.vlgmr.msra.gmra.mxu1 %vm561_vm8, %v1609_v55 }
 0x490   : > { %1312 = vmatpush.bf16.msrb.mxu1 %v1265_v50  ;;  %1566 = vmatpush.bf16.msk.msrb.mxu2 %vm1761_vm6, %v1145_v57  ;;  %vm1329_vm6 = vcmask 130048  }
 0x493   : > { %1567 = vmatmul.msk.bf16.vlgmr.msrb.gmra.mxu2 %vm561_vm8, %v1608_v58 }
 0x494   : > { %1313 = vmatpush.bf16.msrb.mxu1 %v1264_v56 }
 0x497   : > { %v1273_v9 = vpop.permute.xlu0 %1272 }
 0x49f   : > { %1583 = vmatmul.msk.bf16.vlgmr.msrb.gmra.mxu1 %vm561_vm8, %v1611_v23  ;;  %v1288_v26 = vpop.permute.xlu0 %1287 }
 0x4a1   : > { %v1235_v4 = vpop.f32.mrf.mxu3 }
 0x4a9   : > { %v1237_v15 = vpop.f32.mrf.mxu3 }
 0x4af   : > { %1584 = vmatmul.msk.bf16.gmra.mxu1 %vm561_vm8, %v1612_v59 }
 0x50c   : > { %v1186_v60 = vpop.f32.mrf.mxu1 }
 0x514   : > { %v1188_v61 = vpop.f32.mrf.mxu1 }
 0x516   : > { %v1208_v63 = vpop.f32.mrf.mxu2 }
 0x517   : > { %v1209_v2 = vadd.f32 %v1208_v63, %v1186_v60 }
 0x519   : > { %v1240_v8 = vadd.f32 %v1235_v4, %v1209_v2 }
 0x51b   : > { %v1254_v13 = vadd.f32 %v1247_v7, %v1240_v8 }
 0x51c   : > { %v1315_v22 = vpop.f32.mrf.mxu1 }
 0x51d   : > { %v1316_v11 = vadd.f32 %v1315_v22, %v1273_v9 }
 0x51e   : > { %v1210_v10 = vpop.f32.mrf.mxu2 }
 0x51f   : > { %v1211_v14 = vadd.f32 %v1210_v10, %v1188_v61  ;;  %v1325_v17 = vmul.f32 %v1316_v11, %v1254_v13 }
 0x521   : > { %v1241_v19 = vadd.f32 %v1237_v15, %v1211_v14 }
 0x523   : > { %v1255_v0 = vadd.f32 %v1252_v3, %v1241_v19 }
 0x524   : > { %v1317_v6 = vpop.f32.mrf.mxu1 }
 0x525   : > { %v1318_v24 = vadd.f32 %v1317_v6, %v1278_v21 }
 0x527   : > { %v1326_v28 = vmul.f32 %v1318_v24, %v1255_v0 }
 0x52c   : > { %v1320_v16 = vpop.f32.mrf.mxu1 }
 0x52d   : > { %v1321_v18 = vadd.f32 %v1320_v16, %v1283_v12 }
 0x52f   : > { %v1327_v20 = vadd.f32 %v1325_v17, %v1321_v18 }
 0x531   : > { %1330 = vst.msk [vmem:[%s487_s26] sm:$0xff] %vm1329_vm6, %v1327_v20 }
 0x534   : > { %v1322_v27 = vpop.f32.mrf.mxu1 }
 0x535   : > { %v1323_v29 = vadd.f32 %v1322_v27, %v1288_v26 }
 0x537   : > { %v1328_v30 = vadd.f32 %v1326_v28, %v1323_v29 }
 0x539   : > { %1331 = vst.msk [vmem:[%s487_s26 + $0x8] sm:$0xff] %vm1329_vm6, %v1328_v30 }
 0x53a PF: > { %s24_s29 = sadd.s32 1, %s1638_s29  }
 0x53b   : > { %p21_p4 = scmp.ge.s32.totalorder %s24_s29, 4  }
 0x53d   :  { %23 = sbr.rel (!%p21_p4) target bundleno = 1 (0x1), region = 118 }

// kernel: _lambda_.15
= control target key start
LH: loop header
LB: loop body
LE: loop exit
PB: predicated region body
PF: predicated region fallthrough
CT: control target
= control target key end

     0   :  { %s1349_s29 = smov 0   ;;  %s1514_s0 = inlined_call_operand.vmem [shape: f32[2,16,32], index: 0, kind: input, shape index: {}]   ;;  %s1515_s1 = inlined_call_operand.vmem [shape: f32[2,16,32], index: 1, kind: input, shape index: {}]   ;;  %s1516_s2 = inlined_call_operand.vmem [shape: bf16[3,16,16], index: 2, kind: input, shape index: {}]   ;;  %s1517_s3 = inlined_call_operand.vmem [shape: f32[16,1], index: 3, kind: input, shape index: {}]   ;;  %s1518_s4 = inlined_call_operand.vmem [shape: bf16[3,16,16], index: 4, kind: input, shape index: {}]   ;;  %s1519_s5 = inlined_call_operand.vmem [shape: f32[16,1], index: 5, kind: input, shape index: {}]   ;;  %s1520_s6 = inlined_call_operand.vmem [shape: bf16[3,16,16], index: 6, kind: input, shape index: {}]   ;;  %s1521_s7 = inlined_call_operand.vmem [shape: f32[16,1], index: 7, kind: input, shape index: {}]   ;;  %s1522_s8 = inlined_call_operand.vmem [shape: bf16[3,16,16], index: 8, kind: input, shape index: {}]   ;;  %s1523_s9 = inlined_call_operand.vmem [shape: f32[16,1], index: 9, kind: input, shape index: {}]   ;;  %s1524_s10 = inlined_call_operand.vmem [shape: bf16[3,8,16], index: 10, kind: input, shape index: {}]   ;;  %s1525_s11 = inlined_call_operand.vmem [shape: f32[8,1], index: 11, kind: input, shape index: {}]   ;;  %s1526_s12 = inlined_call_operand.vmem [shape: bf16[16,16], index: 12, kind: input, shape index: {}]   ;;  %s1527_s13 = inlined_call_operand.vmem [shape: f32[16,1], index: 13, kind: input, shape index: {}]   ;;  %s1528_s14 = inlined_call_operand.vmem [shape: f32[2,8,32], index: 14, kind: output, shape index: {}]  }
   0x1 LB: > { %s1114_s30 = sadd.s32 4294967295, %s1264_s29   ;;  %p1118_p0 = scmp.ge.s32.totalorder %s1264_s29, 1  ;;  %s1264_s29 = sphi %s1349_s29, %s24_s29  }
   0x2   : > { %p422_p1 = scmp.lt.s32.totalorder %s1264_s29, 3 }
   0x4   : > { %p423_p2 = pnand %p1118_p0, %p422_p1 }
   0x5   : > { %p472_p3 = scmp.lt.s32.totalorder (!%p423_p2), %s1114_s30, 1  ;;  %s1266_s19 = smov (!%p423_p2), 2  }
   0x6   : > { %426 = sbr.rel (%p423_p2) target bundleno = 1356 (0x54c), region = 76  ;;  %s1267_s20 = smov (!%p423_p2), 1  }
   0x7   : > { %s1269_s22 = smov (!%p423_p2), 3   ;;  %s1270_s23 = smov (!%p423_p2), 6  }
   0x8   : > { %s1271_s27 = smov (!%p423_p2), 9   ;;  %s1272_s28 = smov (!%p423_p2), 18  }
   0xb   : > { %s1534_s30 = smov (!%p472_p3, %s1114_s30), 1  ;;  %v1229_v11 = vld [vmem:[%s1516_s2 + $0x10] sm:$0xff]  ;;  %vm525_vm2 = vcmask 130048   ;;  %v593_v12 = vld [vmem:[%s1517_s3] sm:$0xff]  ;;  %v1268_v13 = vmov 0   ;;  %v594_v14 = vld [vmem:[%s1517_s3 + $0x8] sm:$0xff] }
   0xc   : > { %s1225_s15 = sshll.u32 %s1534_s30, 4  ;;  %1255 = vset.pattern.permute.xlu1 %v1268_v13  ;;  %1256 = vset.pattern.permute.xlu0 %v1268_v13  ;;  %v710_v15 = vld [vmem:[%s1519_s5 + $0x8] sm:$0xff]  ;;  %vm504_vm3 = vcmask 15360   ;;  %v1227_v18 = vld [vmem:[%s1516_s2] sm:$0xff]  ;;  %vm513_vm5 = vcmask 7168   ;;  %v1232_v45 = vld [vmem:[%s1518_s4 + $0x10] sm:$0xff] }
   0xd   : > { %s476_s18 = scalar_lea.vmem %s1514_s0, %s1225_s15  ;;  %597 = vperm.xlu1 %1255, %v593_v12   ;;  %1257 = vset.pattern.permute.xlu2 %v1268_v13  ;;  %vm1390_vm4 = vmneg %vm504_vm3  ;;  %v1228_v21 = vld [vmem:[%s1516_s2 + $0x8] sm:$0xff]  ;;  %v709_v46 = vld [vmem:[%s1519_s5] sm:$0xff]  ;;  %vm630_vm9 = vcmask 23552   ;;  %vm622_vm11 = vcmask 48128   ;;  %vm740_vm15 = vcmask 146432  }
   0xe   : > { %v1365_v0 = vld [vmem:[%s476_s18] sm:$0xff]  ;;  %v1367_v1 = vld [vmem:[%s476_s18 + $0x8] sm:$0xff]  ;;  %vm1400_vm6 = vmneg %vm513_vm5 }
   0xf   : > { %vm489_vm0 = vcmp.ge.f32.partialorder %v1365_v0, 0.0  ;;  %vm490_vm1 = vcmp.ge.f32.partialorder %v1367_v1, 0.0  ;;  %v491_v2 = vmul.f32 0.1, %v1365_v0  ;;  %v492_v3 = vmul.f32 0.1, %v1367_v1  ;;  %vm1153_vm10 = vmneg %vm630_vm9 }
  0x10   : > { %v828_v47 = vld [vmem:[%s1521_s7 + $0x8] sm:$0xff]  ;;  %v999_v49 = vld [vmem:[%s1525_s11] sm:$0xff]  ;;  %vm1160_vm12 = vmneg %vm622_vm11 }
  0x11   : > { %v493_v4 = vsel %vm489_vm0, %v1365_v0, %v491_v2  ;;  %v494_v5 = vsel %vm490_vm1, %v1367_v1, %v492_v3  ;;  %v912_v48 = vld [vmem:[%s1523_s9 + $0x8] sm:$0xff]  ;;  %v1230_v53 = vld [vmem:[%s1518_s4] sm:$0xff]  ;;  %vm1183_vm0 = vmneg %vm740_vm15  ;;  %vm748_vm1 = vcmask 72704  }
  0x12   : > { %v495_v6 = vpack.c.bf16 %v493_v4, %v493_v4  ;;  %v496_v7 = vpack.c.bf16 %v494_v5, %v494_v5  ;;  %v1231_v51 = vld [vmem:[%s1518_s4 + $0x8] sm:$0xff]  ;;  %vm1176_vm3 = vmneg %vm748_vm1 }
  0x14   : > { %v499_v8 = vunpack.c.l.b16 %v495_v6  ;;  %v500_v9 = vunpack.c.l.b16 %v496_v7 }
  0x15   : > { %602 = vperm.xlu1 %1255, %v594_v14  }
  0x16   : > { %v501_v10 = vpack.c.b16 %v500_v9, %v499_v8 }
  0x18   : > { %502 = vrot.lane.b32.xlu0 %v501_v10, %s1266_s19  ;;  %584 = vmatpush.bf16.msra.mxu2 %v501_v10 }
  0x1b   : > { %1146 = vmatmul.msk.bf16.vlgmr.msra.gmra.mxu2 %vm525_vm2, %v1229_v11 }
  0x1d   : > { %718 = vperm.xlu1 %1255, %v710_v15  }
  0x20   : > { %511 = vrot.lane.b32.xlu0 %v501_v10, %s1267_s20 }
  0x28   : > { %713 = vperm.xlu0 %1256, %v709_v46  }
  0x30   : > { %836 = vperm.xlu0 %1256, %v828_v47   ;;  %v1237_v47 = vld [vmem:[%s1522_s8 + $0x10] sm:$0xff] }
  0x38   : > { %920 = vperm.xlu0 %1256, %v912_v48  }
  0x40   : > { %1002 = vperm.xlu0 %1256, %v999_v49  }
  0x7f   : > { %v598_v26 = vpop.permute.xlu1 %597 }
  0x87   : > { %v603_v35 = vpop.permute.xlu1 %602 }
  0x8a   : > { %v503_v17 = vpop.permute.xlu0 %502 }
  0x8b   : > { %1138 = vmatpush.bf16.msk.msra.mxu1 %vm1390_vm4, %v503_v17  ;;  %v827_v17 = vld [vmem:[%s1521_s7] sm:$0xff] }
  0x8e   : > { %1139 = vmatmul.msk.bf16.vlgmr.msra.gmra.mxu1 %vm525_vm2, %v1227_v18 }
  0x8f   : > { %v719_v6 = vpop.permute.xlu1 %718 }
  0x92   : > { %v512_v20 = vpop.permute.xlu0 %511 }
  0x93   : > { %1131 = vmatpush.bf16.msk.msra.mxu0 %vm1400_vm6, %v512_v20  ;;  %v1233_v20 = vld [vmem:[%s1520_s6] sm:$0xff] }
  0x96   : > { %1132 = vmatmul.msk.bf16.vlgmr.msra.gmra.mxu0 %vm525_vm2, %v1228_v21  ;;  %v911_v21 = vld [vmem:[%s1523_s9] sm:$0xff] }
  0x9a   : > { %v714_v59 = vpop.permute.xlu0 %713 }
  0x9e   : > { %v586_v23 = vpop.f32.mrf.mxu2 }
  0xa6   : > { %v588_v33 = vpop.f32.mrf.mxu2 }
 0x10b   : > { %v560_v22 = vpop.f32.mrf.mxu1 }
 0x113   : > { %v538_v24 = vpop.f32.mrf.mxu0  ;;  %v562_v29 = vpop.f32.mrf.mxu1 }
 0x114   : > { %v561_v25 = vadd.f32 %v560_v22, %v538_v24 }
 0x116   : > { %v591_v27 = vadd.f32 %v586_v23, %v561_v25  ;;  %v1234_v23 = vld [vmem:[%s1520_s6 + $0x8] sm:$0xff] }
 0x118   : > { %v605_v28 = vadd.f32 %v598_v26, %v591_v27 }
 0x11a   : > { %v609_v31 = vmul.f32 0.1, %v605_v28  ;;  %vm607_vm7 = vcmp.ge.f32.partialorder %v605_v28, 0.0 }
 0x11b   : > { %v540_v30 = vpop.f32.mrf.mxu0 }
 0x11c   : > { %v563_v32 = vadd.f32 %v562_v29, %v540_v30  ;;  %v611_v37 = vsel %vm607_vm7, %v605_v28, %v609_v31 }
 0x11d   : > { %v613_v39 = vpack.c.bf16 %v611_v37, %v611_v37  ;;  %v837_v37 = vpop.permute.xlu0 %836 }
 0x11e   : > { %v592_v34 = vadd.f32 %v588_v33, %v563_v32 }
 0x11f   : > { %v617_v42 = vunpack.c.l.b16 %v613_v39 }
 0x120   : > { %v606_v36 = vadd.f32 %v603_v35, %v592_v34 }
 0x122   : > { %v610_v38 = vmul.f32 0.1, %v606_v36  ;;  %vm608_vm8 = vcmp.ge.f32.partialorder %v606_v36, 0.0 }
 0x124   : > { %v612_v40 = vsel %vm608_vm8, %v606_v36, %v610_v38  ;;  %vm856_vm8 = vcmask 220160  }
 0x125   : > { %v614_v41 = vpack.c.bf16 %v612_v40, %v612_v40  ;;  %vm1206_vm9 = vmneg %vm856_vm8 }
 0x127   : > { %v618_v43 = vunpack.c.l.b16 %v614_v41 }
 0x129   : > { %v619_v44 = vpack.c.b16 %v618_v43, %v617_v42 }
 0x12b   : > { %628 = vrot.lane.b32.xlu2 %v619_v44, %s1269_s22  ;;  %700 = vmatpush.bf16.msrb.mxu1 %v619_v44  ;;  %s481_s22 = scalar_lea.vmem %s1515_s1, %s1225_s15 }
 0x12c   : > { %v1006_v48 = vld [vmem:[%s481_s22] sm:$0xff]  ;;  %v1007_v49 = vld [vmem:[%s481_s22 + $0x8] sm:$0xff] }
 0x12e   : > { %1169 = vmatmul.msk.bf16.vlgmr.msrb.gmra.mxu1 %vm525_vm2, %v1232_v45 }
 0x133   : > { %620 = vrot.lane.b32.xlu2 %v619_v44, %s1270_s23  ;;  %s1123_s23 = sshll.u32 %s1534_s30, 3 }
 0x134   : > { %s485_s26 = scalar_lea.vmem %s1528_s14, %s1123_s23 }
 0x185   : > { %v629_v50 = vpop.permute.xlu2 %628 }
 0x186   : > { %1154 = vmatpush.bf16.msk.msra.mxu3 %vm1153_vm10, %v629_v50  ;;  %v1010_v50 = vpack.c.bf16 %v1007_v49, %v1006_v48 }
 0x189   : > { %1155 = vmatmul.msk.bf16.vlgmr.msra.gmra.mxu3 %vm525_vm2, %v1231_v51 }
 0x18d   : > { %v621_v52 = vpop.permute.xlu2 %620 }
 0x18e   : > { %1161 = vmatpush.bf16.msk.msrb.mxu0 %vm1160_vm12, %v621_v52  ;;  %v1236_v52 = vld [vmem:[%s1522_s8 + $0x8] sm:$0xff] }
 0x191   : > { %1162 = vmatmul.msk.bf16.vlgmr.msrb.gmra.mxu0 %vm525_vm2, %v1230_v53  ;;  %v1238_v53 = vld [vmem:[%s1526_s12] sm:$0xff] }
 0x1ab   : > { %v702_v55 = vpop.f32.mrf.mxu1 }
 0x1b3   : > { %v704_v3 = vpop.f32.mrf.mxu1 }
 0x20c   : > { %v654_v54 = vpop.f32.mrf.mxu3 }
 0x20e   : > { %v676_v56 = vpop.f32.mrf.mxu0 }
 0x20f   : > { %v677_v57 = vadd.f32 %v676_v56, %v654_v54 }
 0x211   : > { %v707_v58 = vadd.f32 %v702_v55, %v677_v57 }
 0x213   : > { %v721_v60 = vadd.f32 %v714_v59, %v707_v58 }
 0x214   : > { %v656_v62 = vpop.f32.mrf.mxu3 }
 0x215   : > { %v1435_v61 = vadd.f32 %v721_v60, %v1365_v0 }
 0x216   : > { %v678_v63 = vpop.f32.mrf.mxu0 }
 0x217   : > { %v679_v2 = vadd.f32 %v678_v63, %v656_v62  ;;  %v727_v5 = vmul.f32 0.1, %v1435_v61  ;;  %vm725_vm13 = vcmp.ge.f32.partialorder %v1435_v61, 0.0 }
 0x219   : > { %v708_v4 = vadd.f32 %v704_v3, %v679_v2  ;;  %v729_v9 = vsel %vm725_vm13, %v1435_v61, %v727_v5  ;;  %v921_v2 = vpop.permute.xlu0 %920 }
 0x21a   : > { %v731_v10 = vpack.c.bf16 %v729_v9, %v729_v9 }
 0x21b   : > { %v722_v7 = vadd.f32 %v719_v6, %v708_v4 }
 0x21c   : > { %v735_v13 = vunpack.c.l.b16 %v731_v10  ;;  %v1012_v10 = vld [vmem:[%s1527_s13 + $0x8] sm:$0xff] }
 0x21d   : > { %v1440_v8 = vadd.f32 %v722_v7, %v1367_v1  ;;  %v1235_v1 = vld [vmem:[%s1520_s6 + $0x10] sm:$0xff] }
 0x21f   : > { %vm726_vm14 = vcmp.ge.f32.partialorder %v1440_v8, 0.0  ;;  %v728_v0 = vmul.f32 0.1, %v1440_v8 }
 0x221   : > { %v730_v11 = vsel %vm726_vm14, %v1440_v8, %v728_v0 }
 0x222   : > { %v732_v12 = vpack.c.bf16 %v730_v11, %v730_v11 }
 0x224   : > { %v736_v14 = vunpack.c.l.b16 %v732_v12  ;;  %v939_v12 = vld [vmem:[%s1524_s10] sm:$0xf] }
 0x226   : > { %v737_v15 = vpack.c.b16 %v736_v14, %v735_v13  ;;  %v1209_v14 = vld [vmem:[%s1524_s10 + $0x4] sm:$0xf] }
 0x228   : > { %746 = vrot.lane.b32.xlu1 %v737_v15, %s1271_s27  ;;  %738 = vrot.lane.b32.xlu2 %v737_v15, %s1272_s28  ;;  %s1273_s28 = smov 27  }
 0x229   : > { %818 = vmatpush.bf16.msra.mxu0 %v737_v15 }
 0x22c   : > { %1192 = vmatmul.msk.bf16.vlgmr.msra.gmra.mxu0 %vm525_vm2, %v1235_v1 }
 0x230   : > { %831 = vperm.xlu2 %1257, %v827_v17  }
 0x238   : > { %915 = vperm.xlu2 %1257, %v911_v21  }
 0x282   : > { %v739_v18 = vpop.permute.xlu2 %738 }
 0x283   : > { %1184 = vmatpush.bf16.msk.msrb.mxu3 %vm1183_vm0, %v739_v18 }
 0x286   : > { %1185 = vmatmul.msk.bf16.vlgmr.msrb.gmra.mxu3 %vm525_vm2, %v1233_v20 }
 0x28a   : > { %v832_v28 = vpop.permute.xlu2 %831 }
 0x292   : > { %v916_v57 = vpop.permute.xlu2 %915 }
 0x29a   : > { %v747_v22 = vpop.permute.xlu1 %746 }
 0x29b   : > { %1177 = vmatpush.bf16.msk.msrb.mxu2 %vm1176_vm3, %v747_v22 }
 0x29e   : > { %1178 = vmatmul.msk.bf16.vlgmr.msrb.gmra.mxu2 %vm525_vm2, %v1234_v23  ;;  %v1003_v23 = vpop.permute.xlu0 %1002 }
 0x2a9   : > { %v820_v25 = vpop.f32.mrf.mxu0 }
 0x2b1   : > { %v822_v35 = vpop.f32.mrf.mxu0 }
 0x309   : > { %v794_v24 = vpop.f32.mrf.mxu3 }
 0x311   : > { %v796_v31 = vpop.f32.mrf.mxu3 }
 0x321   : > { %v772_v26 = vpop.f32.mrf.mxu2 }
 0x322   : > { %v795_v27 = vadd.f32 %v794_v24, %v772_v26 }
 0x324   : > { %v825_v29 = vadd.f32 %v820_v25, %v795_v27 }
 0x326   : > { %v839_v30 = vadd.f32 %v832_v28, %v825_v29 }
 0x328   : > { %v843_v33 = vmul.f32 0.1, %v839_v30  ;;  %vm841_vm5 = vcmp.ge.f32.partialorder %v839_v30, 0.0 }
 0x329   : > { %v774_v32 = vpop.f32.mrf.mxu2 }
 0x32a   : > { %v797_v34 = vadd.f32 %v796_v31, %v774_v32  ;;  %v845_v38 = vsel %vm841_vm5, %v839_v30, %v843_v33 }
 0x32b   : > { %v847_v41 = vpack.c.bf16 %v845_v38, %v845_v38 }
 0x32c   : > { %v826_v36 = vadd.f32 %v822_v35, %v797_v34 }
 0x32d   : > { %v851_v44 = vunpack.c.l.b16 %v847_v41 }
 0x32e   : > { %v840_v39 = vadd.f32 %v837_v37, %v826_v36 }
 0x330   : > { %v844_v40 = vmul.f32 0.1, %v840_v39  ;;  %vm842_vm7 = vcmp.ge.f32.partialorder %v840_v39, 0.0 }
 0x332   : > { %v846_v42 = vsel %vm842_vm7, %v840_v39, %v844_v40 }
 0x333   : > { %v848_v43 = vpack.c.bf16 %v846_v42, %v846_v42 }
 0x335   : > { %v852_v45 = vunpack.c.l.b16 %v848_v43 }
 0x337   : > { %v853_v46 = vpack.c.b16 %v852_v45, %v851_v44 }
 0x339   : > { %854 = vrot.lane.b32.xlu1 %v853_v46, %s1273_s28  ;;  %882 = vmatpush.bf16.msra.mxu1 %v853_v46 }
 0x33c   : > { %1201 = vmatmul.msk.bf16.vlgmr.msra.gmra.mxu1 %vm525_vm2, %v1237_v47 }
 0x3ab   : > { %v855_v51 = vpop.permute.xlu1 %854 }
 0x3ac   : > { %1207 = vmatpush.bf16.msk.msra.mxu2 %vm1206_vm9, %v855_v51 }
 0x3af   : > { %1208 = vmatmul.msk.bf16.vlgmr.msra.gmra.mxu2 %vm525_vm2, %v1236_v52 }
 0x3b0   : > { %1038 = vmatpush.bf16.msrb.mxu2 %v1010_v50 }
 0x3b9   : > { %v884_v54 = vpop.f32.mrf.mxu1 }
 0x3bf   : > { %1222 = vmatmul.msk.bf16.vlgmr.msrb.gmra.mxu2 %vm525_vm2, %v1238_v53 }
 0x3c1   : > { %v886_v59 = vpop.f32.mrf.mxu1 }
 0x432   : > { %v906_v55 = vpop.f32.mrf.mxu2 }
 0x433   : > { %v907_v56 = vadd.f32 %v906_v55, %v884_v54 }
 0x435   : > { %v923_v58 = vadd.f32 %v916_v57, %v907_v56 }
 0x437   : > { %v925_v62 = vadd.f32 %v923_v58, %v1435_v61  ;;  %v1011_v61 = vld [vmem:[%s1527_s13] sm:$0xff] }
 0x439   : > { %v927_v4 = vpack.c.bf16 %v925_v62, %v925_v62 }
 0x43a   : > { %v908_v60 = vpop.f32.mrf.mxu2 }
 0x43b   : > { %v909_v63 = vadd.f32 %v908_v60, %v886_v59  ;;  %v931_v7 = vunpack.c.l.b16 %v927_v4 }
 0x43d   : > { %v924_v3 = vadd.f32 %v921_v2, %v909_v63 }
 0x43f   : > { %v926_v5 = vadd.f32 %v924_v3, %v1440_v8  ;;  %v1216_v8 = vld [vmem:[%s1524_s10 + $0x8] sm:$0xf] }
 0x441   : > { %v928_v6 = vpack.c.bf16 %v926_v5, %v926_v5 }
 0x442   : > { %v1040_v18 = vpop.f32.mrf.mxu2 }
 0x443   : > { %v932_v9 = vunpack.c.l.b16 %v928_v6 }
 0x445   : > { %v933_v0 = vpack.c.b16 %v932_v9, %v931_v7 }
 0x447   : > { %934 = vrot.lane.b32.xlu2 %v933_v0, %s1266_s19  ;;  %940 = vrot.lane.b32.xlu1 %v933_v0, %s1267_s20 }
 0x448   : > { %992 = vmatpush.bf16.msrb.mxu1 %v933_v0 }
 0x44a   : > { %v1042_v25 = vpop.f32.mrf.mxu2 }
 0x44b   : > { %1217 = vmatmul.msk.bf16.vlgmr.msrb.gmra.mxu1 %vm525_vm2, %v1216_v8 }
 0x44f   : > { %1020 = vperm.xlu2 %1257, %v1012_v10   ;;  %1015 = vperm.xlu1 %1255, %v1011_v61  }
 0x4a1   : > { %v935_v11 = vpop.permute.xlu2 %934 }
 0x4a2   : > { %1214 = vmatpush.bf16.msk.msrb.mxu0 %vm1390_vm4, %v935_v11 }
 0x4a5   : > { %1215 = vmatmul.msk.bf16.vlgmr.msrb.gmra.mxu0 %vm525_vm2, %v939_v12 }
 0x4a9   : > { %v1021_v19 = vpop.permute.xlu2 %1020 }
 0x4aa   : > { %v1043_v28 = vadd.f32 %v1042_v25, %v1021_v19 }
 0x4b9   : > { %v941_v13 = vpop.permute.xlu1 %940 }
 0x4ba   : > { %1211 = vmatpush.bf16.msk.msra.mxu3 %vm1400_vm6, %v941_v13 }
 0x4bd   : > { %1212 = vmatmul.msk.bf16.vlgmr.msra.gmra.mxu3 %vm525_vm2, %v1209_v14  ;;  %vm1047_vm2 = vcmask 261120  }
 0x4c1   : > { %v1016_v22 = vpop.permute.xlu1 %1015 }
 0x4c2   : > { %v1041_v26 = vadd.f32 %v1040_v18, %v1016_v22 }
 0x4c8   : > { %v994_v15 = vpop.f32.mrf.mxu1 }
 0x4d0   : > { %v996_v1 = vpop.f32.mrf.mxu1 }
 0x522   : > { %v975_v16 = vpop.f32.mrf.mxu0 }
 0x52a   : > { %v977_v17 = vpop.f32.mrf.mxu0 }
 0x540   : > { %v959_v20 = vpop.f32.mrf.mxu3 }
 0x541   : > { %v976_v21 = vadd.f32 %v975_v16, %v959_v20 }
 0x543   : > { %v998_v24 = vadd.f32 %v994_v15, %v976_v21 }
 0x545   : > { %v1005_v27 = vadd.f32 %v1003_v23, %v998_v24 }
 0x547   : > { %v1045_v29 = vmul.f32 %v1041_v26, %v1005_v27 }
 0x548   : > { %v961_v30 = vpop.f32.mrf.mxu3 }
 0x549   : > { %v1046_v31 = vadd.f32 %v1045_v29, %v1043_v28 }
 0x54b   : > { %1048 = vst.msk [vmem:[%s485_s26] sm:$0xff] %vm1047_vm2, %v1046_v31 }
 0x54c PF: > { %s24_s29 = sadd.s32 1, %s1264_s29  }
 0x54d   : > { %p21_p4 = scmp.ge.s32.totalorder %s24_s29, 4  }
 0x54f   :  { %23 = sbr.rel (!%p21_p4) target bundleno = 1 (0x1), region = 119 }

// kernel: _lambda_.16
= control target key start
LH: loop header
LB: loop body
LE: loop exit
PB: predicated region body
PF: predicated region fallthrough
CT: control target
= control target key end

     0   :  { %s1170_s29 = smov 0   ;;  %s1316_s0 = inlined_call_operand.vmem [shape: f32[2,8,64], index: 0, kind: input, shape index: {}]   ;;  %s1317_s1 = inlined_call_operand.vmem [shape: f32[2,8,64], index: 1, kind: input, shape index: {}]   ;;  %s1318_s2 = inlined_call_operand.vmem [shape: bf16[3,8,8], index: 2, kind: input, shape index: {}]   ;;  %s1319_s3 = inlined_call_operand.vmem [shape: f32[8,1], index: 3, kind: input, shape index: {}]   ;;  %s1320_s4 = inlined_call_operand.vmem [shape: bf16[3,8,8], index: 4, kind: input, shape index: {}]   ;;  %s1321_s5 = inlined_call_operand.vmem [shape: f32[8,1], index: 5, kind: input, shape index: {}]   ;;  %s1322_s6 = inlined_call_operand.vmem [shape: bf16[3,8,8], index: 6, kind: input, shape index: {}]   ;;  %s1323_s7 = inlined_call_operand.vmem [shape: f32[8,1], index: 7, kind: input, shape index: {}]   ;;  %s1324_s8 = inlined_call_operand.vmem [shape: bf16[3,8,8], index: 8, kind: input, shape index: {}]   ;;  %s1325_s9 = inlined_call_operand.vmem [shape: f32[8,1], index: 9, kind: input, shape index: {}]   ;;  %s1326_s10 = inlined_call_operand.vmem [shape: bf16[3,8,8], index: 10, kind: input, shape index: {}]   ;;  %s1327_s11 = inlined_call_operand.vmem [shape: f32[8,1], index: 11, kind: input, shape index: {}]   ;;  %s1328_s12 = inlined_call_operand.vmem [shape: bf16[16,8], index: 12, kind: input, shape index: {}]   ;;  %s1329_s13 = inlined_call_operand.vmem [shape: f32[16,1], index: 13, kind: input, shape index: {}]   ;;  %s1330_s14 = inlined_call_operand.vmem [shape: f32[2,8,64], index: 14, kind: output, shape index: {}]  }
   0x1 LB: > { %s1017_s30 = sadd.s32 4294967295, %s1084_s29   ;;  %p1021_p0 = scmp.ge.s32.totalorder %s1084_s29, 1  ;;  %s1084_s29 = sphi %s1170_s29, %s24_s29  }
   0x2   : > { %p420_p1 = scmp.lt.s32.totalorder %s1084_s29, 3 }
   0x4   : > { %p421_p2 = pnand %p1021_p0, %p420_p1 }
   0x5   : > { %p468_p3 = scmp.lt.s32.totalorder (!%p421_p2), %s1017_s30, 1  ;;  %s1086_s19 = smov (!%p421_p2), 2  }
   0x6   : > { %424 = sbr.rel (%p421_p2) target bundleno = 1352 (0x548), region = 76  ;;  %s1087_s20 = smov (!%p421_p2), 1  }
   0x7   : > { %s1090_s16 = smov (!%p421_p2), 3   ;;  %s1091_s21 = smov (!%p421_p2), 9  }
   0x8   : > { %s1092_s22 = smov (!%p421_p2), 18   ;;  %s1093_s17 = smov (!%p421_p2), 27  }
   0xb   : > { %s1332_s30 = smov (!%p468_p3, %s1017_s30), 1  ;;  %vm507_vm1 = vcmask 1043456   ;;  %vm503_vm2 = vcmask 64512   ;;  %v1028_v7 = vld [vmem:[%s1318_s2 + $0x8] sm:$0xf]  ;;  %v563_v8 = vld [vmem:[%s1319_s3] sm:$0xff] }
   0xc   : > { %s1178_s15 = sshll.u32 %s1332_s30, 3  ;;  %v1088_v9 = vmov 0   ;;  %vm491_vm3 = vcmask 15360   ;;  %v495_v13 = vld [vmem:[%s1318_s2] sm:$0xf]  ;;  %vm498_vm4 = vcmask 7168  }
   0xd   : > { %s471_s18 = scalar_lea.vmem %s1316_s0, %s1178_s15  ;;  %1075 = vset.pattern.permute.xlu1 %v1088_v9  ;;  %1076 = vset.pattern.permute.xlu2 %v1088_v9  ;;  %v1025_v17 = vld [vmem:[%s1318_s2 + $0x4] sm:$0xf]  ;;  %s1089_s30 = smov 6   ;;  %v1033_v34 = vld [vmem:[%s1320_s4 + $0x8] sm:$0xf]  ;;  %vm579_vm6 = vcmask 48128  }
   0xe   : > { %v1184_v0 = vld [vmem:[%s471_s18] sm:$0xff]  ;;  %566 = vperm.xlu1 %1075, %v563_v8   ;;  %1077 = vset.pattern.permute.xlu0 %v1088_v9  ;;  %vm585_vm7 = vcmask 23552   ;;  %vm671_vm9 = vcmask 72704   ;;  %vm665_vm10 = vcmask 146432   ;;  %s1094_s18 = smov 54   ;;  %vm756_vm12 = vcmask 220160   ;;  %s475_s27 = scalar_lea.vmem %s1317_s1, %s1178_s15 }
   0xf   : > { %vm482_vm0 = vcmp.ge.f32.partialorder %v1184_v0, 0.0  ;;  %v483_v1 = vmul.f32 0.1, %v1184_v0  ;;  %v648_v35 = vld [vmem:[%s1321_s5] sm:$0xff]  ;;  %vm750_vm13 = vcmask 441344   ;;  %s479_s28 = scalar_lea.vmem %s1330_s14, %s1178_s15  ;;  %vm950_vm14 = vcmask 523264  }
  0x10   : > { %v582_v39 = vld [vmem:[%s1320_s4] sm:$0xf]  ;;  %v1030_v46 = vld [vmem:[%s1320_s4 + $0x4] sm:$0xf] }
  0x11   : > { %v484_v2 = vsel %vm482_vm0, %v1184_v0, %v483_v1  ;;  %v734_v40 = vld [vmem:[%s1323_s7] sm:$0xff] }
  0x12   : > { %v485_v3 = vpack.c.bf16 %v484_v2, %v484_v2  ;;  %v819_v41 = vld [vmem:[%s1325_s9] sm:$0xff] }
  0x13   : > { %v900_v42 = vld [vmem:[%s1327_s11] sm:$0xff] }
  0x14   : > { %v487_v4 = vunpack.c.l.b16 %v485_v3  ;;  %v547_v5 = vsel %vm507_vm1, %v485_v3, 0  ;;  %v668_v8 = vld [vmem:[%s1322_s6] sm:$0xf] }
  0x15   : > { %556 = vmatpush.bf16.msra.mxu2 %v547_v5 }
  0x16   : > { %v488_v6 = vpack.c.b16 %v487_v4, %v487_v4 }
  0x18   : > { %489 = vrot.lane.b32.xlu0 %v488_v6, %s1086_s19  ;;  %1029 = vmatmul.msk.bf16.vlgmr.msra.gmra.mxu2 %vm503_vm2, %v1028_v7  ;;  %v1035_v7 = vld [vmem:[%s1322_s6 + $0x4] sm:$0xf] }
  0x20   : > { %496 = vrot.lane.b32.xlu0 %v488_v6, %s1087_s20 }
  0x80   : > { %v567_v24 = vpop.permute.xlu1 %566 }
  0x8a   : > { %v490_v10 = vpop.permute.xlu0 %489 }
  0x8b   : > { %v494_v11 = vsel %vm491_vm3, 0, %v490_v10 }
  0x8c   : > { %v526_v12 = vsel %vm507_vm1, %v494_v11, 0 }
  0x8d   : > { %535 = vmatpush.bf16.msra.mxu1 %v526_v12 }
  0x90   : > { %1027 = vmatmul.msk.bf16.vlgmr.msra.gmra.mxu1 %vm503_vm2, %v495_v13 }
  0x92   : > { %v497_v14 = vpop.permute.xlu0 %496 }
  0x93   : > { %v500_v15 = vsel %vm498_vm4, 0, %v497_v14 }
  0x94   : > { %v508_v16 = vsel %vm507_vm1, %v500_v15, 0 }
  0x95   : > { %517 = vmatpush.bf16.msra.mxu0 %v508_v16 }
  0x98   : > { %1026 = vmatmul.msk.bf16.vlgmr.msra.gmra.mxu0 %vm503_vm2, %v1025_v17 }
  0x9b   : > { %v558_v18 = vpop.f32.mrf.mxu2 }
  0xa3   : > { %v560_v19 = vpop.f32.mrf.mxu2 }
 0x10d   : > { %v537_v20 = vpop.f32.mrf.mxu1 }
 0x115   : > { %v519_v21 = vpop.f32.mrf.mxu0  ;;  %v539_v22 = vpop.f32.mrf.mxu1 }
 0x116   : > { %v538_v23 = vadd.f32 %v537_v20, %v519_v21 }
 0x118   : > { %v562_v25 = vadd.f32 %v558_v18, %v538_v23 }
 0x11a   : > { %v569_v26 = vadd.f32 %v567_v24, %v562_v25  ;;  %v1043_v25 = vld [vmem:[%s1324_s8 + $0x8] sm:$0xf] }
 0x11c   : > { %v571_v27 = vmul.f32 0.1, %v569_v26  ;;  %vm570_vm5 = vcmp.ge.f32.partialorder %v569_v26, 0.0 }
 0x11d   : > { %v521_v28 = vpop.f32.mrf.mxu0 }
 0x11e   : > { %v572_v29 = vsel %vm570_vm5, %v569_v26, %v571_v27 }
 0x11f   : > { %v573_v30 = vpack.c.bf16 %v572_v29, %v572_v29 }
 0x121   : > { %v632_v31 = vsel %vm507_vm1, %v573_v30, 0  ;;  %v575_v32 = vunpack.c.l.b16 %v573_v30 }
 0x122   : > { %641 = vmatpush.bf16.msrb.mxu1 %v632_v31 }
 0x123   : > { %v576_v33 = vpack.c.b16 %v575_v32, %v575_v32  ;;  %v1040_v32 = vld [vmem:[%s1324_s8 + $0x4] sm:$0xf] }
 0x125   : > { %577 = vrot.lane.b32.xlu2 %v576_v33, %s1089_s30  ;;  %583 = vrot.lane.b32.xlu1 %v576_v33, %s1090_s16  ;;  %v753_v33 = vld [vmem:[%s1324_s8] sm:$0xf] }
 0x126   : > { %1034 = vmatmul.msk.bf16.vlgmr.msrb.gmra.mxu1 %vm503_vm2, %v1033_v34  ;;  %v907_v34 = vld [vmem:[%s475_s27] sm:$0xff] }
 0x12d   : > { %651 = vperm.xlu2 %1076, %v648_v35   ;;  %v910_v35 = vpack.c.bf16 %v907_v34, %v907_v34 }
 0x135   : > { %737 = vperm.xlu2 %1076, %v734_v40  }
 0x13d   : > { %822 = vperm.xlu2 %1076, %v819_v41  }
 0x145   : > { %903 = vperm.xlu2 %1076, %v900_v42  }
 0x17f   : > { %v578_v36 = vpop.permute.xlu2 %577 }
 0x180   : > { %v581_v37 = vsel %vm579_vm6, 0, %v578_v36 }
 0x181   : > { %v611_v38 = vsel %vm507_vm1, %v581_v37, 0  ;;  %v932_v37 = vsel %vm507_vm1, %v910_v35, 0 }
 0x182   : > { %620 = vmatpush.bf16.msrb.mxu0 %v611_v38  ;;  %v1057_v38 = vld [vmem:[%s1328_s12] sm:$0xff] }
 0x185   : > { %1032 = vmatmul.msk.bf16.vlgmr.msrb.gmra.mxu0 %vm503_vm2, %v582_v39 }
 0x187   : > { %v652_v54 = vpop.permute.xlu2 %651 }
 0x18f   : > { %v738_v15 = vpop.permute.xlu2 %737 }
 0x197   : > { %v584_v43 = vpop.permute.xlu1 %583 }
 0x198   : > { %v587_v44 = vsel %vm585_vm7, 0, %v584_v43 }
 0x199   : > { %v593_v45 = vsel %vm507_vm1, %v587_v44, 0 }
 0x19a   : > { %602 = vmatpush.bf16.msra.mxu3 %v593_v45  ;;  %v823_v45 = vpop.permute.xlu2 %822 }
 0x19d   : > { %1031 = vmatmul.msk.bf16.vlgmr.msra.gmra.mxu3 %vm503_vm2, %v1030_v46 }
 0x1a3   : > { %v643_v47 = vpop.f32.mrf.mxu1 }
 0x1ab   : > { %v645_v49 = vpop.f32.mrf.mxu1 }
 0x202   : > { %v622_v48 = vpop.f32.mrf.mxu0 }
 0x20a   : > { %v624_v50 = vpop.f32.mrf.mxu0 }
 0x220   : > { %v604_v51 = vpop.f32.mrf.mxu3 }
 0x221   : > { %v623_v52 = vadd.f32 %v622_v48, %v604_v51 }
 0x223   : > { %v647_v53 = vadd.f32 %v643_v47, %v623_v52 }
 0x225   : > { %v654_v55 = vadd.f32 %v652_v54, %v647_v53  ;;  %v912_v53 = vld [vmem:[%s1329_s13 + $0x8] sm:$0xff] }
 0x226   : > { %v1048_v54 = vld [vmem:[%s1326_s10 + $0x8] sm:$0xf] }
 0x227   : > { %v1239_v56 = vadd.f32 %v654_v55, %v1184_v0  ;;  %v1038_v0 = vld [vmem:[%s1322_s6 + $0x8] sm:$0xf]  ;;  %v911_v55 = vld [vmem:[%s1329_s13] sm:$0xff] }
 0x228   : > { %v606_v57 = vpop.f32.mrf.mxu3 }
 0x229   : > { %vm656_vm8 = vcmp.ge.f32.partialorder %v1239_v56, 0.0  ;;  %v657_v58 = vmul.f32 0.1, %v1239_v56 }
 0x22b   : > { %v658_v59 = vsel %vm656_vm8, %v1239_v56, %v657_v58 }
 0x22c   : > { %v659_v60 = vpack.c.bf16 %v658_v59, %v658_v59 }
 0x22e   : > { %v718_v61 = vsel %vm507_vm1, %v659_v60, 0  ;;  %v661_v62 = vunpack.c.l.b16 %v659_v60 }
 0x22f   : > { %727 = vmatpush.bf16.msra.mxu0 %v718_v61 }
 0x230   : > { %v662_v63 = vpack.c.b16 %v661_v62, %v661_v62  ;;  %v1045_v62 = vld [vmem:[%s1326_s10 + $0x4] sm:$0xf] }
 0x232   : > { %669 = vrot.lane.b32.xlu1 %v662_v63, %s1091_s21  ;;  %663 = vrot.lane.b32.xlu0 %v662_v63, %s1092_s22  ;;  %v835_v63 = vld [vmem:[%s1326_s10] sm:$0xf] }
 0x233   : > { %1039 = vmatmul.msk.bf16.vlgmr.msra.gmra.mxu0 %vm503_vm2, %v1038_v0 }
 0x2a4   : > { %v670_v1 = vpop.permute.xlu1 %669  ;;  %v664_v2 = vpop.permute.xlu0 %663 }
 0x2a5   : > { %v673_v3 = vsel %vm671_vm9, 0, %v670_v1  ;;  %v667_v4 = vsel %vm665_vm10, 0, %v664_v2 }
 0x2a6   : > { %v679_v5 = vsel %vm507_vm1, %v673_v3, 0  ;;  %v697_v6 = vsel %vm507_vm1, %v667_v4, 0 }
 0x2a7   : > { %688 = vmatpush.bf16.msrb.mxu2 %v679_v5  ;;  %706 = vmatpush.bf16.msrb.mxu3 %v697_v6 }
 0x2aa   : > { %1036 = vmatmul.msk.bf16.vlgmr.msrb.gmra.mxu2 %vm503_vm2, %v1035_v7  ;;  %1037 = vmatmul.msk.bf16.vlgmr.msrb.gmra.mxu3 %vm503_vm2, %v668_v8  ;;  %v904_v7 = vpop.permute.xlu2 %903 }
 0x2b0   : > { %v729_v9 = vpop.f32.mrf.mxu0 }
 0x2b8   : > { %v731_v10 = vpop.f32.mrf.mxu0 }
 0x32d   : > { %v690_v11 = vpop.f32.mrf.mxu2  ;;  %v708_v12 = vpop.f32.mrf.mxu3 }
 0x32e   : > { %v709_v13 = vadd.f32 %v708_v12, %v690_v11 }
 0x330   : > { %v733_v14 = vadd.f32 %v729_v9, %v709_v13 }
 0x332   : > { %v740_v16 = vadd.f32 %v738_v15, %v733_v14 }
 0x334   : > { %v742_v17 = vmul.f32 0.1, %v740_v16  ;;  %vm741_vm11 = vcmp.ge.f32.partialorder %v740_v16, 0.0 }
 0x335   : > { %v692_v18 = vpop.f32.mrf.mxu2  ;;  %v710_v19 = vpop.f32.mrf.mxu3 }
 0x336   : > { %v743_v20 = vsel %vm741_vm11, %v740_v16, %v742_v17 }
 0x337   : > { %v744_v21 = vpack.c.bf16 %v743_v20, %v743_v20 }
 0x339   : > { %v803_v22 = vsel %vm507_vm1, %v744_v21, 0  ;;  %v746_v23 = vunpack.c.l.b16 %v744_v21 }
 0x33a   : > { %812 = vmatpush.bf16.msra.mxu3 %v803_v22 }
 0x33b   : > { %v747_v24 = vpack.c.b16 %v746_v23, %v746_v23 }
 0x33d   : > { %754 = vrot.lane.b32.xlu1 %v747_v24, %s1093_s17  ;;  %748 = vrot.lane.b32.xlu0 %v747_v24, %s1094_s18 }
 0x33e   : > { %1044 = vmatmul.msk.bf16.vlgmr.msra.gmra.mxu3 %vm503_vm2, %v1043_v25 }
 0x33f   : > { %941 = vmatpush.bf16.msrb.mxu3 %v932_v37 }
 0x34e   : > { %1054 = vmatmul.msk.bf16.vlgmr.msrb.gmra.mxu3 %vm503_vm2, %v1057_v38 }
 0x3af   : > { %v755_v26 = vpop.permute.xlu1 %754  ;;  %v749_v27 = vpop.permute.xlu0 %748 }
 0x3b0   : > { %v758_v28 = vsel %vm756_vm12, 0, %v755_v26  ;;  %v752_v29 = vsel %vm750_vm13, 0, %v749_v27 }
 0x3b1   : > { %v764_v30 = vsel %vm507_vm1, %v758_v28, 0  ;;  %v782_v31 = vsel %vm507_vm1, %v752_v29, 0 }
 0x3b2   : > { %773 = vmatpush.bf16.msra.mxu1 %v764_v30  ;;  %791 = vmatpush.bf16.msra.mxu2 %v782_v31 }
 0x3b5   : > { %1041 = vmatmul.msk.bf16.vlgmr.msra.gmra.mxu1 %vm503_vm2, %v1040_v32  ;;  %1042 = vmatmul.msk.bf16.vlgmr.msra.gmra.mxu2 %vm503_vm2, %v753_v33 }
 0x3c1   : > { %v814_v36 = vpop.f32.mrf.mxu3 }
 0x3c9   : > { %v816_v39 = vpop.f32.mrf.mxu3 }
 0x3d1   : > { %v943_v2 = vpop.f32.mrf.mxu3 }
 0x3d9   : > { %v945_v9 = vpop.f32.mrf.mxu3 }
 0x432   : > { %v775_v40 = vpop.f32.mrf.mxu1 }
 0x438   : > { %v793_v41 = vpop.f32.mrf.mxu2 }
 0x439   : > { %v794_v42 = vadd.f32 %v793_v41, %v775_v40 }
 0x43a   : > { %v777_v43 = vpop.f32.mrf.mxu1 }
 0x43b   : > { %v818_v44 = vadd.f32 %v814_v36, %v794_v42 }
 0x43d   : > { %v825_v46 = vadd.f32 %v823_v45, %v818_v44 }
 0x43f   : > { %v826_v47 = vadd.f32 %v825_v46, %v1239_v56 }
 0x440   : > { %v795_v48 = vpop.f32.mrf.mxu2 }
 0x441   : > { %v827_v49 = vpack.c.bf16 %v826_v47, %v826_v47 }
 0x443   : > { %v884_v50 = vsel %vm507_vm1, %v827_v49, 0  ;;  %v829_v51 = vunpack.c.l.b16 %v827_v49 }
 0x444   : > { %893 = vmatpush.bf16.msrb.mxu2 %v884_v50 }
 0x445   : > { %v830_v52 = vpack.c.b16 %v829_v51, %v829_v51 }
 0x447   : > { %836 = vrot.lane.b32.xlu1 %v830_v52, %s1087_s20  ;;  %831 = vrot.lane.b32.xlu0 %v830_v52, %s1086_s19 }
 0x448   : > { %1049 = vmatmul.msk.bf16.vlgmr.msrb.gmra.mxu2 %vm503_vm2, %v1048_v54 }
 0x44f   : > { %920 = vperm.xlu1 %1075, %v912_v53   ;;  %915 = vperm.xlu0 %1077, %v911_v55  }
 0x4b9   : > { %v837_v56 = vpop.permute.xlu1 %836  ;;  %v832_v57 = vpop.permute.xlu0 %831 }
 0x4ba   : > { %v839_v58 = vsel %vm498_vm4, 0, %v837_v56  ;;  %v834_v59 = vsel %vm491_vm3, 0, %v832_v57 }
 0x4bb   : > { %v845_v60 = vsel %vm507_vm1, %v839_v58, 0  ;;  %v863_v61 = vsel %vm507_vm1, %v834_v59, 0 }
 0x4bc   : > { %854 = vmatpush.bf16.msrb.mxu0 %v845_v60  ;;  %872 = vmatpush.bf16.msrb.mxu1 %v863_v61 }
 0x4bf   : > { %1046 = vmatmul.msk.bf16.vlgmr.msrb.gmra.mxu0 %vm503_vm2, %v1045_v62  ;;  %1047 = vmatmul.msk.bf16.vlgmr.msrb.gmra.mxu1 %vm503_vm2, %v835_v63 }
 0x4c1   : > { %v916_v6 = vpop.permute.xlu0 %915  ;;  %v921_v10 = vpop.permute.xlu1 %920 }
 0x4c2   : > { %v944_v12 = vadd.f32 %v943_v2, %v916_v6  ;;  %v946_v13 = vadd.f32 %v945_v9, %v921_v10 }
 0x4cb   : > { %v895_v0 = vpop.f32.mrf.mxu2 }
 0x4d3   : > { %v897_v1 = vpop.f32.mrf.mxu2 }
 0x53c   : > { %v856_v3 = vpop.f32.mrf.mxu0  ;;  %v874_v4 = vpop.f32.mrf.mxu1 }
 0x53d   : > { %v875_v5 = vadd.f32 %v874_v4, %v856_v3 }
 0x53f   : > { %v899_v8 = vadd.f32 %v895_v0, %v875_v5 }
 0x541   : > { %v906_v11 = vadd.f32 %v904_v7, %v899_v8 }
 0x543   : > { %v948_v14 = vmul.f32 %v944_v12, %v906_v11 }
 0x544   : > { %v858_v15 = vpop.f32.mrf.mxu0  ;;  %v876_v16 = vpop.f32.mrf.mxu1 }
 0x545   : > { %v949_v17 = vadd.f32 %v948_v14, %v946_v13 }
 0x547   : > { %951 = vst.msk [vmem:[%s479_s28] sm:$0xff] %vm950_vm14, %v949_v17 }
 0x548 PF: > { %s24_s29 = sadd.s32 1, %s1084_s29  }
 0x549   : > { %p21_p4 = scmp.ge.s32.totalorder %s24_s29, 4  }
 0x54b   :  { %23 = sbr.rel (!%p21_p4) target bundleno = 1 (0x1), region = 119 }

// kernel: _lambda_.17
= control target key start
LH: loop header
LB: loop body
LE: loop exit
PB: predicated region body
PF: predicated region fallthrough
CT: control target
= control target key end

     0   :  { %s1462_s0 = inlined_call_operand.vmem [shape: f32[2,8,128], index: 0, kind: input, shape index: {}]   ;;  %s1463_s1 = inlined_call_operand.vmem [shape: bf16[3,8,8], index: 1, kind: input, shape index: {}]   ;;  %s1464_s2 = inlined_call_operand.vmem [shape: f32[8,1], index: 2, kind: input, shape index: {}]   ;;  %s1465_s3 = inlined_call_operand.vmem [shape: bf16[3,8,8], index: 3, kind: input, shape index: {}]   ;;  %s1466_s4 = inlined_call_operand.vmem [shape: f32[8,1], index: 4, kind: input, shape index: {}]   ;;  %s1467_s5 = inlined_call_operand.vmem [shape: bf16[3,8,8], index: 5, kind: input, shape index: {}]   ;;  %s1468_s6 = inlined_call_operand.vmem [shape: f32[8,1], index: 6, kind: input, shape index: {}]   ;;  %s1469_s7 = inlined_call_operand.vmem [shape: bf16[3,8,8], index: 7, kind: input, shape index: {}]   ;;  %s1470_s8 = inlined_call_operand.vmem [shape: f32[8,1], index: 8, kind: input, shape index: {}]   ;;  %s1471_s9 = inlined_call_operand.vmem [shape: bf16[3,8,8], index: 9, kind: input, shape index: {}]   ;;  %s1472_s10 = inlined_call_operand.vmem [shape: f32[8,1], index: 10, kind: input, shape index: {}]   ;;  %s1473_s11 = inlined_call_operand.vmem [shape: bf16[3,1,8], index: 11, kind: input, shape index: {}]   ;;  %s1474_s12 = inlined_call_operand.<no memory space> [shape: f32[1,1], index: 12, kind: input, shape index: {}]   ;;  %s1475_s13 = inlined_call_operand.hbm [shape: f32[2,1,128], index: 13, kind: output, shape index: {}]  }
   0x1   :  { %1478 = sst [smem:[#allocation6_spill]] %s1462_s0  ;;  %v18_v0 = vstv %s1474_s12 }
   0x2   :  { %1479 = sst [smem:[#allocation7_spill]] %s1463_s1  ;;  %19 = vst [vmem:[#allocation2] sm:$0x1] %v18_v0 }
   0x3   :  { %20 = vsyncpa [#allocation4], 0 }
   0x4   :  { %22 = vsyncpa [#allocation4 + $0x1], 0  ;;  %s1248_s27 = smov 0   ;;  %s1250_s28 = smov 0  }
   0x5   :  { %s1252_s29 = smov 0   ;;  %s1254_s30 = smov 0  }
   0x6 LB: > { %s1269_s12 = sadd.s32 4294967295, %s1164_s30   ;;  %s1014_s14 = sadd.s32 4294967294, %s1164_s30   ;;  %s1164_s30 = sphi %s1254_s30, %s1488_s30   ;;  %s1160_s29 = sphi %s1252_s29, %s1487_s29   ;;  %s1156_s28 = sphi %s1250_s28, %s1486_s28   ;;  %s1152_s27 = sphi %s1248_s27, %s1485_s27  }
   0x7   : > { %s1273_s15 = sadd.s32 1, %s1164_s30   ;;  %s313_s16 = sadd.s32 1, %s1160_s29 }
   0x8   : > { %s310_s17 = ssub.s32 %s1164_s30, %s1273_s15  ;;  %p323_p0 = scmp.ne.s32.totalorder %s1160_s29, %s1156_s28 }
   0x9   : > { %p311_p1 = scmp.eq.s32.totalorder %s310_s17, 0  ;;  %p324_p2 = scmp.eq.s32.totalorder %s1269_s12, 1 }
   0xa   : > { %p329_p3 = scmp.ne.s32.totalorder %s1156_s28, %s1152_s27  ;;  %p330_p4 = scmp.eq.s32.totalorder %s1014_s14, 1 }
   0xb   : > { %s1284_s18 = scalar_select %p311_p1, %s1160_s29, %s313_s16  }
   0xc   : > { %p1286_p5 = por %p324_p2, %p323_p0  ;;  %p1290_p6 = por %p330_p4, %p329_p3 }
   0xd   : > { %p1017_p7 = scmp.ge.s32.totalorder %s1164_s30, 1  ;;  %p391_p8 = scmp.lt.s32.totalorder %s1164_s30, 3 }
   0xf   : > { %p392_p9 = pnand %p1017_p7, %p391_p8 }
  0x10   : > { %p433_p10 = scmp.lt.s32.totalorder (!%p392_p9), %s1269_s12, 1  ;;  %s1482_s0 = sld [smem:[#allocation6_spill]] (!%p392_p9) }
  0x11   : > { %395 = sbr.rel (%p392_p9) target bundleno = 1627 (0x65b), region = 72  ;;  %s1476_s26 = smov (!%p392_p9), 2  }
  0x12   : > { %s1167_s14 = smov (!%p392_p9), 1   ;;  %s1483_s1 = sld [smem:[#allocation7_spill]] (!%p392_p9) }
  0x13   : > { %s1169_s17 = smov (!%p392_p9), 6   ;;  %s1174_s23 = smov (!%p392_p9), 54  }
  0x14   : > { %s431_s24 = sand.u32 (!%p392_p9), 1, %s1156_s28  }
  0x16   : > { %s434_s21 = scalar_select %p433_p10, %s1269_s12, 1  ;;  %vm464_vm1 = vcmask 1043456   ;;  %vm460_vm2 = vcmask 64512   ;;  %v520_v9 = vld [vmem:[%s1464_s2] sm:$0xff]  ;;  %v1168_v10 = vmov 0   ;;  %vm448_vm3 = vcmask 15360  }
  0x17   : > { %1099 = vset.pattern.permute.xlu1 %v1168_v10  ;;  %1100 = vset.pattern.permute.xlu2 %v1168_v10  ;;  %vm455_vm4 = vcmask 7168   ;;  %v1027_v35 = vld [vmem:[%s1465_s3 + $0x8] sm:$0xf]  ;;  %vm536_vm6 = vcmask 48128   ;;  %v605_v36 = vld [vmem:[%s1466_s4] sm:$0xff]  ;;  %vm542_vm7 = vcmask 23552  }
  0x18   : > { %s1018_s22 = sshll.u32 %s434_s21, 3  ;;  %v1022_v8 = vld [vmem:[%s1483_s1 + $0x8] sm:$0xf]  ;;  %523 = vperm.xlu1 %1099, %v520_v9   ;;  %1101 = vset.pattern.permute.xlu0 %v1168_v10  ;;  %v452_v14 = vld [vmem:[%s1483_s1] sm:$0xf]  ;;  %s1170_s21 = smov 3  }
  0x19   : > { %s436_s25 = scalar_lea.vmem %s1482_s0, %s1018_s22  ;;  %v1019_v18 = vld [vmem:[%s1483_s1 + $0x4] sm:$0xf]  ;;  %v539_v40 = vld [vmem:[%s1465_s3] sm:$0xf]  ;;  %vm628_vm9 = vcmask 72704   ;;  %vm622_vm10 = vcmask 146432  }
  0x1a   : > { %v1301_v1 = vld [vmem:[%s436_s25] sm:$0xff]  ;;  %s1173_s22 = smov 27   ;;  %vm713_vm12 = vcmask 220160   ;;  %vm707_vm13 = vcmask 441344   ;;  %s1122_s0 = scalar_lea.hbm %s1475_s13, 2 }
  0x1b   : > { %vm439_vm0 = vcmp.ge.f32.partialorder %v1301_v1, 0.0  ;;  %v440_v2 = vmul.f32 0.1, %v1301_v1  ;;  %v691_v41 = vld [vmem:[%s1468_s6] sm:$0xff] }
  0x1c   : > { %v776_v42 = vld [vmem:[%s1470_s8] sm:$0xff] }
  0x1d   : > { %v441_v3 = vsel %vm439_vm0, %v1301_v1, %v440_v2  ;;  %v857_v43 = vld [vmem:[%s1472_s10] sm:$0xff] }
  0x1e   : > { %v442_v4 = vpack.c.bf16 %v441_v3, %v441_v3  ;;  %v1024_v47 = vld [vmem:[%s1465_s3 + $0x4] sm:$0xf]  ;;  %v937_v48 = vld [vmem:[#allocation2] sm:$0x1] }
  0x1f   : > { %v1029_v9 = vld [vmem:[%s1467_s5 + $0x4] sm:$0xf]  ;;  %v625_v10 = vld [vmem:[%s1467_s5] sm:$0xf] }
  0x20   : > { %v444_v5 = vunpack.c.l.b16 %v442_v4  ;;  %v504_v6 = vsel %vm464_vm1, %v442_v4, 0 }
  0x21   : > { %513 = vmatpush.bf16.msra.mxu2 %v504_v6 }
  0x22   : > { %v445_v7 = vpack.c.b16 %v444_v5, %v444_v5 }
  0x24   : > { %446 = vrot.lane.b32.xlu0 %v445_v7, %s1476_s26  ;;  %1023 = vmatmul.msk.bf16.vlgmr.msra.gmra.mxu2 %vm460_vm2, %v1022_v8  ;;  %s1171_s26 = smov 9  }
  0x2c   : > { %453 = vrot.lane.b32.xlu0 %v445_v7, %s1167_s14 }
  0x8a   : > { %v524_v25 = vpop.permute.xlu1 %523 }
  0x96   : > { %v447_v11 = vpop.permute.xlu0 %446 }
  0x97   : > { %v451_v12 = vsel %vm448_vm3, 0, %v447_v11 }
  0x98   : > { %v483_v13 = vsel %vm464_vm1, %v451_v12, 0 }
  0x99   : > { %492 = vmatpush.bf16.msra.mxu1 %v483_v13 }
  0x9c   : > { %1021 = vmatmul.msk.bf16.vlgmr.msra.gmra.mxu1 %vm460_vm2, %v452_v14 }
  0x9e   : > { %v454_v15 = vpop.permute.xlu0 %453 }
  0x9f   : > { %v457_v16 = vsel %vm455_vm4, 0, %v454_v15 }
  0xa0   : > { %v465_v17 = vsel %vm464_vm1, %v457_v16, 0 }
  0xa1   : > { %474 = vmatpush.bf16.msra.mxu0 %v465_v17 }
  0xa4   : > { %1020 = vmatmul.msk.bf16.vlgmr.msra.gmra.mxu0 %vm460_vm2, %v1019_v18 }
  0xa7   : > { %v515_v19 = vpop.f32.mrf.mxu2 }
  0xaf   : > { %v517_v20 = vpop.f32.mrf.mxu2 }
 0x119   : > { %v494_v21 = vpop.f32.mrf.mxu1 }
 0x121   : > { %v476_v22 = vpop.f32.mrf.mxu0  ;;  %v496_v23 = vpop.f32.mrf.mxu1 }
 0x122   : > { %v495_v24 = vadd.f32 %v494_v21, %v476_v22 }
 0x124   : > { %v519_v26 = vadd.f32 %v515_v19, %v495_v24 }
 0x126   : > { %v526_v27 = vadd.f32 %v524_v25, %v519_v26 }
 0x128   : > { %v528_v28 = vmul.f32 0.1, %v526_v27  ;;  %vm527_vm5 = vcmp.ge.f32.partialorder %v526_v27, 0.0 }
 0x129   : > { %v478_v29 = vpop.f32.mrf.mxu0 }
 0x12a   : > { %v529_v30 = vsel %vm527_vm5, %v526_v27, %v528_v28  ;;  %v1037_v27 = vld [vmem:[%s1469_s7 + $0x8] sm:$0xf] }
 0x12b   : > { %v530_v31 = vpack.c.bf16 %v529_v30, %v529_v30 }
 0x12d   : > { %v589_v32 = vsel %vm464_vm1, %v530_v31, 0  ;;  %v532_v33 = vunpack.c.l.b16 %v530_v31 }
 0x12e   : > { %598 = vmatpush.bf16.msrb.mxu1 %v589_v32 }
 0x12f   : > { %v533_v34 = vpack.c.b16 %v532_v33, %v532_v33 }
 0x131   : > { %534 = vrot.lane.b32.xlu2 %v533_v34, %s1169_s17  ;;  %540 = vrot.lane.b32.xlu1 %v533_v34, %s1170_s21  ;;  %s1172_s21 = smov 18   ;;  %v1034_v34 = vld [vmem:[%s1469_s7 + $0x4] sm:$0xf]  ;;  %s955_s17 = scalar_lea.hbm %s1475_s13, %s1269_s12 }
 0x132   : > { %1028 = vmatmul.msk.bf16.vlgmr.msrb.gmra.mxu1 %vm460_vm2, %v1027_v35  ;;  %v710_v35 = vld [vmem:[%s1469_s7] sm:$0xf] }
 0x139   : > { %608 = vperm.xlu2 %1100, %v605_v36  }
 0x141   : > { %694 = vperm.xlu2 %1100, %v691_v41  }
 0x149   : > { %779 = vperm.xlu2 %1100, %v776_v42  }
 0x151   : > { %860 = vperm.xlu2 %1100, %v857_v43  }
 0x159   : > { %940 = vperm.xlu2 %1100, %v937_v48  }
 0x18b   : > { %v535_v37 = vpop.permute.xlu2 %534 }
 0x18c   : > { %v538_v38 = vsel %vm536_vm6, 0, %v535_v37 }
 0x18d   : > { %v568_v39 = vsel %vm464_vm1, %v538_v38, 0 }
 0x18e   : > { %577 = vmatpush.bf16.msrb.mxu0 %v568_v39 }
 0x191   : > { %1026 = vmatmul.msk.bf16.vlgmr.msrb.gmra.mxu0 %vm460_vm2, %v539_v40 }
 0x193   : > { %v609_v56 = vpop.permute.xlu2 %608 }
 0x19b   : > { %v695_v17 = vpop.permute.xlu2 %694 }
 0x1a3   : > { %v541_v44 = vpop.permute.xlu1 %540  ;;  %v780_v43 = vpop.permute.xlu2 %779 }
 0x1a4   : > { %v544_v45 = vsel %vm542_vm7, 0, %v541_v44 }
 0x1a5   : > { %v550_v46 = vsel %vm464_vm1, %v544_v45, 0 }
 0x1a6   : > { %559 = vmatpush.bf16.msra.mxu3 %v550_v46 }
 0x1a9   : > { %1025 = vmatmul.msk.bf16.vlgmr.msra.gmra.mxu3 %vm460_vm2, %v1024_v47 }
 0x1af   : > { %v600_v49 = vpop.f32.mrf.mxu1 }
 0x1b7   : > { %v602_v51 = vpop.f32.mrf.mxu1 }
 0x1b8   : > { %v1042_v51 = vld [vmem:[%s1471_s9 + $0x8] sm:$0xf] }
 0x20e   : > { %v579_v50 = vpop.f32.mrf.mxu0 }
 0x216   : > { %v581_v52 = vpop.f32.mrf.mxu0 }
 0x22c   : > { %v561_v53 = vpop.f32.mrf.mxu3 }
 0x22d   : > { %v580_v54 = vadd.f32 %v579_v50, %v561_v53 }
 0x22f   : > { %v604_v55 = vadd.f32 %v600_v49, %v580_v54 }
 0x231   : > { %v611_v57 = vadd.f32 %v609_v56, %v604_v55 }
 0x233   : > { %v1356_v58 = vadd.f32 %v611_v57, %v1301_v1  ;;  %v1032_v1 = vld [vmem:[%s1467_s5 + $0x8] sm:$0xf] }
 0x234   : > { %v563_v59 = vpop.f32.mrf.mxu3 }
 0x235   : > { %vm613_vm8 = vcmp.ge.f32.partialorder %v1356_v58, 0.0  ;;  %v614_v60 = vmul.f32 0.1, %v1356_v58  ;;  %v792_v59 = vld [vmem:[%s1471_s9] sm:$0xf] }
 0x237   : > { %v615_v61 = vsel %vm613_vm8, %v1356_v58, %v614_v60 }
 0x238   : > { %v616_v62 = vpack.c.bf16 %v615_v61, %v615_v61 }
 0x23a   : > { %v675_v63 = vsel %vm464_vm1, %v616_v62, 0  ;;  %v618_v0 = vunpack.c.l.b16 %v616_v62 }
 0x23b   : > { %684 = vmatpush.bf16.msra.mxu0 %v675_v63 }
 0x23c   : > { %v619_v2 = vpack.c.b16 %v618_v0, %v618_v0 }
 0x23e   : > { %626 = vrot.lane.b32.xlu1 %v619_v2, %s1171_s26  ;;  %620 = vrot.lane.b32.xlu0 %v619_v2, %s1172_s21  ;;  %s432_s26 = scalar_lea.vmem [#allocation3], %s431_s24  ;;  %s959_s21 = sshll.u32 %s955_s17, 4  ;;  %s960_s21 = int_to_ptr.hbm [resolvable:$true] %s959_s21 }
 0x23f   : > { %1033 = vmatmul.msk.bf16.vlgmr.msra.gmra.mxu0 %vm460_vm2, %v1032_v1  ;;  %v861_v1 = vpop.permute.xlu2 %860 }
 0x2b0   : > { %v627_v3 = vpop.permute.xlu1 %626  ;;  %v621_v4 = vpop.permute.xlu0 %620 }
 0x2b1   : > { %v630_v5 = vsel %vm628_vm9, 0, %v627_v3  ;;  %v624_v6 = vsel %vm622_vm10, 0, %v621_v4 }
 0x2b2   : > { %v636_v7 = vsel %vm464_vm1, %v630_v5, 0  ;;  %v654_v8 = vsel %vm464_vm1, %v624_v6, 0 }
 0x2b3   : > { %645 = vmatpush.bf16.msrb.mxu2 %v636_v7  ;;  %663 = vmatpush.bf16.msrb.mxu3 %v654_v8 }
 0x2b6   : > { %1030 = vmatmul.msk.bf16.vlgmr.msrb.gmra.mxu2 %vm460_vm2, %v1029_v9  ;;  %1031 = vmatmul.msk.bf16.vlgmr.msrb.gmra.mxu3 %vm460_vm2, %v625_v10  ;;  %v1047_v10 = vld [vmem:[%s1473_s11 + $0x2] sm:$0x1] }
 0x2bc   : > { %v686_v11 = vpop.f32.mrf.mxu0 }
 0x2c4   : > { %v688_v12 = vpop.f32.mrf.mxu0 }
 0x339   : > { %v647_v13 = vpop.f32.mrf.mxu2  ;;  %v665_v14 = vpop.f32.mrf.mxu3 }
 0x33a   : > { %v666_v15 = vadd.f32 %v665_v14, %v647_v13 }
 0x33c   : > { %v690_v16 = vadd.f32 %v686_v11, %v666_v15 }
 0x33e   : > { %v697_v18 = vadd.f32 %v695_v17, %v690_v16  ;;  %v1044_v17 = vld [vmem:[%s1473_s11 + $0x1] sm:$0x1] }
 0x340   : > { %v699_v19 = vmul.f32 0.1, %v697_v18  ;;  %vm698_vm11 = vcmp.ge.f32.partialorder %v697_v18, 0.0 }
 0x341   : > { %v649_v20 = vpop.f32.mrf.mxu2  ;;  %v667_v21 = vpop.f32.mrf.mxu3 }
 0x342   : > { %v700_v22 = vsel %vm698_vm11, %v697_v18, %v699_v19  ;;  %v872_v18 = vld [vmem:[%s1473_s11] sm:$0x1] }
 0x343   : > { %v701_v23 = vpack.c.bf16 %v700_v22, %v700_v22  ;;  %v941_v22 = vpop.permute.xlu2 %940 }
 0x345   : > { %v760_v24 = vsel %vm464_vm1, %v701_v23, 0  ;;  %v703_v25 = vunpack.c.l.b16 %v701_v23 }
 0x346   : > { %769 = vmatpush.bf16.msra.mxu3 %v760_v24 }
 0x347   : > { %v704_v26 = vpack.c.b16 %v703_v25, %v703_v25 }
 0x349   : > { %711 = vrot.lane.b32.xlu1 %v704_v26, %s1173_s22  ;;  %705 = vrot.lane.b32.xlu0 %v704_v26, %s1174_s23  ;;  %s1484_s22 = smov 2   ;;  %v943_v26 = vperm.slane %v941_v22, 0  ;;  %s1116_s23 = sshra.s32 %s960_s21, 4  ;;  %s1117_s23 = int_to_ptr.hbm [resolvable:$true] %s1116_s23 }
 0x34a   : > { %1038 = vmatmul.msk.bf16.vlgmr.msra.gmra.mxu3 %vm460_vm2, %v1037_v27  ;;  %s1118_s25 = scalar_lea.hbm %s1117_s23, 1  ;;  %p1123_p0 = scmp.lt.s32.totalorder %s1117_s23, %s1475_s13 }
 0x34b   : > { %p1119_p11 = scmp.ne.s32.totalorder %s1117_s23, %s1118_s25  ;;  %p1124_p1 = scmp.lt.s32.totalorder %s1122_s0, %s1118_s25 }
 0x34d   : > { %p1120_p12 = pnand %p1119_p11, %p1286_p5  ;;  %p1125_p2 = por %p1124_p1, %p1123_p0 }
 0x34f   : > { %p1121_p13 = pneg %p1120_p12 }
 0x351   : > { %p1126_p3 = pnand %p1125_p2, %p1121_p13 }
 0x3bb   : > { %v712_v28 = vpop.permute.xlu1 %711  ;;  %v706_v29 = vpop.permute.xlu0 %705 }
 0x3bc   : > { %v715_v30 = vsel %vm713_vm12, 0, %v712_v28  ;;  %v709_v31 = vsel %vm707_vm13, 0, %v706_v29 }
 0x3bd   : > { %v721_v32 = vsel %vm464_vm1, %v715_v30, 0  ;;  %v739_v33 = vsel %vm464_vm1, %v709_v31, 0 }
 0x3be   : > { %730 = vmatpush.bf16.msra.mxu1 %v721_v32  ;;  %748 = vmatpush.bf16.msra.mxu2 %v739_v33 }
 0x3c1   : > { %1035 = vmatmul.msk.bf16.vlgmr.msra.gmra.mxu1 %vm460_vm2, %v1034_v34  ;;  %1036 = vmatmul.msk.bf16.vlgmr.msra.gmra.mxu2 %vm460_vm2, %v710_v35 }
 0x3cd   : > { %v771_v36 = vpop.f32.mrf.mxu3 }
 0x3d5   : > { %v773_v37 = vpop.f32.mrf.mxu3 }
 0x43e   : > { %v732_v38 = vpop.f32.mrf.mxu1 }
 0x444   : > { %v750_v39 = vpop.f32.mrf.mxu2 }
 0x445   : > { %v751_v40 = vadd.f32 %v750_v39, %v732_v38 }
 0x446   : > { %v734_v41 = vpop.f32.mrf.mxu1 }
 0x447   : > { %v775_v42 = vadd.f32 %v771_v36, %v751_v40 }
 0x449   : > { %v782_v44 = vadd.f32 %v780_v43, %v775_v42 }
 0x44b   : > { %v783_v45 = vadd.f32 %v782_v44, %v1356_v58  ;;  %v1039_v58 = vld [vmem:[%s1471_s9 + $0x4] sm:$0xf] }
 0x44c   : > { %v752_v46 = vpop.f32.mrf.mxu2 }
 0x44d   : > { %v784_v47 = vpack.c.bf16 %v783_v45, %v783_v45 }
 0x44f   : > { %v841_v48 = vsel %vm464_vm1, %v784_v47, 0  ;;  %v786_v49 = vunpack.c.l.b16 %v784_v47 }
 0x450   : > { %850 = vmatpush.bf16.msrb.mxu2 %v841_v48 }
 0x451   : > { %v787_v50 = vpack.c.b16 %v786_v49, %v786_v49 }
 0x453   : > { %793 = vrot.lane.b32.xlu1 %v787_v50, %s1167_s14  ;;  %788 = vrot.lane.b32.xlu0 %v787_v50, %s1484_s22 }
 0x454   : > { %1043 = vmatmul.msk.bf16.vlgmr.msrb.gmra.mxu2 %vm460_vm2, %v1042_v51 }
 0x4c5   : > { %v794_v52 = vpop.permute.xlu1 %793  ;;  %v789_v53 = vpop.permute.xlu0 %788 }
 0x4c6   : > { %v796_v54 = vsel %vm455_vm4, 0, %v794_v52  ;;  %v791_v55 = vsel %vm448_vm3, 0, %v789_v53 }
 0x4c7   : > { %v802_v56 = vsel %vm464_vm1, %v796_v54, 0  ;;  %v820_v57 = vsel %vm464_vm1, %v791_v55, 0 }
 0x4c8   : > { %811 = vmatpush.bf16.msrb.mxu0 %v802_v56  ;;  %829 = vmatpush.bf16.msrb.mxu1 %v820_v57 }
 0x4cb   : > { %1040 = vmatmul.msk.bf16.vlgmr.msrb.gmra.mxu0 %vm460_vm2, %v1039_v58  ;;  %1041 = vmatmul.msk.bf16.vlgmr.msrb.gmra.mxu1 %vm460_vm2, %v792_v59 }
 0x4d7   : > { %v852_v60 = vpop.f32.mrf.mxu2 }
 0x4df   : > { %v854_v61 = vpop.f32.mrf.mxu2 }
 0x548   : > { %v813_v62 = vpop.f32.mrf.mxu0  ;;  %v831_v63 = vpop.f32.mrf.mxu1 }
 0x549   : > { %v832_v0 = vadd.f32 %v831_v63, %v813_v62 }
 0x54b   : > { %v856_v2 = vadd.f32 %v852_v60, %v832_v0 }
 0x54d   : > { %v863_v3 = vadd.f32 %v861_v1, %v856_v2 }
 0x54f   : > { %v864_v4 = vpack.c.bf16 %v863_v3, %v863_v3 }
 0x550   : > { %v815_v5 = vpop.f32.mrf.mxu0  ;;  %v833_v6 = vpop.f32.mrf.mxu1 }
 0x551   : > { %v921_v7 = vsel %vm464_vm1, %v864_v4, 0  ;;  %v866_v8 = vunpack.c.l.b16 %v864_v4 }
 0x552   : > { %930 = vmatpush.bf16.msra.mxu1 %v921_v7 }
 0x553   : > { %v867_v9 = vpack.c.b16 %v866_v8, %v866_v8 }
 0x555   : > { %868 = vrot.lane.b32.xlu1 %v867_v9, %s1484_s22  ;;  %873 = vrot.lane.b32.xlu0 %v867_v9, %s1167_s14  ;;  %s957_s14 = sshll.u32 %s432_s26, 4  ;;  %s947_s22 = scalar_lea.sflag [#allocation4], %s431_s24  ;;  %s958_s14 = int_to_ptr.vmem [resolvable:$true] %s957_s14 }
 0x556   : > { %1048 = vmatmul.msk.bf16.vlgmr.msra.gmra.mxu1 %vm460_vm2, %v1047_v10 }
 0x5c7   : > { %v869_v11 = vpop.permute.xlu1 %868  ;;  %v874_v12 = vpop.permute.xlu0 %873 }
 0x5c8   : > { %v871_v13 = vsel %vm448_vm3, 0, %v869_v11  ;;  %v876_v14 = vsel %vm455_vm4, 0, %v874_v12 }
 0x5c9   : > { %v900_v15 = vsel %vm464_vm1, %v871_v13, 0  ;;  %v882_v16 = vsel %vm464_vm1, %v876_v14, 0 }
 0x5ca   : > { %891 = vmatpush.bf16.msrb.mxu3 %v882_v16  ;;  %909 = vmatpush.bf16.msra.mxu0 %v900_v15 }
 0x5cd   : > { %1045 = vmatmul.msk.bf16.vlgmr.msrb.gmra.mxu3 %vm460_vm2, %v1044_v17  ;;  %1046 = vmatmul.msk.bf16.vlgmr.msra.gmra.mxu0 %vm460_vm2, %v872_v18 }
 0x5d3   : > { %v932_v19 = vpop.f32.mrf.mxu1 }
 0x5db   : > { %v934_v20 = vpop.f32.mrf.mxu1 }
 0x64a   : > { %v911_v21 = vpop.f32.mrf.mxu0 }
 0x650   : > { %v893_v23 = vpop.f32.mrf.mxu3 }
 0x651   : > { %v912_v24 = vadd.f32 %v911_v21, %v893_v23 }
 0x652   : > { %v913_v25 = vpop.f32.mrf.mxu0 }
 0x653   : > { %v936_v27 = vadd.f32 %v932_v19, %v912_v24 }
 0x655   : > { %v944_v28 = vadd.f32 %v943_v26, %v936_v27 }
 0x657   : > { %945 = vst [vmem:[%s432_s26] sm:$0x1] %v944_v28 }
 0x658   : > { %v895_v29 = vpop.f32.mrf.mxu3 }
 0x659   : > { %1129 = shalt.err (!%p1126_p3)
}
 0x65a   : > { %1051 = dma.vmem_to_hbm [thread:$0]  (%p1286_p5), %s958_s14, 16, %s960_s21, %s947_s22  }
 0x65b PF: > { %p1057_p4 = scmp.ge.s32.totalorder %s1164_s30, 2  ;;  %s971_s24 = sand.u32 1, %s1152_s27  }
 0x65c   : > { %s972_s26 = scalar_lea.sflag [#allocation4], %s971_s24 }
 0x65d   : > { %p1054_p7 = pnand %p1057_p4, %p1290_p6 }
 0x65f   : > { %p1055_p8 = pneg %p1054_p7 }
 0x661   : > { %1147 = dma.done.wait (%p1055_p8), %s972_s26, 16  }
 0x662   : > { %1149 = vsyncadd (%p1055_p8), %s972_s26, 4294967280  ;;  %p25_p9 = scmp.ge.s32.totalorder %s1273_s15, 4   ;;  %s1485_s27 = smov %s1156_s28 }
 0x663   : > { %s1486_s28 = smov %s1160_s29  ;;  %s1487_s29 = smov %s1284_s18 }
 0x664   : > { %s1488_s30 = smov %s1273_s15  ;;  %27 = sbr.rel (!%p25_p9) target bundleno = 6 (0x6), region = 119 }
 0x669   :  { %977 = vsyncpa [#allocation4], 1 }
 0x66a   :  { %979 = vsyncpa [#allocation4 + $0x1], 1 }

</bundles_post_ra>
